<compile_context>
chip_gen: v6e
topology: v6e:2x2x1
jax: 0.10.0
libtpu: 0.0.40
codegen_flags: <defaults>
</compile_context>

<pallas_src>
import numpy as np

import jax
import jax.numpy as jnp
from jax.experimental import pallas as pl
from jax.experimental.pallas import tpu as pltpu

MXU_DTYPE = jnp.bfloat16  # MXU input dtype; accumulation / epilogue stay f32.


def _pick_block(n, target, lane_unit):
    """Largest bn <= target that divides n and keeps bn*lane_unit 128-aligned.

    Falls back to bn == n (a single full-extent block, always a legal
    BlockSpec).  TODO(synk): pad the batch instead of falling back when n is
    large and has no aligned divisor."""
    for bn in range(min(n, target), 0, -1):
        if n % bn == 0 and (bn * lane_unit) % 128 == 0:
            return bn
    return n


# ----------------------------------------------------------------------------
# Kernel 1: conv1 (as matmul) + bias + ReLU + 2x2/2 max-pool for a batch block.
#   cols_ref : (4, 75, L) bf16   4 = pool-window offsets, 75 = Cin*kh*kw,
#                                L = bn*196 pooled columns, ordered (n, ph, pw)
#   w_ref    : (6, 75)    bf16   == conv1 weight.reshape(6, 75)
#   b_ref    : (6, 1)     f32
#   o_ref    : (6, L)     bf16   CHW-flattened pooled activations (lane-dense)
# ----------------------------------------------------------------------------
def _conv_relu_pool_kernel(cols_ref, w_ref, b_ref, o_ref):
    w = w_ref[...]
    n_off = cols_ref.shape[0]
    # Issue all four offset matmuls up front (independent MXU work), then a
    # short VPU max tree.  relu(max_a(y_a) + b) == maxpool(relu(conv + b))
    # because the bias is per-channel and ReLU is monotone.
    ys = [jnp.dot(w, cols_ref[a], preferred_element_type=jnp.float32)
          for a in range(n_off)]
    m = ys[0]
    for y in ys[1:]:
        m = jnp.maximum(m, y)
    o_ref[...] = jnp.maximum(m + b_ref[...], 0.0).astype(o_ref.dtype)


def _conv1_cols(x_bf16):
    """im2col for conv1 with the 2x2 pool offsets split onto a leading axis.

    Returns (4, 75, N*196): dim0 = pool offsets (da, db), dim1 = (c_in, kh, kw),
    last axis = (n, ph, pw) so batch blocks are contiguous along it.

    TODO(synk): build these patches inside the kernel from a (bn, 3, 32, 32)
    tile (e.g. via a space-to-depth input layout) to avoid the ~10x K-expanded
    cols tensor in HBM and the XLA relayout at large batch."""
    n = x_bf16.shape[0]
    k, ho = 5, 28
    pats = jnp.stack(
        [jnp.stack([x_bf16[:, :, di:di + ho, dj:dj + ho] for dj in range(k)],
                   axis=2)
         for di in range(k)],
        axis=2)                                       # (N, 3, kh, kw, 28, 28)
    pats = pats.reshape(n, 3, k, k, 14, 2, 14, 2)     # 28 -> (ph, da) / (pw, db)
    pats = pats.transpose(5, 7, 1, 2, 3, 0, 4, 6)     # (da, db, ci, kh, kw, n, ph, pw)
    return pats.reshape(4, 75, n * 196)


def conv1_relu_pool(x, w_mat, b_col):
    """x: (N, 3, 32, 32) f32 NCHW.  Returns (6, N*196) bf16, columns (n, ph, pw)."""
    n = x.shape[0]
    cols = _conv1_cols(x.astype(MXU_DTYPE))           # (4, 75, N*196) bf16

    bn = _pick_block(n, target=32, lane_unit=196)     # bn*196 % 128 == 0 (or bn == N)
    lb = bn * 196

    return pl.pallas_call(
        _conv_relu_pool_kernel,
        out_shape=jax.ShapeDtypeStruct((6, n * 196), MXU_DTYPE),
        grid=(n // bn,),
        in_specs=[
            pl.BlockSpec((4, 75, lb), lambda m: (0, 0, m)),
            pl.BlockSpec((6, 75), lambda m: (0, 0)),
            pl.BlockSpec((6, 1), lambda m: (0, 0)),
        ],
        out_specs=pl.BlockSpec((6, lb), lambda m: (0, m)),
        compiler_params=pltpu.CompilerParams(
            dimension_semantics=("parallel",),
            vmem_limit_bytes=32 * 1024 * 1024),
    )(cols, w_mat, b_col)


# ----------------------------------------------------------------------------
# Kernel 2: conv2 (folded to dense) + bias + ReLU + max-pool + flatten
#           + fc1 + ReLU + fc2 + ReLU + fc3, all feature-major (batch on lanes).
#   h_ref : (1176, bn)  bf16  CHW-flattened conv1 output (6*14*14 rows)
#   w2_ref: (1600, 1176) bf16 conv2 im2col folded into dense weights; the 4
#                             pool-window offsets are stacked along the rows
#   b2_ref: (400, 1) f32      conv2 bias broadcast over the 5x5 pooled positions
#   w3/b3 : fc1 (120, 400)/(120, 1);  w4/b4: fc2 (84, 120)/(84, 1)
#   w5/b5 : fc3 (10, 84)/(10, 1)
#   o_ref : (10, bn) f32
# ----------------------------------------------------------------------------
def _conv2_fc_kernel(h_ref, w2_ref, b2_ref, w3_ref, b3_ref, w4_ref, b4_ref,
                     w5_ref, b5_ref, o_ref):
    h = h_ref[...]                                                    # (1176, bn)
    # conv2 (with implicit im2col) for all 4 pool offsets in ONE dot.
    y = jnp.dot(w2_ref[...], h, preferred_element_type=jnp.float32)  # (1600, bn)
    m = y[0:400]
    for a in range(1, 4):
        m = jnp.maximum(m, y[a * 400:(a + 1) * 400])                  # 8-aligned row slices
    # Rows are already in torch.flatten (c, qh, qw) order -> flatten is a no-op.
    z = jnp.maximum(m + b2_ref[...], 0.0)                             # (400, bn)
    z = jnp.dot(w3_ref[...], z.astype(w3_ref.dtype),
                preferred_element_type=jnp.float32)
    z = jnp.maximum(z + b3_ref[...], 0.0)                             # (120, bn)
    z = jnp.dot(w4_ref[...], z.astype(w4_ref.dtype),
                preferred_element_type=jnp.float32)
    z = jnp.maximum(z + b4_ref[...], 0.0)                             # (84, bn)
    z = jnp.dot(w5_ref[...], z.astype(w5_ref.dtype),
                preferred_element_type=jnp.float32)
    o_ref[...] = (z + b5_ref[...]).astype(o_ref.dtype)                # (10, bn)


def conv2_fc_stack(h1, pp):
    """h1: (1176, N) bf16 CHW-flattened conv1 output, batch on lanes. -> (10, N) f32."""
    feat, n = h1.shape
    # Batch block is the lane axis -> needs bn % 128 == 0 (or bn == N).
    # NOTE: at large N this also keeps >= 2 grid steps for v7x's two TCs.
    bn = _pick_block(n, target=128, lane_unit=1)

    def rep(shape):  # weights/biases stay resident in VMEM across the grid
        return pl.BlockSpec(shape, lambda m: (0, 0))

    return pl.pallas_call(
        _conv2_fc_kernel,
        out_shape=jax.ShapeDtypeStruct((10, n), jnp.float32),
        grid=(n // bn,),
        in_specs=[
            pl.BlockSpec((feat, bn), lambda m: (0, m)),
            rep(pp["c2_w"].shape), rep(pp["c2_b"].shape),
            rep(pp["fc1_w"].shape), rep(pp["fc1_b"].shape),
            rep(pp["fc2_w"].shape), rep(pp["fc2_b"].shape),
            rep(pp["fc3_w"].shape), rep(pp["fc3_b"].shape),
        ],
        out_specs=pl.BlockSpec((10, bn), lambda m: (0, m)),
        compiler_params=pltpu.CompilerParams(
            dimension_semantics=("parallel",),
            vmem_limit_bytes=32 * 1024 * 1024),
    )(h1, pp["c2_w"], pp["c2_b"], pp["fc1_w"], pp["fc1_b"],
      pp["fc2_w"], pp["fc2_b"], pp["fc3_w"], pp["fc3_b"])


# ----------------------------------------------------------------------------
# Parameters (PyTorch-shaped synthetic init) + one-time weight prep.
# ----------------------------------------------------------------------------
def init_params(key):
    ks = jax.random.split(key, 10)

    def uniform(k, shape, fan_in):
        bound = 1.0 / float(fan_in) ** 0.5
        return jax.random.uniform(k, shape, jnp.float32, -bound, bound)

    return {
        "conv1_w": uniform(ks[0], (6, 3, 5, 5), 3 * 5 * 5),
        "conv1_b": uniform(ks[1], (6,), 3 * 5 * 5),
        "conv2_w": uniform(ks[2], (16, 6, 5, 5), 6 * 5 * 5),
        "conv2_b": uniform(ks[3], (16,), 6 * 5 * 5),
        "fc1_w": uniform(ks[4], (120, 16 * 5 * 5), 16 * 5 * 5),
        "fc1_b": uniform(ks[5], (120,), 16 * 5 * 5),
        "fc2_w": uniform(ks[6], (84, 120), 120),
        "fc2_b": uniform(ks[7], (84,), 120),
        "fc3_w": uniform(ks[8], (10, 84), 84),
        "fc3_b": uniform(ks[9], (10,), 84),
    }


def _expand_conv2(w2, b2):
    """Fold conv2's im2col + 2x2/2 max-pool offsets into dense weights.

    Returns:
      w_big: (4*400, 1176) — rows = (offset a, c_out, qh, qw) in torch.flatten
             order per offset; cols = (c_in, ph, pw) indexing the CHW-flattened
             14x14 conv1 output.
      b_big: (400, 1) — conv2 bias repeated over the 5x5 pooled positions.
    """
    w2 = np.asarray(w2, np.float32)            # (16, 6, 5, 5)
    b2 = np.asarray(b2, np.float32)            # (16,)
    blocks = []
    for da in range(2):
        for db in range(2):
            w = np.zeros((16, 5, 5, 6, 14, 14), np.float32)
            for qh in range(5):
                for qw in range(5):
                    w[:, qh, qw, :,
                      2 * qh + da:2 * qh + da + 5,
                      2 * qw + db:2 * qw + db + 5] = w2
            blocks.append(w.reshape(400, 1176))
    w_big = np.concatenate(blocks, axis=0)     # (1600, 1176), ~3.8 MB in bf16
    b_big = np.repeat(b2, 25).reshape(400, 1)
    return w_big, b_big


def prepare_params(p):
    """One-time (un-jitted) weight reshape / conv2 expansion / bf16 cast."""
    w2_big, b2_big = _expand_conv2(p["conv2_w"], p["conv2_b"])
    return {
        "c1_w": jnp.asarray(p["conv1_w"]).reshape(6, 75).astype(MXU_DTYPE),
        "c1_b": jnp.asarray(p["conv1_b"]).reshape(6, 1).astype(jnp.float32),
        "c2_w": jnp.asarray(w2_big).astype(MXU_DTYPE),         # (1600, 1176)
        "c2_b": jnp.asarray(b2_big, jnp.float32),              # (400, 1)
        # FC weights stay in PyTorch (out, in) orientation: the fused tail runs
        # feature-major (y = W @ x), so no transposes are needed anywhere.
        "fc1_w": jnp.asarray(p["fc1_w"]).astype(MXU_DTYPE),    # (120, 400)
        "fc1_b": jnp.asarray(p["fc1_b"]).reshape(120, 1).astype(jnp.float32),
        "fc2_w": jnp.asarray(p["fc2_w"]).astype(MXU_DTYPE),    # (84, 120)
        "fc2_b": jnp.asarray(p["fc2_b"]).reshape(84, 1).astype(jnp.float32),
        "fc3_w": jnp.asarray(p["fc3_w"]).astype(MXU_DTYPE),    # (10, 84)
        "fc3_b": jnp.asarray(p["fc3_b"]).reshape(10, 1).astype(jnp.float32),
    }


# ----------------------------------------------------------------------------
# Forward pass (mirrors Net.forward) — 2 pallas_calls total.
# ----------------------------------------------------------------------------
@jax.jit
def net_forward(pp, x):
    # x: (N, 3, 32, 32) f32 NCHW (PyTorch layout).
    n = x.shape[0]
    h1 = conv1_relu_pool(x, pp["c1_w"], pp["c1_b"])    # (6, N*196) bf16, cols (n, ph, pw)
    # CHW-flatten each image and put the batch on the lane axis: (1176, N).
    # (Tiny bf16 tensor; the relayout is done once here by XLA, not in-kernel.)
    h1 = h1.reshape(6, n, 196).transpose(0, 2, 1).reshape(6 * 196, n)
    out = conv2_fc_stack(h1, pp)                       # (10, N) f32
    return out.T                                       # (N, 10), torch ordering


# Pure-JAX f32 reference (for a sanity check only).
def reference_forward(p, x):
    def conv(x, w, b):
        y = jax.lax.conv_general_dilated(
            x, w, window_strides=(1, 1), padding="VALID",
            dimension_numbers=("NCHW", "OIHW", "NCHW"))
        return jax.nn.relu(y + b.reshape(1, -1, 1, 1))

    def pool(x):
        return jax.lax.reduce_window(
            x, -jnp.inf, jax.lax.max, (1, 1, 2, 2), (1, 1, 2, 2), "VALID")

    x = pool(conv(x, p["conv1_w"], p["conv1_b"]))
    x = pool(conv(x, p["conv2_w"], p["conv2_b"]))
    x = x.reshape(x.shape[0], -1)
    x = jax.nn.relu(x @ p["fc1_w"].T + p["fc1_b"])
    x = jax.nn.relu(x @ p["fc2_w"].T + p["fc2_b"])
    return x @ p["fc3_w"].T + p["fc3_b"]


if __name__ == "__main__":
    key = jax.random.PRNGKey(0)
    k_params, k_input = jax.random.split(key)
    params = init_params(k_params)
    pp = prepare_params(params)

    # fc1 = Linear(16*5*5, 120) implies a 3x32x32 input; small batch = 2.
    x = jax.random.normal(k_input, (2, 3, 32, 32), jnp.float32)

    out = jax.block_until_ready(net_forward(pp, x))
    assert out.shape == (2, 10), out.shape
    assert bool(jnp.all(jnp.isfinite(out)))

    # Sanity check against a pure-JAX reference (loose tol: bf16 MXU inputs).
    ref = reference_forward(params, x)
    err = float(jnp.max(jnp.abs(out - ref)))
    assert err < 5e-2, f"mismatch vs reference: max abs err = {err}"

    print("KERNEL_OK")
</pallas_src>

<mosaic_0001>
module attributes {stable_mosaic.version = 11 : i64} {
  func.func @_conv_relu_pool_kernel(%arg0: i32, %arg1: memref<4x75x392xbf16, #tpu.memory_space<vmem>>, %arg2: memref<6x75xbf16, #tpu.memory_space<vmem>>, %arg3: memref<6x1xf32, #tpu.memory_space<vmem>>, %arg4: memref<6x392xbf16, #tpu.memory_space<vmem>>) attributes {dimension_semantics = [#tpu.dimension_semantics<parallel>], iteration_bounds = array<i64: 1>, scalar_prefetch = 0 : i64, scratch_operands = 0 : i64, tpu.core_type = #tpu.core_type<tc>, window_params = [{transform_indices = @transform_0, window_bounds = array<i64: 4, 75, 392>}, {pipeline_mode = #tpu.pipeline_mode<synchronous>, transform_indices = @transform_1, window_bounds = array<i64: 6, 75>}, {pipeline_mode = #tpu.pipeline_mode<synchronous>, transform_indices = @transform_2, window_bounds = array<i64: 6, 1>}, {transform_indices = @transform_3, window_bounds = array<i64: 6, 392>}]} {
    %c0 = arith.constant 0 : index
    %c0_0 = arith.constant 0 : index
    %0 = vector.load %arg2[%c0, %c0_0] : memref<6x75xbf16, #tpu.memory_space<vmem>>, vector<6x75xbf16>
    %c0_1 = arith.constant 0 : index
    %c0_2 = arith.constant 0 : index
    %c0_3 = arith.constant 0 : index
    %1 = vector.load %arg1[%c0_1, %c0_2, %c0_3] : memref<4x75x392xbf16, #tpu.memory_space<vmem>>, vector<1x75x392xbf16>
    %2 = vector.shape_cast %1 : vector<1x75x392xbf16> to vector<75x392xbf16>
    %cst = arith.constant dense<0.000000e+00> : vector<6x392xf32>
    %3 = tpu.matmul %0, %2, %cst {dimension_numbers = #tpu.dot_dimension_numbers<[1], [0], [0], [1], [0, 0, 1, 1], [], []>} : vector<6x75xbf16>, vector<75x392xbf16>, vector<6x392xf32> -> vector<6x392xf32>
    %c1 = arith.constant 1 : index
    %c0_4 = arith.constant 0 : index
    %c0_5 = arith.constant 0 : index
    %4 = vector.load %arg1[%c1, %c0_4, %c0_5] : memref<4x75x392xbf16, #tpu.memory_space<vmem>>, vector<1x75x392xbf16>
    %5 = vector.shape_cast %4 : vector<1x75x392xbf16> to vector<75x392xbf16>
    %cst_6 = arith.constant dense<0.000000e+00> : vector<6x392xf32>
    %6 = tpu.matmul %0, %5, %cst_6 {dimension_numbers = #tpu.dot_dimension_numbers<[1], [0], [0], [1], [0, 0, 1, 1], [], []>} : vector<6x75xbf16>, vector<75x392xbf16>, vector<6x392xf32> -> vector<6x392xf32>
    %c2 = arith.constant 2 : index
    %c0_7 = arith.constant 0 : index
    %c0_8 = arith.constant 0 : index
    %7 = vector.load %arg1[%c2, %c0_7, %c0_8] : memref<4x75x392xbf16, #tpu.memory_space<vmem>>, vector<1x75x392xbf16>
    %8 = vector.shape_cast %7 : vector<1x75x392xbf16> to vector<75x392xbf16>
    %cst_9 = arith.constant dense<0.000000e+00> : vector<6x392xf32>
    %9 = tpu.matmul %0, %8, %cst_9 {dimension_numbers = #tpu.dot_dimension_numbers<[1], [0], [0], [1], [0, 0, 1, 1], [], []>} : vector<6x75xbf16>, vector<75x392xbf16>, vector<6x392xf32> -> vector<6x392xf32>
    %c3 = arith.constant 3 : index
    %c0_10 = arith.constant 0 : index
    %c0_11 = arith.constant 0 : index
    %10 = vector.load %arg1[%c3, %c0_10, %c0_11] : memref<4x75x392xbf16, #tpu.memory_space<vmem>>, vector<1x75x392xbf16>
    %11 = vector.shape_cast %10 : vector<1x75x392xbf16> to vector<75x392xbf16>
    %cst_12 = arith.constant dense<0.000000e+00> : vector<6x392xf32>
    %12 = tpu.matmul %0, %11, %cst_12 {dimension_numbers = #tpu.dot_dimension_numbers<[1], [0], [0], [1], [0, 0, 1, 1], [], []>} : vector<6x75xbf16>, vector<75x392xbf16>, vector<6x392xf32> -> vector<6x392xf32>
    %13 = arith.maximumf %3, %6 : vector<6x392xf32>
    %14 = arith.maximumf %13, %9 : vector<6x392xf32>
    %15 = arith.maximumf %14, %12 : vector<6x392xf32>
    %c0_13 = arith.constant 0 : index
    %c0_14 = arith.constant 0 : index
    %16 = vector.load %arg3[%c0_13, %c0_14] : memref<6x1xf32, #tpu.memory_space<vmem>>, vector<6x1xf32>
    %17 = vector.broadcast %16 : vector<6x1xf32> to vector<6x392xf32>
    %18 = arith.addf %15, %17 : vector<6x392xf32>
    %cst_15 = arith.constant 0.000000e+00 : f32
    %19 = vector.broadcast %cst_15 : f32 to vector<6x392xf32>
    %20 = arith.maximumf %18, %19 : vector<6x392xf32>
    %21 = arith.truncf %20 : vector<6x392xf32> to vector<6x392xbf16>
    %c0_16 = arith.constant 0 : index
    %c0_17 = arith.constant 0 : index
    %22 = vector.load %arg4[%c0_16, %c0_17] : memref<6x392xbf16, #tpu.memory_space<vmem>>, vector<6x392xbf16>
    tpu.vector_store %arg4[%c0_16, %c0_17], %21 {strides = array<i32>} : memref<6x392xbf16, #tpu.memory_space<vmem>>, vector<6x392xbf16>,
    return
  }
  func.func @transform_0(%arg0: i32) -> (i32, i32, i32) {
    %c0_i32 = arith.constant 0 : i32
    %c0_i32_0 = arith.constant 0 : i32
    %c0_i32_1 = arith.constant 0 : i32
    return %c0_i32, %c0_i32_0, %arg0 : i32, i32, i32
  }
  func.func @transform_1(%arg0: i32) -> (i32, i32) {
    %c0_i32 = arith.constant 0 : i32
    %c0_i32_0 = arith.constant 0 : i32
    %c0_i32_1 = arith.constant 0 : i32
    return %c0_i32, %c0_i32_0 : i32, i32
  }
  func.func @transform_2(%arg0: i32) -> (i32, i32) {
    %c0_i32 = arith.constant 0 : i32
    %c0_i32_0 = arith.constant 0 : i32
    %c0_i32_1 = arith.constant 0 : i32
    return %c0_i32, %c0_i32_0 : i32, i32
  }
  func.func @transform_3(%arg0: i32) -> (i32, i32) {
    %c0_i32 = arith.constant 0 : i32
    %c0_i32_0 = arith.constant 0 : i32
    return %c0_i32, %arg0 : i32, i32
  }
}

module attributes {stable_mosaic.version = 11 : i64} {
  func.func @_conv2_fc_kernel(%arg0: i32, %arg1: memref<1176x2xbf16, #tpu.memory_space<vmem>>, %arg2: memref<1600x1176xbf16, #tpu.memory_space<vmem>>, %arg3: memref<400x1xf32, #tpu.memory_space<vmem>>, %arg4: memref<120x400xbf16, #tpu.memory_space<vmem>>, %arg5: memref<120x1xf32, #tpu.memory_space<vmem>>, %arg6: memref<84x120xbf16, #tpu.memory_space<vmem>>, %arg7: memref<84x1xf32, #tpu.memory_space<vmem>>, %arg8: memref<10x84xbf16, #tpu.memory_space<vmem>>, %arg9: memref<10x1xf32, #tpu.memory_space<vmem>>, %arg10: memref<10x2xf32, #tpu.memory_space<vmem>>) attributes {dimension_semantics = [#tpu.dimension_semantics<parallel>], iteration_bounds = array<i64: 1>, scalar_prefetch = 0 : i64, scratch_operands = 0 : i64, tpu.core_type = #tpu.core_type<tc>, window_params = [{transform_indices = @transform_0, window_bounds = array<i64: 1176, 2>}, {pipeline_mode = #tpu.pipeline_mode<synchronous>, transform_indices = @transform_1, window_bounds = array<i64: 1600, 1176>}, {pipeline_mode = #tpu.pipeline_mode<synchronous>, transform_indices = @transform_2, window_bounds = array<i64: 400, 1>}, {pipeline_mode = #tpu.pipeline_mode<synchronous>, transform_indices = @transform_3, window_bounds = array<i64: 120, 400>}, {pipeline_mode = #tpu.pipeline_mode<synchronous>, transform_indices = @transform_4, window_bounds = array<i64: 120, 1>}, {pipeline_mode = #tpu.pipeline_mode<synchronous>, transform_indices = @transform_5, window_bounds = array<i64: 84, 120>}, {pipeline_mode = #tpu.pipeline_mode<synchronous>, transform_indices = @transform_6, window_bounds = array<i64: 84, 1>}, {pipeline_mode = #tpu.pipeline_mode<synchronous>, transform_indices = @transform_7, window_bounds = array<i64: 10, 84>}, {pipeline_mode = #tpu.pipeline_mode<synchronous>, transform_indices = @transform_8, window_bounds = array<i64: 10, 1>}, {transform_indices = @transform_9, window_bounds = array<i64: 10, 2>}]} {
    %c0 = arith.constant 0 : index
    %c0_0 = arith.constant 0 : index
    %0 = vector.load %arg1[%c0, %c0_0] : memref<1176x2xbf16, #tpu.memory_space<vmem>>, vector<1176x2xbf16>
    %c0_1 = arith.constant 0 : index
    %c0_2 = arith.constant 0 : index
    %1 = vector.load %arg2[%c0_1, %c0_2] : memref<1600x1176xbf16, #tpu.memory_space<vmem>>, vector<1600x1176xbf16>
    %cst = arith.constant dense<0.000000e+00> : vector<1600x2xf32>
    %2 = tpu.matmul %1, %0, %cst {dimension_numbers = #tpu.dot_dimension_numbers<[1], [0], [0], [1], [0, 0, 1, 1], [], []>} : vector<1600x1176xbf16>, vector<1176x2xbf16>, vector<1600x2xf32> -> vector<1600x2xf32>
    %3 = vector.extract_strided_slice %2 {offsets = [0, 0], sizes = [400, 2], strides = [1, 1]} : vector<1600x2xf32> to vector<400x2xf32>
    %4 = vector.extract_strided_slice %2 {offsets = [400, 0], sizes = [400, 2], strides = [1, 1]} : vector<1600x2xf32> to vector<400x2xf32>
    %5 = arith.maximumf %3, %4 : vector<400x2xf32>
    %6 = vector.extract_strided_slice %2 {offsets = [800, 0], sizes = [400, 2], strides = [1, 1]} : vector<1600x2xf32> to vector<400x2xf32>
    %7 = arith.maximumf %5, %6 : vector<400x2xf32>
    %8 = vector.extract_strided_slice %2 {offsets = [1200, 0], sizes = [400, 2], strides = [1, 1]} : vector<1600x2xf32> to vector<400x2xf32>
    %9 = arith.maximumf %7, %8 : vector<400x2xf32>
    %c0_3 = arith.constant 0 : index
    %c0_4 = arith.constant 0 : index
    %10 = vector.load %arg3[%c0_3, %c0_4] : memref<400x1xf32, #tpu.memory_space<vmem>>, vector<400x1xf32>
    %11 = vector.broadcast %10 : vector<400x1xf32> to vector<400x2xf32>
    %12 = arith.addf %9, %11 : vector<400x2xf32>
    %cst_5 = arith.constant 0.000000e+00 : f32
    %13 = vector.broadcast %cst_5 : f32 to vector<400x2xf32>
    %14 = arith.maximumf %12, %13 : vector<400x2xf32>
    %c0_6 = arith.constant 0 : index
    %c0_7 = arith.constant 0 : index
    %15 = vector.load %arg4[%c0_6, %c0_7] : memref<120x400xbf16, #tpu.memory_space<vmem>>, vector<120x400xbf16>
    %16 = arith.truncf %14 : vector<400x2xf32> to vector<400x2xbf16>
    %cst_8 = arith.constant dense<0.000000e+00> : vector<120x2xf32>
    %17 = tpu.matmul %15, %16, %cst_8 {dimension_numbers = #tpu.dot_dimension_numbers<[1], [0], [0], [1], [0, 0, 1, 1], [], []>} : vector<120x400xbf16>, vector<400x2xbf16>, vector<120x2xf32> -> vector<120x2xf32>
    %c0_9 = arith.constant 0 : index
    %c0_10 = arith.constant 0 : index
    %18 = vector.load %arg5[%c0_9, %c0_10] : memref<120x1xf32, #tpu.memory_space<vmem>>, vector<120x1xf32>
    %19 = vector.broadcast %18 : vector<120x1xf32> to vector<120x2xf32>
    %20 = arith.addf %17, %19 : vector<120x2xf32>
    %cst_11 = arith.constant 0.000000e+00 : f32
    %21 = vector.broadcast %cst_11 : f32 to vector<120x2xf32>
    %22 = arith.maximumf %20, %21 : vector<120x2xf32>
    %c0_12 = arith.constant 0 : index
    %c0_13 = arith.constant 0 : index
    %23 = vector.load %arg6[%c0_12, %c0_13] : memref<84x120xbf16, #tpu.memory_space<vmem>>, vector<84x120xbf16>
    %24 = arith.truncf %22 : vector<120x2xf32> to vector<120x2xbf16>
    %cst_14 = arith.constant dense<0.000000e+00> : vector<84x2xf32>
    %25 = tpu.matmul %23, %24, %cst_14 {dimension_numbers = #tpu.dot_dimension_numbers<[1], [0], [0], [1], [0, 0, 1, 1], [], []>} : vector<84x120xbf16>, vector<120x2xbf16>, vector<84x2xf32> -> vector<84x2xf32>
    %c0_15 = arith.constant 0 : index
    %c0_16 = arith.constant 0 : index
    %26 = vector.load %arg7[%c0_15, %c0_16] : memref<84x1xf32, #tpu.memory_space<vmem>>, vector<84x1xf32>
    %27 = vector.broadcast %26 : vector<84x1xf32> to vector<84x2xf32>
    %28 = arith.addf %25, %27 : vector<84x2xf32>
    %cst_17 = arith.constant 0.000000e+00 : f32
    %29 = vector.broadcast %cst_17 : f32 to vector<84x2xf32>
    %30 = arith.maximumf %28, %29 : vector<84x2xf32>
    %c0_18 = arith.constant 0 : index
    %c0_19 = arith.constant 0 : index
    %31 = vector.load %arg8[%c0_18, %c0_19] : memref<10x84xbf16, #tpu.memory_space<vmem>>, vector<10x84xbf16>
    %32 = arith.truncf %30 : vector<84x2xf32> to vector<84x2xbf16>
    %cst_20 = arith.constant dense<0.000000e+00> : vector<10x2xf32>
    %33 = tpu.matmul %31, %32, %cst_20 {dimension_numbers = #tpu.dot_dimension_numbers<[1], [0], [0], [1], [0, 0, 1, 1], [], []>} : vector<10x84xbf16>, vector<84x2xbf16>, vector<10x2xf32> -> vector<10x2xf32>
    %c0_21 = arith.constant 0 : index
    %c0_22 = arith.constant 0 : index
    %34 = vector.load %arg9[%c0_21, %c0_22] : memref<10x1xf32, #tpu.memory_space<vmem>>, vector<10x1xf32>
    %35 = vector.broadcast %34 : vector<10x1xf32> to vector<10x2xf32>
    %36 = arith.addf %33, %35 : vector<10x2xf32>
    %c0_23 = arith.constant 0 : index
    %c0_24 = arith.constant 0 : index
    %37 = vector.load %arg10[%c0_23, %c0_24] : memref<10x2xf32, #tpu.memory_space<vmem>>, vector<10x2xf32>
    tpu.vector_store %arg10[%c0_23, %c0_24], %36 {strides = array<i32>} : memref<10x2xf32, #tpu.memory_space<vmem>>, vector<10x2xf32>,
    return
  }
  func.func @transform_0(%arg0: i32) -> (i32, i32) {
    %c0_i32 = arith.constant 0 : i32
    %c0_i32_0 = arith.constant 0 : i32
    return %c0_i32, %arg0 : i32, i32
  }
  func.func @transform_1(%arg0: i32) -> (i32, i32) {
    %c0_i32 = arith.constant 0 : i32
    %c0_i32_0 = arith.constant 0 : i32
    %c0_i32_1 = arith.constant 0 : i32
    return %c0_i32, %c0_i32_0 : i32, i32
  }
  func.func @transform_2(%arg0: i32) -> (i32, i32) {
    %c0_i32 = arith.constant 0 : i32
    %c0_i32_0 = arith.constant 0 : i32
    %c0_i32_1 = arith.constant 0 : i32
    return %c0_i32, %c0_i32_0 : i32, i32
  }
  func.func @transform_3(%arg0: i32) -> (i32, i32) {
    %c0_i32 = arith.constant 0 : i32
    %c0_i32_0 = arith.constant 0 : i32
    %c0_i32_1 = arith.constant 0 : i32
    return %c0_i32, %c0_i32_0 : i32, i32
  }
  func.func @transform_4(%arg0: i32) -> (i32, i32) {
    %c0_i32 = arith.constant 0 : i32
    %c0_i32_0 = arith.constant 0 : i32
    %c0_i32_1 = arith.constant 0 : i32
    return %c0_i32, %c0_i32_0 : i32, i32
  }
  func.func @transform_5(%arg0: i32) -> (i32, i32) {
    %c0_i32 = arith.constant 0 : i32
    %c0_i32_0 = arith.constant 0 : i32
    %c0_i32_1 = arith.constant 0 : i32
    return %c0_i32, %c0_i32_0 : i32, i32
  }
  func.func @transform_6(%arg0: i32) -> (i32, i32) {
    %c0_i32 = arith.constant 0 : i32
    %c0_i32_0 = arith.constant 0 : i32
    %c0_i32_1 = arith.constant 0 : i32
    return %c0_i32, %c0_i32_0 : i32, i32
  }
  func.func @transform_7(%arg0: i32) -> (i32, i32) {
    %c0_i32 = arith.constant 0 : i32
    %c0_i32_0 = arith.constant 0 : i32
    %c0_i32_1 = arith.constant 0 : i32
    return %c0_i32, %c0_i32_0 : i32, i32
  }
  func.func @transform_8(%arg0: i32) -> (i32, i32) {
    %c0_i32 = arith.constant 0 : i32
    %c0_i32_0 = arith.constant 0 : i32
    %c0_i32_1 = arith.constant 0 : i32
    return %c0_i32, %c0_i32_0 : i32, i32
  }
  func.func @transform_9(%arg0: i32) -> (i32, i32) {
    %c0_i32 = arith.constant 0 : i32
    %c0_i32_0 = arith.constant 0 : i32
    return %c0_i32, %arg0 : i32, i32
  }
}

</mosaic_0001>

<bundles_post_ra>
// kernel: net_forward.2
= control target key start
LH: loop header
LB: loop body
LE: loop exit
PB: predicated region body
PF: predicated region fallthrough
CT: control target
= control target key end

     0   :  { %vm136_vm0 = vcmask 1044480   ;;  %vm137_vm1 = vcmask 1045504   ;;  %v1193_v1 = vmov 0   ;;  %v1194_v2 = vmov 65535   ;;  %s1512_s0 = inlined_call_operand.vmem [shape: bf16[4,75,392], index: 0, kind: input, shape index: {}]   ;;  %s1513_s1 = inlined_call_operand.vmem [shape: bf16[6,75], index: 1, kind: input, shape index: {}]   ;;  %s1514_s2 = inlined_call_operand.vmem [shape: f32[6,1], index: 2, kind: input, shape index: {}]   ;;  %s1515_s3 = inlined_call_operand.vmem [shape: bf16[6,392], index: 3, kind: output, shape index: {}]  }
   0x1   :  { %v1073_v0 = vld [vmem:[%s1512_s0 + $0x84] ss:$16 sps:$4 sm:$0x3f]   ;;  %184 = vmatprep.mubr.bf16.mxu0 %v1193_v1  ;;  %225 = vmatprep.mubr.bf16.mxu1 %v1193_v1  ;;  %v138_v3 = vsel %vm136_vm0, 4294967295, %v1194_v2  ;;  %v1081_v11 = vld [vmem:[%s1512_s0 + $0x6c] ss:$16 sps:$4 sm:$0xff]  }
   0x2   :  { %1072 = vset.pattern.permute.xlu0 %v1193_v1  ;;  %v1221_v4 = vsel %vm137_vm1, %v138_v3, 0  ;;  %v1075_v5 = vld [vmem:[%s1512_s0 + $0x8c] ss:$16 sps:$4 sm:$0x3f]   ;;  %v1079_v10 = vld [vmem:[%s1512_s0 + $0x64] ss:$16 sps:$4 sm:$0xff]  }
   0x3   :  { %v144_v6 = vand.u32 %v1073_v0, %v1221_v4  ;;  %v1077_v7 = vld [vmem:[%s1512_s0 + $0x80] ss:$16 sps:$4 sm:$0x3f]   ;;  %v1078_v8 = vld [vmem:[%s1512_s0 + $0x88] ss:$16 sps:$4 sm:$0x3f]   ;;  %v150_v9 = vand.u32 %v1075_v5, %v1221_v4 }
   0x4   :  { %v141_v12 = vand.u32 %v1077_v7, %v1221_v4  ;;  %v147_v13 = vand.u32 %v1078_v8, %v1221_v4  ;;  %v1083_v14 = vld [vmem:[%s1512_s0 + $0x60] ss:$16 sps:$4 sm:$0xff]   ;;  %v1084_v15 = vld [vmem:[%s1512_s0 + $0x68] ss:$16 sps:$4 sm:$0xff]   ;;  %v1085_v16 = vld [vmem:[%s1512_s0 + $0x44] ss:$16 sps:$4 sm:$0xff]  }
   0x5   :  { %158 = vmatprep.subr.bf16.mxu0 %v144_v6  ;;  %199 = vmatprep.subr.bf16.mxu1 %v150_v9  ;;  %v1087_v17 = vld [vmem:[%s1512_s0 + $0x4c] ss:$16 sps:$4 sm:$0xff]   ;;  %v1089_v18 = vld [vmem:[%s1512_s0 + $0x40] ss:$16 sps:$4 sm:$0xff]   ;;  %v1090_v19 = vld [vmem:[%s1512_s0 + $0x48] ss:$16 sps:$4 sm:$0xff]  }
   0x6   :  { %159 = vmatpush1.bf16.msra.mxu0 %v141_v12  ;;  %200 = vmatpush1.bf16.msra.mxu1 %v147_v13  ;;  %v1091_v20 = vld [vmem:[%s1512_s0 + $0x24] ss:$16 sps:$4 sm:$0xff]   ;;  %v1093_v21 = vld [vmem:[%s1512_s0 + $0x2c] ss:$16 sps:$4 sm:$0xff]   ;;  %v1095_v22 = vld [vmem:[%s1512_s0 + $0x20] ss:$16 sps:$4 sm:$0xff]  }
   0x7   :  { %160 = vmatprep.subr.bf16.mxu0 %v1079_v10  ;;  %201 = vmatprep.subr.bf16.mxu1 %v1081_v11  ;;  %v1096_v23 = vld [vmem:[%s1512_s0 + $0x28] ss:$16 sps:$4 sm:$0xff]   ;;  %v1097_v24 = vld [vmem:[%s1512_s0 + $0x4] ss:$16 sps:$4 sm:$0xff]   ;;  %v1099_v25 = vld [vmem:[%s1512_s0 + $0xc] ss:$16 sps:$4 sm:$0xff]  }
   0x8   :  { %v1105_v26 = vld [vmem:[%s1512_s0 + $0x124] ss:$16 sps:$4 sm:$0x3f]   ;;  %v1108_v27 = vld [vmem:[%s1512_s0 + $0x12c] ss:$16 sps:$4 sm:$0x3f]  }
   0x9   :  { %v1101_v28 = vld [vmem:[%s1512_s0] ss:$16 sps:$4 sm:$0xff]   ;;  %v1102_v30 = vld [vmem:[%s1512_s0 + $0x8] ss:$16 sps:$4 sm:$0xff]   ;;  %v355_v32 = vand.u32 %v1105_v26, %v1221_v4  ;;  %v361_v33 = vand.u32 %v1108_v27, %v1221_v4  ;;  %vm132_vm2 = vcmask 613376   ;;  %vm910_vm3 = vcmask 1042432  }
   0xa   :  { %161 = vmatpush1.bf16.msra.mxu0 %v1083_v14  ;;  %202 = vmatpush1.bf16.msra.mxu1 %v1084_v15  ;;  %v1103_v29 = vld [vmem:[%s1512_s0 + $0x120] ss:$16 sps:$4 sm:$0x3f]   ;;  %v1106_v31 = vld [vmem:[%s1512_s0 + $0x128] ss:$16 sps:$4 sm:$0x3f]  }
   0xb   :  { %162 = vmatprep.subr.bf16.mxu0 %v1085_v16  ;;  %203 = vmatprep.subr.bf16.mxu1 %v1087_v17  ;;  %v1301_v34 = vld [vmem:[%s1513_s1] sm:$0x7]  ;;  %v352_v35 = vand.u32 %v1103_v29, %v1221_v4  ;;  %v358_v36 = vand.u32 %v1106_v31, %v1221_v4  ;;  %v1111_v37 = vld [vmem:[%s1512_s0 + $0x104] ss:$16 sps:$4 sm:$0xff]   ;;  %v1114_v38 = vld [vmem:[%s1512_s0 + $0x10c] ss:$16 sps:$4 sm:$0xff]  }
   0xc   :  { %v1109_v39 = vld [vmem:[%s1512_s0 + $0x100] ss:$16 sps:$4 sm:$0xff]   ;;  %v1112_v40 = vld [vmem:[%s1512_s0 + $0x108] ss:$16 sps:$4 sm:$0xff]   ;;  %v1117_v41 = vld [vmem:[%s1512_s0 + $0xe4] ss:$16 sps:$4 sm:$0xff]  }
   0xd   :  { %v1120_v42 = vld [vmem:[%s1512_s0 + $0xec] ss:$16 sps:$4 sm:$0xff]   ;;  %v1115_v43 = vld [vmem:[%s1512_s0 + $0xe0] ss:$16 sps:$4 sm:$0xff]   ;;  %v1118_v44 = vld [vmem:[%s1512_s0 + $0xe8] ss:$16 sps:$4 sm:$0xff]  }
   0xe   :  { %163 = vmatpush1.bf16.msra.mxu0 %v1089_v18  ;;  %204 = vmatpush1.bf16.msra.mxu1 %v1090_v19  ;;  %v1123_v45 = vld [vmem:[%s1512_s0 + $0xc4] ss:$16 sps:$4 sm:$0xff]   ;;  %v1126_v46 = vld [vmem:[%s1512_s0 + $0xcc] ss:$16 sps:$4 sm:$0xff]   ;;  %v1121_v47 = vld [vmem:[%s1512_s0 + $0xc0] ss:$16 sps:$4 sm:$0xff]  }
   0xf   :  { %164 = vmatprep.subr.bf16.mxu0 %v1091_v20  ;;  %205 = vmatprep.subr.bf16.mxu1 %v1093_v21  ;;  %v1124_v48 = vld [vmem:[%s1512_s0 + $0xc8] ss:$16 sps:$4 sm:$0xff]   ;;  %v1129_v49 = vld [vmem:[%s1512_s0 + $0xa4] ss:$16 sps:$4 sm:$0xff]   ;;  %v1132_v50 = vld [vmem:[%s1512_s0 + $0xac] ss:$16 sps:$4 sm:$0xff]  }
  0x10   :  { %v1135_v51 = vld [vmem:[%s1512_s0 + $0x1c4] ss:$16 sps:$4 sm:$0x3f]   ;;  %v1138_v52 = vld [vmem:[%s1512_s0 + $0x1cc] ss:$16 sps:$4 sm:$0x3f]  }
  0x11   :  { %v1127_v53 = vld [vmem:[%s1512_s0 + $0xa0] ss:$16 sps:$4 sm:$0xff]   ;;  %v1130_v55 = vld [vmem:[%s1512_s0 + $0xa8] ss:$16 sps:$4 sm:$0xff]   ;;  %v566_v57 = vand.u32 %v1135_v51, %v1221_v4  ;;  %v572_v58 = vand.u32 %v1138_v52, %v1221_v4  ;;  %v1141_v61 = vld [vmem:[%s1512_s0 + $0x1a4] ss:$16 sps:$4 sm:$0xff]  }
  0x12   :  { %165 = vmatpush1.bf16.msra.mxu0 %v1095_v22  ;;  %206 = vmatpush1.bf16.msra.mxu1 %v1096_v23  ;;  %v1133_v54 = vld [vmem:[%s1512_s0 + $0x1c0] ss:$16 sps:$4 sm:$0x3f]   ;;  %v1136_v56 = vld [vmem:[%s1512_s0 + $0x1c8] ss:$16 sps:$4 sm:$0x3f]  }
  0x13   :  { %166 = vmatprep.subr.bf16.mxu0 %v1097_v24  ;;  %207 = vmatprep.subr.bf16.mxu1 %v1099_v25  ;;  %v563_v59 = vand.u32 %v1133_v54, %v1221_v4  ;;  %v569_v60 = vand.u32 %v1136_v56, %v1221_v4  ;;  %v1144_v62 = vld [vmem:[%s1512_s0 + $0x1ac] ss:$16 sps:$4 sm:$0xff]   ;;  %v1139_v63 = vld [vmem:[%s1512_s0 + $0x1a0] ss:$16 sps:$4 sm:$0xff]   ;;  %v1142_v0 = vld [vmem:[%s1512_s0 + $0x1a8] ss:$16 sps:$4 sm:$0xff]  }
  0x14   :  { %v1147_v2 = vld [vmem:[%s1512_s0 + $0x184] ss:$16 sps:$4 sm:$0xff]   ;;  %v1150_v3 = vld [vmem:[%s1512_s0 + $0x18c] ss:$16 sps:$4 sm:$0xff]   ;;  %v1145_v5 = vld [vmem:[%s1512_s0 + $0x180] ss:$16 sps:$4 sm:$0xff]  }
  0x15   :  { %v1148_v6 = vld [vmem:[%s1512_s0 + $0x188] ss:$16 sps:$4 sm:$0xff]   ;;  %v1153_v7 = vld [vmem:[%s1512_s0 + $0x164] ss:$16 sps:$4 sm:$0xff]   ;;  %v1156_v8 = vld [vmem:[%s1512_s0 + $0x16c] ss:$16 sps:$4 sm:$0xff]  }
  0x16   :  { %167 = vmatpush1.bf16.msra.mxu0 %v1101_v28  ;;  %208 = vmatpush1.bf16.msra.mxu1 %v1102_v30  ;;  %v1151_v9 = vld [vmem:[%s1512_s0 + $0x160] ss:$16 sps:$4 sm:$0xff]   ;;  %v1154_v10 = vld [vmem:[%s1512_s0 + $0x168] ss:$16 sps:$4 sm:$0xff]   ;;  %v1159_v11 = vld [vmem:[%s1512_s0 + $0x144] ss:$16 sps:$4 sm:$0xff]  }
  0x17   :  { %369 = vmatprep.subr.bf16.mxu0 %v355_v32  ;;  %410 = vmatprep.subr.bf16.mxu1 %v361_v33  ;;  %v1162_v12 = vld [vmem:[%s1512_s0 + $0x14c] ss:$16 sps:$4 sm:$0xff]   ;;  %v879_v13 = vld [vmem:[%s1514_s2] sm:$0x3f]  ;;  %v1160_v17 = vld [vmem:[%s1512_s0 + $0x148] ss:$16 sps:$4 sm:$0xff]  }
  0x18   :  { %v1165_v14 = vld [vmem:[%s1512_s0 + $0x264] ss:$16 sps:$4 sm:$0x3f]   ;;  %v1168_v15 = vld [vmem:[%s1512_s0 + $0x26c] ss:$16 sps:$4 sm:$0x3f]   ;;  %882 = vperm.xlu0 %1072, %v879_v13  }
  0x19   :  { %938 = vmatmul.mubr.msk.bf16.vlgmr.msra.gmra.mxu0 %vm132_vm2, %v1301_v34  ;;  %939 = vmatmul.mubr.msk.bf16.vlgmr.msra.gmra.mxu1 %vm132_vm2, %v1301_v34  ;;  %v1157_v16 = vld [vmem:[%s1512_s0 + $0x140] ss:$16 sps:$4 sm:$0xff]   ;;  %v1166_v19 = vld [vmem:[%s1512_s0 + $0x268] ss:$16 sps:$4 sm:$0x3f]   ;;  %v777_v20 = vand.u32 %v1165_v14, %v1221_v4  ;;  %v783_v21 = vand.u32 %v1168_v15, %v1221_v4  ;;  %vm911_vm4 = vcmask 63492  }
  0x1a   :  { %370 = vmatpush1.bf16.msra.mxu0 %v352_v35  ;;  %411 = vmatpush1.bf16.msra.mxu1 %v358_v36  ;;  %v1163_v18 = vld [vmem:[%s1512_s0 + $0x260] ss:$16 sps:$4 sm:$0x3f]   ;;  %v780_v23 = vand.u32 %v1166_v19, %v1221_v4  ;;  %v1171_v24 = vld [vmem:[%s1512_s0 + $0x244] ss:$16 sps:$4 sm:$0xff]   ;;  %vm912_vm5 = vmor %vm911_vm4, %vm910_vm3 }
  0x1b   :  { %371 = vmatprep.subr.bf16.mxu0 %v1111_v37  ;;  %412 = vmatprep.subr.bf16.mxu1 %v1114_v38  ;;  %v774_v22 = vand.u32 %v1163_v18, %v1221_v4  ;;  %v1174_v25 = vld [vmem:[%s1512_s0 + $0x24c] ss:$16 sps:$4 sm:$0xff]   ;;  %v1169_v4 = vld [vmem:[%s1512_s0 + $0x240] ss:$16 sps:$4 sm:$0xff]   ;;  %v1172_v26 = vld [vmem:[%s1512_s0 + $0x248] ss:$16 sps:$4 sm:$0xff]  }
  0x1c   :  { %395 = vmatprep.mubr.bf16.mxu0 %v1193_v1  ;;  %436 = vmatprep.mubr.bf16.mxu1 %v1193_v1  ;;  %v1177_v27 = vld [vmem:[%s1512_s0 + $0x224] ss:$16 sps:$4 sm:$0xff]   ;;  %v1180_v28 = vld [vmem:[%s1512_s0 + $0x22c] ss:$16 sps:$4 sm:$0xff]   ;;  %v1175_v29 = vld [vmem:[%s1512_s0 + $0x220] ss:$16 sps:$4 sm:$0xff]  }
  0x1d   :  { %v1178_v30 = vld [vmem:[%s1512_s0 + $0x228] ss:$16 sps:$4 sm:$0xff]   ;;  %v1183_v31 = vld [vmem:[%s1512_s0 + $0x204] ss:$16 sps:$4 sm:$0xff]   ;;  %v1181_v32 = vld [vmem:[%s1512_s0 + $0x200] ss:$16 sps:$4 sm:$0xff]  }
  0x1e   :  { %372 = vmatpush1.bf16.msra.mxu0 %v1109_v39  ;;  %413 = vmatpush1.bf16.msra.mxu1 %v1112_v40  ;;  %v1184_v33 = vld [vmem:[%s1512_s0 + $0x208] ss:$16 sps:$4 sm:$0xff]   ;;  %v1189_v35 = vld [vmem:[%s1512_s0 + $0x1e4] ss:$16 sps:$4 sm:$0xff]   ;;  %v1192_v36 = vld [vmem:[%s1512_s0 + $0x1ec] ss:$16 sps:$4 sm:$0xff]  }
  0x1f   :  { %373 = vmatprep.subr.bf16.mxu0 %v1117_v41  ;;  %414 = vmatprep.subr.bf16.mxu1 %v1120_v42  ;;  %v1187_v37 = vld [vmem:[%s1512_s0 + $0x1e0] ss:$16 sps:$4 sm:$0xff]   ;;  %v1190_v38 = vld [vmem:[%s1512_s0 + $0x1e8] ss:$16 sps:$4 sm:$0xff]  }
  0x22   :  { %374 = vmatpush1.bf16.msra.mxu0 %v1115_v43  ;;  %415 = vmatpush1.bf16.msra.mxu1 %v1118_v44 }
  0x23   :  { %375 = vmatprep.subr.bf16.mxu0 %v1123_v45  ;;  %416 = vmatprep.subr.bf16.mxu1 %v1126_v46 }
  0x26   :  { %376 = vmatpush1.bf16.msra.mxu0 %v1121_v47  ;;  %417 = vmatpush1.bf16.msra.mxu1 %v1124_v48 }
  0x27   :  { %377 = vmatprep.subr.bf16.mxu0 %v1129_v49  ;;  %418 = vmatprep.subr.bf16.mxu1 %v1132_v50 }
  0x2a   :  { %378 = vmatpush1.bf16.msra.mxu0 %v1127_v53  ;;  %419 = vmatpush1.bf16.msra.mxu1 %v1130_v55 }
  0x2b   :  { %580 = vmatprep.subr.bf16.mxu0 %v566_v57  ;;  %621 = vmatprep.subr.bf16.mxu1 %v572_v58 }
  0x2d   :  { %980 = vmatmul.mubr.msk.bf16.vlgmr.msra.gmra.mxu0 %vm132_vm2, %v1301_v34  ;;  %981 = vmatmul.mubr.msk.bf16.vlgmr.msra.gmra.mxu1 %vm132_vm2, %v1301_v34 }
  0x2e   :  { %581 = vmatpush1.bf16.msra.mxu0 %v563_v59  ;;  %622 = vmatpush1.bf16.msra.mxu1 %v569_v60 }
  0x2f   :  { %582 = vmatprep.subr.bf16.mxu0 %v1141_v61  ;;  %623 = vmatprep.subr.bf16.mxu1 %v1144_v62 }
  0x30   :  { %606 = vmatprep.mubr.bf16.mxu0 %v1193_v1  ;;  %647 = vmatprep.mubr.bf16.mxu1 %v1193_v1 }
  0x32   :  { %583 = vmatpush1.bf16.msra.mxu0 %v1139_v63  ;;  %624 = vmatpush1.bf16.msra.mxu1 %v1142_v0 }
  0x33   :  { %584 = vmatprep.subr.bf16.mxu0 %v1147_v2  ;;  %625 = vmatprep.subr.bf16.mxu1 %v1150_v3 }
  0x36   :  { %585 = vmatpush1.bf16.msra.mxu0 %v1145_v5  ;;  %626 = vmatpush1.bf16.msra.mxu1 %v1148_v6 }
  0x37   :  { %586 = vmatprep.subr.bf16.mxu0 %v1153_v7  ;;  %627 = vmatprep.subr.bf16.mxu1 %v1156_v8 }
  0x3a   :  { %587 = vmatpush1.bf16.msra.mxu0 %v1151_v9  ;;  %628 = vmatpush1.bf16.msra.mxu1 %v1154_v10 }
  0x3b   :  { %588 = vmatprep.subr.bf16.mxu0 %v1159_v11  ;;  %629 = vmatprep.subr.bf16.mxu1 %v1162_v12 }
  0x3e   :  { %589 = vmatpush1.bf16.msra.mxu0 %v1157_v16  ;;  %630 = vmatpush1.bf16.msra.mxu1 %v1160_v17 }
  0x3f   :  { %791 = vmatprep.subr.bf16.mxu0 %v777_v20  ;;  %832 = vmatprep.subr.bf16.mxu1 %v783_v21 }
  0x41   :  { %1022 = vmatmul.mubr.msk.bf16.vlgmr.msra.gmra.mxu0 %vm132_vm2, %v1301_v34  ;;  %1023 = vmatmul.mubr.msk.bf16.vlgmr.msra.gmra.mxu1 %vm132_vm2, %v1301_v34 }
  0x42   :  { %792 = vmatpush1.bf16.msra.mxu0 %v774_v22  ;;  %833 = vmatpush1.bf16.msra.mxu1 %v780_v23 }
  0x43   :  { %793 = vmatprep.subr.bf16.mxu0 %v1171_v24  ;;  %834 = vmatprep.subr.bf16.mxu1 %v1174_v25 }
  0x44   :  { %817 = vmatprep.mubr.bf16.mxu0 %v1193_v1  ;;  %858 = vmatprep.mubr.bf16.mxu1 %v1193_v1  ;;  %v1186_v1 = vld [vmem:[%s1512_s0 + $0x20c] ss:$16 sps:$4 sm:$0xff]  }
  0x46   :  { %794 = vmatpush1.bf16.msra.mxu0 %v1169_v4  ;;  %835 = vmatpush1.bf16.msra.mxu1 %v1172_v26 }
  0x47   :  { %795 = vmatprep.subr.bf16.mxu0 %v1177_v27  ;;  %836 = vmatprep.subr.bf16.mxu1 %v1180_v28 }
  0x4a   :  { %796 = vmatpush1.bf16.msra.mxu0 %v1175_v29  ;;  %837 = vmatpush1.bf16.msra.mxu1 %v1178_v30 }
  0x4b   :  { %797 = vmatprep.subr.bf16.mxu0 %v1183_v31  ;;  %838 = vmatprep.subr.bf16.mxu1 %v1186_v1 }
  0x4e   :  { %798 = vmatpush1.bf16.msra.mxu0 %v1181_v32  ;;  %839 = vmatpush1.bf16.msra.mxu1 %v1184_v33 }
  0x4f   :  { %799 = vmatprep.subr.bf16.mxu0 %v1189_v35  ;;  %840 = vmatprep.subr.bf16.mxu1 %v1192_v36 }
  0x52   :  { %800 = vmatpush1.bf16.msra.mxu0 %v1187_v37  ;;  %841 = vmatpush1.bf16.msra.mxu1 %v1190_v38 }
  0x55   :  { %1064 = vmatmul.mubr.msk.bf16.vlgmr.msra.gmra.mxu0 %vm132_vm2, %v1301_v34  ;;  %1065 = vmatmul.mubr.msk.bf16.vlgmr.msra.gmra.mxu1 %vm132_vm2, %v1301_v34 }
  0x93   :  { %v883_v6 = vpop.permute.xlu0 %882 }
  0xd9   :  { %v186_v39 = vpop.f32.mrf.mxu0  ;;  %v227_v40 = vpop.f32.mrf.mxu1 }
  0xdb   :  { %v188_v41 = vpop.f32.mrf.mxu0  ;;  %v229_v42 = vpop.f32.mrf.mxu1 }
  0xdd   :  { %v190_v43 = vpop.f32.mrf.mxu0  ;;  %v231_v44 = vpop.f32.mrf.mxu1 }
  0xdf   :  { %v191_v45 = vpop.f32.mrf.mxu0  ;;  %v232_v46 = vpop.f32.mrf.mxu1 }
  0xed   :  { %v397_v47 = vpop.f32.mrf.mxu0  ;;  %v438_v48 = vpop.f32.mrf.mxu1 }
  0xee   :  { %v867_v62 = vmax.f32 %v186_v39, %v397_v47  ;;  %v869_v63 = vmax.f32 %v227_v40, %v438_v48 }
  0xef   :  { %v399_v49 = vpop.f32.mrf.mxu0  ;;  %v440_v50 = vpop.f32.mrf.mxu1 }
  0xf0   :  { %v868_v0 = vmax.f32 %v188_v41, %v399_v49  ;;  %v870_v2 = vmax.f32 %v229_v42, %v440_v50 }
  0xf1   :  { %v401_v51 = vpop.f32.mrf.mxu0  ;;  %v442_v52 = vpop.f32.mrf.mxu1 }
  0xf3   :  { %v402_v53 = vpop.f32.mrf.mxu0  ;;  %v443_v54 = vpop.f32.mrf.mxu1 }
 0x101   :  { %v608_v55 = vpop.f32.mrf.mxu0  ;;  %v649_v56 = vpop.f32.mrf.mxu1 }
 0x102   :  { %v871_v3 = vmax.f32 %v867_v62, %v608_v55  ;;  %v873_v5 = vmax.f32 %v869_v63, %v649_v56 }
 0x103   :  { %v610_v57 = vpop.f32.mrf.mxu0  ;;  %v651_v34 = vpop.f32.mrf.mxu1 }
 0x104   :  { %v872_v9 = vmax.f32 %v868_v0, %v610_v57  ;;  %v874_v10 = vmax.f32 %v870_v2, %v651_v34 }
 0x105   :  { %v612_v58 = vpop.f32.mrf.mxu0  ;;  %v653_v59 = vpop.f32.mrf.mxu1 }
 0x107   :  { %v613_v60 = vpop.f32.mrf.mxu0  ;;  %v654_v61 = vpop.f32.mrf.mxu1 }
 0x115   :  { %v819_v7 = vpop.f32.mrf.mxu0  ;;  %v860_v8 = vpop.f32.mrf.mxu1 }
 0x116   :  { %v875_v11 = vmax.f32 %v871_v3, %v819_v7  ;;  %v877_v12 = vmax.f32 %v873_v5, %v860_v8 }
 0x117   :  { %v821_v13 = vpop.f32.mrf.mxu0  ;;  %v862_v14 = vpop.f32.mrf.mxu1 }
 0x118   :  { %v885_v15 = vadd.f32 %v883_v6, %v875_v11  ;;  %v887_v16 = vadd.f32 %v883_v6, %v877_v12  ;;  %v876_v17 = vmax.f32 %v872_v9, %v821_v13  ;;  %v878_v18 = vmax.f32 %v874_v10, %v862_v14 }
 0x119   :  { %v823_v19 = vpop.f32.mrf.mxu0  ;;  %v864_v20 = vpop.f32.mrf.mxu1 }
 0x11a   :  { %v886_v21 = vadd.f32 %v883_v6, %v876_v17  ;;  %v888_v22 = vadd.f32 %v883_v6, %v878_v18  ;;  %v889_v25 = vmax.f32 %v885_v15, 0.0  ;;  %v891_v4 = vmax.f32 %v887_v16, 0.0 }
 0x11b   :  { %v824_v23 = vpop.f32.mrf.mxu0  ;;  %v865_v24 = vpop.f32.mrf.mxu1 }
 0x11c   :  { %v890_v26 = vmax.f32 %v886_v21, 0.0  ;;  %v892_v27 = vmax.f32 %v888_v22, 0.0 }
 0x11e   :  { %v1068_v28 = vpack.c.bf16 %v890_v26, %v889_v25  ;;  %v1069_v29 = vpack.c.bf16 %v892_v27, %v891_v4 }
 0x120   :  { %909 = vst [vmem:[%s1515_s3] sm:$0x77] %v1068_v28  ;;  %913 = vst.msk [vmem:[%s1515_s3 + $0x8] sm:$0x77] %vm912_vm5, %v1069_v29 }

// kernel: net_forward.3
= control target key start
LH: loop header
LB: loop body
LE: loop exit
PB: predicated region body
PF: predicated region fallthrough
CT: control target
= control target key end

     0   :  { %v22501_v0 = vmov 0   ;;  %vm6822_vm0 = vcmask 1043456   ;;  %vm6521_vm1 = vcmask 195584   ;;  %vm11832_vm2 = vcmask 130048   ;;  %s22491_s0 = inlined_call_operand.vmem [shape: bf16[1176,2], index: 0, kind: input, shape index: {}]   ;;  %s22492_s1 = inlined_call_operand.vmem [shape: bf16[1600,1176], index: 1, kind: input, shape index: {}]   ;;  %s22493_s2 = inlined_call_operand.vmem [shape: f32[400,1], index: 2, kind: input, shape index: {}]   ;;  %s22494_s4 = inlined_call_operand.vmem [shape: f32[120,1], index: 4, kind: input, shape index: {}]   ;;  %s22495_s6 = inlined_call_operand.vmem [shape: f32[84,1], index: 6, kind: input, shape index: {}]   ;;  %s22496_s8 = inlined_call_operand.vmem [shape: f32[10,1], index: 8, kind: input, shape index: {}]   ;;  %s22497_s3 = inlined_call_operand.vmem [shape: bf16[120,400], index: 3, kind: input, shape index: {}]   ;;  %s22498_s5 = inlined_call_operand.vmem [shape: bf16[84,120], index: 5, kind: input, shape index: {}]   ;;  %s22499_s7 = inlined_call_operand.vmem [shape: bf16[10,84], index: 7, kind: input, shape index: {}]   ;;  %s22500_s9 = inlined_call_operand.vmem [shape: f32[10,2], index: 9, kind: output, shape index: {}]  }
   0x1   :  { %6826 = vmatprep.subr.bf16.mxu0 %v22501_v0  ;;  %13729 = vmatprep.subr.bf16.mxu1 %v22501_v0  ;;  %v13767_v1 = vld [vmem:[%s22491_s0 + $0x38] sm:$0xff]   ;;  %v13768_v2 = vld [vmem:[%s22491_s0 + $0x30] sm:$0xff]   ;;  %v13769_v3 = vld [vmem:[%s22491_s0 + $0x28] sm:$0xff]   ;;  %vm12177_vm3 = vcmask 982016   ;;  %vm15396_vm4 = vmmov 0   ;;  %vm12319_vm5 = vcmask 1041408  }
   0x2   :  { %13765 = vset.pattern.permute.xlu0 %v22501_v0  ;;  %13766 = vset.pattern.permute.xlu1 %v22501_v0  ;;  %v13770_v4 = vld [vmem:[%s22491_s0 + $0x20] sm:$0xff]   ;;  %v13771_v5 = vld [vmem:[%s22491_s0 + $0x18] sm:$0xff]   ;;  %v13772_v7 = vld [vmem:[%s22491_s0 + $0x10] sm:$0xff]   ;;  %vm12315_vm6 = vcmask 687104   ;;  %vm12364_vm7 = vcmask 15360   ;;  %vm12366_vm8 = vcmask 9216  }
   0x3   :  { %6827 = vmatpush1.bf16.msra.mxu0 %v13767_v1  ;;  %13745 = vmatpush1.bf16.msra.mxu1 %v13767_v1  ;;  %v13785_v6 = vld [vmem:[%s22492_s1 + $0x4] ss:$40 sps:$4 sm:$0xff]   ;;  %v13775_v11 = vld [vmem:[%s22491_s0 + $0x78] sm:$0xff]   ;;  %v13776_v12 = vld [vmem:[%s22491_s0 + $0x70] sm:$0xff]  }
   0x4   :  { %6828 = vmatprep.subr.bf16.mxu0 %v22501_v0  ;;  %13730 = vmatprep.subr.bf16.mxu1 %v22501_v0  ;;  %v13788_v8 = vld [vmem:[%s22492_s1 + $0x12c4] ss:$40 sps:$4 sm:$0xff]   ;;  %v13779_v15 = vld [vmem:[%s22491_s0 + $0x58] sm:$0xff]   ;;  %v13780_v16 = vld [vmem:[%s22491_s0 + $0x50] sm:$0xff]  }
   0x5   :  { %6858 = vmatprep.mubr.bf16.mxu0 %v13785_v6  ;;  %7338 = vmatprep.mubr.bf16.mxu1 %v13788_v8  ;;  %v13773_v9 = vld [vmem:[%s22491_s0 + $0x8] sm:$0xff]   ;;  %v13774_v10 = vld [vmem:[%s22491_s0] sm:$0xff]   ;;  %v13789_v21 = vld [vmem:[%s22492_s1 + $0x54] ss:$40 sps:$4 sm:$0xff]  }
   0x6   :  { %v13777_v13 = vld [vmem:[%s22491_s0 + $0x68] sm:$0xff]   ;;  %v13778_v14 = vld [vmem:[%s22491_s0 + $0x60] sm:$0xff]   ;;  %v13791_v22 = vld [vmem:[%s22492_s1 + $0x1314] ss:$40 sps:$4 sm:$0xff]  }
   0x7   :  { %6829 = vmatpush1.bf16.msra.mxu0 %v13768_v2  ;;  %13746 = vmatpush1.bf16.msra.mxu1 %v13768_v2  ;;  %v13781_v17 = vld [vmem:[%s22491_s0 + $0x48] sm:$0xff]   ;;  %v13782_v18 = vld [vmem:[%s22491_s0 + $0x40] sm:$0xff]   ;;  %v13793_v23 = vld [vmem:[%s22492_s1 + $0x50] ss:$40 sps:$4 sm:$0xff]  }
   0x8   :  { %6830 = vmatprep.subr.bf16.mxu0 %v22501_v0  ;;  %13731 = vmatprep.subr.bf16.mxu1 %v22501_v0  ;;  %v13783_v19 = vld [vmem:[%s22492_s1] ss:$40 sps:$4 sm:$0xff]   ;;  %v13794_v24 = vld [vmem:[%s22492_s1 + $0x1310] ss:$40 sps:$4 sm:$0xff]   ;;  %v13795_v25 = vld [vmem:[%s22492_s1 + $0xa4] ss:$40 sps:$4 sm:$0xff]  }
   0x9   :  { %v13786_v20 = vld [vmem:[%s22492_s1 + $0x12c0] ss:$40 sps:$4 sm:$0xff]   ;;  %v13797_v26 = vld [vmem:[%s22492_s1 + $0x1364] ss:$40 sps:$4 sm:$0xff]   ;;  %v13801_v29 = vld [vmem:[%s22492_s1 + $0xf4] ss:$40 sps:$4 sm:$0xff]  }
   0xa   :  { %v13799_v27 = vld [vmem:[%s22492_s1 + $0xa0] ss:$40 sps:$4 sm:$0xff]   ;;  %v13803_v30 = vld [vmem:[%s22492_s1 + $0x13b4] ss:$40 sps:$4 sm:$0xff]   ;;  %v13805_v31 = vld [vmem:[%s22492_s1 + $0xf0] ss:$40 sps:$4 sm:$0xff]  }
   0xb   :  { %6831 = vmatpush1.bf16.msra.mxu0 %v13769_v3  ;;  %13747 = vmatpush1.bf16.msra.mxu1 %v13769_v3  ;;  %v13800_v28 = vld [vmem:[%s22492_s1 + $0x1360] ss:$40 sps:$4 sm:$0xff]   ;;  %v13806_v32 = vld [vmem:[%s22492_s1 + $0x13b0] ss:$40 sps:$4 sm:$0xff]   ;;  %v13807_v33 = vld [vmem:[%s22492_s1 + $0x144] ss:$40 sps:$4 sm:$0xff]  }
   0xc   :  { %6832 = vmatprep.subr.bf16.mxu0 %v22501_v0  ;;  %13732 = vmatprep.subr.bf16.mxu1 %v22501_v0  ;;  %v13809_v34 = vld [vmem:[%s22492_s1 + $0x1404] ss:$40 sps:$4 sm:$0xff]   ;;  %v13811_v35 = vld [vmem:[%s22492_s1 + $0x140] ss:$40 sps:$4 sm:$0xff]   ;;  %v13813_v37 = vld [vmem:[%s22492_s1 + $0x194] ss:$40 sps:$4 sm:$0xff]  }
   0xd   :  { %v13812_v36 = vld [vmem:[%s22492_s1 + $0x1400] ss:$40 sps:$4 sm:$0xff]   ;;  %v13815_v38 = vld [vmem:[%s22492_s1 + $0x1454] ss:$40 sps:$4 sm:$0xff]   ;;  %v13817_v39 = vld [vmem:[%s22492_s1 + $0x190] ss:$40 sps:$4 sm:$0xff]  }
   0xe   :  { %v13818_v40 = vld [vmem:[%s22492_s1 + $0x1450] ss:$40 sps:$4 sm:$0xff]   ;;  %v13819_v41 = vld [vmem:[%s22492_s1 + $0x1e4] ss:$40 sps:$4 sm:$0xff]   ;;  %v13823_v43 = vld [vmem:[%s22492_s1 + $0x1e0] ss:$40 sps:$4 sm:$0xff]  }
   0xf   :  { %6833 = vmatpush1.bf16.msra.mxu0 %v13770_v4  ;;  %13748 = vmatpush1.bf16.msra.mxu1 %v13770_v4  ;;  %v13821_v42 = vld [vmem:[%s22492_s1 + $0x14a4] ss:$40 sps:$4 sm:$0xff]   ;;  %v13824_v44 = vld [vmem:[%s22492_s1 + $0x14a0] ss:$40 sps:$4 sm:$0xff]   ;;  %v13825_v45 = vld [vmem:[%s22492_s1 + $0x234] ss:$40 sps:$4 sm:$0xff]  }
  0x10   :  { %6834 = vmatprep.subr.bf16.mxu0 %v22501_v0  ;;  %13733 = vmatprep.subr.bf16.mxu1 %v22501_v0  ;;  %v13827_v46 = vld [vmem:[%s22492_s1 + $0x14f4] ss:$40 sps:$4 sm:$0xff]   ;;  %v13829_v47 = vld [vmem:[%s22492_s1 + $0x230] ss:$40 sps:$4 sm:$0xff]   ;;  %v13831_v49 = vld [vmem:[%s22492_s1 + $0x284] ss:$40 sps:$4 sm:$0xff]  }
  0x11   :  { %v13830_v48 = vld [vmem:[%s22492_s1 + $0x14f0] ss:$40 sps:$4 sm:$0xff]   ;;  %v13833_v50 = vld [vmem:[%s22492_s1 + $0x1544] ss:$40 sps:$4 sm:$0xff]   ;;  %v13835_v51 = vld [vmem:[%s22492_s1 + $0x280] ss:$40 sps:$4 sm:$0xff]  }
  0x12   :  { %v13836_v52 = vld [vmem:[%s22492_s1 + $0x1540] ss:$40 sps:$4 sm:$0xff]   ;;  %v13837_v53 = vld [vmem:[%s22492_s1 + $0x2d4] ss:$40 sps:$4 sm:$0xff]   ;;  %v13841_v55 = vld [vmem:[%s22492_s1 + $0x2d0] ss:$40 sps:$4 sm:$0xff]  }
  0x13   :  { %6835 = vmatpush1.bf16.msra.mxu0 %v13771_v5  ;;  %13749 = vmatpush1.bf16.msra.mxu1 %v13771_v5  ;;  %v13839_v54 = vld [vmem:[%s22492_s1 + $0x1594] ss:$40 sps:$4 sm:$0xff]   ;;  %v13842_v56 = vld [vmem:[%s22492_s1 + $0x1590] ss:$40 sps:$4 sm:$0xff]   ;;  %v13843_v57 = vld [vmem:[%s22492_s1 + $0x324] ss:$40 sps:$4 sm:$0xff]  }
  0x14   :  { %6836 = vmatprep.subr.bf16.mxu0 %v22501_v0  ;;  %13734 = vmatprep.subr.bf16.mxu1 %v22501_v0  ;;  %v13845_v58 = vld [vmem:[%s22492_s1 + $0x15e4] ss:$40 sps:$4 sm:$0xff]   ;;  %v13847_v59 = vld [vmem:[%s22492_s1 + $0x320] ss:$40 sps:$4 sm:$0xff]   ;;  %v13849_v61 = vld [vmem:[%s22492_s1 + $0x374] ss:$40 sps:$4 sm:$0xff]  }
  0x15   :  { %v13848_v60 = vld [vmem:[%s22492_s1 + $0x15e0] ss:$40 sps:$4 sm:$0xff]   ;;  %v13851_v62 = vld [vmem:[%s22492_s1 + $0x1634] ss:$40 sps:$4 sm:$0xff]   ;;  %v13853_v63 = vld [vmem:[%s22492_s1 + $0x370] ss:$40 sps:$4 sm:$0xff]  }
  0x16   :  { %v13854_v1 = vld [vmem:[%s22492_s1 + $0x1630] ss:$40 sps:$4 sm:$0xff]   ;;  %v13855_v2 = vld [vmem:[%s22492_s1 + $0x3c4] ss:$40 sps:$4 sm:$0xff]   ;;  %v13859_v4 = vld [vmem:[%s22492_s1 + $0x3c0] ss:$40 sps:$4 sm:$0xff]  }
  0x17   :  { %6837 = vmatpush1.bf16.msra.mxu0 %v13772_v7  ;;  %13750 = vmatpush1.bf16.msra.mxu1 %v13772_v7  ;;  %v13857_v3 = vld [vmem:[%s22492_s1 + $0x1684] ss:$40 sps:$4 sm:$0xff]   ;;  %v13860_v5 = vld [vmem:[%s22492_s1 + $0x1680] ss:$40 sps:$4 sm:$0xff]   ;;  %v13861_v6 = vld [vmem:[%s22492_s1 + $0x414] ss:$40 sps:$4 sm:$0xff]  }
  0x18   :  { %6838 = vmatprep.subr.bf16.mxu0 %v22501_v0  ;;  %13735 = vmatprep.subr.bf16.mxu1 %v22501_v0  ;;  %v13863_v7 = vld [vmem:[%s22492_s1 + $0x16d4] ss:$40 sps:$4 sm:$0xff]   ;;  %v13865_v8 = vld [vmem:[%s22492_s1 + $0x410] ss:$40 sps:$4 sm:$0xff]  }
  0x1b   :  { %6839 = vmatpush1.bf16.msra.mxu0 %v13773_v9  ;;  %13751 = vmatpush1.bf16.msra.mxu1 %v13773_v9  ;;  %v13866_v9 = vld [vmem:[%s22492_s1 + $0x16d0] ss:$40 sps:$4 sm:$0xff]  }
  0x1c   :  { %6840 = vmatprep.subr.bf16.mxu0 %v22501_v0  ;;  %13736 = vmatprep.subr.bf16.mxu1 %v22501_v0 }
  0x1f   :  { %6841 = vmatpush1.bf16.msra.mxu0 %v13774_v10  ;;  %13752 = vmatpush1.bf16.msra.mxu1 %v13774_v10  ;;  %v13867_v10 = vld [vmem:[%s22492_s1 + $0x464] ss:$40 sps:$4 sm:$0xff]  }
  0x20   :  { %6842 = vmatprep.subr.bf16.mxu0 %v22501_v0  ;;  %13737 = vmatprep.subr.bf16.mxu1 %v22501_v0 }
  0x23   :  { %6843 = vmatpush2.bf16.msra.mxu0 %v13775_v11  ;;  %13753 = vmatpush2.bf16.msra.mxu1 %v13775_v11  ;;  %v13869_v11 = vld [vmem:[%s22492_s1 + $0x1724] ss:$40 sps:$4 sm:$0xff]  }
  0x24   :  { %6844 = vmatprep.subr.bf16.mxu0 %v22501_v0  ;;  %13738 = vmatprep.subr.bf16.mxu1 %v22501_v0 }
  0x27   :  { %6845 = vmatpush2.bf16.msra.mxu0 %v13776_v12  ;;  %13754 = vmatpush2.bf16.msra.mxu1 %v13776_v12  ;;  %v13871_v12 = vld [vmem:[%s22492_s1 + $0x460] ss:$40 sps:$4 sm:$0xff]  }
  0x28   :  { %6846 = vmatprep.subr.bf16.mxu0 %v22501_v0  ;;  %13739 = vmatprep.subr.bf16.mxu1 %v22501_v0 }
  0x2b   :  { %6847 = vmatpush2.bf16.msra.mxu0 %v13777_v13  ;;  %13755 = vmatpush2.bf16.msra.mxu1 %v13777_v13  ;;  %v13872_v13 = vld [vmem:[%s22492_s1 + $0x1720] ss:$40 sps:$4 sm:$0xff]  }
  0x2c   :  { %6848 = vmatprep.subr.bf16.mxu0 %v22501_v0  ;;  %13740 = vmatprep.subr.bf16.mxu1 %v22501_v0 }
  0x2f   :  { %6849 = vmatpush2.bf16.msra.mxu0 %v13778_v14  ;;  %13756 = vmatpush2.bf16.msra.mxu1 %v13778_v14  ;;  %v13873_v14 = vld [vmem:[%s22492_s1 + $0x4b4] ss:$40 sps:$4 sm:$0xff]  }
  0x30   :  { %6850 = vmatprep.subr.bf16.mxu0 %v22501_v0  ;;  %13741 = vmatprep.subr.bf16.mxu1 %v22501_v0 }
  0x33   :  { %6851 = vmatpush2.bf16.msra.mxu0 %v13779_v15  ;;  %13757 = vmatpush2.bf16.msra.mxu1 %v13779_v15  ;;  %v13875_v15 = vld [vmem:[%s22492_s1 + $0x1774] ss:$40 sps:$4 sm:$0xff]  }
  0x34   :  { %6852 = vmatprep.subr.bf16.mxu0 %v22501_v0  ;;  %13742 = vmatprep.subr.bf16.mxu1 %v22501_v0 }
  0x37   :  { %6853 = vmatpush2.bf16.msra.mxu0 %v13780_v16  ;;  %13758 = vmatpush2.bf16.msra.mxu1 %v13780_v16  ;;  %v13877_v16 = vld [vmem:[%s22492_s1 + $0x4b0] ss:$40 sps:$4 sm:$0xff]  }
  0x38   :  { %6854 = vmatprep.subr.bf16.mxu0 %v22501_v0  ;;  %13743 = vmatprep.subr.bf16.mxu1 %v22501_v0 }
  0x3b   :  { %6855 = vmatpush2.bf16.msra.mxu0 %v13781_v17  ;;  %13759 = vmatpush2.bf16.msra.mxu1 %v13781_v17  ;;  %v13878_v17 = vld [vmem:[%s22492_s1 + $0x1770] ss:$40 sps:$4 sm:$0xff]  }
  0x3c   :  { %6856 = vmatprep.subr.bf16.mxu0 %v22501_v0  ;;  %13744 = vmatprep.subr.bf16.mxu1 %v22501_v0 }
  0x3f   :  { %6857 = vmatpush2.bf16.msra.mxu0 %v13782_v18  ;;  %13760 = vmatpush2.bf16.msra.mxu1 %v13782_v18  ;;  %v13879_v18 = vld [vmem:[%s22492_s1 + $0x504] ss:$40 sps:$4 sm:$0xff]  }
  0x40   :  { %7659 = vmatprep.subr.bf16.mxu1 %v22501_v0  ;;  %8492 = vmatprep.subr.bf16.mxu0 %v22501_v0 }
  0x42   :  { %6859 = vmatmul.mubr.bf16.vlgmr.msra.gmra.mxu0 %v13783_v19  ;;  %7339 = vmatmul.mubr.bf16.vlgmr.msra.gmra.mxu1 %v13786_v20  ;;  %v13881_v19 = vld [vmem:[%s22492_s1 + $0x17c4] ss:$40 sps:$4 sm:$0xff]   ;;  %v13883_v20 = vld [vmem:[%s22492_s1 + $0x500] ss:$40 sps:$4 sm:$0xff]  }
  0x43   :  { %6866 = vmatprep.mubr.bf16.mxu0 %v13789_v21  ;;  %7346 = vmatprep.mubr.bf16.mxu1 %v13791_v22  ;;  %v13884_v21 = vld [vmem:[%s22492_s1 + $0x17c0] ss:$40 sps:$4 sm:$0xff]   ;;  %v13885_v22 = vld [vmem:[%s22492_s1 + $0x554] ss:$40 sps:$4 sm:$0xff]  }
  0x4a   :  { %6867 = vmatmul.mubr.bf16.gmra.mxu0 %v13793_v23  ;;  %7347 = vmatmul.mubr.bf16.gmra.mxu1 %v13794_v24  ;;  %v13887_v23 = vld [vmem:[%s22492_s1 + $0x1814] ss:$40 sps:$4 sm:$0xff]  }
  0x4b   :  { %6874 = vmatprep.mubr.bf16.mxu0 %v13795_v25  ;;  %7354 = vmatprep.mubr.bf16.mxu1 %v13797_v26  ;;  %v13981_v24 = vld [vmem:[%s22491_s0 + $0xb8] sm:$0xff]  }
  0x4c   :  { %v13889_v25 = vld [vmem:[%s22492_s1 + $0x550] ss:$40 sps:$4 sm:$0xff]   ;;  %7660 = vmatpush1.bf16.msra.mxu1 %v13981_v24 }
  0x4d   :  { %v13890_v26 = vld [vmem:[%s22492_s1 + $0x1810] ss:$40 sps:$4 sm:$0xff]   ;;  %7661 = vmatprep.subr.bf16.mxu1 %v22501_v0 }
  0x52   :  { %6875 = vmatmul.mubr.bf16.gmra.mxu0 %v13799_v27  ;;  %7355 = vmatmul.mubr.bf16.gmra.mxu1 %v13800_v28  ;;  %v13982_v27 = vld [vmem:[%s22491_s0 + $0xb0] sm:$0xff]   ;;  %v13891_v28 = vld [vmem:[%s22492_s1 + $0x5a4] ss:$40 sps:$4 sm:$0xff]  }
  0x53   :  { %6882 = vmatprep.mubr.bf16.mxu0 %v13801_v29  ;;  %7362 = vmatprep.mubr.bf16.mxu1 %v13803_v30  ;;  %v13893_v29 = vld [vmem:[%s22492_s1 + $0x1864] ss:$40 sps:$4 sm:$0xff]  }
  0x54   :  { %7662 = vmatpush1.bf16.msra.mxu1 %v13982_v27  ;;  %v13989_v30 = vld [vmem:[%s22491_s0 + $0xa8] sm:$0xff]  }
  0x55   :  { %7663 = vmatprep.subr.bf16.mxu1 %v22501_v0 }
  0x58   :  { %7664 = vmatpush1.bf16.msra.mxu1 %v13989_v30  ;;  %v13947_v30 = vld [vmem:[%s22492_s1 + $0x1b34] ss:$40 sps:$4 sm:$0xff]  }
  0x59   :  { %7665 = vmatprep.subr.bf16.mxu1 %v22501_v0 }
  0x5a   :  { %6883 = vmatmul.mubr.bf16.gmra.mxu0 %v13805_v31  ;;  %7363 = vmatmul.mubr.bf16.gmra.mxu1 %v13806_v32  ;;  %v13895_v31 = vld [vmem:[%s22492_s1 + $0x5a0] ss:$40 sps:$4 sm:$0xff]  }
  0x5b   :  { %6890 = vmatprep.mubr.bf16.mxu0 %v13807_v33  ;;  %7370 = vmatprep.mubr.bf16.mxu1 %v13809_v34  ;;  %v13896_v32 = vld [vmem:[%s22492_s1 + $0x1860] ss:$40 sps:$4 sm:$0xff]   ;;  %v13897_v34 = vld [vmem:[%s22492_s1 + $0x5f4] ss:$40 sps:$4 sm:$0xff]  }
  0x5c   :  { %v13990_v33 = vld [vmem:[%s22491_s0 + $0xa0] sm:$0xff]  }
  0x5d   :  { %7666 = vmatpush1.bf16.msra.mxu1 %v13990_v33 }
  0x5e   :  { %7667 = vmatprep.subr.bf16.mxu1 %v22501_v0 }
  0x62   :  { %6891 = vmatmul.mubr.bf16.gmra.mxu0 %v13811_v35  ;;  %7371 = vmatmul.mubr.bf16.gmra.mxu1 %v13812_v36  ;;  %v13899_v35 = vld [vmem:[%s22492_s1 + $0x18b4] ss:$40 sps:$4 sm:$0xff]  }
  0x63   :  { %6898 = vmatprep.mubr.bf16.mxu0 %v13813_v37  ;;  %7378 = vmatprep.mubr.bf16.mxu1 %v13815_v38  ;;  %v13997_v36 = vld [vmem:[%s22491_s0 + $0x98] sm:$0xff]  }
  0x64   :  { %v13901_v37 = vld [vmem:[%s22492_s1 + $0x5f0] ss:$40 sps:$4 sm:$0xff]   ;;  %7668 = vmatpush1.bf16.msra.mxu1 %v13997_v36 }
  0x65   :  { %v13902_v38 = vld [vmem:[%s22492_s1 + $0x18b0] ss:$40 sps:$4 sm:$0xff]   ;;  %7669 = vmatprep.subr.bf16.mxu1 %v22501_v0 }
  0x6a   :  { %6899 = vmatmul.mubr.bf16.gmra.mxu0 %v13817_v39  ;;  %7379 = vmatmul.mubr.bf16.gmra.mxu1 %v13818_v40  ;;  %v13998_v39 = vld [vmem:[%s22491_s0 + $0x90] sm:$0xff]   ;;  %v13903_v40 = vld [vmem:[%s22492_s1 + $0x644] ss:$40 sps:$4 sm:$0xff]  }
  0x6b   :  { %6906 = vmatprep.mubr.bf16.mxu0 %v13819_v41  ;;  %7386 = vmatprep.mubr.bf16.mxu1 %v13821_v42  ;;  %v13905_v41 = vld [vmem:[%s22492_s1 + $0x1904] ss:$40 sps:$4 sm:$0xff]  }
  0x6c   :  { %7670 = vmatpush1.bf16.msra.mxu1 %v13998_v39  ;;  %v14005_v42 = vld [vmem:[%s22491_s0 + $0x88] sm:$0xff]  }
  0x6d   :  { %7671 = vmatprep.subr.bf16.mxu1 %v22501_v0 }
  0x70   :  { %7672 = vmatpush1.bf16.msra.mxu1 %v14005_v42  ;;  %v13956_v42 = vld [vmem:[%s22492_s1 + $0x1b84] ss:$40 sps:$4 sm:$0xff]  }
  0x71   :  { %7673 = vmatprep.subr.bf16.mxu1 %v22501_v0 }
  0x72   :  { %6907 = vmatmul.mubr.bf16.gmra.mxu0 %v13823_v43  ;;  %7387 = vmatmul.mubr.bf16.gmra.mxu1 %v13824_v44  ;;  %v13907_v43 = vld [vmem:[%s22492_s1 + $0x640] ss:$40 sps:$4 sm:$0xff]  }
  0x73   :  { %6914 = vmatprep.mubr.bf16.mxu0 %v13825_v45  ;;  %7394 = vmatprep.mubr.bf16.mxu1 %v13827_v46  ;;  %v13908_v44 = vld [vmem:[%s22492_s1 + $0x1900] ss:$40 sps:$4 sm:$0xff]   ;;  %v13909_v46 = vld [vmem:[%s22492_s1 + $0x694] ss:$40 sps:$4 sm:$0xff]  }
  0x74   :  { %v14006_v45 = vld [vmem:[%s22491_s0 + $0x80] sm:$0xff]  }
  0x75   :  { %7674 = vmatpush1.bf16.msra.mxu1 %v14006_v45 }
  0x76   :  { %7675 = vmatprep.subr.bf16.mxu1 %v22501_v0 }
  0x7a   :  { %6915 = vmatmul.mubr.bf16.gmra.mxu0 %v13829_v47  ;;  %7395 = vmatmul.mubr.bf16.gmra.mxu1 %v13830_v48  ;;  %v13911_v47 = vld [vmem:[%s22492_s1 + $0x1954] ss:$40 sps:$4 sm:$0xff]  }
  0x7b   :  { %6922 = vmatprep.mubr.bf16.mxu0 %v13831_v49  ;;  %7402 = vmatprep.mubr.bf16.mxu1 %v13833_v50  ;;  %v14013_v48 = vld [vmem:[%s22491_s0 + $0xf8] sm:$0xff]  }
  0x7c   :  { %v13913_v49 = vld [vmem:[%s22492_s1 + $0x690] ss:$40 sps:$4 sm:$0xff]   ;;  %7676 = vmatpush2.bf16.msra.mxu1 %v14013_v48 }
  0x7d   :  { %v13914_v50 = vld [vmem:[%s22492_s1 + $0x1950] ss:$40 sps:$4 sm:$0xff]   ;;  %7677 = vmatprep.subr.bf16.mxu1 %v22501_v0 }
  0x82   :  { %6923 = vmatmul.mubr.bf16.gmra.mxu0 %v13835_v51  ;;  %7403 = vmatmul.mubr.bf16.gmra.mxu1 %v13836_v52  ;;  %v14014_v51 = vld [vmem:[%s22491_s0 + $0xf0] sm:$0xff]   ;;  %v13915_v52 = vld [vmem:[%s22492_s1 + $0x6e4] ss:$40 sps:$4 sm:$0xff]  }
  0x83   :  { %6930 = vmatprep.mubr.bf16.mxu0 %v13837_v53  ;;  %7410 = vmatprep.mubr.bf16.mxu1 %v13839_v54  ;;  %v13917_v53 = vld [vmem:[%s22492_s1 + $0x19a4] ss:$40 sps:$4 sm:$0xff]  }
  0x84   :  { %7678 = vmatpush2.bf16.msra.mxu1 %v14014_v51  ;;  %v14021_v54 = vld [vmem:[%s22491_s0 + $0xe8] sm:$0xff]  }
  0x85   :  { %7679 = vmatprep.subr.bf16.mxu1 %v22501_v0 }
  0x88   :  { %7680 = vmatpush2.bf16.msra.mxu1 %v14021_v54  ;;  %v13962_v54 = vld [vmem:[%s22492_s1 + $0x1bd4] ss:$40 sps:$4 sm:$0xff]  }
  0x89   :  { %7681 = vmatprep.subr.bf16.mxu1 %v22501_v0 }
  0x8a   :  { %6931 = vmatmul.mubr.bf16.gmra.mxu0 %v13841_v55  ;;  %7411 = vmatmul.mubr.bf16.gmra.mxu1 %v13842_v56  ;;  %v13919_v55 = vld [vmem:[%s22492_s1 + $0x6e0] ss:$40 sps:$4 sm:$0xff]  }
  0x8b   :  { %6938 = vmatprep.mubr.bf16.mxu0 %v13843_v57  ;;  %7418 = vmatprep.mubr.bf16.mxu1 %v13845_v58  ;;  %v13920_v56 = vld [vmem:[%s22492_s1 + $0x19a0] ss:$40 sps:$4 sm:$0xff]   ;;  %v13921_v58 = vld [vmem:[%s22492_s1 + $0x734] ss:$40 sps:$4 sm:$0xff]  }
  0x8c   :  { %v14022_v57 = vld [vmem:[%s22491_s0 + $0xe0] sm:$0xff]  }
  0x8d   :  { %7682 = vmatpush2.bf16.msra.mxu1 %v14022_v57 }
  0x8e   :  { %7683 = vmatprep.subr.bf16.mxu1 %v22501_v0 }
  0x92   :  { %6939 = vmatmul.mubr.bf16.gmra.mxu0 %v13847_v59  ;;  %7419 = vmatmul.mubr.bf16.gmra.mxu1 %v13848_v60  ;;  %v13923_v59 = vld [vmem:[%s22492_s1 + $0x19f4] ss:$40 sps:$4 sm:$0xff]  }
  0x93   :  { %6946 = vmatprep.mubr.bf16.mxu0 %v13849_v61  ;;  %7426 = vmatprep.mubr.bf16.mxu1 %v13851_v62  ;;  %v14029_v60 = vld [vmem:[%s22491_s0 + $0xd8] sm:$0xff]  }
  0x94   :  { %v13925_v61 = vld [vmem:[%s22492_s1 + $0x730] ss:$40 sps:$4 sm:$0xff]   ;;  %7684 = vmatpush2.bf16.msra.mxu1 %v14029_v60 }
  0x95   :  { %v13926_v62 = vld [vmem:[%s22492_s1 + $0x19f0] ss:$40 sps:$4 sm:$0xff]   ;;  %7685 = vmatprep.subr.bf16.mxu1 %v22501_v0 }
  0x9a   :  { %6947 = vmatmul.mubr.bf16.gmra.mxu0 %v13853_v63  ;;  %7427 = vmatmul.mubr.bf16.gmra.mxu1 %v13854_v1  ;;  %v14030_v63 = vld [vmem:[%s22491_s0 + $0xd0] sm:$0xff]   ;;  %v13927_v1 = vld [vmem:[%s22492_s1 + $0x784] ss:$40 sps:$4 sm:$0xff]  }
  0x9b   :  { %6954 = vmatprep.mubr.bf16.mxu0 %v13855_v2  ;;  %7434 = vmatprep.mubr.bf16.mxu1 %v13857_v3  ;;  %v13929_v2 = vld [vmem:[%s22492_s1 + $0x1a44] ss:$40 sps:$4 sm:$0xff]  }
  0x9c   :  { %7686 = vmatpush2.bf16.msra.mxu1 %v14030_v63  ;;  %v14037_v3 = vld [vmem:[%s22491_s0 + $0xc8] sm:$0xff]  }
  0x9d   :  { %7687 = vmatprep.subr.bf16.mxu1 %v22501_v0 }
  0xa0   :  { %7688 = vmatpush2.bf16.msra.mxu1 %v14037_v3  ;;  %v13968_v3 = vld [vmem:[%s22492_s1 + $0x1c24] ss:$40 sps:$4 sm:$0xff]  }
  0xa1   :  { %7689 = vmatprep.subr.bf16.mxu1 %v22501_v0 }
  0xa2   :  { %6955 = vmatmul.mubr.bf16.gmra.mxu0 %v13859_v4  ;;  %7435 = vmatmul.mubr.bf16.gmra.mxu1 %v13860_v5  ;;  %v13931_v4 = vld [vmem:[%s22492_s1 + $0x780] ss:$40 sps:$4 sm:$0xff]  }
  0xa3   :  { %6962 = vmatprep.mubr.bf16.mxu0 %v13861_v6  ;;  %7442 = vmatprep.mubr.bf16.mxu1 %v13863_v7  ;;  %v13932_v5 = vld [vmem:[%s22492_s1 + $0x1a40] ss:$40 sps:$4 sm:$0xff]   ;;  %v13933_v7 = vld [vmem:[%s22492_s1 + $0x7d4] ss:$40 sps:$4 sm:$0xff]  }
  0xa4   :  { %v14038_v6 = vld [vmem:[%s22491_s0 + $0xc0] sm:$0xff]  }
  0xa5   :  { %7690 = vmatpush2.bf16.msra.mxu1 %v14038_v6 }
  0xa6   :  { %9325 = vmatprep.subr.bf16.mxu1 %v22501_v0 }
  0xaa   :  { %6963 = vmatmul.mubr.bf16.gmra.mxu0 %v13865_v8  ;;  %7443 = vmatmul.mubr.bf16.gmra.mxu1 %v13866_v9  ;;  %v13935_v8 = vld [vmem:[%s22492_s1 + $0x1a94] ss:$40 sps:$4 sm:$0xff]  }
  0xab   :  { %6970 = vmatprep.mubr.bf16.mxu0 %v13867_v10  ;;  %7450 = vmatprep.mubr.bf16.mxu1 %v13869_v11 }
  0xb2   :  { %6971 = vmatmul.mubr.bf16.gmra.mxu0 %v13871_v12  ;;  %7451 = vmatmul.mubr.bf16.gmra.mxu1 %v13872_v13  ;;  %v13937_v13 = vld [vmem:[%s22492_s1 + $0x7d0] ss:$40 sps:$4 sm:$0xff]  }
  0xb3   :  { %6978 = vmatprep.mubr.bf16.mxu0 %v13873_v14  ;;  %7458 = vmatprep.mubr.bf16.mxu1 %v13875_v15  ;;  %v13938_v14 = vld [vmem:[%s22492_s1 + $0x1a90] ss:$40 sps:$4 sm:$0xff]  }
  0xba   :  { %6979 = vmatmul.mubr.bf16.gmra.mxu0 %v13877_v16  ;;  %7459 = vmatmul.mubr.bf16.gmra.mxu1 %v13878_v17  ;;  %v13939_v17 = vld [vmem:[%s22492_s1 + $0x824] ss:$40 sps:$4 sm:$0xff]  }
  0xbb   :  { %6986 = vmatprep.mubr.bf16.mxu0 %v13879_v18  ;;  %7466 = vmatprep.mubr.bf16.mxu1 %v13881_v19  ;;  %v13941_v18 = vld [vmem:[%s22492_s1 + $0x1ae4] ss:$40 sps:$4 sm:$0xff]  }
  0xc2   :  { %6987 = vmatmul.mubr.bf16.gmra.mxu0 %v13883_v20  ;;  %7467 = vmatmul.mubr.bf16.gmra.mxu1 %v13884_v21 }
  0xc3   :  { %6994 = vmatprep.mubr.bf16.mxu0 %v13885_v22  ;;  %7474 = vmatprep.mubr.bf16.mxu1 %v13887_v23 }
  0xca   :  { %6995 = vmatmul.mubr.bf16.gmra.mxu0 %v13889_v25  ;;  %7475 = vmatmul.mubr.bf16.gmra.mxu1 %v13890_v26  ;;  %v13943_v25 = vld [vmem:[%s22492_s1 + $0x820] ss:$40 sps:$4 sm:$0xff]  }
  0xcb   :  { %7002 = vmatprep.mubr.bf16.mxu0 %v13891_v28  ;;  %7482 = vmatprep.mubr.bf16.mxu1 %v13893_v29  ;;  %v13944_v26 = vld [vmem:[%s22492_s1 + $0x1ae0] ss:$40 sps:$4 sm:$0xff]   ;;  %v13945_v29 = vld [vmem:[%s22492_s1 + $0x874] ss:$40 sps:$4 sm:$0xff]  }
  0xd2   :  { %7003 = vmatmul.mubr.bf16.gmra.mxu0 %v13895_v31  ;;  %7483 = vmatmul.mubr.bf16.gmra.mxu1 %v13896_v32 }
  0xd3   :  { %7010 = vmatprep.mubr.bf16.mxu0 %v13897_v34  ;;  %7490 = vmatprep.mubr.bf16.mxu1 %v13899_v35 }
  0xda   :  { %7011 = vmatmul.mubr.bf16.gmra.mxu0 %v13901_v37  ;;  %7491 = vmatmul.mubr.bf16.gmra.mxu1 %v13902_v38  ;;  %v13949_v37 = vld [vmem:[%s22492_s1 + $0x870] ss:$40 sps:$4 sm:$0xff]  }
  0xdb   :  { %7018 = vmatprep.mubr.bf16.mxu0 %v13903_v40  ;;  %7498 = vmatprep.mubr.bf16.mxu1 %v13905_v41  ;;  %v13950_v38 = vld [vmem:[%s22492_s1 + $0x1b30] ss:$40 sps:$4 sm:$0xff]   ;;  %v13953_v41 = vld [vmem:[%s22492_s1 + $0x8c4] ss:$40 sps:$4 sm:$0xff]  }
  0xe2   :  { %7019 = vmatmul.mubr.bf16.gmra.mxu0 %v13907_v43  ;;  %7499 = vmatmul.mubr.bf16.gmra.mxu1 %v13908_v44 }
  0xe3   :  { %7026 = vmatprep.mubr.bf16.mxu0 %v13909_v46  ;;  %7506 = vmatprep.mubr.bf16.mxu1 %v13911_v47 }
  0xea   :  { %7027 = vmatmul.mubr.bf16.gmra.mxu0 %v13913_v49  ;;  %7507 = vmatmul.mubr.bf16.gmra.mxu1 %v13914_v50  ;;  %v13951_v49 = vld [vmem:[%s22492_s1 + $0x8c0] ss:$40 sps:$4 sm:$0xff]  }
  0xeb   :  { %7034 = vmatprep.mubr.bf16.mxu0 %v13915_v52  ;;  %7514 = vmatprep.mubr.bf16.mxu1 %v13917_v53  ;;  %v13954_v50 = vld [vmem:[%s22492_s1 + $0x1b80] ss:$40 sps:$4 sm:$0xff]   ;;  %v13959_v53 = vld [vmem:[%s22492_s1 + $0x914] ss:$40 sps:$4 sm:$0xff]  }
  0xf2   :  { %7035 = vmatmul.mubr.bf16.gmra.mxu0 %v13919_v55  ;;  %7515 = vmatmul.mubr.bf16.gmra.mxu1 %v13920_v56 }
  0xf3   :  { %7042 = vmatprep.mubr.bf16.mxu0 %v13921_v58  ;;  %7522 = vmatprep.mubr.bf16.mxu1 %v13923_v59 }
  0xfa   :  { %7043 = vmatmul.mubr.bf16.gmra.mxu0 %v13925_v61  ;;  %7523 = vmatmul.mubr.bf16.gmra.mxu1 %v13926_v62  ;;  %v13957_v61 = vld [vmem:[%s22492_s1 + $0x910] ss:$40 sps:$4 sm:$0xff]  }
  0xfb   :  { %7050 = vmatprep.mubr.bf16.mxu0 %v13927_v1  ;;  %7530 = vmatprep.mubr.bf16.mxu1 %v13929_v2  ;;  %v13960_v62 = vld [vmem:[%s22492_s1 + $0x1bd0] ss:$40 sps:$4 sm:$0xff]   ;;  %v13965_v2 = vld [vmem:[%s22492_s1 + $0x964] ss:$40 sps:$4 sm:$0xff]  }
 0x102   :  { %v15901_v9 = vpop.f32.mrf.mxu0  ;;  %7051 = vmatmul.mubr.bf16.gmra.mxu0 %v13931_v4  ;;  %v15903_v10 = vpop.f32.mrf.mxu1  ;;  %7531 = vmatmul.mubr.bf16.gmra.mxu1 %v13932_v5 }
 0x103   :  { %22598 = vst [vmem:[#allocation2_spill] sm:$0xff] %v15903_v10  ;;  %7058 = vmatprep.mubr.bf16.mxu0 %v13933_v7  ;;  %7538 = vmatprep.mubr.bf16.mxu1 %v13935_v8  ;;  %v14108_v10 = vld [vmem:[%s22492_s1 + $0x378] ss:$40 sps:$4 sm:$0xff]  }
 0x104   :  { %v6862_v11 = vpop.f32.mrf.mxu0  ;;  %v7342_v12 = vpop.f32.mrf.mxu1 }
 0x105   :  { %v13963_v12 = vld [vmem:[%s22492_s1 + $0x960] ss:$40 sps:$4 sm:$0xff]  }
 0x106   :  { %v15911_v15 = vpop.f32.mrf.mxu0  ;;  %v15913_v16 = vpop.f32.mrf.mxu1 }
 0x107   :  { %22599 = vst [vmem:[#allocation3_spill] sm:$0xff] %v15913_v16  ;;  %v14105_v16 = vld [vmem:[%s22492_s1 + $0xff0] ss:$40 sps:$4 sm:$0xff]  }
 0x108   :  { %v6865_v19 = vpop.f32.mrf.mxu0  ;;  %v7345_v20 = vpop.f32.mrf.mxu1 }
 0x109   :  { %v13974_v19 = vld [vmem:[%s22492_s1 + $0x1c74] ss:$40 sps:$4 sm:$0xff]  }
 0x10a   :  { %v15921_v21 = vpop.f32.mrf.mxu0  ;;  %7059 = vmatmul.mubr.bf16.gmra.mxu0 %v13937_v13  ;;  %v15923_v22 = vpop.f32.mrf.mxu1  ;;  %7539 = vmatmul.mubr.bf16.gmra.mxu1 %v13938_v14  ;;  %v13966_v13 = vld [vmem:[%s22492_s1 + $0x1c20] ss:$40 sps:$4 sm:$0xff]  }
 0x10b   :  { %22600 = vst [vmem:[#allocation4_spill] sm:$0xff] %v15923_v22  ;;  %7066 = vmatprep.mubr.bf16.mxu0 %v13939_v17  ;;  %7546 = vmatprep.mubr.bf16.mxu1 %v13941_v18  ;;  %v13971_v18 = vld [vmem:[%s22492_s1 + $0x9b4] ss:$40 sps:$4 sm:$0xff]   ;;  %v14102_v22 = vld [vmem:[%s22492_s1 + $0x328] ss:$40 sps:$4 sm:$0xff]  }
 0x10c   :  { %v6870_v23 = vpop.f32.mrf.mxu0  ;;  %v7350_v24 = vpop.f32.mrf.mxu1 }
 0x10e   :  { %v15931_v27 = vpop.f32.mrf.mxu0  ;;  %v15933_v28 = vpop.f32.mrf.mxu1 }
 0x10f   :  { %22601 = vst [vmem:[#allocation5_spill] sm:$0xff] %v15933_v28  ;;  %v14099_v28 = vld [vmem:[%s22492_s1 + $0xfa0] ss:$40 sps:$4 sm:$0xff]  }
 0x110   :  { %v6873_v31 = vpop.f32.mrf.mxu0  ;;  %v7353_v32 = vpop.f32.mrf.mxu1 }
 0x111   :  { %v13972_v31 = vld [vmem:[%s22492_s1 + $0x1c70] ss:$40 sps:$4 sm:$0xff]  }
 0x112   :  { %v15941_v33 = vpop.f32.mrf.mxu0  ;;  %7067 = vmatmul.mubr.bf16.gmra.mxu0 %v13943_v25  ;;  %v15943_v34 = vpop.f32.mrf.mxu1  ;;  %7547 = vmatmul.mubr.bf16.gmra.mxu1 %v13944_v26 }
 0x113   :  { %22602 = vst [vmem:[#allocation6_spill] sm:$0xff] %v15943_v34  ;;  %7074 = vmatprep.mubr.bf16.mxu0 %v13945_v29  ;;  %7554 = vmatprep.mubr.bf16.mxu1 %v13947_v30  ;;  %v13969_v30 = vld [vmem:[%s22492_s1 + $0x9b0] ss:$40 sps:$4 sm:$0xff]  }
 0x114   :  { %v6878_v35 = vpop.f32.mrf.mxu0  ;;  %v7358_v36 = vpop.f32.mrf.mxu1  ;;  %v14096_v34 = vld [vmem:[%s22492_s1 + $0x2d8] ss:$40 sps:$4 sm:$0xff]  }
 0x115   :  { %v13977_v36 = vld [vmem:[%s22492_s1 + $0xa04] ss:$40 sps:$4 sm:$0xff]  }
 0x116   :  { %v15951_v39 = vpop.f32.mrf.mxu0  ;;  %v15953_v40 = vpop.f32.mrf.mxu1 }
 0x117   :  { %22603 = vst [vmem:[#allocation7_spill] sm:$0xff] %v15953_v40  ;;  %v14093_v40 = vld [vmem:[%s22492_s1 + $0xf50] ss:$40 sps:$4 sm:$0xff]  }
 0x118   :  { %v6881_v43 = vpop.f32.mrf.mxu0  ;;  %v7361_v44 = vpop.f32.mrf.mxu1 }
 0x11a   :  { %v15961_v45 = vpop.f32.mrf.mxu0  ;;  %7075 = vmatmul.mubr.bf16.gmra.mxu0 %v13949_v37  ;;  %v15963_v46 = vpop.f32.mrf.mxu1  ;;  %7555 = vmatmul.mubr.bf16.gmra.mxu1 %v13950_v38  ;;  %v13980_v37 = vld [vmem:[%s22492_s1 + $0x1cc4] ss:$40 sps:$4 sm:$0xff]  }
 0x11b   :  { %22604 = vst [vmem:[#allocation8_spill] sm:$0xff] %v15963_v46  ;;  %7082 = vmatprep.mubr.bf16.mxu0 %v13953_v41  ;;  %7562 = vmatprep.mubr.bf16.mxu1 %v13956_v42  ;;  %v14090_v46 = vld [vmem:[%s22492_s1 + $0x288] ss:$40 sps:$4 sm:$0xff]  }
 0x11c   :  { %v6886_v47 = vpop.f32.mrf.mxu0  ;;  %v7366_v48 = vpop.f32.mrf.mxu1 }
 0x11d   :  { %v13975_v48 = vld [vmem:[%s22492_s1 + $0xa00] ss:$40 sps:$4 sm:$0xff]  }
 0x11e   :  { %v15971_v51 = vpop.f32.mrf.mxu0  ;;  %v15973_v52 = vpop.f32.mrf.mxu1 }
 0x11f   :  { %22605 = vst [vmem:[#allocation9_spill] sm:$0xff] %v15973_v52  ;;  %v14087_v52 = vld [vmem:[%s22492_s1 + $0xf00] ss:$40 sps:$4 sm:$0xff]  }
 0x120   :  { %v6889_v55 = vpop.f32.mrf.mxu0  ;;  %v7369_v56 = vpop.f32.mrf.mxu1 }
 0x121   :  { %v13988_v55 = vld [vmem:[%s22492_s1 + $0x1d14] ss:$40 sps:$4 sm:$0xff]  }
 0x122   :  { %v15981_v57 = vpop.f32.mrf.mxu0  ;;  %7083 = vmatmul.mubr.bf16.gmra.mxu0 %v13951_v49  ;;  %v15983_v58 = vpop.f32.mrf.mxu1  ;;  %7563 = vmatmul.mubr.bf16.gmra.mxu1 %v13954_v50  ;;  %v13978_v49 = vld [vmem:[%s22492_s1 + $0x1cc0] ss:$40 sps:$4 sm:$0xff]  }
 0x123   :  { %22606 = vst [vmem:[#allocation10_spill] sm:$0xff] %v15983_v58  ;;  %7090 = vmatprep.mubr.bf16.mxu0 %v13959_v53  ;;  %7570 = vmatprep.mubr.bf16.mxu1 %v13962_v54  ;;  %v13985_v54 = vld [vmem:[%s22492_s1 + $0xa54] ss:$40 sps:$4 sm:$0xff]   ;;  %v14084_v58 = vld [vmem:[%s22492_s1 + $0x238] ss:$40 sps:$4 sm:$0xff]  }
 0x124   :  { %v6894_v59 = vpop.f32.mrf.mxu0  ;;  %v7374_v60 = vpop.f32.mrf.mxu1 }
 0x126   :  { %v15991_v63 = vpop.f32.mrf.mxu0  ;;  %v15993_v1 = vpop.f32.mrf.mxu1 }
 0x127   :  { %22607 = vst [vmem:[#allocation11_spill] sm:$0xff] %v15993_v1  ;;  %v14081_v1 = vld [vmem:[%s22492_s1 + $0xeb0] ss:$40 sps:$4 sm:$0xff]  }
 0x128   :  { %v6897_v4 = vpop.f32.mrf.mxu0  ;;  %v7377_v5 = vpop.f32.mrf.mxu1 }
 0x129   :  { %v13986_v4 = vld [vmem:[%s22492_s1 + $0x1d10] ss:$40 sps:$4 sm:$0xff]  }
 0x12a   :  { %v16001_v6 = vpop.f32.mrf.mxu0  ;;  %7091 = vmatmul.mubr.bf16.gmra.mxu0 %v13957_v61  ;;  %v16003_v7 = vpop.f32.mrf.mxu1  ;;  %7571 = vmatmul.mubr.bf16.gmra.mxu1 %v13960_v62 }
 0x12b   :  { %22608 = vst [vmem:[#allocation12_spill] sm:$0xff] %v16003_v7  ;;  %7098 = vmatprep.mubr.bf16.mxu0 %v13965_v2  ;;  %7578 = vmatprep.mubr.bf16.mxu1 %v13968_v3  ;;  %v13983_v3 = vld [vmem:[%s22492_s1 + $0xa50] ss:$40 sps:$4 sm:$0xff]  }
 0x12c   :  { %v6902_v8 = vpop.f32.mrf.mxu0  ;;  %v7382_v11 = vpop.f32.mrf.mxu1  ;;  %v14078_v7 = vld [vmem:[%s22492_s1 + $0x1e8] ss:$40 sps:$4 sm:$0xff]  }
 0x12d   :  { %v13993_v11 = vld [vmem:[%s22492_s1 + $0xaa4] ss:$40 sps:$4 sm:$0xff]  }
 0x12e   :  { %v16011_v14 = vpop.f32.mrf.mxu0  ;;  %v16013_v17 = vpop.f32.mrf.mxu1 }
 0x12f   :  { %22609 = vst [vmem:[#allocation13_spill] sm:$0xff] %v16013_v17  ;;  %v14069_v17 = vld [vmem:[%s22492_s1 + $0xe10] ss:$40 sps:$4 sm:$0xff]  }
 0x130   :  { %v6905_v20 = vpop.f32.mrf.mxu0  ;;  %v7385_v23 = vpop.f32.mrf.mxu1 }
 0x132   :  { %v16021_v24 = vpop.f32.mrf.mxu0  ;;  %7099 = vmatmul.mubr.bf16.gmra.mxu0 %v13963_v12  ;;  %v16023_v25 = vpop.f32.mrf.mxu1  ;;  %7579 = vmatmul.mubr.bf16.gmra.mxu1 %v13966_v13  ;;  %v13996_v12 = vld [vmem:[%s22492_s1 + $0x1d64] ss:$40 sps:$4 sm:$0xff]  }
 0x133   :  { %22610 = vst [vmem:[#allocation14_spill] sm:$0xff] %v16023_v25  ;;  %7106 = vmatprep.mubr.bf16.mxu0 %v13971_v18  ;;  %7586 = vmatprep.mubr.bf16.mxu1 %v13974_v19 }
 0x134   :  { %v6910_v26 = vpop.f32.mrf.mxu0  ;;  %v7390_v29 = vpop.f32.mrf.mxu1 }
 0x135   :  { %v13991_v29 = vld [vmem:[%s22492_s1 + $0xaa0] ss:$40 sps:$4 sm:$0xff]  }
 0x136   :  { %v16031_v32 = vpop.f32.mrf.mxu0  ;;  %v16033_v35 = vpop.f32.mrf.mxu1 }
 0x137   :  { %22611 = vst [vmem:[#allocation15_spill] sm:$0xff] %v16033_v35 }
 0x138   :  { %v6913_v38 = vpop.f32.mrf.mxu0  ;;  %v7393_v41 = vpop.f32.mrf.mxu1 }
 0x139   :  { %v14004_v38 = vld [vmem:[%s22492_s1 + $0x1db4] ss:$40 sps:$4 sm:$0xff]  }
 0x13a   :  { %v16041_v42 = vpop.f32.mrf.mxu0  ;;  %7107 = vmatmul.mubr.bf16.gmra.mxu0 %v13969_v30  ;;  %v16043_v43 = vpop.f32.mrf.mxu1  ;;  %7587 = vmatmul.mubr.bf16.gmra.mxu1 %v13972_v31  ;;  %v13994_v30 = vld [vmem:[%s22492_s1 + $0x1d60] ss:$40 sps:$4 sm:$0xff]  }
 0x13b   :  { %22612 = vst [vmem:[#allocation16_spill] sm:$0xff] %v16043_v43  ;;  %7114 = vmatprep.mubr.bf16.mxu0 %v13977_v36  ;;  %7594 = vmatprep.mubr.bf16.mxu1 %v13980_v37  ;;  %v14001_v37 = vld [vmem:[%s22492_s1 + $0xaf4] ss:$40 sps:$4 sm:$0xff]  }
 0x13c   :  { %v6918_v44 = vpop.f32.mrf.mxu0  ;;  %v7398_v47 = vpop.f32.mrf.mxu1 }
 0x13e   :  { %v16051_v50 = vpop.f32.mrf.mxu0  ;;  %v16053_v53 = vpop.f32.mrf.mxu1 }
 0x13f   :  { %22613 = vst [vmem:[#allocation17_spill] sm:$0xff] %v16053_v53 }
 0x140   :  { %v6921_v56 = vpop.f32.mrf.mxu0  ;;  %v7401_v59 = vpop.f32.mrf.mxu1 }
 0x141   :  { %v14002_v56 = vld [vmem:[%s22492_s1 + $0x1db0] ss:$40 sps:$4 sm:$0xff]  }
 0x142   :  { %v16061_v60 = vpop.f32.mrf.mxu0  ;;  %7115 = vmatmul.mubr.bf16.gmra.mxu0 %v13975_v48  ;;  %v16063_v61 = vpop.f32.mrf.mxu1  ;;  %7595 = vmatmul.mubr.bf16.gmra.mxu1 %v13978_v49 }
 0x143   :  { %22614 = vst [vmem:[#allocation18_spill] sm:$0xff] %v16063_v61  ;;  %7122 = vmatprep.mubr.bf16.mxu0 %v13985_v54  ;;  %7602 = vmatprep.mubr.bf16.mxu1 %v13988_v55  ;;  %v13999_v55 = vld [vmem:[%s22492_s1 + $0xaf0] ss:$40 sps:$4 sm:$0xff]  }
 0x144   :  { %v6926_v62 = vpop.f32.mrf.mxu0  ;;  %v7406_v2 = vpop.f32.mrf.mxu1 }
 0x145   :  { %v14009_v2 = vld [vmem:[%s22492_s1 + $0xb44] ss:$40 sps:$4 sm:$0xff]  }
 0x146   :  { %v16071_v5 = vpop.f32.mrf.mxu0  ;;  %v16073_v8 = vpop.f32.mrf.mxu1 }
 0x147   :  { %22615 = vst [vmem:[#allocation19_spill] sm:$0xff] %v16073_v8 }
 0x148   :  { %v6929_v13 = vpop.f32.mrf.mxu0  ;;  %v7409_v18 = vpop.f32.mrf.mxu1 }
 0x14a   :  { %v16081_v19 = vpop.f32.mrf.mxu0  ;;  %7123 = vmatmul.mubr.bf16.gmra.mxu0 %v13983_v3  ;;  %v16083_v20 = vpop.f32.mrf.mxu1  ;;  %7603 = vmatmul.mubr.bf16.gmra.mxu1 %v13986_v4  ;;  %v14012_v3 = vld [vmem:[%s22492_s1 + $0x1e04] ss:$40 sps:$4 sm:$0xff]  }
 0x14b   :  { %22616 = vst [vmem:[#allocation20_spill] sm:$0xff] %v16083_v20  ;;  %7130 = vmatprep.mubr.bf16.mxu0 %v13993_v11  ;;  %7610 = vmatprep.mubr.bf16.mxu1 %v13996_v12 }
 0x14c   :  { %v6934_v23 = vpop.f32.mrf.mxu0  ;;  %v7414_v26 = vpop.f32.mrf.mxu1 }
 0x14d   :  { %v14007_v26 = vld [vmem:[%s22492_s1 + $0xb40] ss:$40 sps:$4 sm:$0xff]  }
 0x14e   :  { %v16091_v31 = vpop.f32.mrf.mxu0  ;;  %v16093_v36 = vpop.f32.mrf.mxu1 }
 0x14f   :  { %22617 = vst [vmem:[#allocation21_spill] sm:$0xff] %v16093_v36 }
 0x150   :  { %v6937_v41 = vpop.f32.mrf.mxu0  ;;  %v7417_v44 = vpop.f32.mrf.mxu1 }
 0x151   :  { %v14020_v41 = vld [vmem:[%s22492_s1 + $0x1e54] ss:$40 sps:$4 sm:$0xff]  }
 0x152   :  { %v16101_v47 = vpop.f32.mrf.mxu0  ;;  %7131 = vmatmul.mubr.bf16.gmra.mxu0 %v13991_v29  ;;  %v16103_v48 = vpop.f32.mrf.mxu1  ;;  %7611 = vmatmul.mubr.bf16.gmra.mxu1 %v13994_v30  ;;  %v14010_v29 = vld [vmem:[%s22492_s1 + $0x1e00] ss:$40 sps:$4 sm:$0xff]  }
 0x153   :  { %22618 = vst [vmem:[#allocation22_spill] sm:$0xff] %v16103_v48  ;;  %7138 = vmatprep.mubr.bf16.mxu0 %v14001_v37  ;;  %7618 = vmatprep.mubr.bf16.mxu1 %v14004_v38  ;;  %v14017_v38 = vld [vmem:[%s22492_s1 + $0xb94] ss:$40 sps:$4 sm:$0xff]  }
 0x154   :  { %v6942_v49 = vpop.f32.mrf.mxu0  ;;  %v7422_v54 = vpop.f32.mrf.mxu1 }
 0x155   :  { %v14117_v54 = vld [vmem:[%s22491_s0 + $0x138] sm:$0xff]  }
 0x156   :  { %v16111_v59 = vpop.f32.mrf.mxu0  ;;  %v16113_v62 = vpop.f32.mrf.mxu1  ;;  %8493 = vmatpush1.bf16.msra.mxu0 %v14117_v54 }
 0x157   :  { %22619 = vst [vmem:[#allocation23_spill] sm:$0xff] %v16113_v62  ;;  %8494 = vmatprep.subr.bf16.mxu0 %v22501_v0 }
 0x158   :  { %v6945_v4 = vpop.f32.mrf.mxu0  ;;  %v7425_v11 = vpop.f32.mrf.mxu1 }
 0x159   :  { %v14015_v4 = vld [vmem:[%s22492_s1 + $0xb90] ss:$40 sps:$4 sm:$0xff]  }
 0x15a   :  { %v16121_v12 = vpop.f32.mrf.mxu0  ;;  %7139 = vmatmul.mubr.bf16.gmra.mxu0 %v13999_v55  ;;  %v16123_v13 = vpop.f32.mrf.mxu1  ;;  %7619 = vmatmul.mubr.bf16.gmra.mxu1 %v14002_v56  ;;  %v14018_v11 = vld [vmem:[%s22492_s1 + $0x1e50] ss:$40 sps:$4 sm:$0xff]  }
 0x15b   :  { %22620 = vst [vmem:[#allocation24_spill] sm:$0xff] %v16123_v13  ;;  %7146 = vmatprep.mubr.bf16.mxu0 %v14009_v2  ;;  %7626 = vmatprep.mubr.bf16.mxu1 %v14012_v3 }
 0x15c   :  { %v6950_v18 = vpop.f32.mrf.mxu0  ;;  %v7430_v23 = vpop.f32.mrf.mxu1 }
 0x15d   :  { %v14118_v18 = vld [vmem:[%s22491_s0 + $0x130] sm:$0xff]  }
 0x15e   :  { %v16131_v30 = vpop.f32.mrf.mxu0  ;;  %v16133_v37 = vpop.f32.mrf.mxu1  ;;  %8495 = vmatpush1.bf16.msra.mxu0 %v14118_v18  ;;  %v14023_v18 = vld [vmem:[%s22492_s1 + $0xbe0] ss:$40 sps:$4 sm:$0xff]  }
 0x15f   :  { %22621 = vst [vmem:[#allocation25_spill] sm:$0xff] %v16133_v37  ;;  %8496 = vmatprep.subr.bf16.mxu0 %v22501_v0 }
 0x160   :  { %v6953_v44 = vpop.f32.mrf.mxu0  ;;  %v7433_v49 = vpop.f32.mrf.mxu1 }
 0x161   :  { %v14125_v49 = vld [vmem:[%s22491_s0 + $0x128] sm:$0xff]  }
 0x162   :  { %v16144_v55 = vpop.f32.mrf.mxu0  ;;  %7147 = vmatmul.mubr.bf16.gmra.mxu0 %v14007_v26  ;;  %v16146_v56 = vpop.f32.mrf.mxu1  ;;  %7627 = vmatmul.mubr.bf16.gmra.mxu1 %v14010_v29  ;;  %v14025_v29 = vld [vmem:[%s22492_s1 + $0xbe4] ss:$40 sps:$4 sm:$0xff]  }
 0x163   :  { %22622 = vst [vmem:[#allocation26_spill] sm:$0xff] %v16146_v56  ;;  %7154 = vmatprep.mubr.bf16.mxu0 %v14017_v38  ;;  %7634 = vmatprep.mubr.bf16.mxu1 %v14020_v41  ;;  %v14028_v38 = vld [vmem:[%s22492_s1 + $0x1ea4] ss:$40 sps:$4 sm:$0xff]  }
 0x164   :  { %v6958_v2 = vpop.f32.mrf.mxu0  ;;  %v7438_v3 = vpop.f32.mrf.mxu1  ;;  %8497 = vmatpush1.bf16.msra.mxu0 %v14125_v49 }
 0x165   :  { %8498 = vmatprep.subr.bf16.mxu0 %v22501_v0 }
 0x166   :  { %v16158_v23 = vpop.f32.mrf.mxu0  ;;  %v16160_v26 = vpop.f32.mrf.mxu1 }
 0x167   :  { %22623 = vst [vmem:[#allocation27_spill] sm:$0xff] %v16158_v23  ;;  %22624 = vst [vmem:[#allocation28_spill] sm:$0xff] %v16160_v26 }
 0x168   :  { %v6961_v41 = vpop.f32.mrf.mxu0  ;;  %v7441_v44 = vpop.f32.mrf.mxu1 }
 0x169   :  { %v14026_v41 = vld [vmem:[%s22492_s1 + $0x1ea0] ss:$40 sps:$4 sm:$0xff]  }
 0x16a   :  { %v16172_v54 = vpop.f32.mrf.mxu0  ;;  %7155 = vmatmul.mubr.bf16.gmra.mxu0 %v14015_v4  ;;  %v16174_v2 = vpop.f32.mrf.mxu1  ;;  %7635 = vmatmul.mubr.bf16.gmra.mxu1 %v14018_v11  ;;  %v14126_v4 = vld [vmem:[%s22491_s0 + $0x120] sm:$0xff]  }
 0x16b   :  { %22625 = vst [vmem:[#allocation29_spill] sm:$0xff] %v16172_v54  ;;  %22626 = vst [vmem:[#allocation30_spill] sm:$0xff] %v16174_v2  ;;  %7162 = vmatprep.mubr.bf16.mxu0 %v14025_v29  ;;  %7642 = vmatprep.mubr.bf16.mxu1 %v14028_v38  ;;  %v14036_v38 = vld [vmem:[%s22492_s1 + $0x1ef4] ss:$40 sps:$4 sm:$0xff]  }
 0x16c   :  { %v6966_v3 = vpop.f32.mrf.mxu0  ;;  %v7446_v26 = vpop.f32.mrf.mxu1  ;;  %8499 = vmatpush1.bf16.msra.mxu0 %v14126_v4  ;;  %v14031_v4 = vld [vmem:[%s22492_s1 + $0xc30] ss:$40 sps:$4 sm:$0xff]  }
 0x16d   :  { %v14033_v26 = vld [vmem:[%s22492_s1 + $0xc34] ss:$40 sps:$4 sm:$0xff]   ;;  %8500 = vmatprep.subr.bf16.mxu0 %v22501_v0 }
 0x16e   :  { %v16186_v11 = vpop.f32.mrf.mxu0  ;;  %v16188_v29 = vpop.f32.mrf.mxu1  ;;  %v14133_v3 = vld [vmem:[%s22491_s0 + $0x118] sm:$0xff]  }
 0x16f   :  { %22627 = vst [vmem:[#allocation31_spill] sm:$0xff] %v16186_v11  ;;  %22628 = vst [vmem:[#allocation32_spill] sm:$0xff] %v16188_v29  ;;  %v14277_v11 = vld [vmem:[%s22492_s1 + $0xb98] ss:$40 sps:$4 sm:$0xff]  }
 0x170   :  { %v6969_v44 = vpop.f32.mrf.mxu0  ;;  %v7449_v49 = vpop.f32.mrf.mxu1  ;;  %8501 = vmatpush1.bf16.msra.mxu0 %v14133_v3  ;;  %v14141_v3 = vld [vmem:[%s22491_s0 + $0x108] sm:$0xff]  }
 0x171   :  { %v14034_v44 = vld [vmem:[%s22492_s1 + $0x1ef0] ss:$40 sps:$4 sm:$0xff]   ;;  %8502 = vmatprep.subr.bf16.mxu0 %v22501_v0 }
 0x172   :  { %v16200_v2 = vpop.f32.mrf.mxu0  ;;  %7163 = vmatmul.mubr.bf16.gmra.mxu0 %v14023_v18  ;;  %v16202_v29 = vpop.f32.mrf.mxu1  ;;  %7643 = vmatmul.mubr.bf16.gmra.mxu1 %v14026_v41  ;;  %v14134_v18 = vld [vmem:[%s22491_s0 + $0x110] sm:$0xff]  }
 0x173   :  { %22629 = vst [vmem:[#allocation33_spill] sm:$0xff] %v16200_v2  ;;  %22630 = vst [vmem:[#allocation34_spill] sm:$0xff] %v16202_v29  ;;  %7170 = vmatprep.mubr.bf16.mxu0 %v14033_v26  ;;  %7650 = vmatprep.mubr.bf16.mxu1 %v14036_v38 }
 0x174   :  { %v6974_v56 = vpop.f32.mrf.mxu0  ;;  %v7454_v37 = vpop.f32.mrf.mxu1  ;;  %8503 = vmatpush1.bf16.msra.mxu0 %v14134_v18  ;;  %v14039_v18 = vld [vmem:[%s22492_s1 + $0xc80] ss:$40 sps:$4 sm:$0xff]  }
 0x175   :  { %v14041_v37 = vld [vmem:[%s22492_s1 + $0xc84] ss:$40 sps:$4 sm:$0xff]   ;;  %8504 = vmatprep.subr.bf16.mxu0 %v22501_v0 }
 0x176   :  { %v16214_v41 = vpop.f32.mrf.mxu0  ;;  %v16216_v26 = vpop.f32.mrf.mxu1  ;;  %v14044_v56 = vld [vmem:[%s22492_s1 + $0xc] ss:$40 sps:$4 sm:$0xff]  }
 0x177   :  { %22631 = vst [vmem:[#allocation35_spill] sm:$0xff] %v16214_v41  ;;  %22632 = vst [vmem:[#allocation36_spill] sm:$0xff] %v16216_v26  ;;  %v14271_v41 = vld [vmem:[%s22492_s1 + $0xb48] ss:$40 sps:$4 sm:$0xff]  }
 0x178   :  { %v6977_v38 = vpop.f32.mrf.mxu0  ;;  %v7457_v49 = vpop.f32.mrf.mxu1  ;;  %8505 = vmatpush1.bf16.msra.mxu0 %v14141_v3  ;;  %v14149_v3 = vld [vmem:[%s22491_s0 + $0x178] sm:$0xff]  }
 0x179   :  { %v14042_v38 = vld [vmem:[%s22492_s1 + $0x8] ss:$40 sps:$4 sm:$0xff]   ;;  %8506 = vmatprep.subr.bf16.mxu0 %v22501_v0 }
 0x17a   :  { %v16228_v29 = vpop.f32.mrf.mxu0  ;;  %7171 = vmatmul.mubr.bf16.gmra.mxu0 %v14031_v4  ;;  %v16230_v26 = vpop.f32.mrf.mxu1  ;;  %7651 = vmatmul.mubr.bf16.gmra.mxu1 %v14034_v44  ;;  %v14142_v4 = vld [vmem:[%s22491_s0 + $0x100] sm:$0xff]  }
 0x17b   :  { %22633 = vst [vmem:[#allocation37_spill] sm:$0xff] %v16228_v29  ;;  %22634 = vst [vmem:[#allocation38_spill] sm:$0xff] %v16230_v26  ;;  %7178 = vmatprep.mubr.bf16.mxu0 %v14041_v37  ;;  %7691 = vmatprep.mubr.bf16.mxu1 %v14044_v56 }
 0x17c   :  { %v6982_v13 = vpop.f32.mrf.mxu0  ;;  %v7462_v62 = vpop.f32.mrf.mxu1  ;;  %8507 = vmatpush1.bf16.msra.mxu0 %v14142_v4  ;;  %v14045_v4 = vld [vmem:[%s22492_s1 + $0xcd0] ss:$40 sps:$4 sm:$0xff]  }
 0x17d   :  { %v14047_v62 = vld [vmem:[%s22492_s1 + $0xcd4] ss:$40 sps:$4 sm:$0xff]   ;;  %8508 = vmatprep.subr.bf16.mxu0 %v22501_v0 }
 0x17e   :  { %v16242_v44 = vpop.f32.mrf.mxu0  ;;  %v16244_v37 = vpop.f32.mrf.mxu1  ;;  %v14050_v13 = vld [vmem:[%s22492_s1 + $0x5c] ss:$40 sps:$4 sm:$0xff]  }
 0x17f   :  { %22635 = vst [vmem:[#allocation39_spill] sm:$0xff] %v16242_v44  ;;  %22636 = vst [vmem:[#allocation40_spill] sm:$0xff] %v16244_v37  ;;  %v14265_v44 = vld [vmem:[%s22492_s1 + $0xaf8] ss:$40 sps:$4 sm:$0xff]  }
 0x180   :  { %v6985_v56 = vpop.f32.mrf.mxu0  ;;  %v7465_v49 = vpop.f32.mrf.mxu1  ;;  %8509 = vmatpush2.bf16.msra.mxu0 %v14149_v3  ;;  %v14157_v3 = vld [vmem:[%s22491_s0 + $0x168] sm:$0xff]  }
 0x181   :  { %v14048_v56 = vld [vmem:[%s22492_s1 + $0x58] ss:$40 sps:$4 sm:$0xff]   ;;  %8510 = vmatprep.subr.bf16.mxu0 %v22501_v0 }
 0x182   :  { %v16256_v26 = vpop.f32.mrf.mxu0  ;;  %7179 = vmatmul.mubr.bf16.gmra.mxu0 %v14039_v18  ;;  %v16258_v37 = vpop.f32.mrf.mxu1  ;;  %7692 = vmatmul.mubr.bf16.vlgmr.msra.gmra.mxu1 %v14042_v38  ;;  %v14150_v18 = vld [vmem:[%s22491_s0 + $0x170] sm:$0xff]  }
 0x183   :  { %22637 = vst [vmem:[#allocation41_spill] sm:$0xff] %v16256_v26  ;;  %22638 = vst [vmem:[#allocation42_spill] sm:$0xff] %v16258_v37  ;;  %7186 = vmatprep.mubr.bf16.mxu0 %v14047_v62  ;;  %7699 = vmatprep.mubr.bf16.mxu1 %v14050_v13 }
 0x184   :  { %v6990_v48 = vpop.f32.mrf.mxu0  ;;  %v7470_v36 = vpop.f32.mrf.mxu1  ;;  %8511 = vmatpush2.bf16.msra.mxu0 %v14150_v18  ;;  %v14051_v18 = vld [vmem:[%s22492_s1 + $0xd20] ss:$40 sps:$4 sm:$0xff]  }
 0x185   :  { %v14053_v36 = vld [vmem:[%s22492_s1 + $0xd24] ss:$40 sps:$4 sm:$0xff]   ;;  %8512 = vmatprep.subr.bf16.mxu0 %v22501_v0 }
 0x186   :  { %v16270_v38 = vpop.f32.mrf.mxu0  ;;  %v16272_v62 = vpop.f32.mrf.mxu1  ;;  %v14056_v48 = vld [vmem:[%s22492_s1 + $0xac] ss:$40 sps:$4 sm:$0xff]  }
 0x187   :  { %22639 = vst [vmem:[#allocation43_spill] sm:$0xff] %v16270_v38  ;;  %22640 = vst [vmem:[#allocation44_spill] sm:$0xff] %v16272_v62  ;;  %v14259_v38 = vld [vmem:[%s22492_s1 + $0xaa8] ss:$40 sps:$4 sm:$0xff]  }
 0x188   :  { %v6993_v13 = vpop.f32.mrf.mxu0  ;;  %v7473_v49 = vpop.f32.mrf.mxu1  ;;  %8513 = vmatpush2.bf16.msra.mxu0 %v14157_v3  ;;  %v14165_v3 = vld [vmem:[%s22491_s0 + $0x158] sm:$0xff]  }
 0x189   :  { %v14054_v13 = vld [vmem:[%s22492_s1 + $0xa8] ss:$40 sps:$4 sm:$0xff]   ;;  %8514 = vmatprep.subr.bf16.mxu0 %v22501_v0 }
 0x18a   :  { %v16284_v37 = vpop.f32.mrf.mxu0  ;;  %7187 = vmatmul.mubr.bf16.gmra.mxu0 %v14045_v4  ;;  %v16286_v62 = vpop.f32.mrf.mxu1  ;;  %7700 = vmatmul.mubr.bf16.gmra.mxu1 %v14048_v56  ;;  %v14158_v4 = vld [vmem:[%s22491_s0 + $0x160] sm:$0xff]  }
 0x18b   :  { %22641 = vst [vmem:[#allocation45_spill] sm:$0xff] %v16284_v37  ;;  %22642 = vst [vmem:[#allocation46_spill] sm:$0xff] %v16286_v62  ;;  %7194 = vmatprep.mubr.bf16.mxu0 %v14053_v36  ;;  %7707 = vmatprep.mubr.bf16.mxu1 %v14056_v48 }
 0x18c   :  { %v6998_v20 = vpop.f32.mrf.mxu0  ;;  %v7478_v8 = vpop.f32.mrf.mxu1  ;;  %8515 = vmatpush2.bf16.msra.mxu0 %v14158_v4  ;;  %v14057_v4 = vld [vmem:[%s22492_s1 + $0xd70] ss:$40 sps:$4 sm:$0xff]  }
 0x18d   :  { %v14059_v8 = vld [vmem:[%s22492_s1 + $0xd74] ss:$40 sps:$4 sm:$0xff]   ;;  %8516 = vmatprep.subr.bf16.mxu0 %v22501_v0 }
 0x18e   :  { %v16298_v56 = vpop.f32.mrf.mxu0  ;;  %v16300_v36 = vpop.f32.mrf.mxu1  ;;  %v14062_v20 = vld [vmem:[%s22492_s1 + $0xfc] ss:$40 sps:$4 sm:$0xff]  }
 0x18f   :  { %22643 = vst [vmem:[#allocation47_spill] sm:$0xff] %v16298_v56  ;;  %22644 = vst [vmem:[#allocation48_spill] sm:$0xff] %v16300_v36  ;;  %v14253_v56 = vld [vmem:[%s22492_s1 + $0xa58] ss:$40 sps:$4 sm:$0xff]  }
 0x190   :  { %v7001_v48 = vpop.f32.mrf.mxu0  ;;  %v7481_v49 = vpop.f32.mrf.mxu1  ;;  %8517 = vmatpush2.bf16.msra.mxu0 %v14165_v3  ;;  %v14173_v3 = vld [vmem:[%s22491_s0 + $0x148] sm:$0xff]  }
 0x191   :  { %v14060_v48 = vld [vmem:[%s22492_s1 + $0xf8] ss:$40 sps:$4 sm:$0xff]   ;;  %8518 = vmatprep.subr.bf16.mxu0 %v22501_v0 }
 0x192   :  { %v16312_v62 = vpop.f32.mrf.mxu0  ;;  %7195 = vmatmul.mubr.bf16.gmra.mxu0 %v14051_v18  ;;  %v16314_v36 = vpop.f32.mrf.mxu1  ;;  %7708 = vmatmul.mubr.bf16.gmra.mxu1 %v14054_v13  ;;  %v14166_v18 = vld [vmem:[%s22491_s0 + $0x150] sm:$0xff]  }
 0x193   :  { %22645 = vst [vmem:[#allocation49_spill] sm:$0xff] %v16312_v62  ;;  %22646 = vst [vmem:[#allocation50_spill] sm:$0xff] %v16314_v36  ;;  %7202 = vmatprep.mubr.bf16.mxu0 %v14059_v8  ;;  %7715 = vmatprep.mubr.bf16.mxu1 %v14062_v20 }
 0x194   :  { %v7006_v61 = vpop.f32.mrf.mxu0  ;;  %v7486_v53 = vpop.f32.mrf.mxu1  ;;  %8519 = vmatpush2.bf16.msra.mxu0 %v14166_v18  ;;  %v14063_v18 = vld [vmem:[%s22492_s1 + $0xdc0] ss:$40 sps:$4 sm:$0xff]  }
 0x195   :  { %v14065_v53 = vld [vmem:[%s22492_s1 + $0xdc4] ss:$40 sps:$4 sm:$0xff]   ;;  %8520 = vmatprep.subr.bf16.mxu0 %v22501_v0 }
 0x196   :  { %v16326_v13 = vpop.f32.mrf.mxu0  ;;  %v16328_v8 = vpop.f32.mrf.mxu1  ;;  %v14068_v61 = vld [vmem:[%s22492_s1 + $0x14c] ss:$40 sps:$4 sm:$0xff]  }
 0x197   :  { %22647 = vst [vmem:[#allocation51_spill] sm:$0xff] %v16326_v13  ;;  %22648 = vst [vmem:[#allocation52_spill] sm:$0xff] %v16328_v8  ;;  %v14247_v13 = vld [vmem:[%s22492_s1 + $0xa08] ss:$40 sps:$4 sm:$0xff]  }
 0x198   :  { %v7009_v20 = vpop.f32.mrf.mxu0  ;;  %v7489_v49 = vpop.f32.mrf.mxu1  ;;  %8521 = vmatpush2.bf16.msra.mxu0 %v14173_v3 }
 0x199   :  { %v14066_v20 = vld [vmem:[%s22492_s1 + $0x148] ss:$40 sps:$4 sm:$0xff]   ;;  %8522 = vmatprep.subr.bf16.mxu0 %v22501_v0 }
 0x19a   :  { %v16340_v36 = vpop.f32.mrf.mxu0  ;;  %7203 = vmatmul.mubr.bf16.gmra.mxu0 %v14057_v4  ;;  %v16342_v8 = vpop.f32.mrf.mxu1  ;;  %7716 = vmatmul.mubr.bf16.gmra.mxu1 %v14060_v48  ;;  %v14174_v4 = vld [vmem:[%s22491_s0 + $0x140] sm:$0xff]  }
 0x19b   :  { %22649 = vst [vmem:[#allocation53_spill] sm:$0xff] %v16340_v36  ;;  %22650 = vst [vmem:[#allocation54_spill] sm:$0xff] %v16342_v8  ;;  %7210 = vmatprep.mubr.bf16.mxu0 %v14065_v53  ;;  %7723 = vmatprep.mubr.bf16.mxu1 %v14068_v61 }
 0x19c   :  { %v7014_v43 = vpop.f32.mrf.mxu0  ;;  %v7494_v35 = vpop.f32.mrf.mxu1  ;;  %8523 = vmatpush2.bf16.msra.mxu0 %v14174_v4  ;;  %v14072_v4 = vld [vmem:[%s22492_s1 + $0x198] ss:$40 sps:$4 sm:$0xff]  }
 0x19d   :  { %v14071_v35 = vld [vmem:[%s22492_s1 + $0xe14] ss:$40 sps:$4 sm:$0xff]   ;;  %10158 = vmatprep.subr.bf16.mxu0 %v22501_v0 }
 0x19e   :  { %v16354_v48 = vpop.f32.mrf.mxu0  ;;  %v16356_v53 = vpop.f32.mrf.mxu1  ;;  %v14074_v43 = vld [vmem:[%s22492_s1 + $0x19c] ss:$40 sps:$4 sm:$0xff]  }
 0x19f   :  { %22651 = vst [vmem:[#allocation55_spill] sm:$0xff] %v16354_v48  ;;  %22652 = vst [vmem:[#allocation56_spill] sm:$0xff] %v16356_v53  ;;  %v14241_v48 = vld [vmem:[%s22492_s1 + $0x9b8] ss:$40 sps:$4 sm:$0xff]  }
 0x1a0   :  { %v7017_v61 = vpop.f32.mrf.mxu0  ;;  %v7497_v49 = vpop.f32.mrf.mxu1 }
 0x1a2   :  { %v16365_v3 = vpop.f32.mrf.mxu0  ;;  %7211 = vmatmul.mubr.bf16.gmra.mxu0 %v14063_v18  ;;  %v16367_v8 = vpop.f32.mrf.mxu1  ;;  %7724 = vmatmul.mubr.bf16.gmra.mxu1 %v14066_v20  ;;  %v14077_v18 = vld [vmem:[%s22492_s1 + $0xe64] ss:$40 sps:$4 sm:$0xff]  }
 0x1a3   :  { %22653 = vst [vmem:[#allocation57_spill] sm:$0xff] %v16365_v3  ;;  %22654 = vst [vmem:[#allocation58_spill] sm:$0xff] %v16367_v8  ;;  %7218 = vmatprep.mubr.bf16.mxu0 %v14071_v35  ;;  %7731 = vmatprep.mubr.bf16.mxu1 %v14074_v43  ;;  %v14075_v8 = vld [vmem:[%s22492_s1 + $0xe60] ss:$40 sps:$4 sm:$0xff]  }
 0x1a4   :  { %v7022_v53 = vpop.f32.mrf.mxu0  ;;  %v7502_v25 = vpop.f32.mrf.mxu1 }
 0x1a5   :  { %v14080_v25 = vld [vmem:[%s22492_s1 + $0x1ec] ss:$40 sps:$4 sm:$0xff]  }
 0x1a6   :  { %v16375_v61 = vpop.f32.mrf.mxu0  ;;  %v16377_v49 = vpop.f32.mrf.mxu1 }
 0x1a7   :  { %22655 = vst [vmem:[#allocation59_spill] sm:$0xff] %v16375_v61  ;;  %22656 = vst [vmem:[#allocation60_spill] sm:$0xff] %v16377_v49  ;;  %v14235_v61 = vld [vmem:[%s22492_s1 + $0x968] ss:$40 sps:$4 sm:$0xff]  }
 0x1a8   :  { %v7025_v20 = vpop.f32.mrf.mxu0  ;;  %v7505_v53 = vpop.f32.mrf.mxu1 }
 0x1aa   :  { %v16385_v35 = vpop.f32.mrf.mxu0  ;;  %7219 = vmatmul.mubr.bf16.gmra.mxu0 %v14069_v17  ;;  %v16387_v43 = vpop.f32.mrf.mxu1  ;;  %7732 = vmatmul.mubr.bf16.gmra.mxu1 %v14072_v4  ;;  %v14083_v17 = vld [vmem:[%s22492_s1 + $0xeb4] ss:$40 sps:$4 sm:$0xff]  }
 0x1ab   :  { %22657 = vst [vmem:[#allocation61_spill] sm:$0xff] %v16385_v35  ;;  %22658 = vst [vmem:[#allocation62_spill] sm:$0xff] %v16387_v43  ;;  %7226 = vmatprep.mubr.bf16.mxu0 %v14077_v18  ;;  %7739 = vmatprep.mubr.bf16.mxu1 %v14080_v25 }
 0x1ac   :  { %v7030_v0 = vpop.f32.mrf.mxu0  ;;  %v7510_v49 = vpop.f32.mrf.mxu1 }
 0x1ad   :  { %v14086_v0 = vld [vmem:[%s22492_s1 + $0x23c] ss:$40 sps:$4 sm:$0xff]  }
 0x1ae   :  { %v16395_v20 = vpop.f32.mrf.mxu0  ;;  %v16397_v53 = vpop.f32.mrf.mxu1 }
 0x1af   :  { %22659 = vst [vmem:[#allocation63_spill] sm:$0xff] %v16395_v20  ;;  %22660 = vst [vmem:[#allocation64_spill] sm:$0xff] %v16397_v53  ;;  %v14229_v20 = vld [vmem:[%s22492_s1 + $0x918] ss:$40 sps:$4 sm:$0xff]  }
 0x1b0   :  { %v7033_v4 = vpop.f32.mrf.mxu0  ;;  %v7513_v49 = vpop.f32.mrf.mxu1 }
 0x1b2   :  { %v16405_v18 = vpop.f32.mrf.mxu0  ;;  %7227 = vmatmul.mubr.bf16.gmra.mxu0 %v14075_v8  ;;  %v16407_v25 = vpop.f32.mrf.mxu1  ;;  %7740 = vmatmul.mubr.bf16.gmra.mxu1 %v14078_v7  ;;  %v14089_v7 = vld [vmem:[%s22492_s1 + $0xf04] ss:$40 sps:$4 sm:$0xff]  }
 0x1b3   :  { %22661 = vst [vmem:[#allocation65_spill] sm:$0xff] %v16405_v18  ;;  %22662 = vst [vmem:[#allocation66_spill] sm:$0xff] %v16407_v25  ;;  %7234 = vmatprep.mubr.bf16.mxu0 %v14083_v17  ;;  %7747 = vmatprep.mubr.bf16.mxu1 %v14086_v0  ;;  %v14092_v8 = vld [vmem:[%s22492_s1 + $0x28c] ss:$40 sps:$4 sm:$0xff]  }
 0x1b4   :  { %v7038_v43 = vpop.f32.mrf.mxu0  ;;  %v7518_v53 = vpop.f32.mrf.mxu1 }
 0x1b6   :  { %v16415_v4 = vpop.f32.mrf.mxu0  ;;  %v16417_v49 = vpop.f32.mrf.mxu1 }
 0x1b7   :  { %22663 = vst [vmem:[#allocation67_spill] sm:$0xff] %v16415_v4  ;;  %22664 = vst [vmem:[#allocation68_spill] sm:$0xff] %v16417_v49  ;;  %v14223_v4 = vld [vmem:[%s22492_s1 + $0x8c8] ss:$40 sps:$4 sm:$0xff]  }
 0x1b8   :  { %v7041_v43 = vpop.f32.mrf.mxu0  ;;  %v7521_v53 = vpop.f32.mrf.mxu1 }
 0x1ba   :  { %v16425_v17 = vpop.f32.mrf.mxu0  ;;  %7235 = vmatmul.mubr.bf16.gmra.mxu0 %v14081_v1  ;;  %v16427_v0 = vpop.f32.mrf.mxu1  ;;  %7748 = vmatmul.mubr.bf16.gmra.mxu1 %v14084_v58  ;;  %v14095_v58 = vld [vmem:[%s22492_s1 + $0xf54] ss:$40 sps:$4 sm:$0xff]  }
 0x1bb   :  { %22665 = vst [vmem:[#allocation69_spill] sm:$0xff] %v16425_v17  ;;  %22666 = vst [vmem:[#allocation70_spill] sm:$0xff] %v16427_v0  ;;  %7242 = vmatprep.mubr.bf16.mxu0 %v14089_v7  ;;  %7755 = vmatprep.mubr.bf16.mxu1 %v14092_v8  ;;  %v14098_v1 = vld [vmem:[%s22492_s1 + $0x2dc] ss:$40 sps:$4 sm:$0xff]  }
 0x1bc   :  { %v7046_v25 = vpop.f32.mrf.mxu0  ;;  %v7526_v49 = vpop.f32.mrf.mxu1 }
 0x1be   :  { %v16435_v43 = vpop.f32.mrf.mxu0  ;;  %v16437_v53 = vpop.f32.mrf.mxu1 }
 0x1bf   :  { %22667 = vst [vmem:[#allocation71_spill] sm:$0xff] %v16435_v43  ;;  %22668 = vst [vmem:[#allocation72_spill] sm:$0xff] %v16437_v53  ;;  %v14217_v43 = vld [vmem:[%s22492_s1 + $0x878] ss:$40 sps:$4 sm:$0xff]  }
 0x1c0   :  { %v7049_v25 = vpop.f32.mrf.mxu0  ;;  %v7529_v49 = vpop.f32.mrf.mxu1 }
 0x1c2   :  { %v16445_v7 = vpop.f32.mrf.mxu0  ;;  %7243 = vmatmul.mubr.bf16.gmra.mxu0 %v14087_v52  ;;  %v16447_v8 = vpop.f32.mrf.mxu1  ;;  %7756 = vmatmul.mubr.bf16.gmra.mxu1 %v14090_v46  ;;  %v14101_v46 = vld [vmem:[%s22492_s1 + $0xfa4] ss:$40 sps:$4 sm:$0xff]  }
 0x1c3   :  { %22669 = vst [vmem:[#allocation73_spill] sm:$0xff] %v16445_v7  ;;  %22670 = vst [vmem:[#allocation74_spill] sm:$0xff] %v16447_v8  ;;  %7250 = vmatprep.mubr.bf16.mxu0 %v14095_v58  ;;  %7763 = vmatprep.mubr.bf16.mxu1 %v14098_v1  ;;  %v14104_v52 = vld [vmem:[%s22492_s1 + $0x32c] ss:$40 sps:$4 sm:$0xff]  }
 0x1c4   :  { %v7054_v0 = vpop.f32.mrf.mxu0  ;;  %v7534_v53 = vpop.f32.mrf.mxu1 }
 0x1c6   :  { %v16455_v25 = vpop.f32.mrf.mxu0  ;;  %v16457_v49 = vpop.f32.mrf.mxu1 }
 0x1c7   :  { %22671 = vst [vmem:[#allocation75_spill] sm:$0xff] %v16455_v25  ;;  %22672 = vst [vmem:[#allocation76_spill] sm:$0xff] %v16457_v49  ;;  %v14211_v25 = vld [vmem:[%s22492_s1 + $0x828] ss:$40 sps:$4 sm:$0xff]  }
 0x1c8   :  { %v7057_v0 = vpop.f32.mrf.mxu0  ;;  %v7537_v53 = vpop.f32.mrf.mxu1 }
 0x1ca   :  { %v16465_v58 = vpop.f32.mrf.mxu0  ;;  %7251 = vmatmul.mubr.bf16.gmra.mxu0 %v14093_v40  ;;  %v16467_v1 = vpop.f32.mrf.mxu1  ;;  %7764 = vmatmul.mubr.bf16.gmra.mxu1 %v14096_v34  ;;  %v14107_v34 = vld [vmem:[%s22492_s1 + $0xff4] ss:$40 sps:$4 sm:$0xff]  }
 0x1cb   :  { %22673 = vst [vmem:[#allocation77_spill] sm:$0xff] %v16465_v58  ;;  %22674 = vst [vmem:[#allocation78_spill] sm:$0xff] %v16467_v1  ;;  %7258 = vmatprep.mubr.bf16.mxu0 %v14101_v46  ;;  %7771 = vmatprep.mubr.bf16.mxu1 %v14104_v52  ;;  %v14110_v40 = vld [vmem:[%s22492_s1 + $0x37c] ss:$40 sps:$4 sm:$0xff]  }
 0x1cc   :  { %v7062_v8 = vpop.f32.mrf.mxu0  ;;  %v7542_v49 = vpop.f32.mrf.mxu1 }
 0x1ce   :  { %v16475_v0 = vpop.f32.mrf.mxu0  ;;  %v16477_v53 = vpop.f32.mrf.mxu1 }
 0x1cf   :  { %22675 = vst [vmem:[#allocation79_spill] sm:$0xff] %v16475_v0  ;;  %22676 = vst [vmem:[#allocation80_spill] sm:$0xff] %v16477_v53  ;;  %v14127_v0 = vld [vmem:[%s22492_s1 + $0x10e0] ss:$40 sps:$4 sm:$0xff]  }
 0x1d0   :  { %v7065_v8 = vpop.f32.mrf.mxu0  ;;  %v7545_v49 = vpop.f32.mrf.mxu1 }
 0x1d2   :  { %v16485_v46 = vpop.f32.mrf.mxu0  ;;  %7259 = vmatmul.mubr.bf16.gmra.mxu0 %v14099_v28  ;;  %v16487_v52 = vpop.f32.mrf.mxu1  ;;  %7772 = vmatmul.mubr.bf16.gmra.mxu1 %v14102_v22  ;;  %v14113_v22 = vld [vmem:[%s22492_s1 + $0x1044] ss:$40 sps:$4 sm:$0xff]  }
 0x1d3   :  { %22677 = vst [vmem:[#allocation81_spill] sm:$0xff] %v16485_v46  ;;  %22678 = vst [vmem:[#allocation82_spill] sm:$0xff] %v16487_v52  ;;  %7266 = vmatprep.mubr.bf16.mxu0 %v14107_v34  ;;  %7779 = vmatprep.mubr.bf16.mxu1 %v14110_v40  ;;  %v14116_v28 = vld [vmem:[%s22492_s1 + $0x3cc] ss:$40 sps:$4 sm:$0xff]   ;;  %v14114_v46 = vld [vmem:[%s22492_s1 + $0x3c8] ss:$40 sps:$4 sm:$0xff]  }
 0x1d4   :  { %v7070_v1 = vpop.f32.mrf.mxu0  ;;  %v7550_v53 = vpop.f32.mrf.mxu1 }
 0x1d6   :  { %v16495_v8 = vpop.f32.mrf.mxu0  ;;  %v16497_v49 = vpop.f32.mrf.mxu1 }
 0x1d7   :  { %22679 = vst [vmem:[#allocation83_spill] sm:$0xff] %v16495_v8  ;;  %22680 = vst [vmem:[#allocation84_spill] sm:$0xff] %v16497_v49  ;;  %v14111_v8 = vld [vmem:[%s22492_s1 + $0x1040] ss:$40 sps:$4 sm:$0xff]  }
 0x1d8   :  { %v7073_v1 = vpop.f32.mrf.mxu0  ;;  %v7553_v53 = vpop.f32.mrf.mxu1 }
 0x1da   :  { %v16505_v34 = vpop.f32.mrf.mxu0  ;;  %7267 = vmatmul.mubr.bf16.gmra.mxu0 %v14105_v16  ;;  %v16507_v40 = vpop.f32.mrf.mxu1  ;;  %7780 = vmatmul.mubr.bf16.gmra.mxu1 %v14108_v10  ;;  %v14121_v10 = vld [vmem:[%s22492_s1 + $0x1094] ss:$40 sps:$4 sm:$0xff]  }
 0x1db   :  { %22681 = vst [vmem:[#allocation85_spill] sm:$0xff] %v16505_v34  ;;  %22682 = vst [vmem:[#allocation86_spill] sm:$0xff] %v16507_v40  ;;  %7274 = vmatprep.mubr.bf16.mxu0 %v14113_v22  ;;  %7787 = vmatprep.mubr.bf16.mxu1 %v14116_v28  ;;  %v14124_v16 = vld [vmem:[%s22492_s1 + $0x41c] ss:$40 sps:$4 sm:$0xff]   ;;  %v14122_v34 = vld [vmem:[%s22492_s1 + $0x418] ss:$40 sps:$4 sm:$0xff]  }
 0x1dc   :  { %v7078_v52 = vpop.f32.mrf.mxu0  ;;  %v7558_v49 = vpop.f32.mrf.mxu1 }
 0x1de   :  { %v16515_v1 = vpop.f32.mrf.mxu0  ;;  %v16517_v53 = vpop.f32.mrf.mxu1 }
 0x1df   :  { %22683 = vst [vmem:[#allocation87_spill] sm:$0xff] %v16515_v1  ;;  %22684 = vst [vmem:[#allocation88_spill] sm:$0xff] %v16517_v53  ;;  %v14119_v1 = vld [vmem:[%s22492_s1 + $0x1090] ss:$40 sps:$4 sm:$0xff]  }
 0x1e0   :  { %v7081_v52 = vpop.f32.mrf.mxu0  ;;  %v7561_v49 = vpop.f32.mrf.mxu1 }
 0x1e2   :  { %v16525_v22 = vpop.f32.mrf.mxu0  ;;  %7275 = vmatmul.mubr.bf16.gmra.mxu0 %v14111_v8  ;;  %v16527_v28 = vpop.f32.mrf.mxu1  ;;  %7788 = vmatmul.mubr.bf16.gmra.mxu1 %v14114_v46  ;;  %v14129_v46 = vld [vmem:[%s22492_s1 + $0x10e4] ss:$40 sps:$4 sm:$0xff]  }
 0x1e3   :  { %22685 = vst [vmem:[#allocation89_spill] sm:$0xff] %v16525_v22  ;;  %22686 = vst [vmem:[#allocation90_spill] sm:$0xff] %v16527_v28  ;;  %7282 = vmatprep.mubr.bf16.mxu0 %v14121_v10  ;;  %7795 = vmatprep.mubr.bf16.mxu1 %v14124_v16  ;;  %v14132_v8 = vld [vmem:[%s22492_s1 + $0x46c] ss:$40 sps:$4 sm:$0xff]  }
 0x1e4   :  { %v7086_v40 = vpop.f32.mrf.mxu0  ;;  %v7566_v53 = vpop.f32.mrf.mxu1 }
 0x1e6   :  { %v16535_v52 = vpop.f32.mrf.mxu0  ;;  %v16537_v49 = vpop.f32.mrf.mxu1 }
 0x1e7   :  { %22687 = vst [vmem:[#allocation91_spill] sm:$0xff] %v16535_v52  ;;  %22688 = vst [vmem:[#allocation92_spill] sm:$0xff] %v16537_v49 }
 0x1e8   :  { %v7089_v40 = vpop.f32.mrf.mxu0  ;;  %v7569_v53 = vpop.f32.mrf.mxu1 }
 0x1e9   :  { %v14130_v40 = vld [vmem:[%s22492_s1 + $0x468] ss:$40 sps:$4 sm:$0xff]  }
 0x1ea   :  { %v16545_v10 = vpop.f32.mrf.mxu0  ;;  %7283 = vmatmul.mubr.bf16.gmra.mxu0 %v14119_v1  ;;  %v16547_v16 = vpop.f32.mrf.mxu1  ;;  %7796 = vmatmul.mubr.bf16.gmra.mxu1 %v14122_v34  ;;  %v14137_v34 = vld [vmem:[%s22492_s1 + $0x1134] ss:$40 sps:$4 sm:$0xff]  }
 0x1eb   :  { %22689 = vst [vmem:[#allocation93_spill] sm:$0xff] %v16545_v10  ;;  %22690 = vst [vmem:[#allocation94_spill] sm:$0xff] %v16547_v16  ;;  %7290 = vmatprep.mubr.bf16.mxu0 %v14129_v46  ;;  %7803 = vmatprep.mubr.bf16.mxu1 %v14132_v8  ;;  %v14140_v1 = vld [vmem:[%s22492_s1 + $0x4bc] ss:$40 sps:$4 sm:$0xff]   ;;  %v14135_v10 = vld [vmem:[%s22492_s1 + $0x1130] ss:$40 sps:$4 sm:$0xff]  }
 0x1ec   :  { %v7094_v28 = vpop.f32.mrf.mxu0  ;;  %v7574_v49 = vpop.f32.mrf.mxu1 }
 0x1ee   :  { %v16549_v52 = vpop.f32.mrf.mxu0  ;;  %v16551_v22 = vpop.f32.mrf.mxu1 }
 0x1ef   :  { %22691 = vst [vmem:[#allocation95_spill] sm:$0xff] %v16549_v52  ;;  %22692 = vst [vmem:[#allocation96_spill] sm:$0xff] %v16551_v22 }
 0x1f0   :  { %v7097_v28 = vpop.f32.mrf.mxu0  ;;  %v7577_v49 = vpop.f32.mrf.mxu1 }
 0x1f1   :  { %v14138_v28 = vld [vmem:[%s22492_s1 + $0x4b8] ss:$40 sps:$4 sm:$0xff]  }
 0x1f2   :  { %v16565_v46 = vpop.f32.mrf.mxu0  ;;  %7291 = vmatmul.mubr.bf16.gmra.mxu0 %v14127_v0  ;;  %v16567_v8 = vpop.f32.mrf.mxu1  ;;  %7804 = vmatmul.mubr.bf16.gmra.mxu1 %v14130_v40  ;;  %v14145_v0 = vld [vmem:[%s22492_s1 + $0x1184] ss:$40 sps:$4 sm:$0xff]  }
 0x1f3   :  { %22693 = vst [vmem:[#allocation97_spill] sm:$0xff] %v16565_v46  ;;  %22694 = vst [vmem:[#allocation98_spill] sm:$0xff] %v16567_v8  ;;  %7298 = vmatprep.mubr.bf16.mxu0 %v14137_v34  ;;  %7811 = vmatprep.mubr.bf16.mxu1 %v14140_v1  ;;  %v14143_v46 = vld [vmem:[%s22492_s1 + $0x1180] ss:$40 sps:$4 sm:$0xff]  }
 0x1f4   :  { %v7102_v53 = vpop.f32.mrf.mxu0  ;;  %v7582_v22 = vpop.f32.mrf.mxu1 }
 0x1f5   :  { %v14148_v22 = vld [vmem:[%s22492_s1 + $0x50c] ss:$40 sps:$4 sm:$0xff]  }
 0x1f6   :  { %v16569_v16 = vpop.f32.mrf.mxu0  ;;  %v16571_v52 = vpop.f32.mrf.mxu1 }
 0x1f7   :  { %22695 = vst [vmem:[#allocation99_spill] sm:$0xff] %v16569_v16  ;;  %22696 = vst [vmem:[#allocation100_spill] sm:$0xff] %v16571_v52 }
 0x1f8   :  { %v7105_v40 = vpop.f32.mrf.mxu0  ;;  %v7585_v34 = vpop.f32.mrf.mxu1 }
 0x1f9   :  { %v14146_v40 = vld [vmem:[%s22492_s1 + $0x508] ss:$40 sps:$4 sm:$0xff]  }
 0x1fa   :  { %v16585_v1 = vpop.f32.mrf.mxu0  ;;  %7299 = vmatmul.mubr.bf16.gmra.mxu0 %v14135_v10  ;;  %v16587_v49 = vpop.f32.mrf.mxu1  ;;  %7812 = vmatmul.mubr.bf16.gmra.mxu1 %v14138_v28  ;;  %v14153_v10 = vld [vmem:[%s22492_s1 + $0x11d4] ss:$40 sps:$4 sm:$0xff]  }
 0x1fb   :  { %22697 = vst [vmem:[#allocation101_spill] sm:$0xff] %v16585_v1  ;;  %22698 = vst [vmem:[#allocation102_spill] sm:$0xff] %v16587_v49  ;;  %7306 = vmatprep.mubr.bf16.mxu0 %v14145_v0  ;;  %7819 = vmatprep.mubr.bf16.mxu1 %v14148_v22  ;;  %v14151_v1 = vld [vmem:[%s22492_s1 + $0x11d0] ss:$40 sps:$4 sm:$0xff]  }
 0x1fc   :  { %v7110_v53 = vpop.f32.mrf.mxu0  ;;  %v7590_v52 = vpop.f32.mrf.mxu1 }
 0x1fd   :  { %v14156_v52 = vld [vmem:[%s22492_s1 + $0x55c] ss:$40 sps:$4 sm:$0xff]  }
 0x1fe   :  { %v16589_v8 = vpop.f32.mrf.mxu0  ;;  %v16591_v16 = vpop.f32.mrf.mxu1 }
 0x1ff   :  { %22699 = vst [vmem:[#allocation103_spill] sm:$0xff] %v16589_v8  ;;  %22700 = vst [vmem:[#allocation104_spill] sm:$0xff] %v16591_v16 }
 0x200   :  { %v7113_v28 = vpop.f32.mrf.mxu0  ;;  %v7593_v0 = vpop.f32.mrf.mxu1 }
 0x201   :  { %v14154_v28 = vld [vmem:[%s22492_s1 + $0x558] ss:$40 sps:$4 sm:$0xff]  }
 0x202   :  { %v16605_v22 = vpop.f32.mrf.mxu0  ;;  %7307 = vmatmul.mubr.bf16.gmra.mxu0 %v14143_v46  ;;  %v16607_v34 = vpop.f32.mrf.mxu1  ;;  %7820 = vmatmul.mubr.bf16.gmra.mxu1 %v14146_v40  ;;  %v14161_v46 = vld [vmem:[%s22492_s1 + $0x1224] ss:$40 sps:$4 sm:$0xff]  }
 0x203   :  { %22701 = vst [vmem:[#allocation105_spill] sm:$0xff] %v16605_v22  ;;  %22702 = vst [vmem:[#allocation106_spill] sm:$0xff] %v16607_v34  ;;  %7314 = vmatprep.mubr.bf16.mxu0 %v14153_v10  ;;  %7827 = vmatprep.mubr.bf16.mxu1 %v14156_v52  ;;  %v14159_v22 = vld [vmem:[%s22492_s1 + $0x1220] ss:$40 sps:$4 sm:$0xff]  }
 0x204   :  { %v7118_v53 = vpop.f32.mrf.mxu0  ;;  %v7598_v16 = vpop.f32.mrf.mxu1 }
 0x205   :  { %v14164_v16 = vld [vmem:[%s22492_s1 + $0x5ac] ss:$40 sps:$4 sm:$0xff]  }
 0x206   :  { %v16609_v49 = vpop.f32.mrf.mxu0  ;;  %v16611_v8 = vpop.f32.mrf.mxu1 }
 0x207   :  { %22703 = vst [vmem:[#allocation107_spill] sm:$0xff] %v16609_v49  ;;  %22704 = vst [vmem:[#allocation108_spill] sm:$0xff] %v16611_v8 }
 0x208   :  { %v7121_v40 = vpop.f32.mrf.mxu0  ;;  %v7601_v10 = vpop.f32.mrf.mxu1 }
 0x209   :  { %v14162_v40 = vld [vmem:[%s22492_s1 + $0x5a8] ss:$40 sps:$4 sm:$0xff]  }
 0x20a   :  { %v16625_v52 = vpop.f32.mrf.mxu0  ;;  %7315 = vmatmul.mubr.bf16.gmra.mxu0 %v14151_v1  ;;  %v16627_v0 = vpop.f32.mrf.mxu1  ;;  %7828 = vmatmul.mubr.bf16.gmra.mxu1 %v14154_v28  ;;  %v14169_v1 = vld [vmem:[%s22492_s1 + $0x1274] ss:$40 sps:$4 sm:$0xff]  }
 0x20b   :  { %22705 = vst [vmem:[#allocation109_spill] sm:$0xff] %v16625_v52  ;;  %22706 = vst [vmem:[#allocation110_spill] sm:$0xff] %v16627_v0  ;;  %7322 = vmatprep.mubr.bf16.mxu0 %v14161_v46  ;;  %7835 = vmatprep.mubr.bf16.mxu1 %v14164_v16  ;;  %v14167_v52 = vld [vmem:[%s22492_s1 + $0x1270] ss:$40 sps:$4 sm:$0xff]  }
 0x20c   :  { %v7126_v53 = vpop.f32.mrf.mxu0  ;;  %v7606_v8 = vpop.f32.mrf.mxu1 }
 0x20d   :  { %v14172_v8 = vld [vmem:[%s22492_s1 + $0x5fc] ss:$40 sps:$4 sm:$0xff]  }
 0x20e   :  { %v16629_v34 = vpop.f32.mrf.mxu0  ;;  %v16631_v49 = vpop.f32.mrf.mxu1 }
 0x20f   :  { %22707 = vst [vmem:[#allocation111_spill] sm:$0xff] %v16629_v34  ;;  %22708 = vst [vmem:[#allocation112_spill] sm:$0xff] %v16631_v49 }
 0x210   :  { %v7129_v28 = vpop.f32.mrf.mxu0  ;;  %v7609_v46 = vpop.f32.mrf.mxu1 }
 0x211   :  { %v14170_v28 = vld [vmem:[%s22492_s1 + $0x5f8] ss:$40 sps:$4 sm:$0xff]  }
 0x212   :  { %v16645_v16 = vpop.f32.mrf.mxu0  ;;  %7323 = vmatmul.mubr.bf16.gmra.mxu0 %v14159_v22  ;;  %v16647_v10 = vpop.f32.mrf.mxu1  ;;  %7836 = vmatmul.mubr.bf16.gmra.mxu1 %v14162_v40  ;;  %v14177_v22 = vld [vmem:[%s22492_s1 + $0x64c] ss:$40 sps:$4 sm:$0xff]  }
 0x213   :  { %22709 = vst [vmem:[#allocation113_spill] sm:$0xff] %v16645_v16  ;;  %22710 = vst [vmem:[#allocation114_spill] sm:$0xff] %v16647_v10  ;;  %7330 = vmatprep.mubr.bf16.mxu0 %v14169_v1  ;;  %7843 = vmatprep.mubr.bf16.mxu1 %v14172_v8  ;;  %v14175_v16 = vld [vmem:[%s22492_s1 + $0x648] ss:$40 sps:$4 sm:$0xff]  }
 0x214   :  { %v7134_v53 = vpop.f32.mrf.mxu0  ;;  %v7614_v49 = vpop.f32.mrf.mxu1 }
 0x215   :  { %v14180_v49 = vld [vmem:[%s22492_s1 + $0x14] ss:$40 sps:$4 sm:$0xff]  }
 0x216   :  { %v16649_v0 = vpop.f32.mrf.mxu0  ;;  %v16651_v34 = vpop.f32.mrf.mxu1 }
 0x217   :  { %22711 = vst [vmem:[#allocation115_spill] sm:$0xff] %v16649_v0  ;;  %22712 = vst [vmem:[#allocation116_spill] sm:$0xff] %v16651_v34 }
 0x218   :  { %v7137_v40 = vpop.f32.mrf.mxu0  ;;  %v7617_v1 = vpop.f32.mrf.mxu1 }
 0x219   :  { %v14178_v40 = vld [vmem:[%s22492_s1 + $0x10] ss:$40 sps:$4 sm:$0xff]  }
 0x21a   :  { %v16665_v8 = vpop.f32.mrf.mxu0  ;;  %7331 = vmatmul.mubr.bf16.gmra.mxu0 %v14167_v52  ;;  %v16667_v46 = vpop.f32.mrf.mxu1  ;;  %7844 = vmatmul.mubr.bf16.gmra.mxu1 %v14170_v28  ;;  %v14183_v52 = vld [vmem:[%s22492_s1 + $0x69c] ss:$40 sps:$4 sm:$0xff]  }
 0x21b   :  { %22713 = vst [vmem:[#allocation117_spill] sm:$0xff] %v16665_v8  ;;  %22714 = vst [vmem:[#allocation118_spill] sm:$0xff] %v16667_v46  ;;  %7851 = vmatprep.mubr.bf16.mxu1 %v14177_v22  ;;  %8524 = vmatprep.mubr.bf16.mxu0 %v14180_v49  ;;  %v14181_v8 = vld [vmem:[%s22492_s1 + $0x698] ss:$40 sps:$4 sm:$0xff]  }
 0x21c   :  { %v7142_v53 = vpop.f32.mrf.mxu0  ;;  %v7622_v34 = vpop.f32.mrf.mxu1 }
 0x21d   :  { %v14186_v34 = vld [vmem:[%s22492_s1 + $0x64] ss:$40 sps:$4 sm:$0xff]  }
 0x21e   :  { %v16669_v10 = vpop.f32.mrf.mxu0  ;;  %v16671_v0 = vpop.f32.mrf.mxu1 }
 0x21f   :  { %22715 = vst [vmem:[#allocation119_spill] sm:$0xff] %v16669_v10  ;;  %22716 = vst [vmem:[#allocation120_spill] sm:$0xff] %v16671_v0 }
 0x220   :  { %v7145_v28 = vpop.f32.mrf.mxu0  ;;  %v7625_v22 = vpop.f32.mrf.mxu1 }
 0x221   :  { %v14184_v28 = vld [vmem:[%s22492_s1 + $0x60] ss:$40 sps:$4 sm:$0xff]  }
 0x222   :  { %v16685_v49 = vpop.f32.mrf.mxu0  ;;  %v16687_v1 = vpop.f32.mrf.mxu1  ;;  %7852 = vmatmul.mubr.bf16.gmra.mxu1 %v14175_v16  ;;  %8525 = vmatmul.mubr.bf16.vlgmr.msra.gmra.mxu0 %v14178_v40  ;;  %v14189_v16 = vld [vmem:[%s22492_s1 + $0x6ec] ss:$40 sps:$4 sm:$0xff]  }
 0x223   :  { %22717 = vst [vmem:[#allocation121_spill] sm:$0xff] %v16685_v49  ;;  %22718 = vst [vmem:[#allocation122_spill] sm:$0xff] %v16687_v1  ;;  %7859 = vmatprep.mubr.bf16.mxu1 %v14183_v52  ;;  %8532 = vmatprep.mubr.bf16.mxu0 %v14186_v34  ;;  %v14187_v49 = vld [vmem:[%s22492_s1 + $0x6e8] ss:$40 sps:$4 sm:$0xff]  }
 0x224   :  { %v7150_v53 = vpop.f32.mrf.mxu0  ;;  %v7630_v0 = vpop.f32.mrf.mxu1 }
 0x225   :  { %v14192_v0 = vld [vmem:[%s22492_s1 + $0xb4] ss:$40 sps:$4 sm:$0xff]  }
 0x226   :  { %v16689_v46 = vpop.f32.mrf.mxu0  ;;  %v16691_v10 = vpop.f32.mrf.mxu1 }
 0x227   :  { %22719 = vst [vmem:[#allocation123_spill] sm:$0xff] %v16689_v46  ;;  %22720 = vst [vmem:[#allocation124_spill] sm:$0xff] %v16691_v10 }
 0x228   :  { %v7153_v40 = vpop.f32.mrf.mxu0  ;;  %v7633_v52 = vpop.f32.mrf.mxu1 }
 0x229   :  { %v14190_v40 = vld [vmem:[%s22492_s1 + $0xb0] ss:$40 sps:$4 sm:$0xff]  }
 0x22a   :  { %v16705_v34 = vpop.f32.mrf.mxu0  ;;  %v16707_v22 = vpop.f32.mrf.mxu1  ;;  %7860 = vmatmul.mubr.bf16.gmra.mxu1 %v14181_v8  ;;  %8533 = vmatmul.mubr.bf16.gmra.mxu0 %v14184_v28  ;;  %v14195_v8 = vld [vmem:[%s22492_s1 + $0x73c] ss:$40 sps:$4 sm:$0xff]  }
 0x22b   :  { %22721 = vst [vmem:[#allocation125_spill] sm:$0xff] %v16705_v34  ;;  %22722 = vst [vmem:[#allocation126_spill] sm:$0xff] %v16707_v22  ;;  %7867 = vmatprep.mubr.bf16.mxu1 %v14189_v16  ;;  %8540 = vmatprep.mubr.bf16.mxu0 %v14192_v0  ;;  %v14193_v34 = vld [vmem:[%s22492_s1 + $0x738] ss:$40 sps:$4 sm:$0xff]  }
 0x22c   :  { %v7158_v53 = vpop.f32.mrf.mxu0  ;;  %v7638_v10 = vpop.f32.mrf.mxu1 }
 0x22d   :  { %v14198_v10 = vld [vmem:[%s22492_s1 + $0x104] ss:$40 sps:$4 sm:$0xff]  }
 0x22e   :  { %v16709_v1 = vpop.f32.mrf.mxu0  ;;  %v16711_v46 = vpop.f32.mrf.mxu1 }
 0x22f   :  { %22723 = vst [vmem:[#allocation127_spill] sm:$0xff] %v16709_v1  ;;  %22724 = vst [vmem:[#allocation128_spill] sm:$0xff] %v16711_v46 }
 0x230   :  { %v7161_v28 = vpop.f32.mrf.mxu0  ;;  %v7641_v16 = vpop.f32.mrf.mxu1 }
 0x231   :  { %v14196_v28 = vld [vmem:[%s22492_s1 + $0x100] ss:$40 sps:$4 sm:$0xff]  }
 0x232   :  { %v16725_v0 = vpop.f32.mrf.mxu0  ;;  %v16727_v52 = vpop.f32.mrf.mxu1  ;;  %7868 = vmatmul.mubr.bf16.gmra.mxu1 %v14187_v49  ;;  %8541 = vmatmul.mubr.bf16.gmra.mxu0 %v14190_v40  ;;  %v14201_v49 = vld [vmem:[%s22492_s1 + $0x78c] ss:$40 sps:$4 sm:$0xff]  }
 0x233   :  { %22725 = vst [vmem:[#allocation129_spill] sm:$0xff] %v16725_v0  ;;  %22726 = vst [vmem:[#allocation130_spill] sm:$0xff] %v16727_v52  ;;  %7875 = vmatprep.mubr.bf16.mxu1 %v14195_v8  ;;  %8548 = vmatprep.mubr.bf16.mxu0 %v14198_v10  ;;  %v14199_v0 = vld [vmem:[%s22492_s1 + $0x788] ss:$40 sps:$4 sm:$0xff]  }
 0x234   :  { %v7166_v53 = vpop.f32.mrf.mxu0  ;;  %v7646_v46 = vpop.f32.mrf.mxu1 }
 0x235   :  { %v14204_v46 = vld [vmem:[%s22492_s1 + $0x154] ss:$40 sps:$4 sm:$0xff]  }
 0x236   :  { %v16729_v22 = vpop.f32.mrf.mxu0  ;;  %v16731_v1 = vpop.f32.mrf.mxu1 }
 0x237   :  { %22727 = vst [vmem:[#allocation131_spill] sm:$0xff] %v16729_v22  ;;  %22728 = vst [vmem:[#allocation132_spill] sm:$0xff] %v16731_v1 }
 0x238   :  { %v7169_v40 = vpop.f32.mrf.mxu0  ;;  %v7649_v8 = vpop.f32.mrf.mxu1 }
 0x239   :  { %v14202_v40 = vld [vmem:[%s22492_s1 + $0x150] ss:$40 sps:$4 sm:$0xff]  }
 0x23a   :  { %v16745_v10 = vpop.f32.mrf.mxu0  ;;  %v16747_v16 = vpop.f32.mrf.mxu1  ;;  %7876 = vmatmul.mubr.bf16.gmra.mxu1 %v14193_v34  ;;  %8549 = vmatmul.mubr.bf16.gmra.mxu0 %v14196_v28  ;;  %v14207_v34 = vld [vmem:[%s22492_s1 + $0x7dc] ss:$40 sps:$4 sm:$0xff]  }
 0x23b   :  { %22729 = vst [vmem:[#allocation133_spill] sm:$0xff] %v16745_v10  ;;  %22730 = vst [vmem:[#allocation134_spill] sm:$0xff] %v16747_v16  ;;  %7883 = vmatprep.mubr.bf16.mxu1 %v14201_v49  ;;  %8556 = vmatprep.mubr.bf16.mxu0 %v14204_v46  ;;  %v14205_v10 = vld [vmem:[%s22492_s1 + $0x7d8] ss:$40 sps:$4 sm:$0xff]  }
 0x23c   :  { %v7174_v53 = vpop.f32.mrf.mxu0  ;;  %v7654_v1 = vpop.f32.mrf.mxu1 }
 0x23d   :  { %v14210_v1 = vld [vmem:[%s22492_s1 + $0x1a4] ss:$40 sps:$4 sm:$0xff]  }
 0x23e   :  { %v16749_v52 = vpop.f32.mrf.mxu0  ;;  %v16751_v22 = vpop.f32.mrf.mxu1 }
 0x23f   :  { %22731 = vst [vmem:[#allocation135_spill] sm:$0xff] %v16749_v52  ;;  %22732 = vst [vmem:[#allocation136_spill] sm:$0xff] %v16751_v22 }
 0x240   :  { %v7177_v28 = vpop.f32.mrf.mxu0  ;;  %v7657_v49 = vpop.f32.mrf.mxu1 }
 0x241   :  { %v14208_v28 = vld [vmem:[%s22492_s1 + $0x1a0] ss:$40 sps:$4 sm:$0xff]  }
 0x242   :  { %v16765_v46 = vpop.f32.mrf.mxu0  ;;  %v16767_v8 = vpop.f32.mrf.mxu1  ;;  %7884 = vmatmul.mubr.bf16.gmra.mxu1 %v14199_v0  ;;  %8557 = vmatmul.mubr.bf16.gmra.mxu0 %v14202_v40  ;;  %v14213_v0 = vld [vmem:[%s22492_s1 + $0x82c] ss:$40 sps:$4 sm:$0xff]  }
 0x243   :  { %22733 = vst [vmem:[#allocation137_spill] sm:$0xff] %v16765_v46  ;;  %7891 = vmatprep.mubr.bf16.mxu1 %v14207_v34  ;;  %8564 = vmatprep.mubr.bf16.mxu0 %v14210_v1 }
 0x244   :  { %v7182_v53 = vpop.f32.mrf.mxu0  ;;  %v7695_v22 = vpop.f32.mrf.mxu1 }
 0x245   :  { %v14216_v22 = vld [vmem:[%s22492_s1 + $0x1f4] ss:$40 sps:$4 sm:$0xff]  }
 0x246   :  { %v16769_v16 = vpop.f32.mrf.mxu0  ;;  %v16771_v52 = vpop.f32.mrf.mxu1 }
 0x247   :  { %22734 = vst [vmem:[#allocation138_spill] sm:$0xff] %v16769_v16 }
 0x248   :  { %v7185_v40 = vpop.f32.mrf.mxu0  ;;  %v7698_v34 = vpop.f32.mrf.mxu1 }
 0x249   :  { %v14214_v40 = vld [vmem:[%s22492_s1 + $0x1f0] ss:$40 sps:$4 sm:$0xff]  }
 0x24a   :  { %v16785_v1 = vpop.f32.mrf.mxu0  ;;  %v16787_v49 = vpop.f32.mrf.mxu1  ;;  %7892 = vmatmul.mubr.bf16.gmra.mxu1 %v14205_v10  ;;  %8565 = vmatmul.mubr.bf16.gmra.mxu0 %v14208_v28  ;;  %v14219_v10 = vld [vmem:[%s22492_s1 + $0x87c] ss:$40 sps:$4 sm:$0xff]  }
 0x24b   :  { %22735 = vst [vmem:[#allocation139_spill] sm:$0xff] %v16785_v1  ;;  %7899 = vmatprep.mubr.bf16.mxu1 %v14213_v0  ;;  %8572 = vmatprep.mubr.bf16.mxu0 %v14216_v22 }
 0x24c   :  { %v7190_v53 = vpop.f32.mrf.mxu0  ;;  %v7703_v16 = vpop.f32.mrf.mxu1 }
 0x24d   :  { %v14222_v16 = vld [vmem:[%s22492_s1 + $0x244] ss:$40 sps:$4 sm:$0xff]  }
 0x24e   :  { %v16789_v46 = vpop.f32.mrf.mxu0  ;;  %v16791_v58 = vpop.f32.mrf.mxu1 }
 0x24f   :  { %22736 = vst [vmem:[#allocation140_spill] sm:$0xff] %v16789_v46 }
 0x250   :  { %v7193_v28 = vpop.f32.mrf.mxu0  ;;  %v7706_v0 = vpop.f32.mrf.mxu1 }
 0x251   :  { %v14220_v28 = vld [vmem:[%s22492_s1 + $0x240] ss:$40 sps:$4 sm:$0xff]  }
 0x252   :  { %v16805_v22 = vpop.f32.mrf.mxu0  ;;  %v16807_v34 = vpop.f32.mrf.mxu1  ;;  %7900 = vmatmul.mubr.bf16.gmra.mxu1 %v14211_v25  ;;  %8573 = vmatmul.mubr.bf16.gmra.mxu0 %v14214_v40  ;;  %v14225_v25 = vld [vmem:[%s22492_s1 + $0x8cc] ss:$40 sps:$4 sm:$0xff]  }
 0x253   :  { %22737 = vst [vmem:[#allocation141_spill] sm:$0xff] %v16805_v22  ;;  %7907 = vmatprep.mubr.bf16.mxu1 %v14219_v10  ;;  %8580 = vmatprep.mubr.bf16.mxu0 %v14222_v16 }
 0x254   :  { %v7198_v53 = vpop.f32.mrf.mxu0  ;;  %v7711_v46 = vpop.f32.mrf.mxu1 }
 0x255   :  { %v14228_v46 = vld [vmem:[%s22492_s1 + $0x294] ss:$40 sps:$4 sm:$0xff]  }
 0x256   :  { %v16809_v1 = vpop.f32.mrf.mxu0  ;;  %v16811_v7 = vpop.f32.mrf.mxu1 }
 0x257   :  { %22738 = vst [vmem:[#allocation142_spill] sm:$0xff] %v16809_v1 }
 0x258   :  { %v7201_v40 = vpop.f32.mrf.mxu0  ;;  %v7714_v10 = vpop.f32.mrf.mxu1 }
 0x259   :  { %v14226_v40 = vld [vmem:[%s22492_s1 + $0x290] ss:$40 sps:$4 sm:$0xff]  }
 0x25a   :  { %v16825_v16 = vpop.f32.mrf.mxu0  ;;  %v16827_v0 = vpop.f32.mrf.mxu1  ;;  %7908 = vmatmul.mubr.bf16.gmra.mxu1 %v14217_v43  ;;  %8581 = vmatmul.mubr.bf16.gmra.mxu0 %v14220_v28  ;;  %v14231_v43 = vld [vmem:[%s22492_s1 + $0x91c] ss:$40 sps:$4 sm:$0xff]  }
 0x25b   :  { %22739 = vst [vmem:[#allocation143_spill] sm:$0xff] %v16825_v16  ;;  %7915 = vmatprep.mubr.bf16.mxu1 %v14225_v25  ;;  %8588 = vmatprep.mubr.bf16.mxu0 %v14228_v46 }
 0x25c   :  { %v7206_v53 = vpop.f32.mrf.mxu0  ;;  %v7719_v1 = vpop.f32.mrf.mxu1 }
 0x25d   :  { %v14234_v1 = vld [vmem:[%s22492_s1 + $0x2e4] ss:$40 sps:$4 sm:$0xff]  }
 0x25e   :  { %v16829_v22 = vpop.f32.mrf.mxu0  ;;  %v16831_v17 = vpop.f32.mrf.mxu1 }
 0x25f   :  { %22740 = vst [vmem:[#allocation144_spill] sm:$0xff] %v16829_v22 }
 0x260   :  { %v7209_v28 = vpop.f32.mrf.mxu0  ;;  %v7722_v25 = vpop.f32.mrf.mxu1 }
 0x261   :  { %v14232_v28 = vld [vmem:[%s22492_s1 + $0x2e0] ss:$40 sps:$4 sm:$0xff]  }
 0x262   :  { %v16845_v46 = vpop.f32.mrf.mxu0  ;;  %v16847_v10 = vpop.f32.mrf.mxu1  ;;  %7916 = vmatmul.mubr.bf16.gmra.mxu1 %v14223_v4  ;;  %8589 = vmatmul.mubr.bf16.gmra.mxu0 %v14226_v40  ;;  %v14237_v4 = vld [vmem:[%s22492_s1 + $0x96c] ss:$40 sps:$4 sm:$0xff]  }
 0x263   :  { %22741 = vst [vmem:[#allocation145_spill] sm:$0xff] %v16845_v46  ;;  %7923 = vmatprep.mubr.bf16.mxu1 %v14231_v43  ;;  %8596 = vmatprep.mubr.bf16.mxu0 %v14234_v1 }
 0x264   :  { %v7214_v53 = vpop.f32.mrf.mxu0  ;;  %v7727_v22 = vpop.f32.mrf.mxu1 }
 0x265   :  { %v14240_v22 = vld [vmem:[%s22492_s1 + $0x334] ss:$40 sps:$4 sm:$0xff]  }
 0x266   :  { %v16849_v16 = vpop.f32.mrf.mxu0  ;;  %v16851_v18 = vpop.f32.mrf.mxu1 }
 0x267   :  { %22742 = vst [vmem:[#allocation146_spill] sm:$0xff] %v16849_v16 }
 0x268   :  { %v7217_v40 = vpop.f32.mrf.mxu0  ;;  %v7730_v43 = vpop.f32.mrf.mxu1 }
 0x269   :  { %v14238_v40 = vld [vmem:[%s22492_s1 + $0x330] ss:$40 sps:$4 sm:$0xff]  }
 0x26a   :  { %v16865_v1 = vpop.f32.mrf.mxu0  ;;  %v16867_v25 = vpop.f32.mrf.mxu1  ;;  %7924 = vmatmul.mubr.bf16.gmra.mxu1 %v14229_v20  ;;  %8597 = vmatmul.mubr.bf16.gmra.mxu0 %v14232_v28  ;;  %v14243_v20 = vld [vmem:[%s22492_s1 + $0x9bc] ss:$40 sps:$4 sm:$0xff]  }
 0x26b   :  { %22743 = vst [vmem:[#allocation147_spill] sm:$0xff] %v16865_v1  ;;  %7931 = vmatprep.mubr.bf16.mxu1 %v14237_v4  ;;  %8604 = vmatprep.mubr.bf16.mxu0 %v14240_v22 }
 0x26c   :  { %v7222_v53 = vpop.f32.mrf.mxu0  ;;  %v7735_v16 = vpop.f32.mrf.mxu1 }
 0x26d   :  { %v14246_v16 = vld [vmem:[%s22492_s1 + $0x384] ss:$40 sps:$4 sm:$0xff]  }
 0x26e   :  { %v16869_v46 = vpop.f32.mrf.mxu0  ;;  %v16871_v35 = vpop.f32.mrf.mxu1 }
 0x26f   :  { %22744 = vst [vmem:[#allocation148_spill] sm:$0xff] %v16869_v46 }
 0x270   :  { %v7225_v28 = vpop.f32.mrf.mxu0  ;;  %v7738_v4 = vpop.f32.mrf.mxu1 }
 0x271   :  { %v14244_v28 = vld [vmem:[%s22492_s1 + $0x380] ss:$40 sps:$4 sm:$0xff]  }
 0x272   :  { %v16885_v22 = vpop.f32.mrf.mxu0  ;;  %v16887_v43 = vpop.f32.mrf.mxu1  ;;  %7932 = vmatmul.mubr.bf16.gmra.mxu1 %v14235_v61  ;;  %8605 = vmatmul.mubr.bf16.gmra.mxu0 %v14238_v40  ;;  %v14249_v61 = vld [vmem:[%s22492_s1 + $0xa0c] ss:$40 sps:$4 sm:$0xff]  }
 0x273   :  { %22745 = vst [vmem:[#allocation149_spill] sm:$0xff] %v16885_v22  ;;  %7939 = vmatprep.mubr.bf16.mxu1 %v14243_v20  ;;  %8612 = vmatprep.mubr.bf16.mxu0 %v14246_v16 }
 0x274   :  { %v7230_v53 = vpop.f32.mrf.mxu0  ;;  %v7743_v46 = vpop.f32.mrf.mxu1 }
 0x275   :  { %v14252_v46 = vld [vmem:[%s22492_s1 + $0x3d4] ss:$40 sps:$4 sm:$0xff]  }
 0x276   :  { %v16889_v1 = vpop.f32.mrf.mxu0  ;;  %v16891_v3 = vpop.f32.mrf.mxu1 }
 0x277   :  { %22746 = vst [vmem:[#allocation150_spill] sm:$0xff] %v16889_v1 }
 0x278   :  { %v7233_v40 = vpop.f32.mrf.mxu0  ;;  %v7746_v20 = vpop.f32.mrf.mxu1 }
 0x279   :  { %v14250_v40 = vld [vmem:[%s22492_s1 + $0x3d0] ss:$40 sps:$4 sm:$0xff]  }
 0x27a   :  { %v16905_v16 = vpop.f32.mrf.mxu0  ;;  %v16907_v4 = vpop.f32.mrf.mxu1  ;;  %7940 = vmatmul.mubr.bf16.gmra.mxu1 %v14241_v48  ;;  %8613 = vmatmul.mubr.bf16.gmra.mxu0 %v14244_v28  ;;  %v14255_v48 = vld [vmem:[%s22492_s1 + $0xa5c] ss:$40 sps:$4 sm:$0xff]  }
 0x27b   :  { %22747 = vst [vmem:[#allocation151_spill] sm:$0xff] %v16905_v16  ;;  %7947 = vmatprep.mubr.bf16.mxu1 %v14249_v61  ;;  %8620 = vmatprep.mubr.bf16.mxu0 %v14252_v46 }
 0x27c   :  { %v7238_v53 = vpop.f32.mrf.mxu0  ;;  %v7751_v1 = vpop.f32.mrf.mxu1 }
 0x27d   :  { %v14258_v1 = vld [vmem:[%s22492_s1 + $0x424] ss:$40 sps:$4 sm:$0xff]  }
 0x27e   :  { %v16909_v22 = vpop.f32.mrf.mxu0  ;;  %v16911_v36 = vpop.f32.mrf.mxu1 }
 0x27f   :  { %22748 = vst [vmem:[#allocation152_spill] sm:$0xff] %v16909_v22 }
 0x280   :  { %v7241_v28 = vpop.f32.mrf.mxu0  ;;  %v7754_v61 = vpop.f32.mrf.mxu1 }
 0x281   :  { %v14256_v28 = vld [vmem:[%s22492_s1 + $0x420] ss:$40 sps:$4 sm:$0xff]  }
 0x282   :  { %v16925_v46 = vpop.f32.mrf.mxu0  ;;  %v16927_v20 = vpop.f32.mrf.mxu1  ;;  %7948 = vmatmul.mubr.bf16.gmra.mxu1 %v14247_v13  ;;  %8621 = vmatmul.mubr.bf16.gmra.mxu0 %v14250_v40  ;;  %v14261_v13 = vld [vmem:[%s22492_s1 + $0xaac] ss:$40 sps:$4 sm:$0xff]  }
 0x283   :  { %22749 = vst [vmem:[#allocation153_spill] sm:$0xff] %v16925_v46  ;;  %7955 = vmatprep.mubr.bf16.mxu1 %v14255_v48  ;;  %8628 = vmatprep.mubr.bf16.mxu0 %v14258_v1 }
 0x284   :  { %v7246_v53 = vpop.f32.mrf.mxu0  ;;  %v7759_v22 = vpop.f32.mrf.mxu1 }
 0x285   :  { %v14264_v22 = vld [vmem:[%s22492_s1 + $0x474] ss:$40 sps:$4 sm:$0xff]  }
 0x286   :  { %v16929_v16 = vpop.f32.mrf.mxu0  ;;  %v16931_v62 = vpop.f32.mrf.mxu1 }
 0x287   :  { %22750 = vst [vmem:[#allocation154_spill] sm:$0xff] %v16929_v16 }
 0x288   :  { %v7249_v40 = vpop.f32.mrf.mxu0  ;;  %v7762_v48 = vpop.f32.mrf.mxu1 }
 0x289   :  { %v14262_v40 = vld [vmem:[%s22492_s1 + $0x470] ss:$40 sps:$4 sm:$0xff]  }
 0x28a   :  { %v16945_v1 = vpop.f32.mrf.mxu0  ;;  %v16947_v61 = vpop.f32.mrf.mxu1  ;;  %7956 = vmatmul.mubr.bf16.gmra.mxu1 %v14253_v56  ;;  %8629 = vmatmul.mubr.bf16.gmra.mxu0 %v14256_v28  ;;  %v14267_v56 = vld [vmem:[%s22492_s1 + $0xafc] ss:$40 sps:$4 sm:$0xff]  }
 0x28b   :  { %22751 = vst [vmem:[#allocation155_spill] sm:$0xff] %v16945_v1  ;;  %7963 = vmatprep.mubr.bf16.mxu1 %v14261_v13  ;;  %8636 = vmatprep.mubr.bf16.mxu0 %v14264_v22 }
 0x28c   :  { %v7254_v53 = vpop.f32.mrf.mxu0  ;;  %v7767_v16 = vpop.f32.mrf.mxu1 }
 0x28d   :  { %v14270_v16 = vld [vmem:[%s22492_s1 + $0x4c4] ss:$40 sps:$4 sm:$0xff]  }
 0x28e   :  { %v16949_v46 = vpop.f32.mrf.mxu0  ;;  %v16951_v37 = vpop.f32.mrf.mxu1 }
 0x28f   :  { %22752 = vst [vmem:[#allocation156_spill] sm:$0xff] %v16949_v46 }
 0x290   :  { %v7257_v28 = vpop.f32.mrf.mxu0  ;;  %v7770_v13 = vpop.f32.mrf.mxu1 }
 0x291   :  { %v14268_v28 = vld [vmem:[%s22492_s1 + $0x4c0] ss:$40 sps:$4 sm:$0xff]  }
 0x292   :  { %v16965_v22 = vpop.f32.mrf.mxu0  ;;  %v16967_v48 = vpop.f32.mrf.mxu1  ;;  %7964 = vmatmul.mubr.bf16.gmra.mxu1 %v14259_v38  ;;  %8637 = vmatmul.mubr.bf16.gmra.mxu0 %v14262_v40  ;;  %v14273_v38 = vld [vmem:[%s22492_s1 + $0xb4c] ss:$40 sps:$4 sm:$0xff]  }
 0x293   :  { %22753 = vst [vmem:[#allocation157_spill] sm:$0xff] %v16965_v22  ;;  %7971 = vmatprep.mubr.bf16.mxu1 %v14267_v56  ;;  %8644 = vmatprep.mubr.bf16.mxu0 %v14270_v16 }
 0x294   :  { %v7262_v53 = vpop.f32.mrf.mxu0  ;;  %v7775_v46 = vpop.f32.mrf.mxu1 }
 0x295   :  { %v14276_v46 = vld [vmem:[%s22492_s1 + $0x514] ss:$40 sps:$4 sm:$0xff]  }
 0x296   :  { %v16969_v1 = vpop.f32.mrf.mxu0  ;;  %v16971_v26 = vpop.f32.mrf.mxu1 }
 0x297   :  { %22754 = vst [vmem:[#allocation158_spill] sm:$0xff] %v16969_v1 }
 0x298   :  { %v7265_v40 = vpop.f32.mrf.mxu0  ;;  %v7778_v56 = vpop.f32.mrf.mxu1 }
 0x299   :  { %v14274_v40 = vld [vmem:[%s22492_s1 + $0x510] ss:$40 sps:$4 sm:$0xff]  }
 0x29a   :  { %v16985_v16 = vpop.f32.mrf.mxu0  ;;  %v16987_v13 = vpop.f32.mrf.mxu1  ;;  %7972 = vmatmul.mubr.bf16.gmra.mxu1 %v14265_v44  ;;  %8645 = vmatmul.mubr.bf16.gmra.mxu0 %v14268_v28  ;;  %v14279_v44 = vld [vmem:[%s22492_s1 + $0xb9c] ss:$40 sps:$4 sm:$0xff]  }
 0x29b   :  { %22755 = vst [vmem:[#allocation159_spill] sm:$0xff] %v16985_v16  ;;  %7979 = vmatprep.mubr.bf16.mxu1 %v14273_v38  ;;  %8652 = vmatprep.mubr.bf16.mxu0 %v14276_v46 }
 0x29c   :  { %v7270_v53 = vpop.f32.mrf.mxu0  ;;  %v7783_v1 = vpop.f32.mrf.mxu1 }
 0x29d   :  { %v14282_v1 = vld [vmem:[%s22492_s1 + $0x564] ss:$40 sps:$4 sm:$0xff]  }
 0x29e   :  { %v16989_v22 = vpop.f32.mrf.mxu0  ;;  %v16991_v29 = vpop.f32.mrf.mxu1 }
 0x29f   :  { %22756 = vst [vmem:[#allocation160_spill] sm:$0xff] %v16989_v22 }
 0x2a0   :  { %v7273_v28 = vpop.f32.mrf.mxu0  ;;  %v7786_v38 = vpop.f32.mrf.mxu1 }
 0x2a1   :  { %v14280_v28 = vld [vmem:[%s22492_s1 + $0x560] ss:$40 sps:$4 sm:$0xff]  }
 0x2a2   :  { %v17005_v46 = vpop.f32.mrf.mxu0  ;;  %v17007_v56 = vpop.f32.mrf.mxu1  ;;  %7980 = vmatmul.mubr.bf16.gmra.mxu1 %v14271_v41  ;;  %8653 = vmatmul.mubr.bf16.gmra.mxu0 %v14274_v40  ;;  %v14285_v41 = vld [vmem:[%s22492_s1 + $0xbec] ss:$40 sps:$4 sm:$0xff]  }
 0x2a3   :  { %22757 = vst [vmem:[#allocation161_spill] sm:$0xff] %v17005_v46  ;;  %7987 = vmatprep.mubr.bf16.mxu1 %v14279_v44  ;;  %8660 = vmatprep.mubr.bf16.mxu0 %v14282_v1 }
 0x2a4   :  { %v7278_v53 = vpop.f32.mrf.mxu0  ;;  %v7791_v22 = vpop.f32.mrf.mxu1 }
 0x2a5   :  { %v14288_v22 = vld [vmem:[%s22492_s1 + $0x5b4] ss:$40 sps:$4 sm:$0xff]  }
 0x2a6   :  { %v17009_v16 = vpop.f32.mrf.mxu0  ;;  %v17011_v2 = vpop.f32.mrf.mxu1 }
 0x2a7   :  { %22758 = vst [vmem:[#allocation162_spill] sm:$0xff] %v17009_v16  ;;  %22759 = vst [vmem:[#allocation163_spill] sm:$0xff] %v17011_v2  ;;  %v14283_v2 = vld [vmem:[%s22492_s1 + $0xbe8] ss:$40 sps:$4 sm:$0xff]  }
 0x2a8   :  { %v7281_v40 = vpop.f32.mrf.mxu0  ;;  %v7794_v44 = vpop.f32.mrf.mxu1 }
 0x2a9   :  { %v14286_v40 = vld [vmem:[%s22492_s1 + $0x5b0] ss:$40 sps:$4 sm:$0xff]  }
 0x2aa   :  { %v17025_v1 = vpop.f32.mrf.mxu0  ;;  %v17027_v38 = vpop.f32.mrf.mxu1  ;;  %7988 = vmatmul.mubr.bf16.gmra.mxu1 %v14277_v11  ;;  %8661 = vmatmul.mubr.bf16.gmra.mxu0 %v14280_v28  ;;  %v14291_v11 = vld [vmem:[%s22492_s1 + $0xc3c] ss:$40 sps:$4 sm:$0xff]  }
 0x2ab   :  { %22760 = vst [vmem:[#allocation164_spill] sm:$0xff] %v17025_v1  ;;  %22761 = vst [vmem:[#allocation165_spill] sm:$0xff] %v17027_v38  ;;  %7995 = vmatprep.mubr.bf16.mxu1 %v14285_v41  ;;  %8668 = vmatprep.mubr.bf16.mxu0 %v14288_v22  ;;  %v14289_v38 = vld [vmem:[%s22492_s1 + $0xc38] ss:$40 sps:$4 sm:$0xff]  }
 0x2ac   :  { %v7286_v53 = vpop.f32.mrf.mxu0  ;;  %v7799_v16 = vpop.f32.mrf.mxu1 }
 0x2ad   :  { %v14294_v16 = vld [vmem:[%s22492_s1 + $0x604] ss:$40 sps:$4 sm:$0xff]  }
 0x2ae   :  { %v17029_v46 = vpop.f32.mrf.mxu0  ;;  %v17031_v54 = vpop.f32.mrf.mxu1 }
 0x2af   :  { %22762 = vst [vmem:[#allocation166_spill] sm:$0xff] %v17029_v46  ;;  %22763 = vst [vmem:[#allocation167_spill] sm:$0xff] %v17031_v54 }
 0x2b0   :  { %v7289_v28 = vpop.f32.mrf.mxu0  ;;  %v7802_v41 = vpop.f32.mrf.mxu1 }
 0x2b1   :  { %v14292_v28 = vld [vmem:[%s22492_s1 + $0x600] ss:$40 sps:$4 sm:$0xff]  }
 0x2b2   :  { %v17045_v22 = vpop.f32.mrf.mxu0  ;;  %v17047_v44 = vpop.f32.mrf.mxu1  ;;  %7996 = vmatmul.mubr.bf16.gmra.mxu1 %v14283_v2  ;;  %8669 = vmatmul.mubr.bf16.gmra.mxu0 %v14286_v40  ;;  %v14297_v2 = vld [vmem:[%s22492_s1 + $0xc8c] ss:$40 sps:$4 sm:$0xff]  }
 0x2b3   :  { %22764 = vst [vmem:[#allocation168_spill] sm:$0xff] %v17045_v22  ;;  %22765 = vst [vmem:[#allocation169_spill] sm:$0xff] %v17047_v44  ;;  %8003 = vmatprep.mubr.bf16.mxu1 %v14291_v11  ;;  %8676 = vmatprep.mubr.bf16.mxu0 %v14294_v16  ;;  %v14295_v44 = vld [vmem:[%s22492_s1 + $0xc88] ss:$40 sps:$4 sm:$0xff]  }
 0x2b4   :  { %v7294_v53 = vpop.f32.mrf.mxu0  ;;  %v7807_v46 = vpop.f32.mrf.mxu1 }
 0x2b5   :  { %v14300_v46 = vld [vmem:[%s22492_s1 + $0x654] ss:$40 sps:$4 sm:$0xff]  }
 0x2b6   :  { %v17049_v1 = vpop.f32.mrf.mxu0  ;;  %v17051_v54 = vpop.f32.mrf.mxu1 }
 0x2b7   :  { %22766 = vst [vmem:[#allocation170_spill] sm:$0xff] %v17049_v1  ;;  %22767 = vst [vmem:[#allocation171_spill] sm:$0xff] %v17051_v54 }
 0x2b8   :  { %v7297_v40 = vpop.f32.mrf.mxu0  ;;  %v7810_v11 = vpop.f32.mrf.mxu1 }
 0x2b9   :  { %v14298_v40 = vld [vmem:[%s22492_s1 + $0x650] ss:$40 sps:$4 sm:$0xff]  }
 0x2ba   :  { %v17065_v16 = vpop.f32.mrf.mxu0  ;;  %v17067_v41 = vpop.f32.mrf.mxu1  ;;  %8004 = vmatmul.mubr.bf16.gmra.mxu1 %v14289_v38  ;;  %8677 = vmatmul.mubr.bf16.gmra.mxu0 %v14292_v28  ;;  %v14303_v38 = vld [vmem:[%s22492_s1 + $0xcdc] ss:$40 sps:$4 sm:$0xff]  }
 0x2bb   :  { %22768 = vst [vmem:[#allocation172_spill] sm:$0xff] %v17065_v16  ;;  %22769 = vst [vmem:[#allocation173_spill] sm:$0xff] %v17067_v41  ;;  %8011 = vmatprep.mubr.bf16.mxu1 %v14297_v2  ;;  %8684 = vmatprep.mubr.bf16.mxu0 %v14300_v46  ;;  %v14301_v41 = vld [vmem:[%s22492_s1 + $0xcd8] ss:$40 sps:$4 sm:$0xff]  }
 0x2bc   :  { %v7302_v53 = vpop.f32.mrf.mxu0  ;;  %v7815_v1 = vpop.f32.mrf.mxu1 }
 0x2bd   :  { %v14306_v1 = vld [vmem:[%s22492_s1 + $0x6a4] ss:$40 sps:$4 sm:$0xff]  }
 0x2be   :  { %v17069_v22 = vpop.f32.mrf.mxu0  ;;  %v17071_v54 = vpop.f32.mrf.mxu1 }
 0x2bf   :  { %22770 = vst [vmem:[#allocation174_spill] sm:$0xff] %v17069_v22  ;;  %22771 = vst [vmem:[#allocation175_spill] sm:$0xff] %v17071_v54 }
 0x2c0   :  { %v7305_v28 = vpop.f32.mrf.mxu0  ;;  %v7818_v2 = vpop.f32.mrf.mxu1 }
 0x2c1   :  { %v14304_v28 = vld [vmem:[%s22492_s1 + $0x6a0] ss:$40 sps:$4 sm:$0xff]  }
 0x2c2   :  { %v17085_v46 = vpop.f32.mrf.mxu0  ;;  %v17087_v11 = vpop.f32.mrf.mxu1  ;;  %8012 = vmatmul.mubr.bf16.gmra.mxu1 %v14295_v44  ;;  %8685 = vmatmul.mubr.bf16.gmra.mxu0 %v14298_v40  ;;  %v14309_v44 = vld [vmem:[%s22492_s1 + $0xd2c] ss:$40 sps:$4 sm:$0xff]  }
 0x2c3   :  { %22772 = vst [vmem:[#allocation176_spill] sm:$0xff] %v17085_v46  ;;  %22773 = vst [vmem:[#allocation177_spill] sm:$0xff] %v17087_v11  ;;  %8019 = vmatprep.mubr.bf16.mxu1 %v14303_v38  ;;  %8692 = vmatprep.mubr.bf16.mxu0 %v14306_v1  ;;  %v14307_v11 = vld [vmem:[%s22492_s1 + $0xd28] ss:$40 sps:$4 sm:$0xff]  }
 0x2c4   :  { %v7310_v53 = vpop.f32.mrf.mxu0  ;;  %v7823_v22 = vpop.f32.mrf.mxu1 }
 0x2c5   :  { %v14312_v22 = vld [vmem:[%s22492_s1 + $0x6f4] ss:$40 sps:$4 sm:$0xff]  }
 0x2c6   :  { %v17089_v16 = vpop.f32.mrf.mxu0  ;;  %v17091_v54 = vpop.f32.mrf.mxu1 }
 0x2c7   :  { %22774 = vst [vmem:[#allocation178_spill] sm:$0xff] %v17089_v16  ;;  %22775 = vst [vmem:[#allocation179_spill] sm:$0xff] %v17091_v54 }
 0x2c8   :  { %v7313_v40 = vpop.f32.mrf.mxu0  ;;  %v7826_v38 = vpop.f32.mrf.mxu1 }
 0x2c9   :  { %v14310_v40 = vld [vmem:[%s22492_s1 + $0x6f0] ss:$40 sps:$4 sm:$0xff]  }
 0x2ca   :  { %v17105_v1 = vpop.f32.mrf.mxu0  ;;  %v17107_v2 = vpop.f32.mrf.mxu1  ;;  %8020 = vmatmul.mubr.bf16.gmra.mxu1 %v14301_v41  ;;  %8693 = vmatmul.mubr.bf16.gmra.mxu0 %v14304_v28  ;;  %v14315_v41 = vld [vmem:[%s22492_s1 + $0xd7c] ss:$40 sps:$4 sm:$0xff]  }
 0x2cb   :  { %22776 = vst [vmem:[#allocation180_spill] sm:$0xff] %v17105_v1  ;;  %22777 = vst [vmem:[#allocation181_spill] sm:$0xff] %v17107_v2  ;;  %8027 = vmatprep.mubr.bf16.mxu1 %v14309_v44  ;;  %8700 = vmatprep.mubr.bf16.mxu0 %v14312_v22  ;;  %v14313_v2 = vld [vmem:[%s22492_s1 + $0xd78] ss:$40 sps:$4 sm:$0xff]  }
 0x2cc   :  { %v7318_v53 = vpop.f32.mrf.mxu0  ;;  %v7831_v16 = vpop.f32.mrf.mxu1 }
 0x2cd   :  { %v14318_v16 = vld [vmem:[%s22492_s1 + $0x744] ss:$40 sps:$4 sm:$0xff]  }
 0x2ce   :  { %v17109_v46 = vpop.f32.mrf.mxu0  ;;  %v17111_v54 = vpop.f32.mrf.mxu1 }
 0x2cf   :  { %22778 = vst [vmem:[#allocation182_spill] sm:$0xff] %v17109_v46  ;;  %22779 = vst [vmem:[#allocation183_spill] sm:$0xff] %v17111_v54 }
 0x2d0   :  { %v7321_v28 = vpop.f32.mrf.mxu0  ;;  %v7834_v44 = vpop.f32.mrf.mxu1 }
 0x2d1   :  { %v14316_v28 = vld [vmem:[%s22492_s1 + $0x740] ss:$40 sps:$4 sm:$0xff]  }
 0x2d2   :  { %v17125_v22 = vpop.f32.mrf.mxu0  ;;  %v17127_v38 = vpop.f32.mrf.mxu1  ;;  %8028 = vmatmul.mubr.bf16.gmra.mxu1 %v14307_v11  ;;  %8701 = vmatmul.mubr.bf16.gmra.mxu0 %v14310_v40  ;;  %v14321_v11 = vld [vmem:[%s22492_s1 + $0xdcc] ss:$40 sps:$4 sm:$0xff]  }
 0x2d3   :  { %22780 = vst [vmem:[#allocation184_spill] sm:$0xff] %v17125_v22  ;;  %22781 = vst [vmem:[#allocation185_spill] sm:$0xff] %v17127_v38  ;;  %8035 = vmatprep.mubr.bf16.mxu1 %v14315_v41  ;;  %8708 = vmatprep.mubr.bf16.mxu0 %v14318_v16  ;;  %v14319_v38 = vld [vmem:[%s22492_s1 + $0xdc8] ss:$40 sps:$4 sm:$0xff]  }
 0x2d4   :  { %v7326_v53 = vpop.f32.mrf.mxu0  ;;  %v7839_v46 = vpop.f32.mrf.mxu1 }
 0x2d5   :  { %v14324_v46 = vld [vmem:[%s22492_s1 + $0x794] ss:$40 sps:$4 sm:$0xff]  }
 0x2d6   :  { %v17129_v1 = vpop.f32.mrf.mxu0  ;;  %v17131_v54 = vpop.f32.mrf.mxu1 }
 0x2d7   :  { %22782 = vst [vmem:[#allocation186_spill] sm:$0xff] %v17129_v1  ;;  %22783 = vst [vmem:[#allocation187_spill] sm:$0xff] %v17131_v54 }
 0x2d8   :  { %v7329_v40 = vpop.f32.mrf.mxu0  ;;  %v7842_v41 = vpop.f32.mrf.mxu1 }
 0x2d9   :  { %v14322_v40 = vld [vmem:[%s22492_s1 + $0x790] ss:$40 sps:$4 sm:$0xff]  }
 0x2da   :  { %v17145_v16 = vpop.f32.mrf.mxu0  ;;  %v17147_v44 = vpop.f32.mrf.mxu1  ;;  %8036 = vmatmul.mubr.bf16.gmra.mxu1 %v14313_v2  ;;  %8709 = vmatmul.mubr.bf16.gmra.mxu0 %v14316_v28  ;;  %v14327_v2 = vld [vmem:[%s22492_s1 + $0xe1c] ss:$40 sps:$4 sm:$0xff]  }
 0x2db   :  { %22784 = vst [vmem:[#allocation188_spill] sm:$0xff] %v17145_v16  ;;  %22785 = vst [vmem:[#allocation189_spill] sm:$0xff] %v17147_v44  ;;  %8043 = vmatprep.mubr.bf16.mxu1 %v14321_v11  ;;  %8716 = vmatprep.mubr.bf16.mxu0 %v14324_v46  ;;  %v7694_v46 = vadd.f32 %v16767_v8, %v15901_v9  ;;  %v7697_v44 = vadd.f32 %v16771_v52, %v15911_v15  ;;  %v14325_v9 = vld [vmem:[%s22492_s1 + $0xe18] ss:$40 sps:$4 sm:$0xff]   ;;  %v14336_v15 = vld [vmem:[%s22492_s1 + $0x834] ss:$40 sps:$4 sm:$0xff]  }
 0x2dc   :  { %v7334_v53 = vpop.f32.mrf.mxu0  ;;  %v7847_v1 = vpop.f32.mrf.mxu1  ;;  %v14328_v8 = vld [vmem:[%s22492_s1 + $0x7e0] ss:$40 sps:$4 sm:$0xff]  }
 0x2dd   :  { %v14330_v1 = vld [vmem:[%s22492_s1 + $0x7e4] ss:$40 sps:$4 sm:$0xff]  }
 0x2de   :  { %v17149_v22 = vpop.f32.mrf.mxu0  ;;  %v17151_v54 = vpop.f32.mrf.mxu1 }
 0x2df   :  { %22786 = vst [vmem:[#allocation190_spill] sm:$0xff] %v17149_v22  ;;  %22787 = vst [vmem:[#allocation191_spill] sm:$0xff] %v17151_v54 }
 0x2e0   :  { %v7337_v28 = vpop.f32.mrf.mxu0  ;;  %v7850_v11 = vpop.f32.mrf.mxu1 }
 0x2e2   :  { %v17167_v41 = vpop.f32.mrf.mxu1  ;;  %8044 = vmatmul.mubr.bf16.gmra.mxu1 %v14319_v38  ;;  %v8526_v53 = vpop.f32.mrf.mxu0  ;;  %8717 = vmatmul.mubr.bf16.gmra.mxu0 %v14322_v40  ;;  %v7702_v40 = vadd.f32 %v16787_v49, %v15921_v21  ;;  %v14331_v21 = vld [vmem:[%s22492_s1 + $0xe68] ss:$40 sps:$4 sm:$0xff]  }
 0x2e3   :  { %v17169_v22 = vadd.f32 %v8526_v53, %v7694_v46  ;;  %8051 = vmatprep.mubr.bf16.mxu1 %v14327_v2  ;;  %8724 = vmatprep.mubr.bf16.mxu0 %v14330_v1  ;;  %v7705_v53 = vadd.f32 %v16791_v58, %v15931_v27  ;;  %v14334_v49 = vld [vmem:[%s22492_s1 + $0x830] ss:$40 sps:$4 sm:$0xff]   ;;  %v14342_v27 = vld [vmem:[%s22492_s1 + $0x884] ss:$40 sps:$4 sm:$0xff]  }
 0x2e4   :  { %v7855_v16 = vpop.f32.mrf.mxu1  ;;  %v8528_v54 = vpop.f32.mrf.mxu0 }
 0x2e5   :  { %v14333_v54 = vld [vmem:[%s22492_s1 + $0xe6c] ss:$40 sps:$4 sm:$0xff]  }
 0x2e6   :  { %v17173_v23 = vpop.f32.mrf.mxu1  ;;  %v8529_v28 = vpop.f32.mrf.mxu0 }
 0x2e7   :  { %v17181_v38 = vadd.f32 %v8529_v28, %v7697_v44 }
 0x2e8   :  { %v7858_v52 = vpop.f32.mrf.mxu1  ;;  %v8531_v16 = vpop.f32.mrf.mxu0 }
 0x2ea   :  { %v17191_v2 = vpop.f32.mrf.mxu1  ;;  %8052 = vmatmul.mubr.bf16.gmra.mxu1 %v14325_v9  ;;  %v8534_v1 = vpop.f32.mrf.mxu0  ;;  %8725 = vmatmul.mubr.bf16.gmra.mxu0 %v14328_v8  ;;  %v14339_v8 = vld [vmem:[%s22492_s1 + $0xebc] ss:$40 sps:$4 sm:$0xff]  }
 0x2eb   :  { %v17193_v44 = vadd.f32 %v8534_v1, %v7702_v40  ;;  %8059 = vmatprep.mubr.bf16.mxu1 %v14333_v54  ;;  %8732 = vmatprep.mubr.bf16.mxu0 %v14336_v15  ;;  %v7710_v15 = vadd.f32 %v16807_v34, %v15941_v33  ;;  %v14337_v33 = vld [vmem:[%s22492_s1 + $0xeb8] ss:$40 sps:$4 sm:$0xff]  }
 0x2ec   :  { %v7863_v11 = vpop.f32.mrf.mxu1  ;;  %v8536_v46 = vpop.f32.mrf.mxu0  ;;  %v14340_v34 = vld [vmem:[%s22492_s1 + $0x880] ss:$40 sps:$4 sm:$0xff]  }
 0x2ee   :  { %v17197_v28 = vpop.f32.mrf.mxu1  ;;  %v8537_v52 = vpop.f32.mrf.mxu0 }
 0x2ef   :  { %v17205_v9 = vadd.f32 %v8537_v52, %v7705_v53  ;;  %v7713_v53 = vadd.f32 %v16811_v7, %v15951_v39  ;;  %v14348_v39 = vld [vmem:[%s22492_s1 + $0x8d4] ss:$40 sps:$4 sm:$0xff]  }
 0x2f0   :  { %v7866_v58 = vpop.f32.mrf.mxu1  ;;  %v8539_v54 = vpop.f32.mrf.mxu0 }
 0x2f2   :  { %v17215_v16 = vpop.f32.mrf.mxu1  ;;  %8060 = vmatmul.mubr.bf16.gmra.mxu1 %v14331_v21  ;;  %v8542_v40 = vpop.f32.mrf.mxu0  ;;  %8733 = vmatmul.mubr.bf16.gmra.mxu0 %v14334_v49  ;;  %v14345_v49 = vld [vmem:[%s22492_s1 + $0xf0c] ss:$40 sps:$4 sm:$0xff]  }
 0x2f3   :  { %v17217_v1 = vadd.f32 %v8542_v40, %v7710_v15  ;;  %8067 = vmatprep.mubr.bf16.mxu1 %v14339_v8  ;;  %8740 = vmatprep.mubr.bf16.mxu0 %v14342_v27  ;;  %v7718_v27 = vadd.f32 %v16827_v0, %v15961_v45  ;;  %v14343_v45 = vld [vmem:[%s22492_s1 + $0xf08] ss:$40 sps:$4 sm:$0xff]  }
 0x2f4   :  { %v7871_v11 = vpop.f32.mrf.mxu1  ;;  %v8544_v46 = vpop.f32.mrf.mxu0  ;;  %v14346_v0 = vld [vmem:[%s22492_s1 + $0x8d0] ss:$40 sps:$4 sm:$0xff]  }
 0x2f6   :  { %v17221_v52 = vpop.f32.mrf.mxu1  ;;  %v8545_v58 = vpop.f32.mrf.mxu0 }
 0x2f7   :  { %v17229_v21 = vadd.f32 %v8545_v58, %v7713_v53  ;;  %v7721_v53 = vadd.f32 %v16831_v17, %v15971_v51  ;;  %v14354_v51 = vld [vmem:[%s22492_s1 + $0x924] ss:$40 sps:$4 sm:$0xff]  }
 0x2f8   :  { %v7874_v7 = vpop.f32.mrf.mxu1  ;;  %v8547_v8 = vpop.f32.mrf.mxu0 }
 0x2fa   :  { %v17239_v54 = vpop.f32.mrf.mxu1  ;;  %8068 = vmatmul.mubr.bf16.gmra.mxu1 %v14337_v33  ;;  %v8550_v15 = vpop.f32.mrf.mxu0  ;;  %8741 = vmatmul.mubr.bf16.gmra.mxu0 %v14340_v34  ;;  %v14351_v34 = vld [vmem:[%s22492_s1 + $0xf5c] ss:$40 sps:$4 sm:$0xff]  }
 0x2fb   :  { %v17241_v40 = vadd.f32 %v8550_v15, %v7718_v27  ;;  %8075 = vmatprep.mubr.bf16.mxu1 %v14345_v49  ;;  %8748 = vmatprep.mubr.bf16.mxu0 %v14348_v39  ;;  %v7726_v39 = vadd.f32 %v16847_v10, %v15981_v57  ;;  %v14349_v57 = vld [vmem:[%s22492_s1 + $0xf58] ss:$40 sps:$4 sm:$0xff]  }
 0x2fc   :  { %v7879_v11 = vpop.f32.mrf.mxu1  ;;  %v8552_v46 = vpop.f32.mrf.mxu0  ;;  %v14352_v10 = vld [vmem:[%s22492_s1 + $0x920] ss:$40 sps:$4 sm:$0xff]  }
 0x2fe   :  { %v17245_v58 = vpop.f32.mrf.mxu1  ;;  %v8553_v7 = vpop.f32.mrf.mxu0 }
 0x2ff   :  { %v17253_v33 = vadd.f32 %v8553_v7, %v7721_v53  ;;  %v7729_v53 = vadd.f32 %v16851_v18, %v15991_v63  ;;  %v14360_v63 = vld [vmem:[%s22492_s1 + $0x974] ss:$40 sps:$4 sm:$0xff]  }
 0x300   :  { %v7882_v17 = vpop.f32.mrf.mxu1  ;;  %v8555_v49 = vpop.f32.mrf.mxu0 }
 0x301   :  { %22788 = vst [vmem:[#allocation192_spill] sm:$0xff] %v17253_v33 }
 0x302   :  { %v17263_v8 = vpop.f32.mrf.mxu1  ;;  %8076 = vmatmul.mubr.bf16.gmra.mxu1 %v14343_v45  ;;  %v8558_v27 = vpop.f32.mrf.mxu0  ;;  %8749 = vmatmul.mubr.bf16.gmra.mxu0 %v14346_v0  ;;  %v14357_v0 = vld [vmem:[%s22492_s1 + $0xfac] ss:$40 sps:$4 sm:$0xff]  }
 0x303   :  { %v17265_v15 = vadd.f32 %v8558_v27, %v7726_v39  ;;  %8083 = vmatprep.mubr.bf16.mxu1 %v14351_v34  ;;  %8756 = vmatprep.mubr.bf16.mxu0 %v14354_v51  ;;  %v7734_v51 = vadd.f32 %v16867_v25, %v16001_v6  ;;  %v14355_v6 = vld [vmem:[%s22492_s1 + $0xfa8] ss:$40 sps:$4 sm:$0xff]  }
 0x304   :  { %v7887_v11 = vpop.f32.mrf.mxu1  ;;  %v8560_v46 = vpop.f32.mrf.mxu0  ;;  %v14358_v25 = vld [vmem:[%s22492_s1 + $0x970] ss:$40 sps:$4 sm:$0xff]  }
 0x305   :  { %22789 = vst [vmem:[#allocation193_spill] sm:$0xff] %v17265_v15 }
 0x306   :  { %v17269_v7 = vpop.f32.mrf.mxu1  ;;  %v8561_v17 = vpop.f32.mrf.mxu0 }
 0x307   :  { %v17277_v45 = vadd.f32 %v8561_v17, %v7729_v53  ;;  %v7737_v53 = vadd.f32 %v16871_v35, %v16011_v14  ;;  %v14366_v14 = vld [vmem:[%s22492_s1 + $0x9c4] ss:$40 sps:$4 sm:$0xff]  }
 0x308   :  { %v7890_v18 = vpop.f32.mrf.mxu1  ;;  %v8563_v34 = vpop.f32.mrf.mxu0 }
 0x309   :  { %22790 = vst [vmem:[#allocation194_spill] sm:$0xff] %v17277_v45 }
 0x30a   :  { %v17287_v49 = vpop.f32.mrf.mxu1  ;;  %8084 = vmatmul.mubr.bf16.gmra.mxu1 %v14349_v57  ;;  %v8566_v39 = vpop.f32.mrf.mxu0  ;;  %8757 = vmatmul.mubr.bf16.gmra.mxu0 %v14352_v10  ;;  %v14363_v10 = vld [vmem:[%s22492_s1 + $0xffc] ss:$40 sps:$4 sm:$0xff]  }
 0x30b   :  { %v17289_v27 = vadd.f32 %v8566_v39, %v7734_v51  ;;  %8091 = vmatprep.mubr.bf16.mxu1 %v14357_v0  ;;  %8764 = vmatprep.mubr.bf16.mxu0 %v14360_v63  ;;  %v7742_v63 = vadd.f32 %v16887_v43, %v16021_v24  ;;  %v14361_v24 = vld [vmem:[%s22492_s1 + $0xff8] ss:$40 sps:$4 sm:$0xff]  }
 0x30c   :  { %v7895_v11 = vpop.f32.mrf.mxu1  ;;  %v8568_v46 = vpop.f32.mrf.mxu0  ;;  %v14364_v43 = vld [vmem:[%s22492_s1 + $0x9c0] ss:$40 sps:$4 sm:$0xff]  }
 0x30d   :  { %22791 = vst [vmem:[#allocation195_spill] sm:$0xff] %v17289_v27 }
 0x30e   :  { %v17293_v17 = vpop.f32.mrf.mxu1  ;;  %v8569_v18 = vpop.f32.mrf.mxu0 }
 0x30f   :  { %v17301_v57 = vadd.f32 %v8569_v18, %v7737_v53  ;;  %v7745_v53 = vadd.f32 %v16891_v3, %v16031_v32  ;;  %v14372_v32 = vld [vmem:[%s22492_s1 + $0xa14] ss:$40 sps:$4 sm:$0xff]  }
 0x310   :  { %v7898_v35 = vpop.f32.mrf.mxu1  ;;  %v8571_v0 = vpop.f32.mrf.mxu0 }
 0x311   :  { %22792 = vst [vmem:[#allocation196_spill] sm:$0xff] %v17301_v57 }
 0x312   :  { %v17311_v34 = vpop.f32.mrf.mxu1  ;;  %8092 = vmatmul.mubr.bf16.gmra.mxu1 %v14355_v6  ;;  %v8574_v51 = vpop.f32.mrf.mxu0  ;;  %8765 = vmatmul.mubr.bf16.gmra.mxu0 %v14358_v25  ;;  %v14369_v25 = vld [vmem:[%s22492_s1 + $0x104c] ss:$40 sps:$4 sm:$0xff]  }
 0x313   :  { %v17313_v39 = vadd.f32 %v8574_v51, %v7742_v63  ;;  %8099 = vmatprep.mubr.bf16.mxu1 %v14363_v10  ;;  %8772 = vmatprep.mubr.bf16.mxu0 %v14366_v14  ;;  %v7750_v14 = vadd.f32 %v16907_v4, %v16041_v42  ;;  %v14367_v42 = vld [vmem:[%s22492_s1 + $0x1048] ss:$40 sps:$4 sm:$0xff]  }
 0x314   :  { %v7903_v11 = vpop.f32.mrf.mxu1  ;;  %v8576_v46 = vpop.f32.mrf.mxu0  ;;  %v14370_v4 = vld [vmem:[%s22492_s1 + $0xa10] ss:$40 sps:$4 sm:$0xff]  }
 0x315   :  { %22793 = vst [vmem:[#allocation197_spill] sm:$0xff] %v17313_v39 }
 0x316   :  { %v17317_v18 = vpop.f32.mrf.mxu1  ;;  %v8577_v35 = vpop.f32.mrf.mxu0 }
 0x317   :  { %v17325_v6 = vadd.f32 %v8577_v35, %v7745_v53  ;;  %v7753_v53 = vadd.f32 %v16911_v36, %v16051_v50  ;;  %v14378_v50 = vld [vmem:[%s22492_s1 + $0xa64] ss:$40 sps:$4 sm:$0xff]  }
 0x318   :  { %v7906_v3 = vpop.f32.mrf.mxu1  ;;  %v8579_v10 = vpop.f32.mrf.mxu0 }
 0x319   :  { %22794 = vst [vmem:[#allocation198_spill] sm:$0xff] %v17325_v6 }
 0x31a   :  { %v17335_v0 = vpop.f32.mrf.mxu1  ;;  %8100 = vmatmul.mubr.bf16.gmra.mxu1 %v14361_v24  ;;  %v8582_v63 = vpop.f32.mrf.mxu0  ;;  %8773 = vmatmul.mubr.bf16.gmra.mxu0 %v14364_v43  ;;  %v14375_v43 = vld [vmem:[%s22492_s1 + $0x109c] ss:$40 sps:$4 sm:$0xff]  }
 0x31b   :  { %v17337_v51 = vadd.f32 %v8582_v63, %v7750_v14  ;;  %8107 = vmatprep.mubr.bf16.mxu1 %v14369_v25  ;;  %8780 = vmatprep.mubr.bf16.mxu0 %v14372_v32  ;;  %v7758_v32 = vadd.f32 %v16927_v20, %v16061_v60  ;;  %v14373_v60 = vld [vmem:[%s22492_s1 + $0x1098] ss:$40 sps:$4 sm:$0xff]  }
 0x31c   :  { %v7911_v11 = vpop.f32.mrf.mxu1  ;;  %v8584_v46 = vpop.f32.mrf.mxu0  ;;  %v14376_v20 = vld [vmem:[%s22492_s1 + $0xa60] ss:$40 sps:$4 sm:$0xff]  }
 0x31d   :  { %22795 = vst [vmem:[#allocation199_spill] sm:$0xff] %v17337_v51 }
 0x31e   :  { %v17341_v35 = vpop.f32.mrf.mxu1  ;;  %v8585_v3 = vpop.f32.mrf.mxu0 }
 0x31f   :  { %v17349_v24 = vadd.f32 %v8585_v3, %v7753_v53  ;;  %v7761_v53 = vadd.f32 %v16931_v62, %v16071_v5  ;;  %v14384_v5 = vld [vmem:[%s22492_s1 + $0xab4] ss:$40 sps:$4 sm:$0xff]  }
 0x320   :  { %v7914_v36 = vpop.f32.mrf.mxu1  ;;  %v8587_v25 = vpop.f32.mrf.mxu0 }
 0x321   :  { %22796 = vst [vmem:[#allocation200_spill] sm:$0xff] %v17349_v24 }
 0x322   :  { %v17359_v10 = vpop.f32.mrf.mxu1  ;;  %8108 = vmatmul.mubr.bf16.gmra.mxu1 %v14367_v42  ;;  %v8590_v14 = vpop.f32.mrf.mxu0  ;;  %8781 = vmatmul.mubr.bf16.gmra.mxu0 %v14370_v4  ;;  %v14381_v4 = vld [vmem:[%s22492_s1 + $0x10ec] ss:$40 sps:$4 sm:$0xff]  }
 0x323   :  { %v17361_v63 = vadd.f32 %v8590_v14, %v7758_v32  ;;  %8115 = vmatprep.mubr.bf16.mxu1 %v14375_v43  ;;  %8788 = vmatprep.mubr.bf16.mxu0 %v14378_v50  ;;  %v7766_v50 = vadd.f32 %v16947_v61, %v16081_v19  ;;  %v14379_v19 = vld [vmem:[%s22492_s1 + $0x10e8] ss:$40 sps:$4 sm:$0xff]  }
 0x324   :  { %v7919_v11 = vpop.f32.mrf.mxu1  ;;  %v8592_v46 = vpop.f32.mrf.mxu0  ;;  %v14382_v61 = vld [vmem:[%s22492_s1 + $0xab0] ss:$40 sps:$4 sm:$0xff]  }
 0x325   :  { %22797 = vst [vmem:[#allocation201_spill] sm:$0xff] %v17361_v63 }
 0x326   :  { %v17365_v3 = vpop.f32.mrf.mxu1  ;;  %v8593_v36 = vpop.f32.mrf.mxu0 }
 0x327   :  { %v17373_v42 = vadd.f32 %v8593_v36, %v7761_v53  ;;  %v7769_v53 = vadd.f32 %v16951_v37, %v16091_v31  ;;  %v14390_v31 = vld [vmem:[%s22492_s1 + $0xb04] ss:$40 sps:$4 sm:$0xff]  }
 0x328   :  { %v7922_v62 = vpop.f32.mrf.mxu1  ;;  %v8595_v43 = vpop.f32.mrf.mxu0 }
 0x329   :  { %22798 = vst [vmem:[#allocation202_spill] sm:$0xff] %v17373_v42 }
 0x32a   :  { %v17383_v25 = vpop.f32.mrf.mxu1  ;;  %8116 = vmatmul.mubr.bf16.gmra.mxu1 %v14373_v60  ;;  %v8598_v32 = vpop.f32.mrf.mxu0  ;;  %8789 = vmatmul.mubr.bf16.gmra.mxu0 %v14376_v20  ;;  %v14387_v20 = vld [vmem:[%s22492_s1 + $0x113c] ss:$40 sps:$4 sm:$0xff]  }
 0x32b   :  { %v17385_v14 = vadd.f32 %v8598_v32, %v7766_v50  ;;  %8123 = vmatprep.mubr.bf16.mxu1 %v14381_v4  ;;  %8796 = vmatprep.mubr.bf16.mxu0 %v14384_v5  ;;  %v7774_v5 = vadd.f32 %v16967_v48, %v16101_v47  ;;  %v14385_v47 = vld [vmem:[%s22492_s1 + $0x1138] ss:$40 sps:$4 sm:$0xff]  }
 0x32c   :  { %v7927_v11 = vpop.f32.mrf.mxu1  ;;  %v8600_v46 = vpop.f32.mrf.mxu0  ;;  %v14388_v48 = vld [vmem:[%s22492_s1 + $0xb00] ss:$40 sps:$4 sm:$0xff]  }
 0x32d   :  { %22799 = vst [vmem:[#allocation203_spill] sm:$0xff] %v17385_v14 }
 0x32e   :  { %v17389_v36 = vpop.f32.mrf.mxu1  ;;  %v8601_v62 = vpop.f32.mrf.mxu0 }
 0x32f   :  { %v17397_v60 = vadd.f32 %v8601_v62, %v7769_v53  ;;  %v7777_v53 = vadd.f32 %v16971_v26, %v16111_v59  ;;  %v14396_v59 = vld [vmem:[%s22492_s1 + $0xb54] ss:$40 sps:$4 sm:$0xff]  }
 0x330   :  { %v7930_v37 = vpop.f32.mrf.mxu1  ;;  %v8603_v4 = vpop.f32.mrf.mxu0 }
 0x331   :  { %22800 = vst [vmem:[#allocation204_spill] sm:$0xff] %v17397_v60 }
 0x332   :  { %v17407_v43 = vpop.f32.mrf.mxu1  ;;  %8124 = vmatmul.mubr.bf16.gmra.mxu1 %v14379_v19  ;;  %v8606_v50 = vpop.f32.mrf.mxu0  ;;  %8797 = vmatmul.mubr.bf16.gmra.mxu0 %v14382_v61  ;;  %v14393_v61 = vld [vmem:[%s22492_s1 + $0x118c] ss:$40 sps:$4 sm:$0xff]  }
 0x333   :  { %v17409_v32 = vadd.f32 %v8606_v50, %v7774_v5  ;;  %8131 = vmatprep.mubr.bf16.mxu1 %v14387_v20  ;;  %8804 = vmatprep.mubr.bf16.mxu0 %v14390_v31  ;;  %v7782_v31 = vadd.f32 %v16987_v13, %v16121_v12  ;;  %v14391_v12 = vld [vmem:[%s22492_s1 + $0x1188] ss:$40 sps:$4 sm:$0xff]  }
 0x334   :  { %v7935_v11 = vpop.f32.mrf.mxu1  ;;  %v8608_v46 = vpop.f32.mrf.mxu0  ;;  %v14394_v13 = vld [vmem:[%s22492_s1 + $0xb50] ss:$40 sps:$4 sm:$0xff]  }
 0x335   :  { %22801 = vst [vmem:[#allocation205_spill] sm:$0xff] %v17409_v32 }
 0x336   :  { %v17413_v62 = vpop.f32.mrf.mxu1  ;;  %v8609_v37 = vpop.f32.mrf.mxu0 }
 0x337   :  { %v17421_v19 = vadd.f32 %v8609_v37, %v7777_v53  ;;  %v7785_v53 = vadd.f32 %v16991_v29, %v16131_v30  ;;  %v14402_v30 = vld [vmem:[%s22492_s1 + $0xba4] ss:$40 sps:$4 sm:$0xff]  }
 0x338   :  { %v7938_v26 = vpop.f32.mrf.mxu1  ;;  %v8611_v20 = vpop.f32.mrf.mxu0 }
 0x339   :  { %22802 = vst [vmem:[#allocation206_spill] sm:$0xff] %v17421_v19 }
 0x33a   :  { %v17431_v4 = vpop.f32.mrf.mxu1  ;;  %8132 = vmatmul.mubr.bf16.gmra.mxu1 %v14385_v47  ;;  %v8614_v5 = vpop.f32.mrf.mxu0  ;;  %8805 = vmatmul.mubr.bf16.gmra.mxu0 %v14388_v48  ;;  %v14399_v48 = vld [vmem:[%s22492_s1 + $0x11dc] ss:$40 sps:$4 sm:$0xff]  }
 0x33b   :  { %v17433_v50 = vadd.f32 %v8614_v5, %v7782_v31  ;;  %8139 = vmatprep.mubr.bf16.mxu1 %v14393_v61  ;;  %8812 = vmatprep.mubr.bf16.mxu0 %v14396_v59  ;;  %v7790_v59 = vadd.f32 %v17007_v56, %v16144_v55  ;;  %v14397_v55 = vld [vmem:[%s22492_s1 + $0x11d8] ss:$40 sps:$4 sm:$0xff]  }
 0x33c   :  { %v7943_v11 = vpop.f32.mrf.mxu1  ;;  %v8616_v46 = vpop.f32.mrf.mxu0  ;;  %v14400_v56 = vld [vmem:[%s22492_s1 + $0xba0] ss:$40 sps:$4 sm:$0xff]  }
 0x33d   :  { %22803 = vst [vmem:[#allocation207_spill] sm:$0xff] %v17433_v50 }
 0x33e   :  { %v17437_v37 = vpop.f32.mrf.mxu1  ;;  %v8617_v26 = vpop.f32.mrf.mxu0 }
 0x33f   :  { %v17445_v47 = vadd.f32 %v8617_v26, %v7785_v53  ;;  %v22806_v53 = vld [vmem:[#allocation27_spill] sm:$0xff] }
 0x340   :  { %v7946_v29 = vpop.f32.mrf.mxu1  ;;  %v8619_v61 = vpop.f32.mrf.mxu0  ;;  %v22807_v26 = vld [vmem:[#allocation163_spill] sm:$0xff] }
 0x341   :  { %22804 = vst [vmem:[#allocation208_spill] sm:$0xff] %v17445_v47  ;;  %v7793_v47 = vadd.f32 %v22807_v26, %v22806_v53 }
 0x342   :  { %v17455_v20 = vpop.f32.mrf.mxu1  ;;  %8140 = vmatmul.mubr.bf16.gmra.mxu1 %v14391_v12  ;;  %v8622_v31 = vpop.f32.mrf.mxu0  ;;  %8813 = vmatmul.mubr.bf16.gmra.mxu0 %v14394_v13  ;;  %v14405_v13 = vld [vmem:[%s22492_s1 + $0x122c] ss:$40 sps:$4 sm:$0xff]  }
 0x343   :  { %v17457_v5 = vadd.f32 %v8622_v31, %v7790_v59  ;;  %8147 = vmatprep.mubr.bf16.mxu1 %v14399_v48  ;;  %8820 = vmatprep.mubr.bf16.mxu0 %v14402_v30  ;;  %v14408_v48 = vld [vmem:[%s22492_s1 + $0xbf4] ss:$40 sps:$4 sm:$0xff]  }
 0x344   :  { %v7951_v11 = vpop.f32.mrf.mxu1  ;;  %v8624_v46 = vpop.f32.mrf.mxu0  ;;  %v22809_v59 = vld [vmem:[#allocation29_spill] sm:$0xff] }
 0x345   :  { %22805 = vst [vmem:[#allocation209_spill] sm:$0xff] %v17457_v5  ;;  %v22810_v31 = vld [vmem:[#allocation165_spill] sm:$0xff]  ;;  %v22813_v5 = vld [vmem:[#allocation167_spill] sm:$0xff] }
 0x346   :  { %v17461_v50 = vpop.f32.mrf.mxu1  ;;  %v8625_v29 = vpop.f32.mrf.mxu0  ;;  %v7798_v11 = vadd.f32 %v22810_v31, %v22809_v59  ;;  %v22815_v59 = vld [vmem:[#allocation33_spill] sm:$0xff] }
 0x347   :  { %v17469_v12 = vadd.f32 %v8625_v29, %v7793_v47  ;;  %v22816_v31 = vld [vmem:[#allocation169_spill] sm:$0xff] }
 0x348   :  { %v7954_v30 = vpop.f32.mrf.mxu1  ;;  %v8627_v61 = vpop.f32.mrf.mxu0 }
 0x349   :  { %22808 = vst [vmem:[#allocation27_spill] sm:$0xff] %v17469_v12  ;;  %v22812_v12 = vld [vmem:[#allocation31_spill] sm:$0xff] }
 0x34a   :  { %v17479_v46 = vpop.f32.mrf.mxu1  ;;  %8148 = vmatmul.mubr.bf16.gmra.mxu1 %v14397_v55  ;;  %v8630_v53 = vpop.f32.mrf.mxu0  ;;  %8821 = vmatmul.mubr.bf16.gmra.mxu0 %v14400_v56  ;;  %v7801_v19 = vadd.f32 %v22813_v5, %v22812_v12  ;;  %v14403_v61 = vld [vmem:[%s22492_s1 + $0x1228] ss:$40 sps:$4 sm:$0xff]   ;;  %v14414_v5 = vld [vmem:[%s22492_s1 + $0xc44] ss:$40 sps:$4 sm:$0xff]  }
 0x34b   :  { %v17481_v47 = vadd.f32 %v8630_v53, %v7798_v11  ;;  %8155 = vmatprep.mubr.bf16.mxu1 %v14405_v13  ;;  %8828 = vmatprep.mubr.bf16.mxu0 %v14408_v48  ;;  %v14406_v55 = vld [vmem:[%s22492_s1 + $0xbf0] ss:$40 sps:$4 sm:$0xff]   ;;  %v14411_v13 = vld [vmem:[%s22492_s1 + $0x127c] ss:$40 sps:$4 sm:$0xff]   ;;  %v7806_v11 = vadd.f32 %v22816_v31, %v22815_v59 }
 0x34c   :  { %v7959_v26 = vpop.f32.mrf.mxu1  ;;  %v8632_v29 = vpop.f32.mrf.mxu0  ;;  %v22821_v59 = vld [vmem:[#allocation37_spill] sm:$0xff] }
 0x34d   :  { %22811 = vst [vmem:[#allocation163_spill] sm:$0xff] %v17481_v47  ;;  %v22819_v47 = vld [vmem:[#allocation171_spill] sm:$0xff]  ;;  %v22822_v31 = vld [vmem:[#allocation173_spill] sm:$0xff] }
 0x34e   :  { %v17485_v32 = vpop.f32.mrf.mxu1  ;;  %v8633_v30 = vpop.f32.mrf.mxu0 }
 0x34f   :  { %v17493_v56 = vadd.f32 %v8633_v30, %v7801_v19 }
 0x350   :  { %v7962_v12 = vpop.f32.mrf.mxu1  ;;  %v8635_v48 = vpop.f32.mrf.mxu0 }
 0x351   :  { %22814 = vst [vmem:[#allocation29_spill] sm:$0xff] %v17493_v56  ;;  %v22818_v56 = vld [vmem:[#allocation35_spill] sm:$0xff]  ;;  %v14409_v48 = vld [vmem:[%s22492_s1 + $0x1278] ss:$40 sps:$4 sm:$0xff]  }
 0x352   :  { %v17503_v53 = vpop.f32.mrf.mxu1  ;;  %8156 = vmatmul.mubr.bf16.gmra.mxu1 %v14403_v61  ;;  %v8638_v26 = vpop.f32.mrf.mxu0  ;;  %8829 = vmatmul.mubr.bf16.gmra.mxu0 %v14406_v55  ;;  %v7809_v60 = vadd.f32 %v22819_v47, %v22818_v56  ;;  %v14412_v61 = vld [vmem:[%s22492_s1 + $0xc40] ss:$40 sps:$4 sm:$0xff]   ;;  %v14420_v47 = vld [vmem:[%s22492_s1 + $0xc94] ss:$40 sps:$4 sm:$0xff]  }
 0x353   :  { %v17505_v19 = vadd.f32 %v8638_v26, %v7806_v11  ;;  %8163 = vmatprep.mubr.bf16.mxu1 %v14411_v13  ;;  %8836 = vmatprep.mubr.bf16.mxu0 %v14414_v5  ;;  %v14417_v13 = vld [vmem:[%s22492_s1 + $0x12cc] ss:$40 sps:$4 sm:$0xff]   ;;  %v7814_v11 = vadd.f32 %v22822_v31, %v22821_v59  ;;  %v22827_v59 = vld [vmem:[#allocation41_spill] sm:$0xff] }
 0x354   :  { %v7967_v29 = vpop.f32.mrf.mxu1  ;;  %v8640_v30 = vpop.f32.mrf.mxu0  ;;  %v22828_v31 = vld [vmem:[#allocation177_spill] sm:$0xff] }
 0x355   :  { %22817 = vst [vmem:[#allocation165_spill] sm:$0xff] %v17505_v19  ;;  %v22825_v19 = vld [vmem:[#allocation175_spill] sm:$0xff] }
 0x356   :  { %v17509_v14 = vpop.f32.mrf.mxu1  ;;  %v8641_v12 = vpop.f32.mrf.mxu0 }
 0x357   :  { %v17517_v55 = vadd.f32 %v8641_v12, %v7809_v60 }
 0x358   :  { %v7970_v56 = vpop.f32.mrf.mxu1  ;;  %v8643_v5 = vpop.f32.mrf.mxu0 }
 0x359   :  { %22820 = vst [vmem:[#allocation31_spill] sm:$0xff] %v17517_v55  ;;  %v22824_v55 = vld [vmem:[#allocation39_spill] sm:$0xff] }
 0x35a   :  { %v17527_v26 = vpop.f32.mrf.mxu1  ;;  %8164 = vmatmul.mubr.bf16.gmra.mxu1 %v14409_v48  ;;  %v8646_v29 = vpop.f32.mrf.mxu0  ;;  %8837 = vmatmul.mubr.bf16.gmra.mxu0 %v14412_v61  ;;  %v7817_v42 = vadd.f32 %v22825_v19, %v22824_v55  ;;  %v14415_v5 = vld [vmem:[%s22492_s1 + $0x12c8] ss:$40 sps:$4 sm:$0xff]   ;;  %v14426_v19 = vld [vmem:[%s22492_s1 + $0xce4] ss:$40 sps:$4 sm:$0xff]  }
 0x35b   :  { %v17529_v60 = vadd.f32 %v8646_v29, %v7814_v11  ;;  %8171 = vmatprep.mubr.bf16.mxu1 %v14417_v13  ;;  %8844 = vmatprep.mubr.bf16.mxu0 %v14420_v47  ;;  %v14418_v48 = vld [vmem:[%s22492_s1 + $0xc90] ss:$40 sps:$4 sm:$0xff]   ;;  %v14423_v13 = vld [vmem:[%s22492_s1 + $0x131c] ss:$40 sps:$4 sm:$0xff]   ;;  %v7822_v11 = vadd.f32 %v22828_v31, %v22827_v59 }
 0x35c   :  { %v7975_v30 = vpop.f32.mrf.mxu1  ;;  %v8648_v12 = vpop.f32.mrf.mxu0  ;;  %v22833_v59 = vld [vmem:[#allocation45_spill] sm:$0xff] }
 0x35d   :  { %22823 = vst [vmem:[#allocation167_spill] sm:$0xff] %v17529_v60  ;;  %v22831_v60 = vld [vmem:[#allocation179_spill] sm:$0xff]  ;;  %v22834_v31 = vld [vmem:[#allocation181_spill] sm:$0xff] }
 0x35e   :  { %v17533_v63 = vpop.f32.mrf.mxu1  ;;  %v8649_v56 = vpop.f32.mrf.mxu0 }
 0x35f   :  { %v17541_v61 = vadd.f32 %v8649_v56, %v7817_v42 }
 0x360   :  { %v7978_v55 = vpop.f32.mrf.mxu1  ;;  %v8651_v47 = vpop.f32.mrf.mxu0 }
 0x361   :  { %22826 = vst [vmem:[#allocation33_spill] sm:$0xff] %v17541_v61  ;;  %v22830_v61 = vld [vmem:[#allocation43_spill] sm:$0xff]  ;;  %v14421_v47 = vld [vmem:[%s22492_s1 + $0x1318] ss:$40 sps:$4 sm:$0xff]  }
 0x362   :  { %v17551_v29 = vpop.f32.mrf.mxu1  ;;  %8172 = vmatmul.mubr.bf16.gmra.mxu1 %v14415_v5  ;;  %v8654_v30 = vpop.f32.mrf.mxu0  ;;  %8845 = vmatmul.mubr.bf16.gmra.mxu0 %v14418_v48  ;;  %v7825_v24 = vadd.f32 %v22831_v60, %v22830_v61  ;;  %v14424_v5 = vld [vmem:[%s22492_s1 + $0xce0] ss:$40 sps:$4 sm:$0xff]   ;;  %v14432_v60 = vld [vmem:[%s22492_s1 + $0xd34] ss:$40 sps:$4 sm:$0xff]  }
 0x363   :  { %v17553_v42 = vadd.f32 %v8654_v30, %v7822_v11  ;;  %8179 = vmatprep.mubr.bf16.mxu1 %v14423_v13  ;;  %8852 = vmatprep.mubr.bf16.mxu0 %v14426_v19  ;;  %v14429_v13 = vld [vmem:[%s22492_s1 + $0x136c] ss:$40 sps:$4 sm:$0xff]   ;;  %v7830_v11 = vadd.f32 %v22834_v31, %v22833_v59  ;;  %v22839_v59 = vld [vmem:[#allocation49_spill] sm:$0xff] }
 0x364   :  { %v7983_v12 = vpop.f32.mrf.mxu1  ;;  %v8656_v56 = vpop.f32.mrf.mxu0  ;;  %v22840_v31 = vld [vmem:[#allocation185_spill] sm:$0xff] }
 0x365   :  { %22829 = vst [vmem:[#allocation169_spill] sm:$0xff] %v17553_v42  ;;  %v22837_v42 = vld [vmem:[#allocation183_spill] sm:$0xff] }
 0x366   :  { %v17557_v51 = vpop.f32.mrf.mxu1  ;;  %v8657_v55 = vpop.f32.mrf.mxu0 }
 0x367   :  { %v17565_v48 = vadd.f32 %v8657_v55, %v7825_v24 }
 0x368   :  { %v7986_v61 = vpop.f32.mrf.mxu1  ;;  %v8659_v19 = vpop.f32.mrf.mxu0 }
 0x369   :  { %22832 = vst [vmem:[#allocation35_spill] sm:$0xff] %v17565_v48  ;;  %v22836_v48 = vld [vmem:[#allocation47_spill] sm:$0xff] }
 0x36a   :  { %v17575_v30 = vpop.f32.mrf.mxu1  ;;  %8180 = vmatmul.mubr.bf16.gmra.mxu1 %v14421_v47  ;;  %v8662_v12 = vpop.f32.mrf.mxu0  ;;  %8853 = vmatmul.mubr.bf16.gmra.mxu0 %v14424_v5  ;;  %v7833_v6 = vadd.f32 %v22837_v42, %v22836_v48  ;;  %v14427_v19 = vld [vmem:[%s22492_s1 + $0x1368] ss:$40 sps:$4 sm:$0xff]   ;;  %v14438_v42 = vld [vmem:[%s22492_s1 + $0xd84] ss:$40 sps:$4 sm:$0xff]  }
 0x36b   :  { %v17577_v24 = vadd.f32 %v8662_v12, %v7830_v11  ;;  %8187 = vmatprep.mubr.bf16.mxu1 %v14429_v13  ;;  %8860 = vmatprep.mubr.bf16.mxu0 %v14432_v60  ;;  %v14430_v47 = vld [vmem:[%s22492_s1 + $0xd30] ss:$40 sps:$4 sm:$0xff]   ;;  %v14435_v13 = vld [vmem:[%s22492_s1 + $0x13bc] ss:$40 sps:$4 sm:$0xff]   ;;  %v7838_v11 = vadd.f32 %v22840_v31, %v22839_v59 }
 0x36c   :  { %v7991_v56 = vpop.f32.mrf.mxu1  ;;  %v8664_v55 = vpop.f32.mrf.mxu0  ;;  %v22845_v59 = vld [vmem:[#allocation53_spill] sm:$0xff] }
 0x36d   :  { %22835 = vst [vmem:[#allocation171_spill] sm:$0xff] %v17577_v24  ;;  %v22843_v24 = vld [vmem:[#allocation187_spill] sm:$0xff]  ;;  %v22846_v31 = vld [vmem:[#allocation189_spill] sm:$0xff] }
 0x36e   :  { %v17581_v39 = vpop.f32.mrf.mxu1  ;;  %v8665_v61 = vpop.f32.mrf.mxu0 }
 0x36f   :  { %v17589_v5 = vadd.f32 %v8665_v61, %v7833_v6 }
 0x370   :  { %v7994_v48 = vpop.f32.mrf.mxu1  ;;  %v8667_v60 = vpop.f32.mrf.mxu0 }
 0x371   :  { %22838 = vst [vmem:[#allocation37_spill] sm:$0xff] %v17589_v5  ;;  %v22842_v5 = vld [vmem:[#allocation51_spill] sm:$0xff]  ;;  %v14433_v60 = vld [vmem:[%s22492_s1 + $0x13b8] ss:$40 sps:$4 sm:$0xff]  }
 0x372   :  { %v17599_v12 = vpop.f32.mrf.mxu1  ;;  %8188 = vmatmul.mubr.bf16.gmra.mxu1 %v14427_v19  ;;  %v8670_v56 = vpop.f32.mrf.mxu0  ;;  %8861 = vmatmul.mubr.bf16.gmra.mxu0 %v14430_v47  ;;  %v7841_v57 = vadd.f32 %v22843_v24, %v22842_v5  ;;  %v14436_v19 = vld [vmem:[%s22492_s1 + $0xd80] ss:$40 sps:$4 sm:$0xff]   ;;  %v14444_v24 = vld [vmem:[%s22492_s1 + $0xdd4] ss:$40 sps:$4 sm:$0xff]  }
 0x373   :  { %v17601_v6 = vadd.f32 %v8670_v56, %v7838_v11  ;;  %8195 = vmatprep.mubr.bf16.mxu1 %v14435_v13  ;;  %8868 = vmatprep.mubr.bf16.mxu0 %v14438_v42  ;;  %v14441_v13 = vld [vmem:[%s22492_s1 + $0x140c] ss:$40 sps:$4 sm:$0xff]   ;;  %v7846_v11 = vadd.f32 %v22846_v31, %v22845_v59  ;;  %v22851_v59 = vld [vmem:[#allocation57_spill] sm:$0xff] }
 0x374   :  { %v7999_v55 = vpop.f32.mrf.mxu1  ;;  %v8672_v61 = vpop.f32.mrf.mxu0  ;;  %v7854_v31 = vadd.f32 %v17167_v41, %v22851_v59  ;;  %v14445_v41 = vld [vmem:[%s22492_s1 + $0x1458] ss:$40 sps:$4 sm:$0xff]  }
 0x375   :  { %22841 = vst [vmem:[#allocation173_spill] sm:$0xff] %v17601_v6  ;;  %v22849_v6 = vld [vmem:[#allocation191_spill] sm:$0xff]  ;;  %v22855_v59 = vld [vmem:[#allocation61_spill] sm:$0xff] }
 0x376   :  { %v17605_v27 = vpop.f32.mrf.mxu1  ;;  %v8673_v48 = vpop.f32.mrf.mxu0 }
 0x377   :  { %v17613_v47 = vadd.f32 %v8673_v48, %v7841_v57 }
 0x378   :  { %v8002_v5 = vpop.f32.mrf.mxu1  ;;  %v8675_v42 = vpop.f32.mrf.mxu0 }
 0x379   :  { %22844 = vst [vmem:[#allocation39_spill] sm:$0xff] %v17613_v47  ;;  %v22848_v47 = vld [vmem:[#allocation55_spill] sm:$0xff] }
 0x37a   :  { %v17623_v56 = vpop.f32.mrf.mxu1  ;;  %8196 = vmatmul.mubr.bf16.gmra.mxu1 %v14433_v60  ;;  %v8678_v55 = vpop.f32.mrf.mxu0  ;;  %8869 = vmatmul.mubr.bf16.gmra.mxu0 %v14436_v19  ;;  %v7849_v45 = vadd.f32 %v22849_v6, %v22848_v47  ;;  %v14439_v42 = vld [vmem:[%s22492_s1 + $0x1408] ss:$40 sps:$4 sm:$0xff]   ;;  %v14450_v6 = vld [vmem:[%s22492_s1 + $0xe24] ss:$40 sps:$4 sm:$0xff]  }
 0x37b   :  { %v17625_v57 = vadd.f32 %v8678_v55, %v7846_v11  ;;  %8203 = vmatprep.mubr.bf16.mxu1 %v14441_v13  ;;  %8876 = vmatprep.mubr.bf16.mxu0 %v14444_v24  ;;  %v14442_v60 = vld [vmem:[%s22492_s1 + $0xdd0] ss:$40 sps:$4 sm:$0xff]   ;;  %v14447_v13 = vld [vmem:[%s22492_s1 + $0x145c] ss:$40 sps:$4 sm:$0xff]  }
 0x37c   :  { %v8007_v61 = vpop.f32.mrf.mxu1  ;;  %v8680_v48 = vpop.f32.mrf.mxu0 }
 0x37d   :  { %22847 = vst [vmem:[#allocation175_spill] sm:$0xff] %v17625_v57 }
 0x37e   :  { %v17629_v15 = vpop.f32.mrf.mxu1  ;;  %v8681_v5 = vpop.f32.mrf.mxu0 }
 0x37f   :  { %v17637_v19 = vadd.f32 %v8681_v5, %v7849_v45  ;;  %v22853_v5 = vld [vmem:[#allocation59_spill] sm:$0xff] }
 0x380   :  { %v8010_v47 = vpop.f32.mrf.mxu1  ;;  %v8683_v24 = vpop.f32.mrf.mxu0 }
 0x381   :  { %22850 = vst [vmem:[#allocation41_spill] sm:$0xff] %v17637_v19  ;;  %v7857_v19 = vadd.f32 %v17173_v23, %v22853_v5  ;;  %v14456_v23 = vld [vmem:[%s22492_s1 + $0xe74] ss:$40 sps:$4 sm:$0xff]  }
 0x382   :  { %v17647_v11 = vpop.f32.mrf.mxu1  ;;  %8204 = vmatmul.mubr.bf16.gmra.mxu1 %v14439_v42  ;;  %v8686_v55 = vpop.f32.mrf.mxu0  ;;  %8877 = vmatmul.mubr.bf16.gmra.mxu0 %v14442_v60  ;;  %v14448_v42 = vld [vmem:[%s22492_s1 + $0xe20] ss:$40 sps:$4 sm:$0xff]  }
 0x383   :  { %v17649_v45 = vadd.f32 %v8686_v55, %v7854_v31  ;;  %8211 = vmatprep.mubr.bf16.mxu1 %v14447_v13  ;;  %8884 = vmatprep.mubr.bf16.mxu0 %v14450_v6  ;;  %v14453_v13 = vld [vmem:[%s22492_s1 + $0x14ac] ss:$40 sps:$4 sm:$0xff]   ;;  %v7862_v31 = vadd.f32 %v17191_v2, %v22855_v59  ;;  %v14451_v2 = vld [vmem:[%s22492_s1 + $0x14a8] ss:$40 sps:$4 sm:$0xff]   ;;  %v22859_v59 = vld [vmem:[#allocation65_spill] sm:$0xff] }
 0x384   :  { %v8015_v61 = vpop.f32.mrf.mxu1  ;;  %v8688_v48 = vpop.f32.mrf.mxu0 }
 0x385   :  { %22852 = vst [vmem:[#allocation177_spill] sm:$0xff] %v17649_v45 }
 0x386   :  { %v17653_v57 = vpop.f32.mrf.mxu1  ;;  %v8689_v47 = vpop.f32.mrf.mxu0 }
 0x387   :  { %v17661_v60 = vadd.f32 %v8689_v47, %v7857_v19  ;;  %v22857_v47 = vld [vmem:[#allocation63_spill] sm:$0xff] }
 0x388   :  { %v8018_v6 = vpop.f32.mrf.mxu1  ;;  %v8691_v24 = vpop.f32.mrf.mxu0 }
 0x389   :  { %22854 = vst [vmem:[#allocation43_spill] sm:$0xff] %v17661_v60  ;;  %v7865_v60 = vadd.f32 %v17197_v28, %v22857_v47  ;;  %v14462_v28 = vld [vmem:[%s22492_s1 + $0xec4] ss:$40 sps:$4 sm:$0xff]  }
 0x38a   :  { %v17671_v55 = vpop.f32.mrf.mxu1  ;;  %8212 = vmatmul.mubr.bf16.gmra.mxu1 %v14445_v41  ;;  %v8694_v61 = vpop.f32.mrf.mxu0  ;;  %8885 = vmatmul.mubr.bf16.gmra.mxu0 %v14448_v42  ;;  %v14454_v41 = vld [vmem:[%s22492_s1 + $0xe70] ss:$40 sps:$4 sm:$0xff]  }
 0x38b   :  { %v17673_v19 = vadd.f32 %v8694_v61, %v7862_v31  ;;  %8219 = vmatprep.mubr.bf16.mxu1 %v14453_v13  ;;  %8892 = vmatprep.mubr.bf16.mxu0 %v14456_v23  ;;  %v14459_v13 = vld [vmem:[%s22492_s1 + $0x14fc] ss:$40 sps:$4 sm:$0xff]   ;;  %v7870_v31 = vadd.f32 %v17215_v16, %v22859_v59  ;;  %v14457_v16 = vld [vmem:[%s22492_s1 + $0x14f8] ss:$40 sps:$4 sm:$0xff]  }
 0x38c   :  { %v8023_v48 = vpop.f32.mrf.mxu1  ;;  %v8696_v5 = vpop.f32.mrf.mxu0  ;;  %v22863_v59 = vld [vmem:[#allocation69_spill] sm:$0xff] }
 0x38d   :  { %22856 = vst [vmem:[#allocation179_spill] sm:$0xff] %v17673_v19 }
 0x38e   :  { %v17677_v45 = vpop.f32.mrf.mxu1  ;;  %v8697_v6 = vpop.f32.mrf.mxu0 }
 0x38f   :  { %v17685_v42 = vadd.f32 %v8697_v6, %v7865_v60  ;;  %v22861_v6 = vld [vmem:[#allocation67_spill] sm:$0xff] }
 0x390   :  { %v8026_v23 = vpop.f32.mrf.mxu1  ;;  %v8699_v24 = vpop.f32.mrf.mxu0 }
 0x391   :  { %22858 = vst [vmem:[#allocation45_spill] sm:$0xff] %v17685_v42  ;;  %v7873_v42 = vadd.f32 %v17221_v52, %v22861_v6  ;;  %v14468_v52 = vld [vmem:[%s22492_s1 + $0xf14] ss:$40 sps:$4 sm:$0xff]  }
 0x392   :  { %v17695_v61 = vpop.f32.mrf.mxu1  ;;  %8220 = vmatmul.mubr.bf16.gmra.mxu1 %v14451_v2  ;;  %v8702_v48 = vpop.f32.mrf.mxu0  ;;  %8893 = vmatmul.mubr.bf16.gmra.mxu0 %v14454_v41  ;;  %v14460_v2 = vld [vmem:[%s22492_s1 + $0xec0] ss:$40 sps:$4 sm:$0xff]  }
 0x393   :  { %v17697_v60 = vadd.f32 %v8702_v48, %v7870_v31  ;;  %8227 = vmatprep.mubr.bf16.mxu1 %v14459_v13  ;;  %8900 = vmatprep.mubr.bf16.mxu0 %v14462_v28  ;;  %v14465_v13 = vld [vmem:[%s22492_s1 + $0x154c] ss:$40 sps:$4 sm:$0xff]   ;;  %v7878_v31 = vadd.f32 %v17239_v54, %v22863_v59  ;;  %v14463_v54 = vld [vmem:[%s22492_s1 + $0x1548] ss:$40 sps:$4 sm:$0xff]   ;;  %v22867_v59 = vld [vmem:[#allocation73_spill] sm:$0xff] }
 0x394   :  { %v8031_v5 = vpop.f32.mrf.mxu1  ;;  %v8704_v47 = vpop.f32.mrf.mxu0 }
 0x395   :  { %22860 = vst [vmem:[#allocation181_spill] sm:$0xff] %v17697_v60 }
 0x396   :  { %v17701_v19 = vpop.f32.mrf.mxu1  ;;  %v8705_v23 = vpop.f32.mrf.mxu0 }
 0x397   :  { %v17709_v41 = vadd.f32 %v8705_v23, %v7873_v42  ;;  %v22865_v23 = vld [vmem:[#allocation71_spill] sm:$0xff] }
 0x398   :  { %v8034_v28 = vpop.f32.mrf.mxu1  ;;  %v8707_v24 = vpop.f32.mrf.mxu0 }
 0x399   :  { %22862 = vst [vmem:[#allocation47_spill] sm:$0xff] %v17709_v41  ;;  %v7881_v41 = vadd.f32 %v17245_v58, %v22865_v23  ;;  %v14474_v58 = vld [vmem:[%s22492_s1 + $0xf64] ss:$40 sps:$4 sm:$0xff]  }
 0x39a   :  { %v17719_v48 = vpop.f32.mrf.mxu1  ;;  %8228 = vmatmul.mubr.bf16.gmra.mxu1 %v14457_v16  ;;  %v8710_v5 = vpop.f32.mrf.mxu0  ;;  %8901 = vmatmul.mubr.bf16.gmra.mxu0 %v14460_v2  ;;  %v14466_v16 = vld [vmem:[%s22492_s1 + $0xf10] ss:$40 sps:$4 sm:$0xff]  }
 0x39b   :  { %v17721_v42 = vadd.f32 %v8710_v5, %v7878_v31  ;;  %8235 = vmatprep.mubr.bf16.mxu1 %v14465_v13  ;;  %8908 = vmatprep.mubr.bf16.mxu0 %v14468_v52  ;;  %v14471_v13 = vld [vmem:[%s22492_s1 + $0x159c] ss:$40 sps:$4 sm:$0xff]   ;;  %v7886_v31 = vadd.f32 %v17263_v8, %v22867_v59  ;;  %v14469_v8 = vld [vmem:[%s22492_s1 + $0x1598] ss:$40 sps:$4 sm:$0xff]  }
 0x39c   :  { %v8039_v47 = vpop.f32.mrf.mxu1  ;;  %v8712_v6 = vpop.f32.mrf.mxu0  ;;  %v22871_v59 = vld [vmem:[#allocation77_spill] sm:$0xff] }
 0x39d   :  { %22864 = vst [vmem:[#allocation183_spill] sm:$0xff] %v17721_v42 }
 0x39e   :  { %v17725_v60 = vpop.f32.mrf.mxu1  ;;  %v8713_v28 = vpop.f32.mrf.mxu0 }
 0x39f   :  { %v17733_v2 = vadd.f32 %v8713_v28, %v7881_v41  ;;  %v22869_v28 = vld [vmem:[#allocation75_spill] sm:$0xff] }
 0x3a0   :  { %v8042_v52 = vpop.f32.mrf.mxu1  ;;  %v8715_v24 = vpop.f32.mrf.mxu0 }
 0x3a1   :  { %22866 = vst [vmem:[#allocation49_spill] sm:$0xff] %v17733_v2  ;;  %v7889_v2 = vadd.f32 %v17269_v7, %v22869_v28  ;;  %v14480_v7 = vld [vmem:[%s22492_s1 + $0xfb4] ss:$40 sps:$4 sm:$0xff]  }
 0x3a2   :  { %v17743_v5 = vpop.f32.mrf.mxu1  ;;  %8236 = vmatmul.mubr.bf16.gmra.mxu1 %v14463_v54  ;;  %v8718_v47 = vpop.f32.mrf.mxu0  ;;  %8909 = vmatmul.mubr.bf16.gmra.mxu0 %v14466_v16  ;;  %v14472_v54 = vld [vmem:[%s22492_s1 + $0xf60] ss:$40 sps:$4 sm:$0xff]  }
 0x3a3   :  { %v17745_v41 = vadd.f32 %v8718_v47, %v7886_v31  ;;  %8243 = vmatprep.mubr.bf16.mxu1 %v14471_v13  ;;  %8916 = vmatprep.mubr.bf16.mxu0 %v14474_v58  ;;  %v14477_v13 = vld [vmem:[%s22492_s1 + $0x15ec] ss:$40 sps:$4 sm:$0xff]   ;;  %v7894_v31 = vadd.f32 %v17287_v49, %v22871_v59  ;;  %v14475_v49 = vld [vmem:[%s22492_s1 + $0x15e8] ss:$40 sps:$4 sm:$0xff]   ;;  %v22875_v59 = vld [vmem:[#allocation81_spill] sm:$0xff] }
 0x3a4   :  { %v8047_v6 = vpop.f32.mrf.mxu1  ;;  %v8720_v23 = vpop.f32.mrf.mxu0 }
 0x3a5   :  { %22868 = vst [vmem:[#allocation185_spill] sm:$0xff] %v17745_v41 }
 0x3a6   :  { %v17749_v42 = vpop.f32.mrf.mxu1  ;;  %v8721_v52 = vpop.f32.mrf.mxu0 }
 0x3a7   :  { %v17757_v16 = vadd.f32 %v8721_v52, %v7889_v2  ;;  %v22873_v52 = vld [vmem:[#allocation79_spill] sm:$0xff] }
 0x3a8   :  { %v8050_v58 = vpop.f32.mrf.mxu1  ;;  %v8723_v24 = vpop.f32.mrf.mxu0 }
 0x3a9   :  { %22870 = vst [vmem:[#allocation51_spill] sm:$0xff] %v17757_v16  ;;  %v7897_v16 = vadd.f32 %v17293_v17, %v22873_v52  ;;  %v14486_v17 = vld [vmem:[%s22492_s1 + $0x1004] ss:$40 sps:$4 sm:$0xff]  }
 0x3aa   :  { %v17767_v47 = vpop.f32.mrf.mxu1  ;;  %8244 = vmatmul.mubr.bf16.gmra.mxu1 %v14469_v8  ;;  %v8726_v6 = vpop.f32.mrf.mxu0  ;;  %8917 = vmatmul.mubr.bf16.gmra.mxu0 %v14472_v54  ;;  %v14478_v8 = vld [vmem:[%s22492_s1 + $0xfb0] ss:$40 sps:$4 sm:$0xff]  }
 0x3ab   :  { %v17769_v2 = vadd.f32 %v8726_v6, %v7894_v31  ;;  %8251 = vmatprep.mubr.bf16.mxu1 %v14477_v13  ;;  %8924 = vmatprep.mubr.bf16.mxu0 %v14480_v7  ;;  %v14483_v13 = vld [vmem:[%s22492_s1 + $0x163c] ss:$40 sps:$4 sm:$0xff]   ;;  %v7902_v31 = vadd.f32 %v17311_v34, %v22875_v59  ;;  %v14481_v34 = vld [vmem:[%s22492_s1 + $0x1638] ss:$40 sps:$4 sm:$0xff]  }
 0x3ac   :  { %v8055_v23 = vpop.f32.mrf.mxu1  ;;  %v8728_v28 = vpop.f32.mrf.mxu0  ;;  %v22879_v59 = vld [vmem:[#allocation85_spill] sm:$0xff] }
 0x3ad   :  { %22872 = vst [vmem:[#allocation187_spill] sm:$0xff] %v17769_v2 }
 0x3ae   :  { %v17773_v41 = vpop.f32.mrf.mxu1  ;;  %v8729_v58 = vpop.f32.mrf.mxu0 }
 0x3af   :  { %v17781_v54 = vadd.f32 %v8729_v58, %v7897_v16  ;;  %v22877_v58 = vld [vmem:[#allocation83_spill] sm:$0xff] }
 0x3b0   :  { %v8058_v7 = vpop.f32.mrf.mxu1  ;;  %v8731_v24 = vpop.f32.mrf.mxu0 }
 0x3b1   :  { %22874 = vst [vmem:[#allocation53_spill] sm:$0xff] %v17781_v54  ;;  %v7905_v54 = vadd.f32 %v17317_v18, %v22877_v58  ;;  %v14492_v18 = vld [vmem:[%s22492_s1 + $0x1054] ss:$40 sps:$4 sm:$0xff]  }
 0x3b2   :  { %v17791_v6 = vpop.f32.mrf.mxu1  ;;  %8252 = vmatmul.mubr.bf16.gmra.mxu1 %v14475_v49  ;;  %v8734_v23 = vpop.f32.mrf.mxu0  ;;  %8925 = vmatmul.mubr.bf16.gmra.mxu0 %v14478_v8  ;;  %v14484_v49 = vld [vmem:[%s22492_s1 + $0x1000] ss:$40 sps:$4 sm:$0xff]  }
 0x3b3   :  { %v17793_v16 = vadd.f32 %v8734_v23, %v7902_v31  ;;  %8259 = vmatprep.mubr.bf16.mxu1 %v14483_v13  ;;  %8932 = vmatprep.mubr.bf16.mxu0 %v14486_v17  ;;  %v14489_v13 = vld [vmem:[%s22492_s1 + $0x168c] ss:$40 sps:$4 sm:$0xff]   ;;  %v7910_v31 = vadd.f32 %v17335_v0, %v22879_v59  ;;  %v14487_v0 = vld [vmem:[%s22492_s1 + $0x1688] ss:$40 sps:$4 sm:$0xff]   ;;  %v22883_v59 = vld [vmem:[#allocation89_spill] sm:$0xff] }
 0x3b4   :  { %v8063_v28 = vpop.f32.mrf.mxu1  ;;  %v8736_v52 = vpop.f32.mrf.mxu0 }
 0x3b5   :  { %22876 = vst [vmem:[#allocation189_spill] sm:$0xff] %v17793_v16 }
 0x3b6   :  { %v17797_v2 = vpop.f32.mrf.mxu1  ;;  %v8737_v7 = vpop.f32.mrf.mxu0 }
 0x3b7   :  { %v17805_v8 = vadd.f32 %v8737_v7, %v7905_v54  ;;  %v22881_v7 = vld [vmem:[#allocation87_spill] sm:$0xff] }
 0x3b8   :  { %v8066_v17 = vpop.f32.mrf.mxu1  ;;  %v8739_v24 = vpop.f32.mrf.mxu0 }
 0x3b9   :  { %22878 = vst [vmem:[#allocation55_spill] sm:$0xff] %v17805_v8  ;;  %v7913_v8 = vadd.f32 %v17341_v35, %v22881_v7  ;;  %v14498_v35 = vld [vmem:[%s22492_s1 + $0x10a4] ss:$40 sps:$4 sm:$0xff]  }
 0x3ba   :  { %v17815_v23 = vpop.f32.mrf.mxu1  ;;  %8260 = vmatmul.mubr.bf16.gmra.mxu1 %v14481_v34  ;;  %v8742_v28 = vpop.f32.mrf.mxu0  ;;  %8933 = vmatmul.mubr.bf16.gmra.mxu0 %v14484_v49  ;;  %v14490_v34 = vld [vmem:[%s22492_s1 + $0x1050] ss:$40 sps:$4 sm:$0xff]  }
 0x3bb   :  { %v17817_v54 = vadd.f32 %v8742_v28, %v7910_v31  ;;  %8267 = vmatprep.mubr.bf16.mxu1 %v14489_v13  ;;  %8940 = vmatprep.mubr.bf16.mxu0 %v14492_v18  ;;  %v14495_v13 = vld [vmem:[%s22492_s1 + $0x16dc] ss:$40 sps:$4 sm:$0xff]   ;;  %v7918_v31 = vadd.f32 %v17359_v10, %v22883_v59  ;;  %v14493_v10 = vld [vmem:[%s22492_s1 + $0x16d8] ss:$40 sps:$4 sm:$0xff]  }
 0x3bc   :  { %v8071_v52 = vpop.f32.mrf.mxu1  ;;  %v8744_v58 = vpop.f32.mrf.mxu0  ;;  %v22887_v59 = vld [vmem:[#allocation93_spill] sm:$0xff] }
 0x3bd   :  { %22880 = vst [vmem:[#allocation191_spill] sm:$0xff] %v17817_v54 }
 0x3be   :  { %v17821_v16 = vpop.f32.mrf.mxu1  ;;  %v8745_v17 = vpop.f32.mrf.mxu0 }
 0x3bf   :  { %v17829_v49 = vadd.f32 %v8745_v17, %v7913_v8  ;;  %v22885_v17 = vld [vmem:[#allocation91_spill] sm:$0xff] }
 0x3c0   :  { %v8074_v18 = vpop.f32.mrf.mxu1  ;;  %v8747_v24 = vpop.f32.mrf.mxu0 }
 0x3c1   :  { %22882 = vst [vmem:[#allocation57_spill] sm:$0xff] %v17829_v49  ;;  %v7921_v49 = vadd.f32 %v17365_v3, %v22885_v17  ;;  %v14504_v3 = vld [vmem:[%s22492_s1 + $0x10f4] ss:$40 sps:$4 sm:$0xff]  }
 0x3c2   :  { %v17839_v28 = vpop.f32.mrf.mxu1  ;;  %8268 = vmatmul.mubr.bf16.gmra.mxu1 %v14487_v0  ;;  %v8750_v52 = vpop.f32.mrf.mxu0  ;;  %8941 = vmatmul.mubr.bf16.gmra.mxu0 %v14490_v34  ;;  %v14496_v0 = vld [vmem:[%s22492_s1 + $0x10a0] ss:$40 sps:$4 sm:$0xff]  }
 0x3c3   :  { %v17841_v8 = vadd.f32 %v8750_v52, %v7918_v31  ;;  %8275 = vmatprep.mubr.bf16.mxu1 %v14495_v13  ;;  %8948 = vmatprep.mubr.bf16.mxu0 %v14498_v35  ;;  %v14501_v13 = vld [vmem:[%s22492_s1 + $0x172c] ss:$40 sps:$4 sm:$0xff]   ;;  %v7926_v31 = vadd.f32 %v17383_v25, %v22887_v59  ;;  %v14499_v25 = vld [vmem:[%s22492_s1 + $0x1728] ss:$40 sps:$4 sm:$0xff]   ;;  %v22891_v59 = vld [vmem:[#allocation97_spill] sm:$0xff] }
 0x3c4   :  { %v8079_v58 = vpop.f32.mrf.mxu1  ;;  %v8752_v7 = vpop.f32.mrf.mxu0 }
 0x3c5   :  { %22884 = vst [vmem:[#allocation59_spill] sm:$0xff] %v17841_v8 }
 0x3c6   :  { %v17845_v54 = vpop.f32.mrf.mxu1  ;;  %v8753_v18 = vpop.f32.mrf.mxu0 }
 0x3c7   :  { %v17853_v34 = vadd.f32 %v8753_v18, %v7921_v49  ;;  %v22889_v18 = vld [vmem:[#allocation95_spill] sm:$0xff] }
 0x3c8   :  { %v8082_v35 = vpop.f32.mrf.mxu1  ;;  %v8755_v24 = vpop.f32.mrf.mxu0 }
 0x3c9   :  { %22886 = vst [vmem:[#allocation61_spill] sm:$0xff] %v17853_v34  ;;  %v7929_v34 = vadd.f32 %v17389_v36, %v22889_v18  ;;  %v14510_v36 = vld [vmem:[%s22492_s1 + $0x1144] ss:$40 sps:$4 sm:$0xff]  }
 0x3ca   :  { %v17863_v52 = vpop.f32.mrf.mxu1  ;;  %8276 = vmatmul.mubr.bf16.gmra.mxu1 %v14493_v10  ;;  %v8758_v58 = vpop.f32.mrf.mxu0  ;;  %8949 = vmatmul.mubr.bf16.gmra.mxu0 %v14496_v0  ;;  %v14502_v10 = vld [vmem:[%s22492_s1 + $0x10f0] ss:$40 sps:$4 sm:$0xff]  }
 0x3cb   :  { %v17865_v49 = vadd.f32 %v8758_v58, %v7926_v31  ;;  %8283 = vmatprep.mubr.bf16.mxu1 %v14501_v13  ;;  %8956 = vmatprep.mubr.bf16.mxu0 %v14504_v3  ;;  %v14507_v13 = vld [vmem:[%s22492_s1 + $0x177c] ss:$40 sps:$4 sm:$0xff]   ;;  %v7934_v31 = vadd.f32 %v17407_v43, %v22891_v59  ;;  %v14505_v43 = vld [vmem:[%s22492_s1 + $0x1778] ss:$40 sps:$4 sm:$0xff]  }
 0x3cc   :  { %v8087_v7 = vpop.f32.mrf.mxu1  ;;  %v8760_v17 = vpop.f32.mrf.mxu0  ;;  %v22895_v59 = vld [vmem:[#allocation101_spill] sm:$0xff] }
 0x3cd   :  { %22888 = vst [vmem:[#allocation63_spill] sm:$0xff] %v17865_v49 }
 0x3ce   :  { %v17869_v8 = vpop.f32.mrf.mxu1  ;;  %v8761_v35 = vpop.f32.mrf.mxu0 }
 0x3cf   :  { %v17877_v0 = vadd.f32 %v8761_v35, %v7929_v34  ;;  %v22893_v35 = vld [vmem:[#allocation99_spill] sm:$0xff] }
 0x3d0   :  { %v8090_v3 = vpop.f32.mrf.mxu1  ;;  %v8763_v24 = vpop.f32.mrf.mxu0 }
 0x3d1   :  { %22890 = vst [vmem:[#allocation65_spill] sm:$0xff] %v17877_v0  ;;  %v7937_v0 = vadd.f32 %v17413_v62, %v22893_v35  ;;  %v14516_v62 = vld [vmem:[%s22492_s1 + $0x1194] ss:$40 sps:$4 sm:$0xff]  }
 0x3d2   :  { %v17887_v58 = vpop.f32.mrf.mxu1  ;;  %8284 = vmatmul.mubr.bf16.gmra.mxu1 %v14499_v25  ;;  %v8766_v7 = vpop.f32.mrf.mxu0  ;;  %8957 = vmatmul.mubr.bf16.gmra.mxu0 %v14502_v10  ;;  %v14508_v25 = vld [vmem:[%s22492_s1 + $0x1140] ss:$40 sps:$4 sm:$0xff]  }
 0x3d3   :  { %v17889_v34 = vadd.f32 %v8766_v7, %v7934_v31  ;;  %8291 = vmatprep.mubr.bf16.mxu1 %v14507_v13  ;;  %8964 = vmatprep.mubr.bf16.mxu0 %v14510_v36  ;;  %v14513_v13 = vld [vmem:[%s22492_s1 + $0x17cc] ss:$40 sps:$4 sm:$0xff]   ;;  %v7942_v31 = vadd.f32 %v17431_v4, %v22895_v59  ;;  %v14511_v4 = vld [vmem:[%s22492_s1 + $0x17c8] ss:$40 sps:$4 sm:$0xff]   ;;  %v22899_v59 = vld [vmem:[#allocation105_spill] sm:$0xff] }
 0x3d4   :  { %v8095_v17 = vpop.f32.mrf.mxu1  ;;  %v8768_v18 = vpop.f32.mrf.mxu0 }
 0x3d5   :  { %22892 = vst [vmem:[#allocation67_spill] sm:$0xff] %v17889_v34 }
 0x3d6   :  { %v17893_v49 = vpop.f32.mrf.mxu1  ;;  %v8769_v3 = vpop.f32.mrf.mxu0 }
 0x3d7   :  { %v17901_v10 = vadd.f32 %v8769_v3, %v7937_v0  ;;  %v22897_v3 = vld [vmem:[#allocation103_spill] sm:$0xff] }
 0x3d8   :  { %v8098_v36 = vpop.f32.mrf.mxu1  ;;  %v8771_v24 = vpop.f32.mrf.mxu0 }
 0x3d9   :  { %22894 = vst [vmem:[#allocation69_spill] sm:$0xff] %v17901_v10  ;;  %v7945_v10 = vadd.f32 %v17437_v37, %v22897_v3  ;;  %v14522_v37 = vld [vmem:[%s22492_s1 + $0x11e4] ss:$40 sps:$4 sm:$0xff]  }
 0x3da   :  { %v17911_v7 = vpop.f32.mrf.mxu1  ;;  %8292 = vmatmul.mubr.bf16.gmra.mxu1 %v14505_v43  ;;  %v8774_v17 = vpop.f32.mrf.mxu0  ;;  %8965 = vmatmul.mubr.bf16.gmra.mxu0 %v14508_v25  ;;  %v14514_v43 = vld [vmem:[%s22492_s1 + $0x1190] ss:$40 sps:$4 sm:$0xff]  }
 0x3db   :  { %v17913_v0 = vadd.f32 %v8774_v17, %v7942_v31  ;;  %8299 = vmatprep.mubr.bf16.mxu1 %v14513_v13  ;;  %8972 = vmatprep.mubr.bf16.mxu0 %v14516_v62  ;;  %v14519_v13 = vld [vmem:[%s22492_s1 + $0x181c] ss:$40 sps:$4 sm:$0xff]   ;;  %v7950_v31 = vadd.f32 %v17455_v20, %v22899_v59  ;;  %v22902_v20 = vmov 0   ;;  %v14614_v59 = vld [vmem:[%s22491_s0 + $0x1b0] sm:$0xff]  }
 0x3dc   :  { %v8103_v18 = vpop.f32.mrf.mxu1  ;;  %v8776_v35 = vpop.f32.mrf.mxu0  ;;  %v14613_v17 = vld [vmem:[%s22491_s0 + $0x1b8] sm:$0xff]  }
 0x3dd   :  { %22896 = vst [vmem:[#allocation71_spill] sm:$0xff] %v17913_v0  ;;  %9326 = vmatpush1.bf16.msra.mxu1 %v14613_v17  ;;  %v22934_v0 = vld [vmem:[#allocation138_spill] sm:$0xff] }
 0x3de   :  { %v17917_v34 = vpop.f32.mrf.mxu1  ;;  %v8777_v36 = vpop.f32.mrf.mxu0  ;;  %9327 = vmatprep.subr.bf16.mxu1 %v22902_v20  ;;  %v8017_v33 = vadd.f32 %v17653_v57, %v22934_v0  ;;  %v14576_v57 = vld [vmem:[%s22492_s1 + $0x14b4] ss:$40 sps:$4 sm:$0xff]  }
 0x3df   :  { %v17925_v25 = vadd.f32 %v8777_v36, %v7945_v10 }
 0x3e0   :  { %v8106_v62 = vpop.f32.mrf.mxu1  ;;  %v8779_v24 = vpop.f32.mrf.mxu0 }
 0x3e1   :  { %22898 = vst [vmem:[#allocation73_spill] sm:$0xff] %v17925_v25  ;;  %v22901_v62 = vld [vmem:[#allocation107_spill] sm:$0xff]  ;;  %9328 = vmatpush1.bf16.msra.mxu1 %v14614_v59 }
 0x3e2   :  { %v17938_v18 = vpop.f32.mrf.mxu1  ;;  %8300 = vmatmul.mubr.bf16.gmra.mxu1 %v14511_v4  ;;  %v8782_v10 = vpop.f32.mrf.mxu0  ;;  %8973 = vmatmul.mubr.bf16.gmra.mxu0 %v14514_v43  ;;  %v7953_v24 = vadd.f32 %v17461_v50, %v22901_v62  ;;  %v14517_v43 = vld [vmem:[%s22492_s1 + $0x1818] ss:$40 sps:$4 sm:$0xff]   ;;  %v14525_v50 = vld [vmem:[%s22492_s1 + $0x186c] ss:$40 sps:$4 sm:$0xff]  }
 0x3e3   :  { %v17940_v35 = vadd.f32 %v8782_v10, %v7950_v31  ;;  %8307 = vmatprep.mubr.bf16.mxu1 %v14519_v13  ;;  %8980 = vmatprep.mubr.bf16.mxu0 %v14522_v37  ;;  %v14520_v13 = vld [vmem:[%s22492_s1 + $0x11e0] ss:$40 sps:$4 sm:$0xff]   ;;  %v14528_v31 = vld [vmem:[%s22492_s1 + $0x1234] ss:$40 sps:$4 sm:$0xff]  }
 0x3e4   :  { %v8111_v3 = vpop.f32.mrf.mxu1  ;;  %v8784_v36 = vpop.f32.mrf.mxu0  ;;  %9329 = vmatprep.subr.bf16.mxu1 %v22902_v20  ;;  %v14621_v62 = vld [vmem:[%s22491_s0 + $0x1a8] sm:$0xff]  }
 0x3e5   :  { %22900 = vst [vmem:[#allocation75_spill] sm:$0xff] %v17940_v35  ;;  %v22904_v3 = vld [vmem:[#allocation109_spill] sm:$0xff]  ;;  %9330 = vmatpush1.bf16.msra.mxu1 %v14621_v62 }
 0x3e6   :  { %v17948_v25 = vpop.f32.mrf.mxu1  ;;  %v8785_v4 = vpop.f32.mrf.mxu0  ;;  %v7958_v36 = vadd.f32 %v17479_v46, %v22904_v3  ;;  %9331 = vmatprep.subr.bf16.mxu1 %v22902_v20  ;;  %v14622_v3 = vld [vmem:[%s22491_s0 + $0x1a0] sm:$0xff]  }
 0x3e7   :  { %v17956_v37 = vadd.f32 %v8785_v4, %v7953_v24 }
 0x3e8   :  { %v8114_v17 = vpop.f32.mrf.mxu1  ;;  %v8787_v10 = vpop.f32.mrf.mxu0 }
 0x3e9   :  { %22903 = vst [vmem:[#allocation77_spill] sm:$0xff] %v17956_v37  ;;  %v22906_v10 = vld [vmem:[#allocation111_spill] sm:$0xff]  ;;  %9332 = vmatpush1.bf16.msra.mxu1 %v14622_v3 }
 0x3ea   :  { %v17970_v24 = vpop.f32.mrf.mxu1  ;;  %8308 = vmatmul.mubr.bf16.gmra.mxu1 %v14517_v43  ;;  %v8790_v4 = vpop.f32.mrf.mxu0  ;;  %8981 = vmatmul.mubr.bf16.gmra.mxu0 %v14520_v13  ;;  %v7961_v46 = vadd.f32 %v17485_v32, %v22906_v10  ;;  %v14523_v13 = vld [vmem:[%s22492_s1 + $0x1868] ss:$40 sps:$4 sm:$0xff]   ;;  %v14531_v32 = vld [vmem:[%s22492_s1 + $0x18bc] ss:$40 sps:$4 sm:$0xff]  }
 0x3eb   :  { %v17972_v37 = vadd.f32 %v8790_v4, %v7958_v36  ;;  %8315 = vmatprep.mubr.bf16.mxu1 %v14525_v50  ;;  %8988 = vmatprep.mubr.bf16.mxu0 %v14528_v31  ;;  %v14526_v50 = vld [vmem:[%s22492_s1 + $0x1230] ss:$40 sps:$4 sm:$0xff]   ;;  %v14534_v36 = vld [vmem:[%s22492_s1 + $0x1284] ss:$40 sps:$4 sm:$0xff]  }
 0x3ec   :  { %v8119_v17 = vpop.f32.mrf.mxu1  ;;  %v8792_v59 = vpop.f32.mrf.mxu0  ;;  %9333 = vmatprep.subr.bf16.mxu1 %v22902_v20  ;;  %v14629_v10 = vld [vmem:[%s22491_s0 + $0x198] sm:$0xff]  }
 0x3ed   :  { %22905 = vst [vmem:[#allocation79_spill] sm:$0xff] %v17972_v37  ;;  %v22908_v17 = vld [vmem:[#allocation113_spill] sm:$0xff]  ;;  %9334 = vmatpush1.bf16.msra.mxu1 %v14629_v10 }
 0x3ee   :  { %v17980_v35 = vpop.f32.mrf.mxu1  ;;  %v8793_v43 = vpop.f32.mrf.mxu0  ;;  %v7966_v59 = vadd.f32 %v17503_v53, %v22908_v17  ;;  %9335 = vmatprep.subr.bf16.mxu1 %v22902_v20  ;;  %v14630_v17 = vld [vmem:[%s22491_s0 + $0x190] sm:$0xff]  }
 0x3ef   :  { %v17988_v31 = vadd.f32 %v8793_v43, %v7961_v46 }
 0x3f0   :  { %v8122_v62 = vpop.f32.mrf.mxu1  ;;  %v8795_v4 = vpop.f32.mrf.mxu0 }
 0x3f1   :  { %22907 = vst [vmem:[#allocation81_spill] sm:$0xff] %v17988_v31  ;;  %v22910_v4 = vld [vmem:[#allocation115_spill] sm:$0xff]  ;;  %9336 = vmatpush1.bf16.msra.mxu1 %v14630_v17 }
 0x3f2   :  { %v18002_v46 = vpop.f32.mrf.mxu1  ;;  %8316 = vmatmul.mubr.bf16.gmra.mxu1 %v14523_v13  ;;  %v8798_v43 = vpop.f32.mrf.mxu0  ;;  %8989 = vmatmul.mubr.bf16.gmra.mxu0 %v14526_v50  ;;  %v7969_v53 = vadd.f32 %v17509_v14, %v22910_v4  ;;  %v14529_v50 = vld [vmem:[%s22492_s1 + $0x18b8] ss:$40 sps:$4 sm:$0xff]   ;;  %v14537_v14 = vld [vmem:[%s22492_s1 + $0x190c] ss:$40 sps:$4 sm:$0xff]  }
 0x3f3   :  { %v18004_v31 = vadd.f32 %v8798_v43, %v7966_v59  ;;  %8323 = vmatprep.mubr.bf16.mxu1 %v14531_v32  ;;  %8996 = vmatprep.mubr.bf16.mxu0 %v14534_v36  ;;  %v14532_v32 = vld [vmem:[%s22492_s1 + $0x1280] ss:$40 sps:$4 sm:$0xff]   ;;  %v14540_v59 = vld [vmem:[%s22492_s1 + $0x12d4] ss:$40 sps:$4 sm:$0xff]  }
 0x3f4   :  { %v8127_v62 = vpop.f32.mrf.mxu1  ;;  %v8800_v3 = vpop.f32.mrf.mxu0  ;;  %9337 = vmatprep.subr.bf16.mxu1 %v22902_v20  ;;  %v14637_v4 = vld [vmem:[%s22491_s0 + $0x188] sm:$0xff]  }
 0x3f5   :  { %22909 = vst [vmem:[#allocation83_spill] sm:$0xff] %v18004_v31  ;;  %v22912_v62 = vld [vmem:[#allocation117_spill] sm:$0xff]  ;;  %9338 = vmatpush1.bf16.msra.mxu1 %v14637_v4 }
 0x3f6   :  { %v18012_v37 = vpop.f32.mrf.mxu1  ;;  %v8801_v13 = vpop.f32.mrf.mxu0  ;;  %v7974_v3 = vadd.f32 %v17527_v26, %v22912_v62  ;;  %9339 = vmatprep.subr.bf16.mxu1 %v22902_v20  ;;  %v14638_v62 = vld [vmem:[%s22491_s0 + $0x180] sm:$0xff]  }
 0x3f7   :  { %v18020_v36 = vadd.f32 %v8801_v13, %v7969_v53 }
 0x3f8   :  { %v8130_v10 = vpop.f32.mrf.mxu1  ;;  %v8803_v43 = vpop.f32.mrf.mxu0 }
 0x3f9   :  { %22911 = vst [vmem:[#allocation85_spill] sm:$0xff] %v18020_v36  ;;  %v22914_v43 = vld [vmem:[#allocation119_spill] sm:$0xff]  ;;  %9340 = vmatpush1.bf16.msra.mxu1 %v14638_v62 }
 0x3fa   :  { %v18034_v53 = vpop.f32.mrf.mxu1  ;;  %8324 = vmatmul.mubr.bf16.gmra.mxu1 %v14529_v50  ;;  %v8806_v13 = vpop.f32.mrf.mxu0  ;;  %8997 = vmatmul.mubr.bf16.gmra.mxu0 %v14532_v32  ;;  %v7977_v26 = vadd.f32 %v17533_v63, %v22914_v43  ;;  %v14535_v32 = vld [vmem:[%s22492_s1 + $0x1908] ss:$40 sps:$4 sm:$0xff]   ;;  %v14543_v63 = vld [vmem:[%s22492_s1 + $0x195c] ss:$40 sps:$4 sm:$0xff]  }
 0x3fb   :  { %v18036_v36 = vadd.f32 %v8806_v13, %v7974_v3  ;;  %8331 = vmatprep.mubr.bf16.mxu1 %v14537_v14  ;;  %9004 = vmatprep.mubr.bf16.mxu0 %v14540_v59  ;;  %v14538_v14 = vld [vmem:[%s22492_s1 + $0x12d0] ss:$40 sps:$4 sm:$0xff]   ;;  %v14546_v3 = vld [vmem:[%s22492_s1 + $0x1324] ss:$40 sps:$4 sm:$0xff]  }
 0x3fc   :  { %v8135_v10 = vpop.f32.mrf.mxu1  ;;  %v8808_v17 = vpop.f32.mrf.mxu0  ;;  %9341 = vmatprep.subr.bf16.mxu1 %v22902_v20  ;;  %v14645_v43 = vld [vmem:[%s22491_s0 + $0x1f8] sm:$0xff]  }
 0x3fd   :  { %22913 = vst [vmem:[#allocation87_spill] sm:$0xff] %v18036_v36  ;;  %v22916_v10 = vld [vmem:[#allocation121_spill] sm:$0xff]  ;;  %9342 = vmatpush2.bf16.msra.mxu1 %v14645_v43 }
 0x3fe   :  { %v18044_v31 = vpop.f32.mrf.mxu1  ;;  %v8809_v50 = vpop.f32.mrf.mxu0  ;;  %v7982_v17 = vadd.f32 %v17551_v29, %v22916_v10  ;;  %9343 = vmatprep.subr.bf16.mxu1 %v22902_v20  ;;  %v14646_v10 = vld [vmem:[%s22491_s0 + $0x1f0] sm:$0xff]  }
 0x3ff   :  { %v18052_v59 = vadd.f32 %v8809_v50, %v7977_v26 }
 0x400   :  { %v8138_v4 = vpop.f32.mrf.mxu1  ;;  %v8811_v13 = vpop.f32.mrf.mxu0 }
 0x401   :  { %22915 = vst [vmem:[#allocation89_spill] sm:$0xff] %v18052_v59  ;;  %v22918_v13 = vld [vmem:[#allocation123_spill] sm:$0xff]  ;;  %9344 = vmatpush2.bf16.msra.mxu1 %v14646_v10 }
 0x402   :  { %v18066_v26 = vpop.f32.mrf.mxu1  ;;  %8332 = vmatmul.mubr.bf16.gmra.mxu1 %v14535_v32  ;;  %v8814_v50 = vpop.f32.mrf.mxu0  ;;  %9005 = vmatmul.mubr.bf16.gmra.mxu0 %v14538_v14  ;;  %v7985_v29 = vadd.f32 %v17557_v51, %v22918_v13  ;;  %v14541_v14 = vld [vmem:[%s22492_s1 + $0x1958] ss:$40 sps:$4 sm:$0xff]   ;;  %v14549_v51 = vld [vmem:[%s22492_s1 + $0x19ac] ss:$40 sps:$4 sm:$0xff]  }
 0x403   :  { %v18068_v59 = vadd.f32 %v8814_v50, %v7982_v17  ;;  %8339 = vmatprep.mubr.bf16.mxu1 %v14543_v63  ;;  %9012 = vmatprep.mubr.bf16.mxu0 %v14546_v3  ;;  %v14544_v63 = vld [vmem:[%s22492_s1 + $0x1320] ss:$40 sps:$4 sm:$0xff]   ;;  %v14552_v17 = vld [vmem:[%s22492_s1 + $0x1374] ss:$40 sps:$4 sm:$0xff]  }
 0x404   :  { %v8143_v4 = vpop.f32.mrf.mxu1  ;;  %v8816_v62 = vpop.f32.mrf.mxu0  ;;  %9345 = vmatprep.subr.bf16.mxu1 %v22902_v20  ;;  %v14653_v13 = vld [vmem:[%s22491_s0 + $0x1e8] sm:$0xff]  }
 0x405   :  { %22917 = vst [vmem:[#allocation91_spill] sm:$0xff] %v18068_v59  ;;  %v22920_v4 = vld [vmem:[#allocation125_spill] sm:$0xff]  ;;  %9346 = vmatpush2.bf16.msra.mxu1 %v14653_v13 }
 0x406   :  { %v18076_v36 = vpop.f32.mrf.mxu1  ;;  %v8817_v32 = vpop.f32.mrf.mxu0  ;;  %v7990_v62 = vadd.f32 %v17575_v30, %v22920_v4  ;;  %9347 = vmatprep.subr.bf16.mxu1 %v22902_v20  ;;  %v14654_v4 = vld [vmem:[%s22491_s0 + $0x1e0] sm:$0xff]  }
 0x407   :  { %v18084_v3 = vadd.f32 %v8817_v32, %v7985_v29 }
 0x408   :  { %v8146_v43 = vpop.f32.mrf.mxu1  ;;  %v8819_v50 = vpop.f32.mrf.mxu0 }
 0x409   :  { %22919 = vst [vmem:[#allocation93_spill] sm:$0xff] %v18084_v3  ;;  %v22922_v50 = vld [vmem:[#allocation127_spill] sm:$0xff]  ;;  %9348 = vmatpush2.bf16.msra.mxu1 %v14654_v4 }
 0x40a   :  { %v18098_v29 = vpop.f32.mrf.mxu1  ;;  %8340 = vmatmul.mubr.bf16.gmra.mxu1 %v14541_v14  ;;  %v8822_v32 = vpop.f32.mrf.mxu0  ;;  %9013 = vmatmul.mubr.bf16.gmra.mxu0 %v14544_v63  ;;  %v7993_v30 = vadd.f32 %v17581_v39, %v22922_v50  ;;  %v14547_v63 = vld [vmem:[%s22492_s1 + $0x19a8] ss:$40 sps:$4 sm:$0xff]   ;;  %v14555_v39 = vld [vmem:[%s22492_s1 + $0x19fc] ss:$40 sps:$4 sm:$0xff]  }
 0x40b   :  { %v18100_v3 = vadd.f32 %v8822_v32, %v7990_v62  ;;  %8347 = vmatprep.mubr.bf16.mxu1 %v14549_v51  ;;  %9020 = vmatprep.mubr.bf16.mxu0 %v14552_v17  ;;  %v14550_v51 = vld [vmem:[%s22492_s1 + $0x1370] ss:$40 sps:$4 sm:$0xff]   ;;  %v14558_v62 = vld [vmem:[%s22492_s1 + $0x13c4] ss:$40 sps:$4 sm:$0xff]  }
 0x40c   :  { %v8151_v43 = vpop.f32.mrf.mxu1  ;;  %v8824_v10 = vpop.f32.mrf.mxu0  ;;  %9349 = vmatprep.subr.bf16.mxu1 %v22902_v20  ;;  %v14661_v50 = vld [vmem:[%s22491_s0 + $0x1d8] sm:$0xff]  }
 0x40d   :  { %22921 = vst [vmem:[#allocation95_spill] sm:$0xff] %v18100_v3  ;;  %v22924_v43 = vld [vmem:[#allocation129_spill] sm:$0xff]  ;;  %9350 = vmatpush2.bf16.msra.mxu1 %v14661_v50 }
 0x40e   :  { %v18108_v59 = vpop.f32.mrf.mxu1  ;;  %v8825_v14 = vpop.f32.mrf.mxu0  ;;  %v7998_v10 = vadd.f32 %v17599_v12, %v22924_v43  ;;  %9351 = vmatprep.subr.bf16.mxu1 %v22902_v20  ;;  %v14662_v43 = vld [vmem:[%s22491_s0 + $0x1d0] sm:$0xff]  }
 0x40f   :  { %v18116_v17 = vadd.f32 %v8825_v14, %v7993_v30 }
 0x410   :  { %v8154_v13 = vpop.f32.mrf.mxu1  ;;  %v8827_v32 = vpop.f32.mrf.mxu0 }
 0x411   :  { %22923 = vst [vmem:[#allocation97_spill] sm:$0xff] %v18116_v17  ;;  %v22926_v32 = vld [vmem:[#allocation131_spill] sm:$0xff]  ;;  %9352 = vmatpush2.bf16.msra.mxu1 %v14662_v43 }
 0x412   :  { %v18130_v30 = vpop.f32.mrf.mxu1  ;;  %8348 = vmatmul.mubr.bf16.gmra.mxu1 %v14547_v63  ;;  %v8830_v14 = vpop.f32.mrf.mxu0  ;;  %9021 = vmatmul.mubr.bf16.gmra.mxu0 %v14550_v51  ;;  %v8001_v12 = vadd.f32 %v17605_v27, %v22926_v32  ;;  %v14553_v51 = vld [vmem:[%s22492_s1 + $0x19f8] ss:$40 sps:$4 sm:$0xff]   ;;  %v14561_v27 = vld [vmem:[%s22492_s1 + $0x1a4c] ss:$40 sps:$4 sm:$0xff]  }
 0x413   :  { %v18132_v17 = vadd.f32 %v8830_v14, %v7998_v10  ;;  %8355 = vmatprep.mubr.bf16.mxu1 %v14555_v39  ;;  %9028 = vmatprep.mubr.bf16.mxu0 %v14558_v62  ;;  %v14556_v39 = vld [vmem:[%s22492_s1 + $0x13c0] ss:$40 sps:$4 sm:$0xff]   ;;  %v14564_v10 = vld [vmem:[%s22492_s1 + $0x1414] ss:$40 sps:$4 sm:$0xff]  }
 0x414   :  { %v8159_v13 = vpop.f32.mrf.mxu1  ;;  %v8832_v4 = vpop.f32.mrf.mxu0  ;;  %9353 = vmatprep.subr.bf16.mxu1 %v22902_v20  ;;  %v14669_v32 = vld [vmem:[%s22491_s0 + $0x1c8] sm:$0xff]  }
 0x415   :  { %22925 = vst [vmem:[#allocation99_spill] sm:$0xff] %v18132_v17  ;;  %v22928_v13 = vld [vmem:[#allocation133_spill] sm:$0xff]  ;;  %9354 = vmatpush2.bf16.msra.mxu1 %v14669_v32 }
 0x416   :  { %v18140_v3 = vpop.f32.mrf.mxu1  ;;  %v8833_v63 = vpop.f32.mrf.mxu0  ;;  %v8006_v4 = vadd.f32 %v17623_v56, %v22928_v13  ;;  %9355 = vmatprep.subr.bf16.mxu1 %v22902_v20  ;;  %v14670_v13 = vld [vmem:[%s22491_s0 + $0x1c0] sm:$0xff]  }
 0x417   :  { %v18148_v62 = vadd.f32 %v8833_v63, %v8001_v12 }
 0x418   :  { %v8162_v50 = vpop.f32.mrf.mxu1  ;;  %v8835_v14 = vpop.f32.mrf.mxu0 }
 0x419   :  { %22927 = vst [vmem:[#allocation101_spill] sm:$0xff] %v18148_v62  ;;  %v22930_v14 = vld [vmem:[#allocation135_spill] sm:$0xff]  ;;  %9356 = vmatpush2.bf16.msra.mxu1 %v14670_v13 }
 0x41a   :  { %v18162_v12 = vpop.f32.mrf.mxu1  ;;  %8356 = vmatmul.mubr.bf16.gmra.mxu1 %v14553_v51  ;;  %v8838_v63 = vpop.f32.mrf.mxu0  ;;  %9029 = vmatmul.mubr.bf16.gmra.mxu0 %v14556_v39  ;;  %v8009_v56 = vadd.f32 %v17629_v15, %v22930_v14  ;;  %v14559_v39 = vld [vmem:[%s22492_s1 + $0x1a48] ss:$40 sps:$4 sm:$0xff]   ;;  %v14567_v15 = vld [vmem:[%s22492_s1 + $0x1a9c] ss:$40 sps:$4 sm:$0xff]  }
 0x41b   :  { %v18164_v62 = vadd.f32 %v8838_v63, %v8006_v4  ;;  %8363 = vmatprep.mubr.bf16.mxu1 %v14561_v27  ;;  %9036 = vmatprep.mubr.bf16.mxu0 %v14564_v10  ;;  %v14562_v27 = vld [vmem:[%s22492_s1 + $0x1410] ss:$40 sps:$4 sm:$0xff]   ;;  %v14570_v4 = vld [vmem:[%s22492_s1 + $0x1464] ss:$40 sps:$4 sm:$0xff]  }
 0x41c   :  { %v8167_v50 = vpop.f32.mrf.mxu1  ;;  %v8840_v43 = vpop.f32.mrf.mxu0 }
 0x41d   :  { %22929 = vst [vmem:[#allocation103_spill] sm:$0xff] %v18164_v62  ;;  %v22932_v50 = vld [vmem:[#allocation137_spill] sm:$0xff] }
 0x41e   :  { %v18172_v17 = vpop.f32.mrf.mxu1  ;;  %v8841_v51 = vpop.f32.mrf.mxu0  ;;  %v8014_v43 = vadd.f32 %v17647_v11, %v22932_v50  ;;  %v14565_v11 = vld [vmem:[%s22492_s1 + $0x1a98] ss:$40 sps:$4 sm:$0xff]  }
 0x41f   :  { %v18180_v10 = vadd.f32 %v8841_v51, %v8009_v56 }
 0x420   :  { %v8170_v32 = vpop.f32.mrf.mxu1  ;;  %v8843_v63 = vpop.f32.mrf.mxu0 }
 0x421   :  { %22931 = vst [vmem:[#allocation105_spill] sm:$0xff] %v18180_v10 }
 0x422   :  { %v18190_v14 = vpop.f32.mrf.mxu1  ;;  %8364 = vmatmul.mubr.bf16.gmra.mxu1 %v14559_v39  ;;  %v8846_v62 = vpop.f32.mrf.mxu0  ;;  %9037 = vmatmul.mubr.bf16.gmra.mxu0 %v14562_v27  ;;  %v14568_v39 = vld [vmem:[%s22492_s1 + $0x1460] ss:$40 sps:$4 sm:$0xff]   ;;  %v14573_v27 = vld [vmem:[%s22492_s1 + $0x1aec] ss:$40 sps:$4 sm:$0xff]  }
 0x423   :  { %v18192_v56 = vadd.f32 %v8846_v62, %v8014_v43  ;;  %8371 = vmatprep.mubr.bf16.mxu1 %v14567_v15  ;;  %9044 = vmatprep.mubr.bf16.mxu0 %v14570_v4  ;;  %v22936_v15 = vld [vmem:[#allocation139_spill] sm:$0xff] }
 0x424   :  { %v8175_v51 = vpop.f32.mrf.mxu1  ;;  %v8848_v10 = vpop.f32.mrf.mxu0  ;;  %v8022_v4 = vadd.f32 %v17671_v55, %v22936_v15  ;;  %v14571_v55 = vld [vmem:[%s22492_s1 + $0x1ae8] ss:$40 sps:$4 sm:$0xff]   ;;  %v22940_v15 = vld [vmem:[#allocation141_spill] sm:$0xff] }
 0x425   :  { %22933 = vst [vmem:[#allocation107_spill] sm:$0xff] %v18192_v56 }
 0x426   :  { %v18196_v32 = vpop.f32.mrf.mxu1  ;;  %v8849_v13 = vpop.f32.mrf.mxu0 }
 0x427   :  { %v18204_v62 = vadd.f32 %v8849_v13, %v8017_v33  ;;  %v22938_v13 = vld [vmem:[#allocation140_spill] sm:$0xff] }
 0x428   :  { %v8178_v0 = vpop.f32.mrf.mxu1  ;;  %v8851_v10 = vpop.f32.mrf.mxu0 }
 0x429   :  { %22935 = vst [vmem:[#allocation109_spill] sm:$0xff] %v18204_v62  ;;  %v8025_v62 = vadd.f32 %v17677_v45, %v22938_v13  ;;  %v14582_v45 = vld [vmem:[%s22492_s1 + $0x1504] ss:$40 sps:$4 sm:$0xff]  }
 0x42a   :  { %v18214_v63 = vpop.f32.mrf.mxu1  ;;  %8372 = vmatmul.mubr.bf16.gmra.mxu1 %v14565_v11  ;;  %v8854_v50 = vpop.f32.mrf.mxu0  ;;  %9045 = vmatmul.mubr.bf16.gmra.mxu0 %v14568_v39  ;;  %v14574_v11 = vld [vmem:[%s22492_s1 + $0x14b0] ss:$40 sps:$4 sm:$0xff]  }
 0x42b   :  { %v18216_v33 = vadd.f32 %v8854_v50, %v8022_v4  ;;  %8379 = vmatprep.mubr.bf16.mxu1 %v14573_v27  ;;  %9052 = vmatprep.mubr.bf16.mxu0 %v14576_v57  ;;  %v14579_v27 = vld [vmem:[%s22492_s1 + $0x1b3c] ss:$40 sps:$4 sm:$0xff]   ;;  %v8030_v4 = vadd.f32 %v17695_v61, %v22940_v15  ;;  %v14577_v61 = vld [vmem:[%s22492_s1 + $0x1b38] ss:$40 sps:$4 sm:$0xff]   ;;  %v22944_v15 = vld [vmem:[#allocation143_spill] sm:$0xff] }
 0x42c   :  { %v8183_v43 = vpop.f32.mrf.mxu1  ;;  %v8856_v51 = vpop.f32.mrf.mxu0 }
 0x42d   :  { %22937 = vst [vmem:[#allocation111_spill] sm:$0xff] %v18216_v33 }
 0x42e   :  { %v18220_v56 = vpop.f32.mrf.mxu1  ;;  %v8857_v0 = vpop.f32.mrf.mxu0 }
 0x42f   :  { %v18228_v39 = vadd.f32 %v8857_v0, %v8025_v62  ;;  %v22942_v0 = vld [vmem:[#allocation142_spill] sm:$0xff] }
 0x430   :  { %v8186_v57 = vpop.f32.mrf.mxu1  ;;  %v8859_v10 = vpop.f32.mrf.mxu0 }
 0x431   :  { %22939 = vst [vmem:[#allocation113_spill] sm:$0xff] %v18228_v39  ;;  %v8033_v39 = vadd.f32 %v17701_v19, %v22942_v0  ;;  %v14588_v19 = vld [vmem:[%s22492_s1 + $0x1554] ss:$40 sps:$4 sm:$0xff]  }
 0x432   :  { %v18238_v50 = vpop.f32.mrf.mxu1  ;;  %8380 = vmatmul.mubr.bf16.gmra.mxu1 %v14571_v55  ;;  %v8862_v43 = vpop.f32.mrf.mxu0  ;;  %9053 = vmatmul.mubr.bf16.gmra.mxu0 %v14574_v11  ;;  %v14580_v55 = vld [vmem:[%s22492_s1 + $0x1500] ss:$40 sps:$4 sm:$0xff]  }
 0x433   :  { %v18240_v62 = vadd.f32 %v8862_v43, %v8030_v4  ;;  %8387 = vmatprep.mubr.bf16.mxu1 %v14579_v27  ;;  %9060 = vmatprep.mubr.bf16.mxu0 %v14582_v45  ;;  %v14585_v27 = vld [vmem:[%s22492_s1 + $0x1b8c] ss:$40 sps:$4 sm:$0xff]   ;;  %v8038_v4 = vadd.f32 %v17719_v48, %v22944_v15  ;;  %v14583_v48 = vld [vmem:[%s22492_s1 + $0x1b88] ss:$40 sps:$4 sm:$0xff]   ;;  %v22948_v15 = vld [vmem:[#allocation145_spill] sm:$0xff] }
 0x434   :  { %v8191_v51 = vpop.f32.mrf.mxu1  ;;  %v8864_v13 = vpop.f32.mrf.mxu0 }
 0x435   :  { %22941 = vst [vmem:[#allocation115_spill] sm:$0xff] %v18240_v62 }
 0x436   :  { %v18244_v33 = vpop.f32.mrf.mxu1  ;;  %v8865_v57 = vpop.f32.mrf.mxu0 }
 0x437   :  { %v18252_v11 = vadd.f32 %v8865_v57, %v8033_v39  ;;  %v22946_v57 = vld [vmem:[#allocation144_spill] sm:$0xff] }
 0x438   :  { %v8194_v45 = vpop.f32.mrf.mxu1  ;;  %v8867_v10 = vpop.f32.mrf.mxu0 }
 0x439   :  { %22943 = vst [vmem:[#allocation117_spill] sm:$0xff] %v18252_v11  ;;  %v8041_v11 = vadd.f32 %v17725_v60, %v22946_v57  ;;  %v14594_v60 = vld [vmem:[%s22492_s1 + $0x15a4] ss:$40 sps:$4 sm:$0xff]  }
 0x43a   :  { %v18262_v43 = vpop.f32.mrf.mxu1  ;;  %8388 = vmatmul.mubr.bf16.gmra.mxu1 %v14577_v61  ;;  %v8870_v51 = vpop.f32.mrf.mxu0  ;;  %9061 = vmatmul.mubr.bf16.gmra.mxu0 %v14580_v55  ;;  %v14586_v61 = vld [vmem:[%s22492_s1 + $0x1550] ss:$40 sps:$4 sm:$0xff]  }
 0x43b   :  { %v18264_v39 = vadd.f32 %v8870_v51, %v8038_v4  ;;  %8395 = vmatprep.mubr.bf16.mxu1 %v14585_v27  ;;  %9068 = vmatprep.mubr.bf16.mxu0 %v14588_v19  ;;  %v14591_v27 = vld [vmem:[%s22492_s1 + $0x1bdc] ss:$40 sps:$4 sm:$0xff]   ;;  %v8046_v4 = vadd.f32 %v17743_v5, %v22948_v15  ;;  %v14589_v5 = vld [vmem:[%s22492_s1 + $0x1bd8] ss:$40 sps:$4 sm:$0xff]   ;;  %v22952_v15 = vld [vmem:[#allocation147_spill] sm:$0xff] }
 0x43c   :  { %v8199_v13 = vpop.f32.mrf.mxu1  ;;  %v8872_v0 = vpop.f32.mrf.mxu0 }
 0x43d   :  { %22945 = vst [vmem:[#allocation119_spill] sm:$0xff] %v18264_v39 }
 0x43e   :  { %v18268_v62 = vpop.f32.mrf.mxu1  ;;  %v8873_v45 = vpop.f32.mrf.mxu0 }
 0x43f   :  { %v18276_v55 = vadd.f32 %v8873_v45, %v8041_v11  ;;  %v22950_v45 = vld [vmem:[#allocation146_spill] sm:$0xff] }
 0x440   :  { %v8202_v19 = vpop.f32.mrf.mxu1  ;;  %v8875_v10 = vpop.f32.mrf.mxu0 }
 0x441   :  { %22947 = vst [vmem:[#allocation121_spill] sm:$0xff] %v18276_v55  ;;  %v8049_v55 = vadd.f32 %v17749_v42, %v22950_v45  ;;  %v14600_v42 = vld [vmem:[%s22492_s1 + $0x15f4] ss:$40 sps:$4 sm:$0xff]  }
 0x442   :  { %v18286_v51 = vpop.f32.mrf.mxu1  ;;  %8396 = vmatmul.mubr.bf16.gmra.mxu1 %v14583_v48  ;;  %v8878_v13 = vpop.f32.mrf.mxu0  ;;  %9069 = vmatmul.mubr.bf16.gmra.mxu0 %v14586_v61  ;;  %v14592_v48 = vld [vmem:[%s22492_s1 + $0x15a0] ss:$40 sps:$4 sm:$0xff]  }
 0x443   :  { %v18288_v11 = vadd.f32 %v8878_v13, %v8046_v4  ;;  %8403 = vmatprep.mubr.bf16.mxu1 %v14591_v27  ;;  %9076 = vmatprep.mubr.bf16.mxu0 %v14594_v60  ;;  %v14597_v27 = vld [vmem:[%s22492_s1 + $0x1c2c] ss:$40 sps:$4 sm:$0xff]   ;;  %v8054_v4 = vadd.f32 %v17767_v47, %v22952_v15  ;;  %v14595_v47 = vld [vmem:[%s22492_s1 + $0x1c28] ss:$40 sps:$4 sm:$0xff]   ;;  %v22956_v15 = vld [vmem:[#allocation149_spill] sm:$0xff] }
 0x444   :  { %v8207_v0 = vpop.f32.mrf.mxu1  ;;  %v8880_v57 = vpop.f32.mrf.mxu0 }
 0x445   :  { %22949 = vst [vmem:[#allocation123_spill] sm:$0xff] %v18288_v11 }
 0x446   :  { %v18292_v39 = vpop.f32.mrf.mxu1  ;;  %v8881_v19 = vpop.f32.mrf.mxu0 }
 0x447   :  { %v18300_v61 = vadd.f32 %v8881_v19, %v8049_v55  ;;  %v22954_v19 = vld [vmem:[#allocation148_spill] sm:$0xff] }
 0x448   :  { %v8210_v60 = vpop.f32.mrf.mxu1  ;;  %v8883_v10 = vpop.f32.mrf.mxu0 }
 0x449   :  { %22951 = vst [vmem:[#allocation125_spill] sm:$0xff] %v18300_v61  ;;  %v8057_v61 = vadd.f32 %v17773_v41, %v22954_v19  ;;  %v14606_v41 = vld [vmem:[%s22492_s1 + $0x1644] ss:$40 sps:$4 sm:$0xff]  }
 0x44a   :  { %v18310_v13 = vpop.f32.mrf.mxu1  ;;  %8404 = vmatmul.mubr.bf16.gmra.mxu1 %v14589_v5  ;;  %v8886_v0 = vpop.f32.mrf.mxu0  ;;  %9077 = vmatmul.mubr.bf16.gmra.mxu0 %v14592_v48  ;;  %v14598_v5 = vld [vmem:[%s22492_s1 + $0x15f0] ss:$40 sps:$4 sm:$0xff]  }
 0x44b   :  { %v18312_v55 = vadd.f32 %v8886_v0, %v8054_v4  ;;  %8411 = vmatprep.mubr.bf16.mxu1 %v14597_v27  ;;  %9084 = vmatprep.mubr.bf16.mxu0 %v14600_v42  ;;  %v14603_v27 = vld [vmem:[%s22492_s1 + $0x1c7c] ss:$40 sps:$4 sm:$0xff]   ;;  %v8062_v4 = vadd.f32 %v17791_v6, %v22956_v15  ;;  %v14601_v6 = vld [vmem:[%s22492_s1 + $0x1c78] ss:$40 sps:$4 sm:$0xff]   ;;  %v22960_v15 = vld [vmem:[#allocation151_spill] sm:$0xff] }
 0x44c   :  { %v8215_v57 = vpop.f32.mrf.mxu1  ;;  %v8888_v45 = vpop.f32.mrf.mxu0 }
 0x44d   :  { %22953 = vst [vmem:[#allocation127_spill] sm:$0xff] %v18312_v55 }
 0x44e   :  { %v18316_v11 = vpop.f32.mrf.mxu1  ;;  %v8889_v60 = vpop.f32.mrf.mxu0 }
 0x44f   :  { %v18324_v48 = vadd.f32 %v8889_v60, %v8057_v61  ;;  %v22958_v60 = vld [vmem:[#allocation150_spill] sm:$0xff] }
 0x450   :  { %v8218_v42 = vpop.f32.mrf.mxu1  ;;  %v8891_v10 = vpop.f32.mrf.mxu0 }
 0x451   :  { %22955 = vst [vmem:[#allocation129_spill] sm:$0xff] %v18324_v48  ;;  %v8065_v48 = vadd.f32 %v17797_v2, %v22958_v60  ;;  %v14612_v2 = vld [vmem:[%s22492_s1 + $0x1694] ss:$40 sps:$4 sm:$0xff]  }
 0x452   :  { %v18334_v0 = vpop.f32.mrf.mxu1  ;;  %8412 = vmatmul.mubr.bf16.gmra.mxu1 %v14595_v47  ;;  %v8894_v57 = vpop.f32.mrf.mxu0  ;;  %9085 = vmatmul.mubr.bf16.gmra.mxu0 %v14598_v5  ;;  %v14604_v47 = vld [vmem:[%s22492_s1 + $0x1640] ss:$40 sps:$4 sm:$0xff]  }
 0x453   :  { %v18336_v61 = vadd.f32 %v8894_v57, %v8062_v4  ;;  %8419 = vmatprep.mubr.bf16.mxu1 %v14603_v27  ;;  %9092 = vmatprep.mubr.bf16.mxu0 %v14606_v41  ;;  %v14609_v27 = vld [vmem:[%s22492_s1 + $0x1ccc] ss:$40 sps:$4 sm:$0xff]   ;;  %v8070_v4 = vadd.f32 %v17815_v23, %v22960_v15  ;;  %v14607_v23 = vld [vmem:[%s22492_s1 + $0x1cc8] ss:$40 sps:$4 sm:$0xff]   ;;  %v22964_v15 = vld [vmem:[#allocation153_spill] sm:$0xff] }
 0x454   :  { %v8223_v45 = vpop.f32.mrf.mxu1  ;;  %v8896_v19 = vpop.f32.mrf.mxu0 }
 0x455   :  { %22957 = vst [vmem:[#allocation131_spill] sm:$0xff] %v18336_v61 }
 0x456   :  { %v18340_v55 = vpop.f32.mrf.mxu1  ;;  %v8897_v42 = vpop.f32.mrf.mxu0 }
 0x457   :  { %v18348_v5 = vadd.f32 %v8897_v42, %v8065_v48  ;;  %v22962_v42 = vld [vmem:[#allocation152_spill] sm:$0xff] }
 0x458   :  { %v8226_v41 = vpop.f32.mrf.mxu1  ;;  %v8899_v10 = vpop.f32.mrf.mxu0 }
 0x459   :  { %22959 = vst [vmem:[#allocation133_spill] sm:$0xff] %v18348_v5  ;;  %v8073_v5 = vadd.f32 %v17821_v16, %v22962_v42  ;;  %v14620_v16 = vld [vmem:[%s22492_s1 + $0x16e4] ss:$40 sps:$4 sm:$0xff]  }
 0x45a   :  { %v18358_v57 = vpop.f32.mrf.mxu1  ;;  %8420 = vmatmul.mubr.bf16.gmra.mxu1 %v14601_v6  ;;  %v8902_v45 = vpop.f32.mrf.mxu0  ;;  %9093 = vmatmul.mubr.bf16.gmra.mxu0 %v14604_v47  ;;  %v14610_v6 = vld [vmem:[%s22492_s1 + $0x1690] ss:$40 sps:$4 sm:$0xff]  }
 0x45b   :  { %v18360_v48 = vadd.f32 %v8902_v45, %v8070_v4  ;;  %8427 = vmatprep.mubr.bf16.mxu1 %v14609_v27  ;;  %9100 = vmatprep.mubr.bf16.mxu0 %v14612_v2  ;;  %v14617_v27 = vld [vmem:[%s22492_s1 + $0x1d1c] ss:$40 sps:$4 sm:$0xff]   ;;  %v8078_v4 = vadd.f32 %v17839_v28, %v22964_v15  ;;  %v14615_v28 = vld [vmem:[%s22492_s1 + $0x1d18] ss:$40 sps:$4 sm:$0xff]   ;;  %v22968_v15 = vld [vmem:[#allocation155_spill] sm:$0xff] }
 0x45c   :  { %v8231_v19 = vpop.f32.mrf.mxu1  ;;  %v8904_v60 = vpop.f32.mrf.mxu0 }
 0x45d   :  { %22961 = vst [vmem:[#allocation135_spill] sm:$0xff] %v18360_v48 }
 0x45e   :  { %v18364_v61 = vpop.f32.mrf.mxu1  ;;  %v8905_v41 = vpop.f32.mrf.mxu0 }
 0x45f   :  { %v18372_v47 = vadd.f32 %v8905_v41, %v8073_v5  ;;  %v22966_v41 = vld [vmem:[#allocation154_spill] sm:$0xff] }
 0x460   :  { %v8234_v2 = vpop.f32.mrf.mxu1  ;;  %v8907_v10 = vpop.f32.mrf.mxu0 }
 0x461   :  { %22963 = vst [vmem:[#allocation137_spill] sm:$0xff] %v18372_v47  ;;  %v8081_v47 = vadd.f32 %v17845_v54, %v22966_v41  ;;  %v14628_v54 = vld [vmem:[%s22492_s1 + $0x1734] ss:$40 sps:$4 sm:$0xff]  }
 0x462   :  { %v18382_v45 = vpop.f32.mrf.mxu1  ;;  %8428 = vmatmul.mubr.bf16.gmra.mxu1 %v14607_v23  ;;  %v8910_v19 = vpop.f32.mrf.mxu0  ;;  %9101 = vmatmul.mubr.bf16.gmra.mxu0 %v14610_v6  ;;  %v14618_v23 = vld [vmem:[%s22492_s1 + $0x16e0] ss:$40 sps:$4 sm:$0xff]  }
 0x463   :  { %v18384_v5 = vadd.f32 %v8910_v19, %v8078_v4  ;;  %8435 = vmatprep.mubr.bf16.mxu1 %v14617_v27  ;;  %9108 = vmatprep.mubr.bf16.mxu0 %v14620_v16  ;;  %v14625_v27 = vld [vmem:[%s22492_s1 + $0x1d6c] ss:$40 sps:$4 sm:$0xff]   ;;  %v8086_v4 = vadd.f32 %v17863_v52, %v22968_v15  ;;  %v14623_v52 = vld [vmem:[%s22492_s1 + $0x1d68] ss:$40 sps:$4 sm:$0xff]   ;;  %v22972_v15 = vld [vmem:[#allocation157_spill] sm:$0xff] }
 0x464   :  { %v8239_v60 = vpop.f32.mrf.mxu1  ;;  %v8912_v42 = vpop.f32.mrf.mxu0 }
 0x465   :  { %22965 = vst [vmem:[#allocation138_spill] sm:$0xff] %v18384_v5 }
 0x466   :  { %v18388_v48 = vpop.f32.mrf.mxu1  ;;  %v8913_v2 = vpop.f32.mrf.mxu0 }
 0x467   :  { %v18396_v6 = vadd.f32 %v8913_v2, %v8081_v47  ;;  %v22970_v2 = vld [vmem:[#allocation156_spill] sm:$0xff] }
 0x468   :  { %v8242_v16 = vpop.f32.mrf.mxu1  ;;  %v8915_v10 = vpop.f32.mrf.mxu0 }
 0x469   :  { %22967 = vst [vmem:[#allocation139_spill] sm:$0xff] %v18396_v6  ;;  %v8089_v6 = vadd.f32 %v17869_v8, %v22970_v2  ;;  %v14636_v8 = vld [vmem:[%s22492_s1 + $0x1784] ss:$40 sps:$4 sm:$0xff]  }
 0x46a   :  { %v18406_v19 = vpop.f32.mrf.mxu1  ;;  %8436 = vmatmul.mubr.bf16.gmra.mxu1 %v14615_v28  ;;  %v8918_v60 = vpop.f32.mrf.mxu0  ;;  %9109 = vmatmul.mubr.bf16.gmra.mxu0 %v14618_v23  ;;  %v14626_v28 = vld [vmem:[%s22492_s1 + $0x1730] ss:$40 sps:$4 sm:$0xff]  }
 0x46b   :  { %v18408_v47 = vadd.f32 %v8918_v60, %v8086_v4  ;;  %8443 = vmatprep.mubr.bf16.mxu1 %v14625_v27  ;;  %9116 = vmatprep.mubr.bf16.mxu0 %v14628_v54  ;;  %v14633_v27 = vld [vmem:[%s22492_s1 + $0x1dbc] ss:$40 sps:$4 sm:$0xff]   ;;  %v8094_v4 = vadd.f32 %v17887_v58, %v22972_v15  ;;  %v14631_v58 = vld [vmem:[%s22492_s1 + $0x1db8] ss:$40 sps:$4 sm:$0xff]   ;;  %v22976_v15 = vld [vmem:[#allocation159_spill] sm:$0xff] }
 0x46c   :  { %v8247_v42 = vpop.f32.mrf.mxu1  ;;  %v8920_v41 = vpop.f32.mrf.mxu0 }
 0x46d   :  { %22969 = vst [vmem:[#allocation140_spill] sm:$0xff] %v18408_v47 }
 0x46e   :  { %v18412_v5 = vpop.f32.mrf.mxu1  ;;  %v8921_v16 = vpop.f32.mrf.mxu0 }
 0x46f   :  { %v18420_v23 = vadd.f32 %v8921_v16, %v8089_v6  ;;  %v22974_v16 = vld [vmem:[#allocation158_spill] sm:$0xff] }
 0x470   :  { %v8250_v54 = vpop.f32.mrf.mxu1  ;;  %v8923_v10 = vpop.f32.mrf.mxu0 }
 0x471   :  { %22971 = vst [vmem:[#allocation141_spill] sm:$0xff] %v18420_v23  ;;  %v8097_v23 = vadd.f32 %v17893_v49, %v22974_v16  ;;  %v14644_v49 = vld [vmem:[%s22492_s1 + $0x17d4] ss:$40 sps:$4 sm:$0xff]  }
 0x472   :  { %v18430_v60 = vpop.f32.mrf.mxu1  ;;  %8444 = vmatmul.mubr.bf16.gmra.mxu1 %v14623_v52  ;;  %v8926_v42 = vpop.f32.mrf.mxu0  ;;  %9117 = vmatmul.mubr.bf16.gmra.mxu0 %v14626_v28  ;;  %v14634_v52 = vld [vmem:[%s22492_s1 + $0x1780] ss:$40 sps:$4 sm:$0xff]  }
 0x473   :  { %v18432_v6 = vadd.f32 %v8926_v42, %v8094_v4  ;;  %8451 = vmatprep.mubr.bf16.mxu1 %v14633_v27  ;;  %9124 = vmatprep.mubr.bf16.mxu0 %v14636_v8  ;;  %v14641_v27 = vld [vmem:[%s22492_s1 + $0x1e0c] ss:$40 sps:$4 sm:$0xff]   ;;  %v8102_v4 = vadd.f32 %v17911_v7, %v22976_v15  ;;  %v14639_v7 = vld [vmem:[%s22492_s1 + $0x1e08] ss:$40 sps:$4 sm:$0xff]   ;;  %v22980_v15 = vld [vmem:[#allocation161_spill] sm:$0xff] }
 0x474   :  { %v8255_v41 = vpop.f32.mrf.mxu1  ;;  %v8928_v2 = vpop.f32.mrf.mxu0 }
 0x475   :  { %22973 = vst [vmem:[#allocation142_spill] sm:$0xff] %v18432_v6 }
 0x476   :  { %v18436_v47 = vpop.f32.mrf.mxu1  ;;  %v8929_v54 = vpop.f32.mrf.mxu0 }
 0x477   :  { %v18444_v28 = vadd.f32 %v8929_v54, %v8097_v23  ;;  %v22978_v54 = vld [vmem:[#allocation160_spill] sm:$0xff] }
 0x478   :  { %v8258_v8 = vpop.f32.mrf.mxu1  ;;  %v8931_v10 = vpop.f32.mrf.mxu0 }
 0x479   :  { %22975 = vst [vmem:[#allocation143_spill] sm:$0xff] %v18444_v28  ;;  %v8105_v28 = vadd.f32 %v17917_v34, %v22978_v54  ;;  %v14652_v34 = vld [vmem:[%s22492_s1 + $0x1824] ss:$40 sps:$4 sm:$0xff]  }
 0x47a   :  { %v18454_v42 = vpop.f32.mrf.mxu1  ;;  %8452 = vmatmul.mubr.bf16.gmra.mxu1 %v14631_v58  ;;  %v8934_v41 = vpop.f32.mrf.mxu0  ;;  %9125 = vmatmul.mubr.bf16.gmra.mxu0 %v14634_v52  ;;  %v14642_v58 = vld [vmem:[%s22492_s1 + $0x17d0] ss:$40 sps:$4 sm:$0xff]  }
 0x47b   :  { %v18456_v23 = vadd.f32 %v8934_v41, %v8102_v4  ;;  %8459 = vmatprep.mubr.bf16.mxu1 %v14641_v27  ;;  %9132 = vmatprep.mubr.bf16.mxu0 %v14644_v49  ;;  %v14649_v27 = vld [vmem:[%s22492_s1 + $0x1e5c] ss:$40 sps:$4 sm:$0xff]   ;;  %v8110_v4 = vadd.f32 %v17938_v18, %v22980_v15  ;;  %v14647_v18 = vld [vmem:[%s22492_s1 + $0x1e58] ss:$40 sps:$4 sm:$0xff]   ;;  %v22984_v15 = vld [vmem:[#allocation164_spill] sm:$0xff] }
 0x47c   :  { %v8263_v2 = vpop.f32.mrf.mxu1  ;;  %v8936_v16 = vpop.f32.mrf.mxu0 }
 0x47d   :  { %22977 = vst [vmem:[#allocation144_spill] sm:$0xff] %v18456_v23 }
 0x47e   :  { %v18460_v6 = vpop.f32.mrf.mxu1  ;;  %v8937_v8 = vpop.f32.mrf.mxu0 }
 0x47f   :  { %v18468_v52 = vadd.f32 %v8937_v8, %v8105_v28  ;;  %v22982_v8 = vld [vmem:[#allocation162_spill] sm:$0xff] }
 0x480   :  { %v8266_v49 = vpop.f32.mrf.mxu1  ;;  %v8939_v10 = vpop.f32.mrf.mxu0 }
 0x481   :  { %22979 = vst [vmem:[#allocation145_spill] sm:$0xff] %v18468_v52  ;;  %v8113_v52 = vadd.f32 %v17948_v25, %v22982_v8  ;;  %v14660_v25 = vld [vmem:[%s22492_s1 + $0x1874] ss:$40 sps:$4 sm:$0xff]  }
 0x482   :  { %v18478_v41 = vpop.f32.mrf.mxu1  ;;  %8460 = vmatmul.mubr.bf16.gmra.mxu1 %v14639_v7  ;;  %v8942_v2 = vpop.f32.mrf.mxu0  ;;  %9133 = vmatmul.mubr.bf16.gmra.mxu0 %v14642_v58  ;;  %v14650_v7 = vld [vmem:[%s22492_s1 + $0x1820] ss:$40 sps:$4 sm:$0xff]  }
 0x483   :  { %v18480_v28 = vadd.f32 %v8942_v2, %v8110_v4  ;;  %8467 = vmatprep.mubr.bf16.mxu1 %v14649_v27  ;;  %9140 = vmatprep.mubr.bf16.mxu0 %v14652_v34  ;;  %v14657_v27 = vld [vmem:[%s22492_s1 + $0x1eac] ss:$40 sps:$4 sm:$0xff]   ;;  %v8118_v4 = vadd.f32 %v17970_v24, %v22984_v15  ;;  %v14655_v24 = vld [vmem:[%s22492_s1 + $0x1ea8] ss:$40 sps:$4 sm:$0xff]  }
 0x484   :  { %v8271_v16 = vpop.f32.mrf.mxu1  ;;  %v8944_v54 = vpop.f32.mrf.mxu0  ;;  %v22988_v15 = vld [vmem:[#allocation168_spill] sm:$0xff] }
 0x485   :  { %22981 = vst [vmem:[#allocation146_spill] sm:$0xff] %v18480_v28 }
 0x486   :  { %v18484_v23 = vpop.f32.mrf.mxu1  ;;  %v8945_v49 = vpop.f32.mrf.mxu0 }
 0x487   :  { %v18492_v58 = vadd.f32 %v8945_v49, %v8113_v52  ;;  %v22986_v49 = vld [vmem:[#allocation166_spill] sm:$0xff] }
 0x488   :  { %v8274_v34 = vpop.f32.mrf.mxu1  ;;  %v8947_v10 = vpop.f32.mrf.mxu0 }
 0x489   :  { %22983 = vst [vmem:[#allocation147_spill] sm:$0xff] %v18492_v58  ;;  %v8121_v58 = vadd.f32 %v17980_v35, %v22986_v49  ;;  %v14668_v35 = vld [vmem:[%s22492_s1 + $0x18c4] ss:$40 sps:$4 sm:$0xff]  }
 0x48a   :  { %v18502_v2 = vpop.f32.mrf.mxu1  ;;  %8468 = vmatmul.mubr.bf16.gmra.mxu1 %v14647_v18  ;;  %v8950_v16 = vpop.f32.mrf.mxu0  ;;  %9141 = vmatmul.mubr.bf16.gmra.mxu0 %v14650_v7  ;;  %v14658_v18 = vld [vmem:[%s22492_s1 + $0x1870] ss:$40 sps:$4 sm:$0xff]  }
 0x48b   :  { %v18504_v52 = vadd.f32 %v8950_v16, %v8118_v4  ;;  %8475 = vmatprep.mubr.bf16.mxu1 %v14657_v27  ;;  %9148 = vmatprep.mubr.bf16.mxu0 %v14660_v25  ;;  %v14665_v27 = vld [vmem:[%s22492_s1 + $0x1efc] ss:$40 sps:$4 sm:$0xff]   ;;  %v8126_v4 = vadd.f32 %v18002_v46, %v22988_v15  ;;  %v14663_v46 = vld [vmem:[%s22492_s1 + $0x1ef8] ss:$40 sps:$4 sm:$0xff]   ;;  %v22992_v15 = vld [vmem:[#allocation172_spill] sm:$0xff] }
 0x48c   :  { %v8279_v54 = vpop.f32.mrf.mxu1  ;;  %v8952_v8 = vpop.f32.mrf.mxu0 }
 0x48d   :  { %22985 = vst [vmem:[#allocation148_spill] sm:$0xff] %v18504_v52 }
 0x48e   :  { %v18508_v28 = vpop.f32.mrf.mxu1  ;;  %v8953_v34 = vpop.f32.mrf.mxu0 }
 0x48f   :  { %v18516_v7 = vadd.f32 %v8953_v34, %v8121_v58  ;;  %v22990_v34 = vld [vmem:[#allocation170_spill] sm:$0xff] }
 0x490   :  { %v8282_v25 = vpop.f32.mrf.mxu1  ;;  %v8955_v10 = vpop.f32.mrf.mxu0 }
 0x491   :  { %22987 = vst [vmem:[#allocation149_spill] sm:$0xff] %v18516_v7  ;;  %v8129_v7 = vadd.f32 %v18012_v37, %v22990_v34  ;;  %v14676_v37 = vld [vmem:[%s22492_s1 + $0x1c] ss:$40 sps:$4 sm:$0xff]  }
 0x492   :  { %v18526_v16 = vpop.f32.mrf.mxu1  ;;  %8476 = vmatmul.mubr.bf16.gmra.mxu1 %v14655_v24  ;;  %v8958_v54 = vpop.f32.mrf.mxu0  ;;  %9149 = vmatmul.mubr.bf16.gmra.mxu0 %v14658_v18  ;;  %v14666_v24 = vld [vmem:[%s22492_s1 + $0x18c0] ss:$40 sps:$4 sm:$0xff]  }
 0x493   :  { %v18528_v58 = vadd.f32 %v8958_v54, %v8126_v4  ;;  %8483 = vmatprep.mubr.bf16.mxu1 %v14665_v27  ;;  %9156 = vmatprep.mubr.bf16.mxu0 %v14668_v35  ;;  %v14673_v27 = vld [vmem:[%s22492_s1 + $0x1914] ss:$40 sps:$4 sm:$0xff]   ;;  %v8134_v4 = vadd.f32 %v18034_v53, %v22992_v15 }
 0x494   :  { %v8287_v8 = vpop.f32.mrf.mxu1  ;;  %v8960_v49 = vpop.f32.mrf.mxu0  ;;  %v14767_v54 = vld [vmem:[%s22491_s0 + $0x238] sm:$0xff]   ;;  %v14768_v53 = vld [vmem:[%s22491_s0 + $0x230] sm:$0xff]  }
 0x495   :  { %22989 = vst [vmem:[#allocation150_spill] sm:$0xff] %v18528_v58  ;;  %10159 = vmatpush1.bf16.msra.mxu0 %v14767_v54 }
 0x496   :  { %v18532_v52 = vpop.f32.mrf.mxu1  ;;  %v8961_v25 = vpop.f32.mrf.mxu0  ;;  %10160 = vmatprep.subr.bf16.mxu0 %v22902_v20 }
 0x497   :  { %v18540_v18 = vadd.f32 %v8961_v25, %v8129_v7 }
 0x498   :  { %v8290_v35 = vpop.f32.mrf.mxu1  ;;  %v8963_v10 = vpop.f32.mrf.mxu0 }
 0x499   :  { %22991 = vst [vmem:[#allocation151_spill] sm:$0xff] %v18540_v18  ;;  %v22994_v35 = vld [vmem:[#allocation174_spill] sm:$0xff]  ;;  %10161 = vmatpush1.bf16.msra.mxu0 %v14768_v53 }
 0x49a   :  { %v18553_v8 = vpop.f32.mrf.mxu1  ;;  %8484 = vmatmul.mubr.bf16.gmra.mxu1 %v14663_v46  ;;  %v8966_v7 = vpop.f32.mrf.mxu0  ;;  %9157 = vmatmul.mubr.bf16.gmra.mxu0 %v14666_v24  ;;  %v8137_v10 = vadd.f32 %v18044_v31, %v22994_v35  ;;  %v14671_v24 = vld [vmem:[%s22492_s1 + $0x1910] ss:$40 sps:$4 sm:$0xff]   ;;  %v14679_v31 = vld [vmem:[%s22492_s1 + $0x1964] ss:$40 sps:$4 sm:$0xff]  }
 0x49b   :  { %v18555_v49 = vadd.f32 %v8966_v7, %v8134_v4  ;;  %9164 = vmatprep.mubr.bf16.mxu0 %v14673_v27  ;;  %9357 = vmatprep.mubr.bf16.mxu1 %v14676_v37  ;;  %v14674_v27 = vld [vmem:[%s22492_s1 + $0x18] ss:$40 sps:$4 sm:$0xff]   ;;  %v14682_v4 = vld [vmem:[%s22492_s1 + $0x6c] ss:$40 sps:$4 sm:$0xff]  }
 0x49c   :  { %v8295_v34 = vpop.f32.mrf.mxu1  ;;  %v8968_v25 = vpop.f32.mrf.mxu0  ;;  %10162 = vmatprep.subr.bf16.mxu0 %v22902_v20  ;;  %v14775_v35 = vld [vmem:[%s22491_s0 + $0x228] sm:$0xff]  }
 0x49d   :  { %22993 = vst [vmem:[#allocation152_spill] sm:$0xff] %v18555_v49  ;;  %v22996_v34 = vld [vmem:[#allocation176_spill] sm:$0xff]  ;;  %10163 = vmatpush1.bf16.msra.mxu0 %v14775_v35 }
 0x49e   :  { %v18563_v15 = vpop.f32.mrf.mxu1  ;;  %v8969_v46 = vpop.f32.mrf.mxu0  ;;  %v8142_v25 = vadd.f32 %v18066_v26, %v22996_v34  ;;  %10164 = vmatprep.subr.bf16.mxu0 %v22902_v20  ;;  %v14776_v34 = vld [vmem:[%s22491_s0 + $0x220] sm:$0xff]  }
 0x49f   :  { %v18571_v37 = vadd.f32 %v8969_v46, %v8137_v10 }
 0x4a0   :  { %v8298_v54 = vpop.f32.mrf.mxu1  ;;  %v8971_v7 = vpop.f32.mrf.mxu0 }
 0x4a1   :  { %22995 = vst [vmem:[#allocation153_spill] sm:$0xff] %v18571_v37  ;;  %v22998_v7 = vld [vmem:[#allocation178_spill] sm:$0xff]  ;;  %10165 = vmatpush1.bf16.msra.mxu0 %v14776_v34 }
 0x4a2   :  { %v18585_v10 = vpop.f32.mrf.mxu1  ;;  %v8974_v46 = vpop.f32.mrf.mxu0  ;;  %9165 = vmatmul.mubr.bf16.gmra.mxu0 %v14671_v24  ;;  %9358 = vmatmul.mubr.bf16.vlgmr.msra.gmra.mxu1 %v14674_v27  ;;  %v8145_v26 = vadd.f32 %v18076_v36, %v22998_v7  ;;  %v14677_v27 = vld [vmem:[%s22492_s1 + $0x1960] ss:$40 sps:$4 sm:$0xff]   ;;  %v14685_v36 = vld [vmem:[%s22492_s1 + $0x19b4] ss:$40 sps:$4 sm:$0xff]  }
 0x4a3   :  { %v18587_v37 = vadd.f32 %v8974_v46, %v8142_v25  ;;  %9172 = vmatprep.mubr.bf16.mxu0 %v14679_v31  ;;  %9365 = vmatprep.mubr.bf16.mxu1 %v14682_v4  ;;  %v14680_v31 = vld [vmem:[%s22492_s1 + $0x68] ss:$40 sps:$4 sm:$0xff]   ;;  %v14688_v25 = vld [vmem:[%s22492_s1 + $0xbc] ss:$40 sps:$4 sm:$0xff]  }
 0x4a4   :  { %v8303_v54 = vpop.f32.mrf.mxu1  ;;  %v8976_v53 = vpop.f32.mrf.mxu0  ;;  %10166 = vmatprep.subr.bf16.mxu0 %v22902_v20  ;;  %v14783_v7 = vld [vmem:[%s22491_s0 + $0x218] sm:$0xff]  }
 0x4a5   :  { %22997 = vst [vmem:[#allocation154_spill] sm:$0xff] %v18587_v37  ;;  %v23000_v54 = vld [vmem:[#allocation180_spill] sm:$0xff]  ;;  %10167 = vmatpush1.bf16.msra.mxu0 %v14783_v7 }
 0x4a6   :  { %v18595_v49 = vpop.f32.mrf.mxu1  ;;  %v8977_v24 = vpop.f32.mrf.mxu0  ;;  %v8150_v53 = vadd.f32 %v18098_v29, %v23000_v54  ;;  %10168 = vmatprep.subr.bf16.mxu0 %v22902_v20  ;;  %v14784_v54 = vld [vmem:[%s22491_s0 + $0x210] sm:$0xff]  }
 0x4a7   :  { %v18603_v4 = vadd.f32 %v8977_v24, %v8145_v26 }
 0x4a8   :  { %v8306_v35 = vpop.f32.mrf.mxu1  ;;  %v8979_v46 = vpop.f32.mrf.mxu0 }
 0x4a9   :  { %22999 = vst [vmem:[#allocation155_spill] sm:$0xff] %v18603_v4  ;;  %v23002_v46 = vld [vmem:[#allocation182_spill] sm:$0xff]  ;;  %10169 = vmatpush1.bf16.msra.mxu0 %v14784_v54 }
 0x4aa   :  { %v18617_v26 = vpop.f32.mrf.mxu1  ;;  %v8982_v24 = vpop.f32.mrf.mxu0  ;;  %9173 = vmatmul.mubr.bf16.gmra.mxu0 %v14677_v27  ;;  %9366 = vmatmul.mubr.bf16.gmra.mxu1 %v14680_v31  ;;  %v8153_v29 = vadd.f32 %v18108_v59, %v23002_v46  ;;  %v14683_v31 = vld [vmem:[%s22492_s1 + $0x19b0] ss:$40 sps:$4 sm:$0xff]   ;;  %v14691_v59 = vld [vmem:[%s22492_s1 + $0x1a04] ss:$40 sps:$4 sm:$0xff]  }
 0x4ab   :  { %v18619_v4 = vadd.f32 %v8982_v24, %v8150_v53  ;;  %9180 = vmatprep.mubr.bf16.mxu0 %v14685_v36  ;;  %9373 = vmatprep.mubr.bf16.mxu1 %v14688_v25  ;;  %v14686_v36 = vld [vmem:[%s22492_s1 + $0xb8] ss:$40 sps:$4 sm:$0xff]   ;;  %v14694_v53 = vld [vmem:[%s22492_s1 + $0x10c] ss:$40 sps:$4 sm:$0xff]  }
 0x4ac   :  { %v8311_v35 = vpop.f32.mrf.mxu1  ;;  %v8984_v34 = vpop.f32.mrf.mxu0  ;;  %10170 = vmatprep.subr.bf16.mxu0 %v22902_v20  ;;  %v14791_v46 = vld [vmem:[%s22491_s0 + $0x208] sm:$0xff]  }
 0x4ad   :  { %23001 = vst [vmem:[#allocation156_spill] sm:$0xff] %v18619_v4  ;;  %v23004_v35 = vld [vmem:[#allocation184_spill] sm:$0xff]  ;;  %10171 = vmatpush1.bf16.msra.mxu0 %v14791_v46 }
 0x4ae   :  { %v18627_v37 = vpop.f32.mrf.mxu1  ;;  %v8985_v27 = vpop.f32.mrf.mxu0  ;;  %v8158_v34 = vadd.f32 %v18130_v30, %v23004_v35  ;;  %10172 = vmatprep.subr.bf16.mxu0 %v22902_v20  ;;  %v14792_v35 = vld [vmem:[%s22491_s0 + $0x200] sm:$0xff]  }
 0x4af   :  { %v18635_v25 = vadd.f32 %v8985_v27, %v8153_v29 }
 0x4b0   :  { %v8314_v7 = vpop.f32.mrf.mxu1  ;;  %v8987_v24 = vpop.f32.mrf.mxu0 }
 0x4b1   :  { %23003 = vst [vmem:[#allocation157_spill] sm:$0xff] %v18635_v25  ;;  %v23006_v24 = vld [vmem:[#allocation186_spill] sm:$0xff]  ;;  %10173 = vmatpush1.bf16.msra.mxu0 %v14792_v35 }
 0x4b2   :  { %v18649_v29 = vpop.f32.mrf.mxu1  ;;  %v8990_v27 = vpop.f32.mrf.mxu0  ;;  %9181 = vmatmul.mubr.bf16.gmra.mxu0 %v14683_v31  ;;  %9374 = vmatmul.mubr.bf16.gmra.mxu1 %v14686_v36  ;;  %v8161_v30 = vadd.f32 %v18140_v3, %v23006_v24  ;;  %v14689_v36 = vld [vmem:[%s22492_s1 + $0x1a00] ss:$40 sps:$4 sm:$0xff]   ;;  %v14697_v3 = vld [vmem:[%s22492_s1 + $0x1a54] ss:$40 sps:$4 sm:$0xff]  }
 0x4b3   :  { %v18651_v25 = vadd.f32 %v8990_v27, %v8158_v34  ;;  %9188 = vmatprep.mubr.bf16.mxu0 %v14691_v59  ;;  %9381 = vmatprep.mubr.bf16.mxu1 %v14694_v53  ;;  %v14692_v59 = vld [vmem:[%s22492_s1 + $0x108] ss:$40 sps:$4 sm:$0xff]   ;;  %v14700_v34 = vld [vmem:[%s22492_s1 + $0x15c] ss:$40 sps:$4 sm:$0xff]  }
 0x4b4   :  { %v8319_v7 = vpop.f32.mrf.mxu1  ;;  %v8992_v54 = vpop.f32.mrf.mxu0  ;;  %10186 = vmatprep.subr.bf16.mxu0 %v22902_v20 }
 0x4b5   :  { %23005 = vst [vmem:[#allocation158_spill] sm:$0xff] %v18651_v25  ;;  %v14799_v7 = vld [vmem:[%s22491_s0 + $0x248] ss:$0 sps:$4 sm:$0xff]   ;;  %v23008_v54 = vld [vmem:[#allocation188_spill] sm:$0xff]  ;;  %v23010_v25 = vld [vmem:[#allocation190_spill] sm:$0xff] }
 0x4b6   :  { %v18659_v4 = vpop.f32.mrf.mxu1  ;;  %v8993_v31 = vpop.f32.mrf.mxu0  ;;  %v8166_v24 = vadd.f32 %v18162_v12, %v23008_v54  ;;  %v8169_v12 = vadd.f32 %v18172_v17, %v23010_v25  ;;  %v14800_v54 = vld [vmem:[%s22491_s0 + $0x240] sm:$0xff]   ;;  %v14706_v25 = vld [vmem:[%s22492_s1 + $0x1ac] ss:$40 sps:$4 sm:$0xff]  }
 0x4b7   :  { %v18667_v53 = vadd.f32 %v8993_v31, %v8161_v30  ;;  %v14703_v17 = vld [vmem:[%s22492_s1 + $0x1aa4] ss:$40 sps:$4 sm:$0xff]  }
 0x4b8   :  { %v8322_v46 = vpop.f32.mrf.mxu1  ;;  %v8995_v27 = vpop.f32.mrf.mxu0 }
 0x4b9   :  { %23007 = vst [vmem:[#allocation159_spill] sm:$0xff] %v18667_v53  ;;  %v6824_v53 = vsel %vm6822_vm0, %v14799_v7, 0 }
 0x4ba   :  { %v18681_v30 = vpop.f32.mrf.mxu1  ;;  %v8998_v31 = vpop.f32.mrf.mxu0  ;;  %9189 = vmatmul.mubr.bf16.gmra.mxu0 %v14689_v36  ;;  %9382 = vmatmul.mubr.bf16.gmra.mxu1 %v14692_v59 }
 0x4bb   :  { %v18684_v46 = vadd.f32 %v8998_v31, %v8166_v24  ;;  %9196 = vmatprep.mubr.bf16.mxu0 %v14697_v3  ;;  %9389 = vmatprep.mubr.bf16.mxu1 %v14700_v34  ;;  %v14695_v3 = vld [vmem:[%s22492_s1 + $0x1a50] ss:$40 sps:$4 sm:$0xff]   ;;  %v23012_v31 = vld [vmem:[#allocation2_spill] sm:$0xff] }
 0x4bc   :  { %v8327_v35 = vpop.f32.mrf.mxu1  ;;  %v9000_v27 = vpop.f32.mrf.mxu0  ;;  %10187 = vmatpush2.bf16.msra.mxu0 %v6824_v53  ;;  %v14698_v53 = vld [vmem:[%s22492_s1 + $0x158] ss:$40 sps:$4 sm:$0xff]  }
 0x4bd   :  { %23009 = vst [vmem:[#allocation160_spill] sm:$0xff] %v18684_v46  ;;  %10188 = vmatprep.subr.bf16.mxu0 %v22902_v20  ;;  %v8174_v35 = vadd.f32 %v18190_v14, %v23012_v31  ;;  %v23014_v46 = vld [vmem:[#allocation3_spill] sm:$0xff] }
 0x4be   :  { %v18692_v36 = vpop.f32.mrf.mxu1  ;;  %v9001_v59 = vpop.f32.mrf.mxu0  ;;  %v8177_v18 = vadd.f32 %v18196_v32, %v23014_v46  ;;  %v14701_v14 = vld [vmem:[%s22492_s1 + $0x1aa0] ss:$40 sps:$4 sm:$0xff]   ;;  %v14712_v32 = vld [vmem:[%s22492_s1 + $0x1fc] ss:$40 sps:$4 sm:$0xff]  }
 0x4bf   :  { %v18700_v34 = vadd.f32 %v9001_v59, %v8169_v12 }
 0x4c0   :  { %v8330_v7 = vpop.f32.mrf.mxu1  ;;  %v9003_v24 = vpop.f32.mrf.mxu0  ;;  %10189 = vmatpush2.bf16.msra.mxu0 %v14800_v54 }
 0x4c1   :  { %23011 = vst [vmem:[#allocation161_spill] sm:$0xff] %v18700_v34 }
 0x4c2   :  { %v18710_v27 = vpop.f32.mrf.mxu1  ;;  %v9006_v20 = vpop.f32.mrf.mxu0  ;;  %9197 = vmatmul.mubr.bf16.gmra.mxu0 %v14695_v3  ;;  %9390 = vmatmul.mubr.bf16.gmra.mxu1 %v14698_v53  ;;  %v14704_v3 = vld [vmem:[%s22492_s1 + $0x1a8] ss:$40 sps:$4 sm:$0xff]   ;;  %v14709_v53 = vld [vmem:[%s22492_s1 + $0x1af4] ss:$40 sps:$4 sm:$0xff]  }
 0x4c3   :  { %v18712_v12 = vadd.f32 %v9006_v20, %v8174_v35  ;;  %9204 = vmatprep.mubr.bf16.mxu0 %v14703_v17  ;;  %9397 = vmatprep.mubr.bf16.mxu1 %v14706_v25  ;;  %v23016_v17 = vld [vmem:[#allocation4_spill] sm:$0xff] }
 0x4c4   :  { %v8335_v59 = vpop.f32.mrf.mxu1  ;;  %v9008_v34 = vpop.f32.mrf.mxu0  ;;  %v8182_v25 = vadd.f32 %v18214_v63, %v23016_v17  ;;  %v14707_v63 = vld [vmem:[%s22492_s1 + $0x1af0] ss:$40 sps:$4 sm:$0xff]   ;;  %v23020_v17 = vld [vmem:[#allocation6_spill] sm:$0xff] }
 0x4c5   :  { %23013 = vst [vmem:[#allocation162_spill] sm:$0xff] %v18712_v12 }
 0x4c6   :  { %v18716_v7 = vpop.f32.mrf.mxu1  ;;  %v9009_v54 = vpop.f32.mrf.mxu0 }
 0x4c7   :  { %v18724_v20 = vadd.f32 %v9009_v54, %v8177_v18  ;;  %v23018_v54 = vld [vmem:[#allocation5_spill] sm:$0xff] }
 0x4c8   :  { %v8338_v46 = vpop.f32.mrf.mxu1  ;;  %v9011_v34 = vpop.f32.mrf.mxu0 }
 0x4c9   :  { %23015 = vst [vmem:[#allocation164_spill] sm:$0xff] %v18724_v20  ;;  %v8185_v20 = vadd.f32 %v18220_v56, %v23018_v54  ;;  %v14718_v56 = vld [vmem:[%s22492_s1 + $0x24c] ss:$40 sps:$4 sm:$0xff]  }
 0x4ca   :  { %v18734_v24 = vpop.f32.mrf.mxu1  ;;  %v9014_v31 = vpop.f32.mrf.mxu0  ;;  %9205 = vmatmul.mubr.bf16.gmra.mxu0 %v14701_v14  ;;  %9398 = vmatmul.mubr.bf16.gmra.mxu1 %v14704_v3  ;;  %v14710_v14 = vld [vmem:[%s22492_s1 + $0x1f8] ss:$40 sps:$4 sm:$0xff]  }
 0x4cb   :  { %v18736_v18 = vadd.f32 %v9014_v31, %v8182_v25  ;;  %9212 = vmatprep.mubr.bf16.mxu0 %v14709_v53  ;;  %9405 = vmatprep.mubr.bf16.mxu1 %v14712_v32  ;;  %v14715_v53 = vld [vmem:[%s22492_s1 + $0x1b44] ss:$40 sps:$4 sm:$0xff]   ;;  %v8190_v25 = vadd.f32 %v18238_v50, %v23020_v17  ;;  %v14713_v50 = vld [vmem:[%s22492_s1 + $0x1b40] ss:$40 sps:$4 sm:$0xff]   ;;  %v23024_v17 = vld [vmem:[#allocation8_spill] sm:$0xff] }
 0x4cc   :  { %v8343_v35 = vpop.f32.mrf.mxu1  ;;  %v9016_v59 = vpop.f32.mrf.mxu0 }
 0x4cd   :  { %23017 = vst [vmem:[#allocation166_spill] sm:$0xff] %v18736_v18 }
 0x4ce   :  { %v18740_v12 = vpop.f32.mrf.mxu1  ;;  %v9017_v46 = vpop.f32.mrf.mxu0 }
 0x4cf   :  { %v18748_v3 = vadd.f32 %v9017_v46, %v8185_v20  ;;  %v23022_v46 = vld [vmem:[#allocation7_spill] sm:$0xff] }
 0x4d0   :  { %v8346_v32 = vpop.f32.mrf.mxu1  ;;  %v9019_v34 = vpop.f32.mrf.mxu0 }
 0x4d1   :  { %23019 = vst [vmem:[#allocation168_spill] sm:$0xff] %v18748_v3  ;;  %v8193_v3 = vadd.f32 %v18244_v33, %v23022_v46  ;;  %v14724_v33 = vld [vmem:[%s22492_s1 + $0x29c] ss:$40 sps:$4 sm:$0xff]  }
 0x4d2   :  { %v18758_v31 = vpop.f32.mrf.mxu1  ;;  %v9022_v35 = vpop.f32.mrf.mxu0  ;;  %9213 = vmatmul.mubr.bf16.gmra.mxu0 %v14707_v63  ;;  %9406 = vmatmul.mubr.bf16.gmra.mxu1 %v14710_v14  ;;  %v14716_v63 = vld [vmem:[%s22492_s1 + $0x248] ss:$40 sps:$4 sm:$0xff]  }
 0x4d3   :  { %v18760_v20 = vadd.f32 %v9022_v35, %v8190_v25  ;;  %9220 = vmatprep.mubr.bf16.mxu0 %v14715_v53  ;;  %9413 = vmatprep.mubr.bf16.mxu1 %v14718_v56  ;;  %v14721_v53 = vld [vmem:[%s22492_s1 + $0x1b94] ss:$40 sps:$4 sm:$0xff]   ;;  %v8198_v25 = vadd.f32 %v18262_v43, %v23024_v17  ;;  %v14719_v43 = vld [vmem:[%s22492_s1 + $0x1b90] ss:$40 sps:$4 sm:$0xff]   ;;  %v23028_v17 = vld [vmem:[#allocation10_spill] sm:$0xff] }
 0x4d4   :  { %v8351_v59 = vpop.f32.mrf.mxu1  ;;  %v9024_v54 = vpop.f32.mrf.mxu0 }
 0x4d5   :  { %23021 = vst [vmem:[#allocation170_spill] sm:$0xff] %v18760_v20 }
 0x4d6   :  { %v18764_v18 = vpop.f32.mrf.mxu1  ;;  %v9025_v32 = vpop.f32.mrf.mxu0 }
 0x4d7   :  { %v18772_v14 = vadd.f32 %v9025_v32, %v8193_v3  ;;  %v23026_v32 = vld [vmem:[#allocation9_spill] sm:$0xff] }
 0x4d8   :  { %v8354_v56 = vpop.f32.mrf.mxu1  ;;  %v9027_v34 = vpop.f32.mrf.mxu0 }
 0x4d9   :  { %23023 = vst [vmem:[#allocation172_spill] sm:$0xff] %v18772_v14  ;;  %v8201_v14 = vadd.f32 %v18268_v62, %v23026_v32  ;;  %v14730_v62 = vld [vmem:[%s22492_s1 + $0x2ec] ss:$40 sps:$4 sm:$0xff]  }
 0x4da   :  { %v18782_v35 = vpop.f32.mrf.mxu1  ;;  %v9030_v59 = vpop.f32.mrf.mxu0  ;;  %9221 = vmatmul.mubr.bf16.gmra.mxu0 %v14713_v50  ;;  %9414 = vmatmul.mubr.bf16.gmra.mxu1 %v14716_v63  ;;  %v14722_v50 = vld [vmem:[%s22492_s1 + $0x298] ss:$40 sps:$4 sm:$0xff]  }
 0x4db   :  { %v18784_v3 = vadd.f32 %v9030_v59, %v8198_v25  ;;  %9228 = vmatprep.mubr.bf16.mxu0 %v14721_v53  ;;  %9421 = vmatprep.mubr.bf16.mxu1 %v14724_v33  ;;  %v14727_v53 = vld [vmem:[%s22492_s1 + $0x1be4] ss:$40 sps:$4 sm:$0xff]   ;;  %v8206_v25 = vadd.f32 %v18286_v51, %v23028_v17  ;;  %v14725_v51 = vld [vmem:[%s22492_s1 + $0x1be0] ss:$40 sps:$4 sm:$0xff]   ;;  %v23032_v17 = vld [vmem:[#allocation12_spill] sm:$0xff] }
 0x4dc   :  { %v8359_v54 = vpop.f32.mrf.mxu1  ;;  %v9032_v46 = vpop.f32.mrf.mxu0 }
 0x4dd   :  { %23025 = vst [vmem:[#allocation174_spill] sm:$0xff] %v18784_v3 }
 0x4de   :  { %v18788_v20 = vpop.f32.mrf.mxu1  ;;  %v9033_v56 = vpop.f32.mrf.mxu0 }
 0x4df   :  { %v18796_v63 = vadd.f32 %v9033_v56, %v8201_v14  ;;  %v23030_v56 = vld [vmem:[#allocation11_spill] sm:$0xff] }
 0x4e0   :  { %v8362_v33 = vpop.f32.mrf.mxu1  ;;  %v9035_v34 = vpop.f32.mrf.mxu0 }
 0x4e1   :  { %23027 = vst [vmem:[#allocation176_spill] sm:$0xff] %v18796_v63  ;;  %v8209_v63 = vadd.f32 %v18292_v39, %v23030_v56  ;;  %v14736_v39 = vld [vmem:[%s22492_s1 + $0x33c] ss:$40 sps:$4 sm:$0xff]  }
 0x4e2   :  { %v18806_v59 = vpop.f32.mrf.mxu1  ;;  %v9038_v54 = vpop.f32.mrf.mxu0  ;;  %9229 = vmatmul.mubr.bf16.gmra.mxu0 %v14719_v43  ;;  %9422 = vmatmul.mubr.bf16.gmra.mxu1 %v14722_v50  ;;  %v14728_v43 = vld [vmem:[%s22492_s1 + $0x2e8] ss:$40 sps:$4 sm:$0xff]  }
 0x4e3   :  { %v18808_v14 = vadd.f32 %v9038_v54, %v8206_v25  ;;  %9236 = vmatprep.mubr.bf16.mxu0 %v14727_v53  ;;  %9429 = vmatprep.mubr.bf16.mxu1 %v14730_v62  ;;  %v14733_v53 = vld [vmem:[%s22492_s1 + $0x1c34] ss:$40 sps:$4 sm:$0xff]   ;;  %v8214_v25 = vadd.f32 %v18310_v13, %v23032_v17  ;;  %v14731_v13 = vld [vmem:[%s22492_s1 + $0x1c30] ss:$40 sps:$4 sm:$0xff]   ;;  %v23036_v17 = vld [vmem:[#allocation14_spill] sm:$0xff] }
 0x4e4   :  { %v8367_v46 = vpop.f32.mrf.mxu1  ;;  %v9040_v32 = vpop.f32.mrf.mxu0 }
 0x4e5   :  { %23029 = vst [vmem:[#allocation178_spill] sm:$0xff] %v18808_v14 }
 0x4e6   :  { %v18812_v3 = vpop.f32.mrf.mxu1  ;;  %v9041_v33 = vpop.f32.mrf.mxu0 }
 0x4e7   :  { %v18820_v50 = vadd.f32 %v9041_v33, %v8209_v63  ;;  %v23034_v33 = vld [vmem:[#allocation13_spill] sm:$0xff] }
 0x4e8   :  { %v8370_v62 = vpop.f32.mrf.mxu1  ;;  %v9043_v34 = vpop.f32.mrf.mxu0 }
 0x4e9   :  { %23031 = vst [vmem:[#allocation180_spill] sm:$0xff] %v18820_v50  ;;  %v8217_v50 = vadd.f32 %v18316_v11, %v23034_v33  ;;  %v14742_v11 = vld [vmem:[%s22492_s1 + $0x38c] ss:$40 sps:$4 sm:$0xff]  }
 0x4ea   :  { %v18830_v54 = vpop.f32.mrf.mxu1  ;;  %v9046_v46 = vpop.f32.mrf.mxu0  ;;  %9237 = vmatmul.mubr.bf16.gmra.mxu0 %v14725_v51  ;;  %9430 = vmatmul.mubr.bf16.gmra.mxu1 %v14728_v43  ;;  %v14734_v51 = vld [vmem:[%s22492_s1 + $0x338] ss:$40 sps:$4 sm:$0xff]  }
 0x4eb   :  { %v18832_v63 = vadd.f32 %v9046_v46, %v8214_v25  ;;  %9244 = vmatprep.mubr.bf16.mxu0 %v14733_v53  ;;  %9437 = vmatprep.mubr.bf16.mxu1 %v14736_v39  ;;  %v14739_v53 = vld [vmem:[%s22492_s1 + $0x1c84] ss:$40 sps:$4 sm:$0xff]   ;;  %v8222_v25 = vadd.f32 %v18334_v0, %v23036_v17  ;;  %v14737_v0 = vld [vmem:[%s22492_s1 + $0x1c80] ss:$40 sps:$4 sm:$0xff]   ;;  %v23040_v17 = vld [vmem:[#allocation16_spill] sm:$0xff] }
 0x4ec   :  { %v8375_v32 = vpop.f32.mrf.mxu1  ;;  %v9048_v56 = vpop.f32.mrf.mxu0 }
 0x4ed   :  { %23033 = vst [vmem:[#allocation182_spill] sm:$0xff] %v18832_v63 }
 0x4ee   :  { %v18836_v14 = vpop.f32.mrf.mxu1  ;;  %v9049_v62 = vpop.f32.mrf.mxu0 }
 0x4ef   :  { %v18844_v43 = vadd.f32 %v9049_v62, %v8217_v50  ;;  %v23038_v62 = vld [vmem:[#allocation15_spill] sm:$0xff] }
 0x4f0   :  { %v8378_v39 = vpop.f32.mrf.mxu1  ;;  %v9051_v34 = vpop.f32.mrf.mxu0 }
 0x4f1   :  { %23035 = vst [vmem:[#allocation184_spill] sm:$0xff] %v18844_v43  ;;  %v8225_v43 = vadd.f32 %v18340_v55, %v23038_v62  ;;  %v14748_v55 = vld [vmem:[%s22492_s1 + $0x3dc] ss:$40 sps:$4 sm:$0xff]  }
 0x4f2   :  { %v18854_v46 = vpop.f32.mrf.mxu1  ;;  %v9054_v32 = vpop.f32.mrf.mxu0  ;;  %9245 = vmatmul.mubr.bf16.gmra.mxu0 %v14731_v13  ;;  %9438 = vmatmul.mubr.bf16.gmra.mxu1 %v14734_v51  ;;  %v14740_v13 = vld [vmem:[%s22492_s1 + $0x388] ss:$40 sps:$4 sm:$0xff]  }
 0x4f3   :  { %v18856_v50 = vadd.f32 %v9054_v32, %v8222_v25  ;;  %9252 = vmatprep.mubr.bf16.mxu0 %v14739_v53  ;;  %9445 = vmatprep.mubr.bf16.mxu1 %v14742_v11  ;;  %v14745_v53 = vld [vmem:[%s22492_s1 + $0x1cd4] ss:$40 sps:$4 sm:$0xff]   ;;  %v8230_v25 = vadd.f32 %v18358_v57, %v23040_v17  ;;  %v14743_v57 = vld [vmem:[%s22492_s1 + $0x1cd0] ss:$40 sps:$4 sm:$0xff]   ;;  %v23044_v17 = vld [vmem:[#allocation18_spill] sm:$0xff] }
 0x4f4   :  { %v8383_v56 = vpop.f32.mrf.mxu1  ;;  %v9056_v33 = vpop.f32.mrf.mxu0 }
 0x4f5   :  { %23037 = vst [vmem:[#allocation186_spill] sm:$0xff] %v18856_v50 }
 0x4f6   :  { %v18860_v63 = vpop.f32.mrf.mxu1  ;;  %v9057_v39 = vpop.f32.mrf.mxu0 }
 0x4f7   :  { %v18868_v51 = vadd.f32 %v9057_v39, %v8225_v43  ;;  %v23042_v39 = vld [vmem:[#allocation17_spill] sm:$0xff] }
 0x4f8   :  { %v8386_v11 = vpop.f32.mrf.mxu1  ;;  %v9059_v34 = vpop.f32.mrf.mxu0 }
 0x4f9   :  { %23039 = vst [vmem:[#allocation188_spill] sm:$0xff] %v18868_v51  ;;  %v8233_v51 = vadd.f32 %v18364_v61, %v23042_v39  ;;  %v14754_v61 = vld [vmem:[%s22492_s1 + $0x42c] ss:$40 sps:$4 sm:$0xff]  }
 0x4fa   :  { %v18878_v32 = vpop.f32.mrf.mxu1  ;;  %v9062_v56 = vpop.f32.mrf.mxu0  ;;  %9253 = vmatmul.mubr.bf16.gmra.mxu0 %v14737_v0  ;;  %9446 = vmatmul.mubr.bf16.gmra.mxu1 %v14740_v13  ;;  %v14746_v0 = vld [vmem:[%s22492_s1 + $0x3d8] ss:$40 sps:$4 sm:$0xff]  }
 0x4fb   :  { %v18880_v43 = vadd.f32 %v9062_v56, %v8230_v25  ;;  %9260 = vmatprep.mubr.bf16.mxu0 %v14745_v53  ;;  %9453 = vmatprep.mubr.bf16.mxu1 %v14748_v55  ;;  %v14751_v53 = vld [vmem:[%s22492_s1 + $0x1d24] ss:$40 sps:$4 sm:$0xff]   ;;  %v8238_v25 = vadd.f32 %v18382_v45, %v23044_v17  ;;  %v14749_v45 = vld [vmem:[%s22492_s1 + $0x1d20] ss:$40 sps:$4 sm:$0xff]   ;;  %v23048_v17 = vld [vmem:[#allocation20_spill] sm:$0xff] }
 0x4fc   :  { %v8391_v33 = vpop.f32.mrf.mxu1  ;;  %v9064_v62 = vpop.f32.mrf.mxu0 }
 0x4fd   :  { %23041 = vst [vmem:[#allocation190_spill] sm:$0xff] %v18880_v43 }
 0x4fe   :  { %v18884_v50 = vpop.f32.mrf.mxu1  ;;  %v9065_v11 = vpop.f32.mrf.mxu0 }
 0x4ff   :  { %v18892_v13 = vadd.f32 %v9065_v11, %v8233_v51  ;;  %v23046_v11 = vld [vmem:[#allocation19_spill] sm:$0xff] }
 0x500   :  { %v8394_v55 = vpop.f32.mrf.mxu1  ;;  %v9067_v34 = vpop.f32.mrf.mxu0 }
 0x501   :  { %23043 = vst [vmem:[#allocation2_spill] sm:$0xff] %v18892_v13  ;;  %v8241_v13 = vadd.f32 %v18388_v48, %v23046_v11  ;;  %v14760_v48 = vld [vmem:[%s22492_s1 + $0x47c] ss:$40 sps:$4 sm:$0xff]  }
 0x502   :  { %v18902_v56 = vpop.f32.mrf.mxu1  ;;  %v9070_v33 = vpop.f32.mrf.mxu0  ;;  %9261 = vmatmul.mubr.bf16.gmra.mxu0 %v14743_v57  ;;  %9454 = vmatmul.mubr.bf16.gmra.mxu1 %v14746_v0  ;;  %v14752_v57 = vld [vmem:[%s22492_s1 + $0x428] ss:$40 sps:$4 sm:$0xff]  }
 0x503   :  { %v18904_v51 = vadd.f32 %v9070_v33, %v8238_v25  ;;  %9268 = vmatprep.mubr.bf16.mxu0 %v14751_v53  ;;  %9461 = vmatprep.mubr.bf16.mxu1 %v14754_v61  ;;  %v14757_v53 = vld [vmem:[%s22492_s1 + $0x1d74] ss:$40 sps:$4 sm:$0xff]   ;;  %v8246_v25 = vadd.f32 %v18406_v19, %v23048_v17  ;;  %v14755_v19 = vld [vmem:[%s22492_s1 + $0x1d70] ss:$40 sps:$4 sm:$0xff]   ;;  %v23052_v17 = vld [vmem:[#allocation22_spill] sm:$0xff] }
 0x504   :  { %v8399_v62 = vpop.f32.mrf.mxu1  ;;  %v9072_v39 = vpop.f32.mrf.mxu0 }
 0x505   :  { %23045 = vst [vmem:[#allocation3_spill] sm:$0xff] %v18904_v51 }
 0x506   :  { %v18908_v43 = vpop.f32.mrf.mxu1  ;;  %v9073_v55 = vpop.f32.mrf.mxu0 }
 0x507   :  { %v18916_v0 = vadd.f32 %v9073_v55, %v8241_v13  ;;  %v23050_v55 = vld [vmem:[#allocation21_spill] sm:$0xff] }
 0x508   :  { %v8402_v61 = vpop.f32.mrf.mxu1  ;;  %v9075_v34 = vpop.f32.mrf.mxu0 }
 0x509   :  { %23047 = vst [vmem:[#allocation4_spill] sm:$0xff] %v18916_v0  ;;  %v8249_v0 = vadd.f32 %v18412_v5, %v23050_v55  ;;  %v14766_v5 = vld [vmem:[%s22492_s1 + $0x4cc] ss:$40 sps:$4 sm:$0xff]  }
 0x50a   :  { %v18926_v33 = vpop.f32.mrf.mxu1  ;;  %v9078_v62 = vpop.f32.mrf.mxu0  ;;  %9269 = vmatmul.mubr.bf16.gmra.mxu0 %v14749_v45  ;;  %9462 = vmatmul.mubr.bf16.gmra.mxu1 %v14752_v57  ;;  %v14758_v45 = vld [vmem:[%s22492_s1 + $0x478] ss:$40 sps:$4 sm:$0xff]  }
 0x50b   :  { %v18928_v13 = vadd.f32 %v9078_v62, %v8246_v25  ;;  %9276 = vmatprep.mubr.bf16.mxu0 %v14757_v53  ;;  %9469 = vmatprep.mubr.bf16.mxu1 %v14760_v48  ;;  %v14763_v53 = vld [vmem:[%s22492_s1 + $0x1dc4] ss:$40 sps:$4 sm:$0xff]   ;;  %v8254_v25 = vadd.f32 %v18430_v60, %v23052_v17  ;;  %v14761_v60 = vld [vmem:[%s22492_s1 + $0x1dc0] ss:$40 sps:$4 sm:$0xff]   ;;  %v23056_v17 = vld [vmem:[#allocation24_spill] sm:$0xff] }
 0x50c   :  { %v8407_v39 = vpop.f32.mrf.mxu1  ;;  %v9080_v11 = vpop.f32.mrf.mxu0 }
 0x50d   :  { %23049 = vst [vmem:[#allocation5_spill] sm:$0xff] %v18928_v13 }
 0x50e   :  { %v18932_v51 = vpop.f32.mrf.mxu1  ;;  %v9081_v61 = vpop.f32.mrf.mxu0 }
 0x50f   :  { %v18940_v57 = vadd.f32 %v9081_v61, %v8249_v0  ;;  %v23054_v61 = vld [vmem:[#allocation23_spill] sm:$0xff] }
 0x510   :  { %v8410_v48 = vpop.f32.mrf.mxu1  ;;  %v9083_v34 = vpop.f32.mrf.mxu0 }
 0x511   :  { %23051 = vst [vmem:[#allocation6_spill] sm:$0xff] %v18940_v57  ;;  %v8257_v57 = vadd.f32 %v18436_v47, %v23054_v61  ;;  %v14774_v47 = vld [vmem:[%s22492_s1 + $0x51c] ss:$40 sps:$4 sm:$0xff]  }
 0x512   :  { %v18950_v62 = vpop.f32.mrf.mxu1  ;;  %v9086_v39 = vpop.f32.mrf.mxu0  ;;  %9277 = vmatmul.mubr.bf16.gmra.mxu0 %v14755_v19  ;;  %9470 = vmatmul.mubr.bf16.gmra.mxu1 %v14758_v45  ;;  %v14764_v19 = vld [vmem:[%s22492_s1 + $0x4c8] ss:$40 sps:$4 sm:$0xff]  }
 0x513   :  { %v18952_v0 = vadd.f32 %v9086_v39, %v8254_v25  ;;  %9284 = vmatprep.mubr.bf16.mxu0 %v14763_v53  ;;  %9477 = vmatprep.mubr.bf16.mxu1 %v14766_v5  ;;  %v14771_v53 = vld [vmem:[%s22492_s1 + $0x1e14] ss:$40 sps:$4 sm:$0xff]   ;;  %v8262_v25 = vadd.f32 %v18454_v42, %v23056_v17  ;;  %v14769_v42 = vld [vmem:[%s22492_s1 + $0x1e10] ss:$40 sps:$4 sm:$0xff]   ;;  %v23060_v17 = vld [vmem:[#allocation26_spill] sm:$0xff] }
 0x514   :  { %v8415_v11 = vpop.f32.mrf.mxu1  ;;  %v9088_v55 = vpop.f32.mrf.mxu0 }
 0x515   :  { %23053 = vst [vmem:[#allocation7_spill] sm:$0xff] %v18952_v0 }
 0x516   :  { %v18956_v13 = vpop.f32.mrf.mxu1  ;;  %v9089_v48 = vpop.f32.mrf.mxu0 }
 0x517   :  { %v18964_v45 = vadd.f32 %v9089_v48, %v8257_v57  ;;  %v23058_v48 = vld [vmem:[#allocation25_spill] sm:$0xff] }
 0x518   :  { %v8418_v5 = vpop.f32.mrf.mxu1  ;;  %v9091_v34 = vpop.f32.mrf.mxu0 }
 0x519   :  { %23055 = vst [vmem:[#allocation8_spill] sm:$0xff] %v18964_v45  ;;  %v8265_v45 = vadd.f32 %v18460_v6, %v23058_v48  ;;  %v14782_v6 = vld [vmem:[%s22492_s1 + $0x56c] ss:$40 sps:$4 sm:$0xff]  }
 0x51a   :  { %v18974_v39 = vpop.f32.mrf.mxu1  ;;  %v9094_v11 = vpop.f32.mrf.mxu0  ;;  %9285 = vmatmul.mubr.bf16.gmra.mxu0 %v14761_v60  ;;  %9478 = vmatmul.mubr.bf16.gmra.mxu1 %v14764_v19  ;;  %v14772_v60 = vld [vmem:[%s22492_s1 + $0x518] ss:$40 sps:$4 sm:$0xff]  }
 0x51b   :  { %v18976_v57 = vadd.f32 %v9094_v11, %v8262_v25  ;;  %9292 = vmatprep.mubr.bf16.mxu0 %v14771_v53  ;;  %9485 = vmatprep.mubr.bf16.mxu1 %v14774_v47  ;;  %v14779_v53 = vld [vmem:[%s22492_s1 + $0x1e64] ss:$40 sps:$4 sm:$0xff]   ;;  %v8270_v25 = vadd.f32 %v18478_v41, %v23060_v17  ;;  %v14777_v41 = vld [vmem:[%s22492_s1 + $0x1e60] ss:$40 sps:$4 sm:$0xff]  }
 0x51c   :  { %v8423_v55 = vpop.f32.mrf.mxu1  ;;  %v9096_v61 = vpop.f32.mrf.mxu0  ;;  %v23064_v17 = vld [vmem:[#allocation30_spill] sm:$0xff] }
 0x51d   :  { %23057 = vst [vmem:[#allocation9_spill] sm:$0xff] %v18976_v57 }
 0x51e   :  { %v18980_v0 = vpop.f32.mrf.mxu1  ;;  %v9097_v5 = vpop.f32.mrf.mxu0 }
 0x51f   :  { %v18988_v19 = vadd.f32 %v9097_v5, %v8265_v45  ;;  %v23062_v5 = vld [vmem:[#allocation28_spill] sm:$0xff] }
 0x520   :  { %v8426_v47 = vpop.f32.mrf.mxu1  ;;  %v9099_v34 = vpop.f32.mrf.mxu0 }
 0x521   :  { %23059 = vst [vmem:[#allocation10_spill] sm:$0xff] %v18988_v19  ;;  %v8273_v19 = vadd.f32 %v18484_v23, %v23062_v5  ;;  %v14790_v23 = vld [vmem:[%s22492_s1 + $0x5bc] ss:$40 sps:$4 sm:$0xff]  }
 0x522   :  { %v18998_v11 = vpop.f32.mrf.mxu1  ;;  %v9102_v55 = vpop.f32.mrf.mxu0  ;;  %9293 = vmatmul.mubr.bf16.gmra.mxu0 %v14769_v42  ;;  %9486 = vmatmul.mubr.bf16.gmra.mxu1 %v14772_v60  ;;  %v14780_v42 = vld [vmem:[%s22492_s1 + $0x568] ss:$40 sps:$4 sm:$0xff]  }
 0x523   :  { %v19000_v45 = vadd.f32 %v9102_v55, %v8270_v25  ;;  %9300 = vmatprep.mubr.bf16.mxu0 %v14779_v53  ;;  %9493 = vmatprep.mubr.bf16.mxu1 %v14782_v6  ;;  %v14787_v53 = vld [vmem:[%s22492_s1 + $0x1eb4] ss:$40 sps:$4 sm:$0xff]   ;;  %v8278_v25 = vadd.f32 %v18502_v2, %v23064_v17  ;;  %v14785_v2 = vld [vmem:[%s22492_s1 + $0x1eb0] ss:$40 sps:$4 sm:$0xff]   ;;  %v23068_v17 = vld [vmem:[#allocation34_spill] sm:$0xff] }
 0x524   :  { %v8431_v61 = vpop.f32.mrf.mxu1  ;;  %v9104_v48 = vpop.f32.mrf.mxu0 }
 0x525   :  { %23061 = vst [vmem:[#allocation11_spill] sm:$0xff] %v19000_v45 }
 0x526   :  { %v19004_v57 = vpop.f32.mrf.mxu1  ;;  %v9105_v47 = vpop.f32.mrf.mxu0 }
 0x527   :  { %v19012_v60 = vadd.f32 %v9105_v47, %v8273_v19  ;;  %v23066_v47 = vld [vmem:[#allocation32_spill] sm:$0xff] }
 0x528   :  { %v8434_v6 = vpop.f32.mrf.mxu1  ;;  %v9107_v34 = vpop.f32.mrf.mxu0 }
 0x529   :  { %23063 = vst [vmem:[#allocation12_spill] sm:$0xff] %v19012_v60  ;;  %v8281_v60 = vadd.f32 %v18508_v28, %v23066_v47  ;;  %v14798_v28 = vld [vmem:[%s22492_s1 + $0x60c] ss:$40 sps:$4 sm:$0xff]  }
 0x52a   :  { %v19022_v55 = vpop.f32.mrf.mxu1  ;;  %v9110_v61 = vpop.f32.mrf.mxu0  ;;  %9301 = vmatmul.mubr.bf16.gmra.mxu0 %v14777_v41  ;;  %9494 = vmatmul.mubr.bf16.gmra.mxu1 %v14780_v42  ;;  %v14788_v41 = vld [vmem:[%s22492_s1 + $0x5b8] ss:$40 sps:$4 sm:$0xff]  }
 0x52b   :  { %v19024_v19 = vadd.f32 %v9110_v61, %v8278_v25  ;;  %9308 = vmatprep.mubr.bf16.mxu0 %v14787_v53  ;;  %9501 = vmatprep.mubr.bf16.mxu1 %v14790_v23  ;;  %v14795_v53 = vld [vmem:[%s22492_s1 + $0x1f04] ss:$40 sps:$4 sm:$0xff]   ;;  %v8286_v25 = vadd.f32 %v18526_v16, %v23068_v17  ;;  %v14793_v16 = vld [vmem:[%s22492_s1 + $0x1f00] ss:$40 sps:$4 sm:$0xff]  }
 0x52c   :  { %v8439_v48 = vpop.f32.mrf.mxu1  ;;  %v9112_v5 = vpop.f32.mrf.mxu0  ;;  %v23072_v17 = vld [vmem:[#allocation38_spill] sm:$0xff] }
 0x52d   :  { %23065 = vst [vmem:[#allocation13_spill] sm:$0xff] %v19024_v19 }
 0x52e   :  { %v19028_v45 = vpop.f32.mrf.mxu1  ;;  %v9113_v6 = vpop.f32.mrf.mxu0 }
 0x52f   :  { %v19036_v42 = vadd.f32 %v9113_v6, %v8281_v60  ;;  %v23070_v6 = vld [vmem:[#allocation36_spill] sm:$0xff] }
 0x530   :  { %v8442_v23 = vpop.f32.mrf.mxu1  ;;  %v9115_v34 = vpop.f32.mrf.mxu0 }
 0x531   :  { %23067 = vst [vmem:[#allocation14_spill] sm:$0xff] %v19036_v42  ;;  %v8289_v42 = vadd.f32 %v18532_v52, %v23070_v6  ;;  %v14806_v52 = vld [vmem:[%s22492_s1 + $0x24] ss:$40 sps:$4 sm:$0xff]  }
 0x532   :  { %v19046_v61 = vpop.f32.mrf.mxu1  ;;  %v9118_v48 = vpop.f32.mrf.mxu0  ;;  %9309 = vmatmul.mubr.bf16.gmra.mxu0 %v14785_v2  ;;  %9502 = vmatmul.mubr.bf16.gmra.mxu1 %v14788_v41  ;;  %v14796_v2 = vld [vmem:[%s22492_s1 + $0x608] ss:$40 sps:$4 sm:$0xff]  }
 0x533   :  { %v19048_v60 = vadd.f32 %v9118_v48, %v8286_v25  ;;  %9316 = vmatprep.mubr.bf16.mxu0 %v14795_v53  ;;  %9509 = vmatprep.mubr.bf16.mxu1 %v14798_v28  ;;  %v14803_v53 = vld [vmem:[%s22492_s1 + $0x65c] ss:$40 sps:$4 sm:$0xff]   ;;  %v8294_v25 = vadd.f32 %v18553_v8, %v23072_v17  ;;  %v14801_v8 = vld [vmem:[%s22492_s1 + $0x658] ss:$40 sps:$4 sm:$0xff]  }
 0x534   :  { %v8447_v5 = vpop.f32.mrf.mxu1  ;;  %v9120_v47 = vpop.f32.mrf.mxu0 }
 0x535   :  { %23069 = vst [vmem:[#allocation15_spill] sm:$0xff] %v19048_v60 }
 0x536   :  { %v19052_v19 = vpop.f32.mrf.mxu1  ;;  %v9121_v23 = vpop.f32.mrf.mxu0 }
 0x537   :  { %v19060_v41 = vadd.f32 %v9121_v23, %v8289_v42  ;;  %v23074_v23 = vld [vmem:[#allocation40_spill] sm:$0xff] }
 0x538   :  { %v8450_v28 = vpop.f32.mrf.mxu1  ;;  %v9123_v34 = vpop.f32.mrf.mxu0 }
 0x539   :  { %23071 = vst [vmem:[#allocation16_spill] sm:$0xff] %v19060_v41  ;;  %v8297_v28 = vadd.f32 %v18563_v15, %v23074_v23  ;;  %v14810_v15 = vld [vmem:[%s22492_s1 + $0x74] ss:$40 sps:$4 sm:$0xff]  }
 0x53a   :  { %v19070_v48 = vpop.f32.mrf.mxu1  ;;  %v9126_v5 = vpop.f32.mrf.mxu0  ;;  %9317 = vmatmul.mubr.bf16.gmra.mxu0 %v14793_v16  ;;  %9510 = vmatmul.mubr.bf16.gmra.mxu1 %v14796_v2  ;;  %v14804_v16 = vld [vmem:[%s22492_s1 + $0x20] ss:$40 sps:$4 sm:$0xff]  }
 0x53b   :  { %v19072_v42 = vadd.f32 %v9126_v5, %v8294_v25  ;;  %9517 = vmatprep.mubr.bf16.mxu1 %v14803_v53  ;;  %13446 = vmatprep.mubr.msk.bf16.mxu0 %vm6521_vm1, %v14806_v52  ;;  %v14809_v53 = vld [vmem:[%s22492_s1 + $0x6ac] ss:$40 sps:$4 sm:$0xff]   ;;  %v23076_v25 = vld [vmem:[#allocation42_spill] sm:$0xff] }
 0x53c   :  { %v8455_v47 = vpop.f32.mrf.mxu1  ;;  %v9128_v6 = vpop.f32.mrf.mxu0  ;;  %v8302_v5 = vadd.f32 %v18585_v10, %v23076_v25  ;;  %v14807_v10 = vld [vmem:[%s22492_s1 + $0x6a8] ss:$40 sps:$4 sm:$0xff]   ;;  %v23080_v25 = vld [vmem:[#allocation46_spill] sm:$0xff] }
 0x53d   :  { %23073 = vst [vmem:[#allocation17_spill] sm:$0xff] %v19072_v42 }
 0x53e   :  { %v19077_v34 = vpop.f32.mrf.mxu1  ;;  %v9129_v41 = vpop.f32.mrf.mxu0 }
 0x53f   :  { %v19085_v2 = vadd.f32 %v9129_v41, %v8297_v28 }
 0x540   :  { %v8458_v52 = vpop.f32.mrf.mxu1  ;;  %v9131_v17 = vpop.f32.mrf.mxu0 }
 0x541   :  { %23075 = vst [vmem:[#allocation18_spill] sm:$0xff] %v19085_v2  ;;  %v23078_v2 = vld [vmem:[#allocation44_spill] sm:$0xff] }
 0x542   :  { %v19095_v47 = vpop.f32.mrf.mxu1  ;;  %v9134_v6 = vpop.f32.mrf.mxu0  ;;  %9518 = vmatmul.mubr.bf16.gmra.mxu1 %v14801_v8  ;;  %10191 = vmatmul.mubr.bf16.vlgmr.msra.gmra.mxu0 %v14804_v16  ;;  %v8305_v42 = vadd.f32 %v18595_v49, %v23078_v2  ;;  %v14812_v8 = vld [vmem:[%s22492_s1 + $0x70] ss:$40 sps:$4 sm:$0xff]   ;;  %v14816_v49 = vld [vmem:[%s22492_s1 + $0xc4] ss:$40 sps:$4 sm:$0xff]  }
 0x543   :  { %v19097_v41 = vadd.f32 %v9134_v6, %v8302_v5  ;;  %9525 = vmatprep.mubr.bf16.mxu1 %v14809_v53  ;;  %13447 = vmatprep.mubr.msk.bf16.mxu0 %vm6521_vm1, %v14810_v15  ;;  %v14815_v53 = vld [vmem:[%s22492_s1 + $0x6fc] ss:$40 sps:$4 sm:$0xff]   ;;  %v8310_v5 = vadd.f32 %v18617_v26, %v23080_v25  ;;  %v14813_v26 = vld [vmem:[%s22492_s1 + $0x6f8] ss:$40 sps:$4 sm:$0xff]  }
 0x544   :  { %v8463_v23 = vpop.f32.mrf.mxu1  ;;  %v9136_v28 = vpop.f32.mrf.mxu0  ;;  %v23084_v25 = vld [vmem:[#allocation50_spill] sm:$0xff] }
 0x545   :  { %23077 = vst [vmem:[#allocation19_spill] sm:$0xff] %v19097_v41 }
 0x546   :  { %v19102_v52 = vpop.f32.mrf.mxu1  ;;  %v9137_v17 = vpop.f32.mrf.mxu0 }
 0x547   :  { %v19110_v16 = vadd.f32 %v9137_v17, %v8305_v42 }
 0x548   :  { %v8466_v2 = vpop.f32.mrf.mxu1  ;;  %v9139_v15 = vpop.f32.mrf.mxu0 }
 0x549   :  { %23079 = vst [vmem:[#allocation20_spill] sm:$0xff] %v19110_v16  ;;  %v23082_v16 = vld [vmem:[#allocation48_spill] sm:$0xff] }
 0x54a   :  { %v19120_v6 = vpop.f32.mrf.mxu1  ;;  %v9142_v23 = vpop.f32.mrf.mxu0  ;;  %9526 = vmatmul.mubr.bf16.gmra.mxu1 %v14807_v10  ;;  %10199 = vmatmul.mubr.bf16.gmra.mxu0 %v14812_v8  ;;  %v8313_v41 = vadd.f32 %v18627_v37, %v23082_v16  ;;  %v14818_v10 = vld [vmem:[%s22492_s1 + $0xc0] ss:$40 sps:$4 sm:$0xff]   ;;  %v14822_v37 = vld [vmem:[%s22492_s1 + $0x114] ss:$40 sps:$4 sm:$0xff]  }
 0x54b   :  { %v19122_v42 = vadd.f32 %v9142_v23, %v8310_v5  ;;  %9533 = vmatprep.mubr.bf16.mxu1 %v14815_v53  ;;  %13448 = vmatprep.mubr.msk.bf16.mxu0 %vm6521_vm1, %v14816_v49  ;;  %v14821_v53 = vld [vmem:[%s22492_s1 + $0x74c] ss:$40 sps:$4 sm:$0xff]   ;;  %v8318_v5 = vadd.f32 %v18649_v29, %v23084_v25  ;;  %v14819_v29 = vld [vmem:[%s22492_s1 + $0x748] ss:$40 sps:$4 sm:$0xff]   ;;  %v23088_v25 = vld [vmem:[#allocation54_spill] sm:$0xff] }
 0x54c   :  { %v8471_v28 = vpop.f32.mrf.mxu1  ;;  %v9144_v17 = vpop.f32.mrf.mxu0 }
 0x54d   :  { %23081 = vst [vmem:[#allocation21_spill] sm:$0xff] %v19122_v42 }
 0x54e   :  { %v19127_v2 = vpop.f32.mrf.mxu1  ;;  %v9145_v15 = vpop.f32.mrf.mxu0 }
 0x54f   :  { %v19135_v8 = vadd.f32 %v9145_v15, %v8313_v41 }
 0x550   :  { %v8474_v16 = vpop.f32.mrf.mxu1  ;;  %v9147_v49 = vpop.f32.mrf.mxu0 }
 0x551   :  { %23083 = vst [vmem:[#allocation22_spill] sm:$0xff] %v19135_v8  ;;  %v23086_v8 = vld [vmem:[#allocation52_spill] sm:$0xff] }
 0x552   :  { %v19145_v23 = vpop.f32.mrf.mxu1  ;;  %v9150_v28 = vpop.f32.mrf.mxu0  ;;  %9534 = vmatmul.mubr.bf16.gmra.mxu1 %v14813_v26  ;;  %10207 = vmatmul.mubr.bf16.gmra.mxu0 %v14818_v10  ;;  %v8321_v42 = vadd.f32 %v18659_v4, %v23086_v8  ;;  %v14824_v26 = vld [vmem:[%s22492_s1 + $0x110] ss:$40 sps:$4 sm:$0xff]   ;;  %v14828_v4 = vld [vmem:[%s22492_s1 + $0x164] ss:$40 sps:$4 sm:$0xff]  }
 0x553   :  { %v19147_v41 = vadd.f32 %v9150_v28, %v8318_v5  ;;  %9541 = vmatprep.mubr.bf16.mxu1 %v14821_v53  ;;  %13449 = vmatprep.mubr.msk.bf16.mxu0 %vm6521_vm1, %v14822_v37  ;;  %v14827_v53 = vld [vmem:[%s22492_s1 + $0x79c] ss:$40 sps:$4 sm:$0xff]   ;;  %v8326_v5 = vadd.f32 %v18681_v30, %v23088_v25  ;;  %v14825_v30 = vld [vmem:[%s22492_s1 + $0x798] ss:$40 sps:$4 sm:$0xff]  }
 0x554   :  { %v8479_v17 = vpop.f32.mrf.mxu1  ;;  %v9152_v15 = vpop.f32.mrf.mxu0  ;;  %v23092_v25 = vld [vmem:[#allocation58_spill] sm:$0xff] }
 0x555   :  { %23085 = vst [vmem:[#allocation23_spill] sm:$0xff] %v19147_v41 }
 0x556   :  { %v19152_v16 = vpop.f32.mrf.mxu1  ;;  %v9153_v49 = vpop.f32.mrf.mxu0 }
 0x557   :  { %v19160_v10 = vadd.f32 %v9153_v49, %v8321_v42 }
 0x558   :  { %v8482_v8 = vpop.f32.mrf.mxu1  ;;  %v9155_v37 = vpop.f32.mrf.mxu0 }
 0x559   :  { %23087 = vst [vmem:[#allocation24_spill] sm:$0xff] %v19160_v10  ;;  %v23090_v10 = vld [vmem:[#allocation56_spill] sm:$0xff] }
 0x55a   :  { %v19170_v28 = vpop.f32.mrf.mxu1  ;;  %v9158_v17 = vpop.f32.mrf.mxu0  ;;  %9542 = vmatmul.mubr.bf16.gmra.mxu1 %v14819_v29  ;;  %10215 = vmatmul.mubr.bf16.gmra.mxu0 %v14824_v26  ;;  %v8329_v41 = vadd.f32 %v18692_v36, %v23090_v10  ;;  %v14830_v29 = vld [vmem:[%s22492_s1 + $0x160] ss:$40 sps:$4 sm:$0xff]   ;;  %v14834_v36 = vld [vmem:[%s22492_s1 + $0x1b4] ss:$40 sps:$4 sm:$0xff]  }
 0x55b   :  { %v19172_v42 = vadd.f32 %v9158_v17, %v8326_v5  ;;  %9549 = vmatprep.mubr.bf16.mxu1 %v14827_v53  ;;  %13450 = vmatprep.mubr.msk.bf16.mxu0 %vm6521_vm1, %v14828_v4  ;;  %v14833_v53 = vld [vmem:[%s22492_s1 + $0x7ec] ss:$40 sps:$4 sm:$0xff]   ;;  %v8334_v5 = vadd.f32 %v18710_v27, %v23092_v25  ;;  %v14831_v27 = vld [vmem:[%s22492_s1 + $0x7e8] ss:$40 sps:$4 sm:$0xff]  }
 0x55c   :  { %v8487_v15 = vpop.f32.mrf.mxu1  ;;  %v9160_v49 = vpop.f32.mrf.mxu0 }
 0x55d   :  { %23089 = vst [vmem:[#allocation25_spill] sm:$0xff] %v19172_v42  ;;  %v23094_v42 = vld [vmem:[#allocation60_spill] sm:$0xff] }
 0x55e   :  { %v19177_v8 = vpop.f32.mrf.mxu1  ;;  %v9161_v37 = vpop.f32.mrf.mxu0 }
 0x55f   :  { %v19185_v26 = vadd.f32 %v9161_v37, %v8329_v41 }
 0x560   :  { %v8490_v10 = vpop.f32.mrf.mxu1  ;;  %v9163_v4 = vpop.f32.mrf.mxu0 }
 0x561   :  { %23091 = vst [vmem:[#allocation26_spill] sm:$0xff] %v19185_v26  ;;  %v8337_v10 = vadd.f32 %v18716_v7, %v23094_v42  ;;  %v14840_v7 = vld [vmem:[%s22492_s1 + $0x204] ss:$40 sps:$4 sm:$0xff]  }
 0x562   :  { %v9166_v17 = vpop.f32.mrf.mxu0  ;;  %v9359_v15 = vpop.f32.mrf.mxu1  ;;  %9550 = vmatmul.mubr.bf16.gmra.mxu1 %v14825_v30  ;;  %10223 = vmatmul.mubr.bf16.gmra.mxu0 %v14830_v29  ;;  %v14836_v30 = vld [vmem:[%s22492_s1 + $0x1b0] ss:$40 sps:$4 sm:$0xff]  }
 0x563   :  { %v19195_v49 = vadd.f32 %v9166_v17, %v8334_v5  ;;  %v19198_v41 = vadd.f32 %v9359_v15, %v17169_v22  ;;  %9557 = vmatprep.mubr.bf16.mxu1 %v14833_v53  ;;  %13451 = vmatprep.mubr.msk.bf16.mxu0 %vm6521_vm1, %v14834_v36  ;;  %v23096_v36 = vld [vmem:[#allocation62_spill] sm:$0xff] }
 0x564   :  { %v9168_v37 = vpop.f32.mrf.mxu0  ;;  %v9361_v26 = vpop.f32.mrf.mxu1  ;;  %v8342_v25 = vadd.f32 %v18734_v24, %v23096_v36  ;;  %v14837_v24 = vld [vmem:[%s22492_s1 + $0x838] ss:$40 sps:$4 sm:$0xff]  }
 0x565   :  { %23093 = vst [vmem:[#allocation28_spill] sm:$0xff] %v19195_v49  ;;  %v14839_v26 = vld [vmem:[%s22492_s1 + $0x83c] ss:$40 sps:$4 sm:$0xff]  }
 0x566   :  { %v9169_v4 = vpop.f32.mrf.mxu0  ;;  %v9362_v60 = vpop.f32.mrf.mxu1 }
 0x567   :  { %v19209_v22 = vadd.f32 %v9169_v4, %v8337_v10  ;;  %v19212_v29 = vadd.f32 %v9362_v60, %v17181_v38  ;;  %v23098_v10 = vld [vmem:[#allocation64_spill] sm:$0xff] }
 0x568   :  { %v9171_v42 = vpop.f32.mrf.mxu0  ;;  %v9364_v53 = vpop.f32.mrf.mxu1  ;;  %v8345_v4 = vadd.f32 %v18740_v12, %v23098_v10  ;;  %v14846_v12 = vld [vmem:[%s22492_s1 + $0x254] ss:$40 sps:$4 sm:$0xff]  }
 0x569   :  { %23095 = vst [vmem:[#allocation30_spill] sm:$0xff] %v19209_v22 }
 0x56a   :  { %v9174_v5 = vpop.f32.mrf.mxu0  ;;  %v9367_v17 = vpop.f32.mrf.mxu1  ;;  %9558 = vmatmul.mubr.bf16.gmra.mxu1 %v14831_v27  ;;  %10231 = vmatmul.mubr.bf16.gmra.mxu0 %v14836_v30  ;;  %v14842_v27 = vld [vmem:[%s22492_s1 + $0x200] ss:$40 sps:$4 sm:$0xff]  }
 0x56b   :  { %v19222_v15 = vadd.f32 %v9174_v5, %v8342_v25  ;;  %v19225_v38 = vadd.f32 %v9367_v17, %v17193_v44  ;;  %9565 = vmatprep.mubr.bf16.mxu1 %v14839_v26  ;;  %13452 = vmatprep.mubr.msk.bf16.mxu0 %vm6521_vm1, %v14840_v7  ;;  %v14845_v26 = vld [vmem:[%s22492_s1 + $0x88c] ss:$40 sps:$4 sm:$0xff]   ;;  %v23100_v25 = vld [vmem:[#allocation66_spill] sm:$0xff] }
 0x56c   :  { %v9176_v60 = vpop.f32.mrf.mxu0  ;;  %v9369_v37 = vpop.f32.mrf.mxu1  ;;  %v8350_v5 = vadd.f32 %v18758_v31, %v23100_v25  ;;  %v14843_v31 = vld [vmem:[%s22492_s1 + $0x888] ss:$40 sps:$4 sm:$0xff]  }
 0x56d   :  { %23097 = vst [vmem:[#allocation32_spill] sm:$0xff] %v19222_v15 }
 0x56e   :  { %v9177_v42 = vpop.f32.mrf.mxu0  ;;  %v9370_v53 = vpop.f32.mrf.mxu1 }
 0x56f   :  { %v19236_v44 = vadd.f32 %v9177_v42, %v8345_v4  ;;  %v19239_v30 = vadd.f32 %v9370_v53, %v17205_v9  ;;  %v23102_v42 = vld [vmem:[#allocation68_spill] sm:$0xff] }
 0x570   :  { %v9179_v7 = vpop.f32.mrf.mxu0  ;;  %v9372_v36 = vpop.f32.mrf.mxu1  ;;  %v8353_v53 = vadd.f32 %v18764_v18, %v23102_v42  ;;  %v14852_v18 = vld [vmem:[%s22492_s1 + $0x2a4] ss:$40 sps:$4 sm:$0xff]  }
 0x571   :  { %23099 = vst [vmem:[#allocation34_spill] sm:$0xff] %v19236_v44 }
 0x572   :  { %v9182_v17 = vpop.f32.mrf.mxu0  ;;  %v9375_v60 = vpop.f32.mrf.mxu1  ;;  %9566 = vmatmul.mubr.bf16.gmra.mxu1 %v14837_v24  ;;  %10239 = vmatmul.mubr.bf16.gmra.mxu0 %v14842_v27  ;;  %v14848_v24 = vld [vmem:[%s22492_s1 + $0x250] ss:$40 sps:$4 sm:$0xff]  }
 0x573   :  { %v19249_v37 = vadd.f32 %v9182_v17, %v8350_v5  ;;  %v19252_v9 = vadd.f32 %v9375_v60, %v17217_v1  ;;  %9573 = vmatprep.mubr.bf16.mxu1 %v14845_v26  ;;  %13453 = vmatprep.mubr.msk.bf16.mxu0 %vm6521_vm1, %v14846_v12  ;;  %v14851_v26 = vld [vmem:[%s22492_s1 + $0x8dc] ss:$40 sps:$4 sm:$0xff]  }
 0x574   :  { %v9184_v10 = vpop.f32.mrf.mxu0  ;;  %v9377_v4 = vpop.f32.mrf.mxu1  ;;  %v23104_v5 = vld [vmem:[#allocation70_spill] sm:$0xff] }
 0x575   :  { %23101 = vst [vmem:[#allocation36_spill] sm:$0xff] %v19249_v37  ;;  %v8358_v17 = vadd.f32 %v18782_v35, %v23104_v5  ;;  %v14849_v35 = vld [vmem:[%s22492_s1 + $0x8d8] ss:$40 sps:$4 sm:$0xff]  }
 0x576   :  { %v9185_v7 = vpop.f32.mrf.mxu0  ;;  %v9378_v36 = vpop.f32.mrf.mxu1 }
 0x577   :  { %v19263_v1 = vadd.f32 %v9185_v7, %v8353_v53  ;;  %v19266_v27 = vadd.f32 %v9378_v36, %v17229_v21  ;;  %v23106_v7 = vld [vmem:[#allocation72_spill] sm:$0xff] }
 0x578   :  { %v9187_v12 = vpop.f32.mrf.mxu0  ;;  %v9380_v25 = vpop.f32.mrf.mxu1  ;;  %v8361_v36 = vadd.f32 %v18788_v20, %v23106_v7  ;;  %v14858_v20 = vld [vmem:[%s22492_s1 + $0x2f4] ss:$40 sps:$4 sm:$0xff]  }
 0x579   :  { %23103 = vst [vmem:[#allocation38_spill] sm:$0xff] %v19263_v1 }
 0x57a   :  { %v9190_v60 = vpop.f32.mrf.mxu0  ;;  %v9383_v10 = vpop.f32.mrf.mxu1  ;;  %9574 = vmatmul.mubr.bf16.gmra.mxu1 %v14843_v31  ;;  %10247 = vmatmul.mubr.bf16.gmra.mxu0 %v14848_v24  ;;  %v14854_v31 = vld [vmem:[%s22492_s1 + $0x2a0] ss:$40 sps:$4 sm:$0xff]   ;;  %v23108_v24 = vld [vmem:[#allocation192_spill] sm:$0xff] }
 0x57b   :  { %v19276_v4 = vadd.f32 %v9190_v60, %v8358_v17  ;;  %v19279_v21 = vadd.f32 %v9383_v10, %v17241_v40  ;;  %9581 = vmatprep.mubr.bf16.mxu1 %v14851_v26  ;;  %13454 = vmatprep.mubr.msk.bf16.mxu0 %vm6521_vm1, %v14852_v18  ;;  %v14857_v18 = vld [vmem:[%s22492_s1 + $0x92c] ss:$40 sps:$4 sm:$0xff]   ;;  %v23109_v60 = vld [vmem:[#allocation74_spill] sm:$0xff] }
 0x57c   :  { %v9192_v42 = vpop.f32.mrf.mxu0  ;;  %v9385_v53 = vpop.f32.mrf.mxu1  ;;  %v8366_v10 = vadd.f32 %v18806_v59, %v23109_v60  ;;  %v14855_v59 = vld [vmem:[%s22492_s1 + $0x928] ss:$40 sps:$4 sm:$0xff]  }
 0x57d   :  { %23105 = vst [vmem:[#allocation40_spill] sm:$0xff] %v19276_v4 }
 0x57e   :  { %v9193_v12 = vpop.f32.mrf.mxu0  ;;  %v9386_v25 = vpop.f32.mrf.mxu1 }
 0x57f   :  { %v19290_v40 = vadd.f32 %v9193_v12, %v8361_v36  ;;  %v19293_v26 = vadd.f32 %v9386_v25, %v23108_v24  ;;  %v23111_v36 = vld [vmem:[#allocation193_spill] sm:$0xff] }
 0x580   :  { %v9195_v5 = vpop.f32.mrf.mxu0  ;;  %v9388_v17 = vpop.f32.mrf.mxu1 }
 0x581   :  { %23107 = vst [vmem:[#allocation42_spill] sm:$0xff] %v19290_v40  ;;  %v23112_v40 = vld [vmem:[#allocation76_spill] sm:$0xff] }
 0x582   :  { %v9198_v42 = vpop.f32.mrf.mxu0  ;;  %v9391_v53 = vpop.f32.mrf.mxu1  ;;  %9582 = vmatmul.mubr.bf16.gmra.mxu1 %v14849_v35  ;;  %10255 = vmatmul.mubr.bf16.gmra.mxu0 %v14854_v31  ;;  %v8369_v5 = vadd.f32 %v18812_v3, %v23112_v40  ;;  %v14860_v35 = vld [vmem:[%s22492_s1 + $0x2f0] ss:$40 sps:$4 sm:$0xff]   ;;  %v14864_v3 = vld [vmem:[%s22492_s1 + $0x344] ss:$40 sps:$4 sm:$0xff]  }
 0x583   :  { %v19303_v7 = vadd.f32 %v9198_v42, %v8366_v10  ;;  %v19306_v12 = vadd.f32 %v9391_v53, %v23111_v36  ;;  %9589 = vmatprep.mubr.bf16.mxu1 %v14857_v18  ;;  %13455 = vmatprep.mubr.msk.bf16.mxu0 %vm6521_vm1, %v14858_v20  ;;  %v23114_v18 = vld [vmem:[#allocation194_spill] sm:$0xff] }
 0x584   :  { %v9200_v25 = vpop.f32.mrf.mxu0  ;;  %v9393_v24 = vpop.f32.mrf.mxu1  ;;  %v14863_v20 = vld [vmem:[%s22492_s1 + $0x97c] ss:$40 sps:$4 sm:$0xff]  }
 0x585   :  { %23110 = vst [vmem:[#allocation44_spill] sm:$0xff] %v19303_v7  ;;  %v23115_v42 = vld [vmem:[#allocation78_spill] sm:$0xff] }
 0x586   :  { %v9201_v17 = vpop.f32.mrf.mxu0  ;;  %v9394_v4 = vpop.f32.mrf.mxu1  ;;  %v8374_v53 = vadd.f32 %v18830_v54, %v23115_v42  ;;  %v14861_v54 = vld [vmem:[%s22492_s1 + $0x978] ss:$40 sps:$4 sm:$0xff]  }
 0x587   :  { %v19317_v31 = vadd.f32 %v9201_v17, %v8369_v5  ;;  %v19320_v60 = vadd.f32 %v9394_v4, %v23114_v18  ;;  %v23117_v4 = vld [vmem:[#allocation195_spill] sm:$0xff] }
 0x588   :  { %v9203_v40 = vpop.f32.mrf.mxu0  ;;  %v9396_v10 = vpop.f32.mrf.mxu1 }
 0x589   :  { %23113 = vst [vmem:[#allocation46_spill] sm:$0xff] %v19317_v31  ;;  %v23118_v31 = vld [vmem:[#allocation80_spill] sm:$0xff] }
 0x58a   :  { %v9206_v36 = vpop.f32.mrf.mxu0  ;;  %v9399_v25 = vpop.f32.mrf.mxu1  ;;  %9590 = vmatmul.mubr.bf16.gmra.mxu1 %v14855_v59  ;;  %10263 = vmatmul.mubr.bf16.gmra.mxu0 %v14860_v35  ;;  %v8377_v40 = vadd.f32 %v18836_v14, %v23118_v31  ;;  %v14866_v59 = vld [vmem:[%s22492_s1 + $0x340] ss:$40 sps:$4 sm:$0xff]   ;;  %v14870_v14 = vld [vmem:[%s22492_s1 + $0x394] ss:$40 sps:$4 sm:$0xff]  }
 0x58b   :  { %v19330_v24 = vadd.f32 %v9206_v36, %v8374_v53  ;;  %v19333_v5 = vadd.f32 %v9399_v25, %v23117_v4  ;;  %9597 = vmatprep.mubr.bf16.mxu1 %v14863_v20  ;;  %13456 = vmatprep.mubr.msk.bf16.mxu0 %vm6521_vm1, %v14864_v3  ;;  %v23120_v20 = vld [vmem:[#allocation196_spill] sm:$0xff]  ;;  %v23121_v36 = vld [vmem:[#allocation82_spill] sm:$0xff] }
 0x58c   :  { %v9208_v17 = vpop.f32.mrf.mxu0  ;;  %v9401_v18 = vpop.f32.mrf.mxu1  ;;  %v14869_v3 = vld [vmem:[%s22492_s1 + $0x9cc] ss:$40 sps:$4 sm:$0xff]   ;;  %v8382_v25 = vadd.f32 %v18854_v46, %v23121_v36  ;;  %v14867_v46 = vld [vmem:[%s22492_s1 + $0x9c8] ss:$40 sps:$4 sm:$0xff]  }
 0x58d   :  { %23116 = vst [vmem:[#allocation48_spill] sm:$0xff] %v19330_v24 }
 0x58e   :  { %v9209_v10 = vpop.f32.mrf.mxu0  ;;  %v9402_v7 = vpop.f32.mrf.mxu1 }
 0x58f   :  { %v19344_v35 = vadd.f32 %v9209_v10, %v8377_v40  ;;  %v19347_v42 = vadd.f32 %v9402_v7, %v23120_v20  ;;  %v23123_v7 = vld [vmem:[#allocation197_spill] sm:$0xff] }
 0x590   :  { %v9211_v31 = vpop.f32.mrf.mxu0  ;;  %v9404_v53 = vpop.f32.mrf.mxu1 }
 0x591   :  { %23119 = vst [vmem:[#allocation50_spill] sm:$0xff] %v19344_v35  ;;  %v23124_v35 = vld [vmem:[#allocation84_spill] sm:$0xff] }
 0x592   :  { %v9214_v4 = vpop.f32.mrf.mxu0  ;;  %v9407_v17 = vpop.f32.mrf.mxu1  ;;  %9598 = vmatmul.mubr.bf16.gmra.mxu1 %v14861_v54  ;;  %10271 = vmatmul.mubr.bf16.gmra.mxu0 %v14866_v59  ;;  %v8385_v31 = vadd.f32 %v18860_v63, %v23124_v35  ;;  %v14872_v54 = vld [vmem:[%s22492_s1 + $0x390] ss:$40 sps:$4 sm:$0xff]   ;;  %v14876_v63 = vld [vmem:[%s22492_s1 + $0x3e4] ss:$40 sps:$4 sm:$0xff]  }
 0x593   :  { %v19357_v18 = vadd.f32 %v9214_v4, %v8382_v25  ;;  %v19360_v40 = vadd.f32 %v9407_v17, %v23123_v7  ;;  %9605 = vmatprep.mubr.bf16.mxu1 %v14869_v3  ;;  %13457 = vmatprep.mubr.msk.bf16.mxu0 %vm6521_vm1, %v14870_v14  ;;  %v23126_v3 = vld [vmem:[#allocation198_spill] sm:$0xff] }
 0x594   :  { %v9216_v10 = vpop.f32.mrf.mxu0  ;;  %v9409_v20 = vpop.f32.mrf.mxu1  ;;  %v14875_v14 = vld [vmem:[%s22492_s1 + $0xa1c] ss:$40 sps:$4 sm:$0xff]  }
 0x595   :  { %23122 = vst [vmem:[#allocation52_spill] sm:$0xff] %v19357_v18  ;;  %v23127_v4 = vld [vmem:[#allocation86_spill] sm:$0xff] }
 0x596   :  { %v9217_v53 = vpop.f32.mrf.mxu0  ;;  %v9410_v24 = vpop.f32.mrf.mxu1  ;;  %v8390_v17 = vadd.f32 %v18878_v32, %v23127_v4  ;;  %v14873_v32 = vld [vmem:[%s22492_s1 + $0xa18] ss:$40 sps:$4 sm:$0xff]  }
 0x597   :  { %v19371_v59 = vadd.f32 %v9217_v53, %v8385_v31  ;;  %v19374_v36 = vadd.f32 %v9410_v24, %v23126_v3  ;;  %v23129_v24 = vld [vmem:[#allocation199_spill] sm:$0xff] }
 0x598   :  { %v9219_v35 = vpop.f32.mrf.mxu0  ;;  %v9412_v25 = vpop.f32.mrf.mxu1 }
 0x599   :  { %23125 = vst [vmem:[#allocation54_spill] sm:$0xff] %v19371_v59  ;;  %v23130_v59 = vld [vmem:[#allocation88_spill] sm:$0xff] }
 0x59a   :  { %v9222_v7 = vpop.f32.mrf.mxu0  ;;  %v9415_v10 = vpop.f32.mrf.mxu1  ;;  %9606 = vmatmul.mubr.bf16.gmra.mxu1 %v14867_v46  ;;  %10279 = vmatmul.mubr.bf16.gmra.mxu0 %v14872_v54  ;;  %v8393_v35 = vadd.f32 %v18884_v50, %v23130_v59  ;;  %v14878_v46 = vld [vmem:[%s22492_s1 + $0x3e0] ss:$40 sps:$4 sm:$0xff]   ;;  %v14882_v50 = vld [vmem:[%s22492_s1 + $0x434] ss:$40 sps:$4 sm:$0xff]  }
 0x59b   :  { %v19384_v20 = vadd.f32 %v9222_v7, %v8390_v17  ;;  %v19387_v31 = vadd.f32 %v9415_v10, %v23129_v24  ;;  %9613 = vmatprep.mubr.bf16.mxu1 %v14875_v14  ;;  %13458 = vmatprep.mubr.msk.bf16.mxu0 %vm6521_vm1, %v14876_v63  ;;  %v23132_v14 = vld [vmem:[#allocation200_spill] sm:$0xff]  ;;  %v23133_v7 = vld [vmem:[#allocation90_spill] sm:$0xff] }
 0x59c   :  { %v9224_v53 = vpop.f32.mrf.mxu0  ;;  %v9417_v3 = vpop.f32.mrf.mxu1  ;;  %v14881_v63 = vld [vmem:[%s22492_s1 + $0xa6c] ss:$40 sps:$4 sm:$0xff]   ;;  %v8398_v10 = vadd.f32 %v18902_v56, %v23133_v7  ;;  %v14879_v56 = vld [vmem:[%s22492_s1 + $0xa68] ss:$40 sps:$4 sm:$0xff]  }
 0x59d   :  { %23128 = vst [vmem:[#allocation56_spill] sm:$0xff] %v19384_v20 }
 0x59e   :  { %v9225_v25 = vpop.f32.mrf.mxu0  ;;  %v9418_v18 = vpop.f32.mrf.mxu1 }
 0x59f   :  { %v19398_v54 = vadd.f32 %v9225_v25, %v8393_v35  ;;  %v19401_v4 = vadd.f32 %v9418_v18, %v23132_v14  ;;  %v23135_v18 = vld [vmem:[#allocation201_spill] sm:$0xff] }
 0x5a0   :  { %v9227_v59 = vpop.f32.mrf.mxu0  ;;  %v9420_v17 = vpop.f32.mrf.mxu1 }
 0x5a1   :  { %23131 = vst [vmem:[#allocation58_spill] sm:$0xff] %v19398_v54  ;;  %v23136_v54 = vld [vmem:[#allocation92_spill] sm:$0xff] }
 0x5a2   :  { %v9230_v24 = vpop.f32.mrf.mxu0  ;;  %v9423_v53 = vpop.f32.mrf.mxu1  ;;  %9614 = vmatmul.mubr.bf16.gmra.mxu1 %v14873_v32  ;;  %10287 = vmatmul.mubr.bf16.gmra.mxu0 %v14878_v46  ;;  %v8401_v59 = vadd.f32 %v18908_v43, %v23136_v54  ;;  %v14884_v32 = vld [vmem:[%s22492_s1 + $0x430] ss:$40 sps:$4 sm:$0xff]   ;;  %v14888_v43 = vld [vmem:[%s22492_s1 + $0x484] ss:$40 sps:$4 sm:$0xff]  }
 0x5a3   :  { %v19411_v3 = vadd.f32 %v9230_v24, %v8398_v10  ;;  %v19414_v35 = vadd.f32 %v9423_v53, %v23135_v18  ;;  %9621 = vmatprep.mubr.bf16.mxu1 %v14881_v63  ;;  %13459 = vmatprep.mubr.msk.bf16.mxu0 %vm6521_vm1, %v14882_v50  ;;  %v23138_v63 = vld [vmem:[#allocation202_spill] sm:$0xff] }
 0x5a4   :  { %v9232_v25 = vpop.f32.mrf.mxu0  ;;  %v9425_v14 = vpop.f32.mrf.mxu1  ;;  %v14887_v50 = vld [vmem:[%s22492_s1 + $0xabc] ss:$40 sps:$4 sm:$0xff]  }
 0x5a5   :  { %23134 = vst [vmem:[#allocation60_spill] sm:$0xff] %v19411_v3  ;;  %v23139_v24 = vld [vmem:[#allocation94_spill] sm:$0xff] }
 0x5a6   :  { %v9233_v17 = vpop.f32.mrf.mxu0  ;;  %v9426_v20 = vpop.f32.mrf.mxu1  ;;  %v8406_v53 = vadd.f32 %v18926_v33, %v23139_v24  ;;  %v14885_v33 = vld [vmem:[%s22492_s1 + $0xab8] ss:$40 sps:$4 sm:$0xff]  }
 0x5a7   :  { %v19425_v46 = vadd.f32 %v9233_v17, %v8401_v59  ;;  %v19428_v7 = vadd.f32 %v9426_v20, %v23138_v63  ;;  %v23141_v20 = vld [vmem:[#allocation203_spill] sm:$0xff] }
 0x5a8   :  { %v9235_v54 = vpop.f32.mrf.mxu0  ;;  %v9428_v10 = vpop.f32.mrf.mxu1 }
 0x5a9   :  { %23137 = vst [vmem:[#allocation62_spill] sm:$0xff] %v19425_v46  ;;  %v23142_v46 = vld [vmem:[#allocation96_spill] sm:$0xff] }
 0x5aa   :  { %v9238_v18 = vpop.f32.mrf.mxu0  ;;  %v9431_v25 = vpop.f32.mrf.mxu1  ;;  %9622 = vmatmul.mubr.bf16.gmra.mxu1 %v14879_v56  ;;  %10295 = vmatmul.mubr.bf16.gmra.mxu0 %v14884_v32  ;;  %v8409_v54 = vadd.f32 %v18932_v51, %v23142_v46  ;;  %v14890_v56 = vld [vmem:[%s22492_s1 + $0x480] ss:$40 sps:$4 sm:$0xff]   ;;  %v14894_v51 = vld [vmem:[%s22492_s1 + $0x4d4] ss:$40 sps:$4 sm:$0xff]  }
 0x5ab   :  { %v19438_v14 = vadd.f32 %v9238_v18, %v8406_v53  ;;  %v19441_v59 = vadd.f32 %v9431_v25, %v23141_v20  ;;  %9629 = vmatprep.mubr.bf16.mxu1 %v14887_v50  ;;  %13460 = vmatprep.mubr.msk.bf16.mxu0 %vm6521_vm1, %v14888_v43  ;;  %v23144_v50 = vld [vmem:[#allocation204_spill] sm:$0xff]  ;;  %v23145_v18 = vld [vmem:[#allocation98_spill] sm:$0xff] }
 0x5ac   :  { %v9240_v17 = vpop.f32.mrf.mxu0  ;;  %v9433_v63 = vpop.f32.mrf.mxu1  ;;  %v14893_v43 = vld [vmem:[%s22492_s1 + $0xb0c] ss:$40 sps:$4 sm:$0xff]   ;;  %v8414_v25 = vadd.f32 %v18950_v62, %v23145_v18  ;;  %v14891_v62 = vld [vmem:[%s22492_s1 + $0xb08] ss:$40 sps:$4 sm:$0xff]  }
 0x5ad   :  { %23140 = vst [vmem:[#allocation64_spill] sm:$0xff] %v19438_v14 }
 0x5ae   :  { %v9241_v10 = vpop.f32.mrf.mxu0  ;;  %v9434_v3 = vpop.f32.mrf.mxu1 }
 0x5af   :  { %v19452_v32 = vadd.f32 %v9241_v10, %v8409_v54  ;;  %v19455_v24 = vadd.f32 %v9434_v3, %v23144_v50  ;;  %v23147_v3 = vld [vmem:[#allocation205_spill] sm:$0xff] }
 0x5b0   :  { %v9243_v46 = vpop.f32.mrf.mxu0  ;;  %v9436_v53 = vpop.f32.mrf.mxu1 }
 0x5b1   :  { %23143 = vst [vmem:[#allocation66_spill] sm:$0xff] %v19452_v32  ;;  %v23148_v32 = vld [vmem:[#allocation100_spill] sm:$0xff] }
 0x5b2   :  { %v9246_v20 = vpop.f32.mrf.mxu0  ;;  %v9439_v17 = vpop.f32.mrf.mxu1  ;;  %9630 = vmatmul.mubr.bf16.gmra.mxu1 %v14885_v33  ;;  %10303 = vmatmul.mubr.bf16.gmra.mxu0 %v14890_v56  ;;  %v8417_v46 = vadd.f32 %v18956_v13, %v23148_v32  ;;  %v14896_v33 = vld [vmem:[%s22492_s1 + $0x4d0] ss:$40 sps:$4 sm:$0xff]   ;;  %v14900_v13 = vld [vmem:[%s22492_s1 + $0x524] ss:$40 sps:$4 sm:$0xff]  }
 0x5b3   :  { %v19465_v63 = vadd.f32 %v9246_v20, %v8414_v25  ;;  %v19468_v54 = vadd.f32 %v9439_v17, %v23147_v3  ;;  %9637 = vmatprep.mubr.bf16.mxu1 %v14893_v43  ;;  %13461 = vmatprep.mubr.msk.bf16.mxu0 %vm6521_vm1, %v14894_v51  ;;  %v23150_v43 = vld [vmem:[#allocation206_spill] sm:$0xff] }
 0x5b4   :  { %v9248_v10 = vpop.f32.mrf.mxu0  ;;  %v9441_v50 = vpop.f32.mrf.mxu1  ;;  %v14899_v51 = vld [vmem:[%s22492_s1 + $0xb5c] ss:$40 sps:$4 sm:$0xff]  }
 0x5b5   :  { %23146 = vst [vmem:[#allocation68_spill] sm:$0xff] %v19465_v63  ;;  %v23151_v20 = vld [vmem:[#allocation102_spill] sm:$0xff] }
 0x5b6   :  { %v9249_v53 = vpop.f32.mrf.mxu0  ;;  %v9442_v14 = vpop.f32.mrf.mxu1  ;;  %v8422_v17 = vadd.f32 %v18974_v39, %v23151_v20  ;;  %v14897_v39 = vld [vmem:[%s22492_s1 + $0xb58] ss:$40 sps:$4 sm:$0xff]  }
 0x5b7   :  { %v19479_v56 = vadd.f32 %v9249_v53, %v8417_v46  ;;  %v19482_v18 = vadd.f32 %v9442_v14, %v23150_v43  ;;  %v23153_v14 = vld [vmem:[#allocation207_spill] sm:$0xff] }
 0x5b8   :  { %v9251_v32 = vpop.f32.mrf.mxu0  ;;  %v9444_v25 = vpop.f32.mrf.mxu1 }
 0x5b9   :  { %23149 = vst [vmem:[#allocation70_spill] sm:$0xff] %v19479_v56  ;;  %v23154_v56 = vld [vmem:[#allocation104_spill] sm:$0xff] }
 0x5ba   :  { %v9254_v3 = vpop.f32.mrf.mxu0  ;;  %v9447_v10 = vpop.f32.mrf.mxu1  ;;  %9638 = vmatmul.mubr.bf16.gmra.mxu1 %v14891_v62  ;;  %10311 = vmatmul.mubr.bf16.gmra.mxu0 %v14896_v33  ;;  %v8425_v32 = vadd.f32 %v18980_v0, %v23154_v56  ;;  %v14902_v62 = vld [vmem:[%s22492_s1 + $0x520] ss:$40 sps:$4 sm:$0xff]   ;;  %v14906_v0 = vld [vmem:[%s22492_s1 + $0x574] ss:$40 sps:$4 sm:$0xff]  }
 0x5bb   :  { %v19492_v50 = vadd.f32 %v9254_v3, %v8422_v17  ;;  %v19495_v46 = vadd.f32 %v9447_v10, %v23153_v14  ;;  %9645 = vmatprep.mubr.bf16.mxu1 %v14899_v51  ;;  %13462 = vmatprep.mubr.msk.bf16.mxu0 %vm6521_vm1, %v14900_v13  ;;  %v23156_v51 = vld [vmem:[#allocation208_spill] sm:$0xff]  ;;  %v23157_v3 = vld [vmem:[#allocation106_spill] sm:$0xff] }
 0x5bc   :  { %v9256_v53 = vpop.f32.mrf.mxu0  ;;  %v9449_v43 = vpop.f32.mrf.mxu1  ;;  %v14905_v13 = vld [vmem:[%s22492_s1 + $0xbac] ss:$40 sps:$4 sm:$0xff]   ;;  %v8430_v10 = vadd.f32 %v18998_v11, %v23157_v3  ;;  %v14903_v11 = vld [vmem:[%s22492_s1 + $0xba8] ss:$40 sps:$4 sm:$0xff]  }
 0x5bd   :  { %23152 = vst [vmem:[#allocation72_spill] sm:$0xff] %v19492_v50 }
 0x5be   :  { %v9257_v25 = vpop.f32.mrf.mxu0  ;;  %v9450_v63 = vpop.f32.mrf.mxu1 }
 0x5bf   :  { %v19506_v33 = vadd.f32 %v9257_v25, %v8425_v32  ;;  %v19509_v20 = vadd.f32 %v9450_v63, %v23156_v51  ;;  %v23159_v63 = vld [vmem:[#allocation209_spill] sm:$0xff] }
 0x5c0   :  { %v9259_v56 = vpop.f32.mrf.mxu0  ;;  %v9452_v17 = vpop.f32.mrf.mxu1 }
 0x5c1   :  { %23155 = vst [vmem:[#allocation192_spill] sm:$0xff] %v19506_v33  ;;  %v23160_v33 = vld [vmem:[#allocation108_spill] sm:$0xff] }
 0x5c2   :  { %v9262_v14 = vpop.f32.mrf.mxu0  ;;  %v9455_v53 = vpop.f32.mrf.mxu1  ;;  %9646 = vmatmul.mubr.bf16.gmra.mxu1 %v14897_v39  ;;  %10319 = vmatmul.mubr.bf16.gmra.mxu0 %v14902_v62  ;;  %v8433_v56 = vadd.f32 %v19004_v57, %v23160_v33  ;;  %v14908_v39 = vld [vmem:[%s22492_s1 + $0x570] ss:$40 sps:$4 sm:$0xff]   ;;  %v14912_v57 = vld [vmem:[%s22492_s1 + $0x5c4] ss:$40 sps:$4 sm:$0xff]  }
 0x5c3   :  { %v19519_v43 = vadd.f32 %v9262_v14, %v8430_v10  ;;  %v19522_v32 = vadd.f32 %v9455_v53, %v23159_v63  ;;  %9653 = vmatprep.mubr.bf16.mxu1 %v14905_v13  ;;  %13463 = vmatprep.mubr.msk.bf16.mxu0 %vm6521_vm1, %v14906_v0  ;;  %v23162_v13 = vld [vmem:[#allocation27_spill] sm:$0xff]  ;;  %v14911_v0 = vld [vmem:[%s22492_s1 + $0xbfc] ss:$40 sps:$4 sm:$0xff]  }
 0x5c4   :  { %v9264_v25 = vpop.f32.mrf.mxu0  ;;  %v9457_v51 = vpop.f32.mrf.mxu1  ;;  %v23163_v14 = vld [vmem:[#allocation110_spill] sm:$0xff] }
 0x5c5   :  { %23158 = vst [vmem:[#allocation74_spill] sm:$0xff] %v19519_v43  ;;  %v8438_v53 = vadd.f32 %v19022_v55, %v23163_v14  ;;  %v14909_v55 = vld [vmem:[%s22492_s1 + $0xbf8] ss:$40 sps:$4 sm:$0xff]  }
 0x5c6   :  { %v9265_v17 = vpop.f32.mrf.mxu0  ;;  %v9458_v50 = vpop.f32.mrf.mxu1 }
 0x5c7   :  { %v19533_v62 = vadd.f32 %v9265_v17, %v8433_v56  ;;  %v19536_v3 = vadd.f32 %v9458_v50, %v23162_v13  ;;  %v23165_v50 = vld [vmem:[#allocation163_spill] sm:$0xff] }
 0x5c8   :  { %v9267_v33 = vpop.f32.mrf.mxu0  ;;  %v9460_v10 = vpop.f32.mrf.mxu1 }
 0x5c9   :  { %23161 = vst [vmem:[#allocation193_spill] sm:$0xff] %v19533_v62  ;;  %v23166_v62 = vld [vmem:[#allocation112_spill] sm:$0xff] }
 0x5ca   :  { %v9270_v63 = vpop.f32.mrf.mxu0  ;;  %v9463_v25 = vpop.f32.mrf.mxu1  ;;  %9654 = vmatmul.mubr.bf16.gmra.mxu1 %v14903_v11  ;;  %10327 = vmatmul.mubr.bf16.gmra.mxu0 %v14908_v39  ;;  %v8441_v33 = vadd.f32 %v19028_v45, %v23166_v62  ;;  %v14914_v11 = vld [vmem:[%s22492_s1 + $0x5c0] ss:$40 sps:$4 sm:$0xff]   ;;  %v14918_v45 = vld [vmem:[%s22492_s1 + $0x614] ss:$40 sps:$4 sm:$0xff]  }
 0x5cb   :  { %v19546_v51 = vadd.f32 %v9270_v63, %v8438_v53  ;;  %v19549_v56 = vadd.f32 %v9463_v25, %v23165_v50  ;;  %9661 = vmatprep.mubr.bf16.mxu1 %v14911_v0  ;;  %13464 = vmatprep.mubr.msk.bf16.mxu0 %vm6521_vm1, %v14912_v57  ;;  %v23168_v0 = vld [vmem:[#allocation29_spill] sm:$0xff]  ;;  %v14917_v57 = vld [vmem:[%s22492_s1 + $0xc4c] ss:$40 sps:$4 sm:$0xff]   ;;  %v23169_v63 = vld [vmem:[#allocation114_spill] sm:$0xff] }
 0x5cc   :  { %v9272_v17 = vpop.f32.mrf.mxu0  ;;  %v9465_v13 = vpop.f32.mrf.mxu1  ;;  %v8446_v25 = vadd.f32 %v19046_v61, %v23169_v63  ;;  %v14915_v61 = vld [vmem:[%s22492_s1 + $0xc48] ss:$40 sps:$4 sm:$0xff]  }
 0x5cd   :  { %23164 = vst [vmem:[#allocation76_spill] sm:$0xff] %v19546_v51 }
 0x5ce   :  { %v9273_v10 = vpop.f32.mrf.mxu0  ;;  %v9466_v43 = vpop.f32.mrf.mxu1 }
 0x5cf   :  { %v19560_v39 = vadd.f32 %v9273_v10, %v8441_v33  ;;  %v19563_v14 = vadd.f32 %v9466_v43, %v23168_v0  ;;  %v23171_v43 = vld [vmem:[#allocation165_spill] sm:$0xff] }
 0x5d0   :  { %v9275_v62 = vpop.f32.mrf.mxu0  ;;  %v9468_v53 = vpop.f32.mrf.mxu1 }
 0x5d1   :  { %23167 = vst [vmem:[#allocation194_spill] sm:$0xff] %v19560_v39  ;;  %v23172_v39 = vld [vmem:[#allocation116_spill] sm:$0xff] }
 0x5d2   :  { %v9278_v50 = vpop.f32.mrf.mxu0  ;;  %v9471_v17 = vpop.f32.mrf.mxu1  ;;  %9662 = vmatmul.mubr.bf16.gmra.mxu1 %v14909_v55  ;;  %10335 = vmatmul.mubr.bf16.gmra.mxu0 %v14914_v11  ;;  %v8449_v62 = vadd.f32 %v19052_v19, %v23172_v39  ;;  %v14920_v55 = vld [vmem:[%s22492_s1 + $0x610] ss:$40 sps:$4 sm:$0xff]   ;;  %v14924_v19 = vld [vmem:[%s22492_s1 + $0x664] ss:$40 sps:$4 sm:$0xff]  }
 0x5d3   :  { %v19573_v13 = vadd.f32 %v9278_v50, %v8446_v25  ;;  %v19576_v33 = vadd.f32 %v9471_v17, %v23171_v43  ;;  %9669 = vmatprep.mubr.bf16.mxu1 %v14917_v57  ;;  %13465 = vmatprep.mubr.msk.bf16.mxu0 %vm6521_vm1, %v14918_v45  ;;  %v23174_v57 = vld [vmem:[#allocation31_spill] sm:$0xff]  ;;  %v14923_v45 = vld [vmem:[%s22492_s1 + $0xc9c] ss:$40 sps:$4 sm:$0xff]  }
 0x5d4   :  { %v9280_v10 = vpop.f32.mrf.mxu0  ;;  %v9473_v0 = vpop.f32.mrf.mxu1  ;;  %v23175_v50 = vld [vmem:[#allocation118_spill] sm:$0xff] }
 0x5d5   :  { %23170 = vst [vmem:[#allocation78_spill] sm:$0xff] %v19573_v13  ;;  %v8454_v17 = vadd.f32 %v19070_v48, %v23175_v50  ;;  %v14921_v48 = vld [vmem:[%s22492_s1 + $0xc98] ss:$40 sps:$4 sm:$0xff]  }
 0x5d6   :  { %v9281_v53 = vpop.f32.mrf.mxu0  ;;  %v9474_v51 = vpop.f32.mrf.mxu1 }
 0x5d7   :  { %v19587_v11 = vadd.f32 %v9281_v53, %v8449_v62  ;;  %v19590_v63 = vadd.f32 %v9474_v51, %v23174_v57  ;;  %v23177_v51 = vld [vmem:[#allocation167_spill] sm:$0xff] }
 0x5d8   :  { %v9283_v39 = vpop.f32.mrf.mxu0  ;;  %v9476_v25 = vpop.f32.mrf.mxu1 }
 0x5d9   :  { %23173 = vst [vmem:[#allocation195_spill] sm:$0xff] %v19587_v11  ;;  %v23178_v11 = vld [vmem:[#allocation120_spill] sm:$0xff] }
 0x5da   :  { %v9286_v43 = vpop.f32.mrf.mxu0  ;;  %v9479_v10 = vpop.f32.mrf.mxu1  ;;  %9670 = vmatmul.mubr.bf16.gmra.mxu1 %v14915_v61  ;;  %10343 = vmatmul.mubr.bf16.gmra.mxu0 %v14920_v55  ;;  %v8457_v39 = vadd.f32 %v19077_v34, %v23178_v11  ;;  %v14926_v61 = vld [vmem:[%s22492_s1 + $0x660] ss:$40 sps:$4 sm:$0xff]   ;;  %v14930_v34 = vld [vmem:[%s22492_s1 + $0x6b4] ss:$40 sps:$4 sm:$0xff]  }
 0x5db   :  { %v19600_v0 = vadd.f32 %v9286_v43, %v8454_v17  ;;  %v19603_v62 = vadd.f32 %v9479_v10, %v23177_v51  ;;  %9677 = vmatprep.mubr.bf16.mxu1 %v14923_v45  ;;  %13466 = vmatprep.mubr.msk.bf16.mxu0 %vm6521_vm1, %v14924_v19  ;;  %v23180_v45 = vld [vmem:[#allocation33_spill] sm:$0xff]  ;;  %v14929_v19 = vld [vmem:[%s22492_s1 + $0xcec] ss:$40 sps:$4 sm:$0xff]   ;;  %v23181_v43 = vld [vmem:[#allocation122_spill] sm:$0xff] }
 0x5dc   :  { %v9288_v53 = vpop.f32.mrf.mxu0  ;;  %v9481_v57 = vpop.f32.mrf.mxu1  ;;  %v8462_v10 = vadd.f32 %v19095_v47, %v23181_v43  ;;  %v14927_v47 = vld [vmem:[%s22492_s1 + $0xce8] ss:$40 sps:$4 sm:$0xff]  }
 0x5dd   :  { %23176 = vst [vmem:[#allocation80_spill] sm:$0xff] %v19600_v0 }
 0x5de   :  { %v9289_v25 = vpop.f32.mrf.mxu0  ;;  %v9482_v13 = vpop.f32.mrf.mxu1 }
 0x5df   :  { %v19614_v55 = vadd.f32 %v9289_v25, %v8457_v39  ;;  %v19617_v50 = vadd.f32 %v9482_v13, %v23180_v45  ;;  %v23183_v13 = vld [vmem:[#allocation169_spill] sm:$0xff] }
 0x5e0   :  { %v9291_v11 = vpop.f32.mrf.mxu0  ;;  %v9484_v17 = vpop.f32.mrf.mxu1 }
 0x5e1   :  { %23179 = vst [vmem:[#allocation196_spill] sm:$0xff] %v19614_v55  ;;  %v23184_v55 = vld [vmem:[#allocation124_spill] sm:$0xff] }
 0x5e2   :  { %v9294_v51 = vpop.f32.mrf.mxu0  ;;  %v9487_v53 = vpop.f32.mrf.mxu1  ;;  %9678 = vmatmul.mubr.bf16.gmra.mxu1 %v14921_v48  ;;  %10351 = vmatmul.mubr.bf16.gmra.mxu0 %v14926_v61  ;;  %v8465_v11 = vadd.f32 %v19102_v52, %v23184_v55  ;;  %v14932_v48 = vld [vmem:[%s22492_s1 + $0x6b0] ss:$40 sps:$4 sm:$0xff]   ;;  %v14936_v52 = vld [vmem:[%s22492_s1 + $0x704] ss:$40 sps:$4 sm:$0xff]  }
 0x5e3   :  { %v19627_v57 = vadd.f32 %v9294_v51, %v8462_v10  ;;  %v19630_v39 = vadd.f32 %v9487_v53, %v23183_v13  ;;  %9685 = vmatprep.mubr.bf16.mxu1 %v14929_v19  ;;  %13467 = vmatprep.mubr.msk.bf16.mxu0 %vm6521_vm1, %v14930_v34  ;;  %v23186_v19 = vld [vmem:[#allocation35_spill] sm:$0xff]  ;;  %v14935_v34 = vld [vmem:[%s22492_s1 + $0xd3c] ss:$40 sps:$4 sm:$0xff]  }
 0x5e4   :  { %v9296_v25 = vpop.f32.mrf.mxu0  ;;  %v9489_v45 = vpop.f32.mrf.mxu1  ;;  %v23187_v51 = vld [vmem:[#allocation126_spill] sm:$0xff] }
 0x5e5   :  { %23182 = vst [vmem:[#allocation82_spill] sm:$0xff] %v19627_v57  ;;  %v8470_v53 = vadd.f32 %v19120_v6, %v23187_v51  ;;  %v14933_v6 = vld [vmem:[%s22492_s1 + $0xd38] ss:$40 sps:$4 sm:$0xff]  }
 0x5e6   :  { %v9297_v17 = vpop.f32.mrf.mxu0  ;;  %v9490_v0 = vpop.f32.mrf.mxu1 }
 0x5e7   :  { %v19641_v61 = vadd.f32 %v9297_v17, %v8465_v11  ;;  %v19644_v43 = vadd.f32 %v9490_v0, %v23186_v19  ;;  %v23189_v0 = vld [vmem:[#allocation171_spill] sm:$0xff] }
 0x5e8   :  { %v9299_v55 = vpop.f32.mrf.mxu0  ;;  %v9492_v10 = vpop.f32.mrf.mxu1 }
 0x5e9   :  { %23185 = vst [vmem:[#allocation197_spill] sm:$0xff] %v19641_v61  ;;  %v23190_v61 = vld [vmem:[#allocation128_spill] sm:$0xff] }
 0x5ea   :  { %v9302_v13 = vpop.f32.mrf.mxu0  ;;  %v9495_v25 = vpop.f32.mrf.mxu1  ;;  %9686 = vmatmul.mubr.bf16.gmra.mxu1 %v14927_v47  ;;  %10359 = vmatmul.mubr.bf16.gmra.mxu0 %v14932_v48  ;;  %v8473_v55 = vadd.f32 %v19127_v2, %v23190_v61  ;;  %v14938_v47 = vld [vmem:[%s22492_s1 + $0x700] ss:$40 sps:$4 sm:$0xff]   ;;  %v14942_v2 = vld [vmem:[%s22492_s1 + $0x754] ss:$40 sps:$4 sm:$0xff]  }
 0x5eb   :  { %v19654_v45 = vadd.f32 %v9302_v13, %v8470_v53  ;;  %v19657_v11 = vadd.f32 %v9495_v25, %v23189_v0  ;;  %9693 = vmatprep.mubr.bf16.mxu1 %v14935_v34  ;;  %13468 = vmatprep.mubr.msk.bf16.mxu0 %vm6521_vm1, %v14936_v52  ;;  %v23192_v34 = vld [vmem:[#allocation37_spill] sm:$0xff]  ;;  %v14941_v52 = vld [vmem:[%s22492_s1 + $0xd8c] ss:$40 sps:$4 sm:$0xff]   ;;  %v23193_v13 = vld [vmem:[#allocation130_spill] sm:$0xff] }
 0x5ec   :  { %v9304_v17 = vpop.f32.mrf.mxu0  ;;  %v9497_v19 = vpop.f32.mrf.mxu1  ;;  %v8478_v25 = vadd.f32 %v19145_v23, %v23193_v13  ;;  %v14939_v23 = vld [vmem:[%s22492_s1 + $0xd88] ss:$40 sps:$4 sm:$0xff]  }
 0x5ed   :  { %23188 = vst [vmem:[#allocation84_spill] sm:$0xff] %v19654_v45 }
 0x5ee   :  { %v9305_v10 = vpop.f32.mrf.mxu0  ;;  %v9498_v57 = vpop.f32.mrf.mxu1 }
 0x5ef   :  { %v19668_v48 = vadd.f32 %v9305_v10, %v8473_v55  ;;  %v19671_v51 = vadd.f32 %v9498_v57, %v23192_v34  ;;  %v23195_v57 = vld [vmem:[#allocation173_spill] sm:$0xff] }
 0x5f0   :  { %v9307_v61 = vpop.f32.mrf.mxu0  ;;  %v9500_v53 = vpop.f32.mrf.mxu1 }
 0x5f1   :  { %23191 = vst [vmem:[#allocation198_spill] sm:$0xff] %v19668_v48  ;;  %v23196_v48 = vld [vmem:[#allocation132_spill] sm:$0xff] }
 0x5f2   :  { %v9310_v0 = vpop.f32.mrf.mxu0  ;;  %v9503_v17 = vpop.f32.mrf.mxu1  ;;  %9694 = vmatmul.mubr.bf16.gmra.mxu1 %v14933_v6  ;;  %10367 = vmatmul.mubr.bf16.gmra.mxu0 %v14938_v47  ;;  %v8481_v61 = vadd.f32 %v19152_v16, %v23196_v48  ;;  %v14944_v6 = vld [vmem:[%s22492_s1 + $0x750] ss:$40 sps:$4 sm:$0xff]   ;;  %v14948_v16 = vld [vmem:[%s22492_s1 + $0x7a4] ss:$40 sps:$4 sm:$0xff]  }
 0x5f3   :  { %v19681_v19 = vadd.f32 %v9310_v0, %v8478_v25  ;;  %v19684_v55 = vadd.f32 %v9503_v17, %v23195_v57  ;;  %9701 = vmatprep.mubr.bf16.mxu1 %v14941_v52  ;;  %13469 = vmatprep.mubr.msk.bf16.mxu0 %vm6521_vm1, %v14942_v2  ;;  %v23198_v52 = vld [vmem:[#allocation39_spill] sm:$0xff]  ;;  %v14947_v2 = vld [vmem:[%s22492_s1 + $0xddc] ss:$40 sps:$4 sm:$0xff]  }
 0x5f4   :  { %v9312_v10 = vpop.f32.mrf.mxu0  ;;  %v9505_v34 = vpop.f32.mrf.mxu1  ;;  %v23199_v0 = vld [vmem:[#allocation134_spill] sm:$0xff] }
 0x5f5   :  { %23194 = vst [vmem:[#allocation86_spill] sm:$0xff] %v19681_v19  ;;  %v8486_v17 = vadd.f32 %v19170_v28, %v23199_v0  ;;  %v14945_v28 = vld [vmem:[%s22492_s1 + $0xdd8] ss:$40 sps:$4 sm:$0xff]  }
 0x5f6   :  { %v9313_v53 = vpop.f32.mrf.mxu0  ;;  %v9506_v45 = vpop.f32.mrf.mxu1 }
 0x5f7   :  { %v19695_v47 = vadd.f32 %v9313_v53, %v8481_v61  ;;  %v19698_v13 = vadd.f32 %v9506_v45, %v23198_v52  ;;  %v23201_v45 = vld [vmem:[#allocation175_spill] sm:$0xff] }
 0x5f8   :  { %v9315_v48 = vpop.f32.mrf.mxu0  ;;  %v9508_v25 = vpop.f32.mrf.mxu1 }
 0x5f9   :  { %23197 = vst [vmem:[#allocation199_spill] sm:$0xff] %v19695_v47  ;;  %v23202_v47 = vld [vmem:[#allocation136_spill] sm:$0xff] }
 0x5fa   :  { %v9318_v57 = vpop.f32.mrf.mxu0  ;;  %v9511_v10 = vpop.f32.mrf.mxu1  ;;  %9702 = vmatmul.mubr.bf16.gmra.mxu1 %v14939_v23  ;;  %10375 = vmatmul.mubr.bf16.gmra.mxu0 %v14944_v6  ;;  %v8489_v48 = vadd.f32 %v19177_v8, %v23202_v47  ;;  %v14950_v23 = vld [vmem:[%s22492_s1 + $0x7a0] ss:$40 sps:$4 sm:$0xff]   ;;  %v14954_v8 = vld [vmem:[%s22492_s1 + $0x7f4] ss:$40 sps:$4 sm:$0xff]  }
 0x5fb   :  { %v19708_v34 = vadd.f32 %v9318_v57, %v8486_v17  ;;  %v19711_v61 = vadd.f32 %v9511_v10, %v23201_v45  ;;  %9709 = vmatprep.mubr.bf16.mxu1 %v14947_v2  ;;  %13470 = vmatprep.mubr.msk.bf16.mxu0 %vm6521_vm1, %v14948_v16  ;;  %v23204_v2 = vld [vmem:[#allocation41_spill] sm:$0xff]  ;;  %v14953_v16 = vld [vmem:[%s22492_s1 + $0xe2c] ss:$40 sps:$4 sm:$0xff]  }
 0x5fc   :  { %v9320_v53 = vpop.f32.mrf.mxu0  ;;  %v9513_v52 = vpop.f32.mrf.mxu1  ;;  %v23205_v45 = vld [vmem:[#allocation177_spill] sm:$0xff] }
 0x5fd   :  { %23200 = vst [vmem:[#allocation88_spill] sm:$0xff] %v19708_v34 }
 0x5fe   :  { %v9321_v25 = vpop.f32.mrf.mxu0  ;;  %v9514_v19 = vpop.f32.mrf.mxu1 }
 0x5ff   :  { %v19722_v6 = vadd.f32 %v9321_v25, %v8489_v48  ;;  %v19725_v0 = vadd.f32 %v9514_v19, %v23204_v2 }
 0x600   :  { %v9323_v47 = vpop.f32.mrf.mxu0  ;;  %v9516_v17 = vpop.f32.mrf.mxu1 }
 0x601   :  { %23203 = vst [vmem:[#allocation200_spill] sm:$0xff] %v19722_v6  ;;  %v14951_v47 = vld [vmem:[%s22492_s1 + $0xe28] ss:$40 sps:$4 sm:$0xff]  }
 0x602   :  { %v9519_v57 = vpop.f32.mrf.mxu1  ;;  %9710 = vmatmul.mubr.bf16.gmra.mxu1 %v14945_v28  ;;  %v10192_v10 = vpop.f32.mrf.mxu0  ;;  %10383 = vmatmul.mubr.bf16.gmra.mxu0 %v14950_v23  ;;  %v14956_v28 = vld [vmem:[%s22492_s1 + $0x7f0] ss:$40 sps:$4 sm:$0xff]   ;;  %v23207_v23 = vld [vmem:[#allocation43_spill] sm:$0xff] }
 0x603   :  { %v19734_v53 = vadd.f32 %v9519_v57, %v23205_v45  ;;  %v19737_v19 = vadd.f32 %v10192_v10, %v19198_v41  ;;  %9717 = vmatprep.mubr.bf16.mxu1 %v14953_v16  ;;  %13471 = vmatprep.mubr.msk.bf16.mxu0 %vm6521_vm1, %v14954_v8  ;;  %v14959_v16 = vld [vmem:[%s22492_s1 + $0xe7c] ss:$40 sps:$4 sm:$0xff]  }
 0x604   :  { %v9521_v52 = vpop.f32.mrf.mxu1  ;;  %v10194_v48 = vpop.f32.mrf.mxu0  ;;  %v14960_v8 = vld [vmem:[%s22492_s1 + $0x844] ss:$40 sps:$4 sm:$0xff]  }
 0x605   :  { %23206 = vst [vmem:[#allocation90_spill] sm:$0xff] %v19737_v19  ;;  %v23208_v48 = vld [vmem:[#allocation179_spill] sm:$0xff] }
 0x606   :  { %v9522_v25 = vpop.f32.mrf.mxu1  ;;  %v10195_v2 = vpop.f32.mrf.mxu0 }
 0x607   :  { %v19747_v17 = vadd.f32 %v9522_v25, %v23207_v23  ;;  %v19750_v41 = vadd.f32 %v10195_v2, %v19212_v29 }
 0x608   :  { %v9524_v57 = vpop.f32.mrf.mxu1  ;;  %v10197_v10 = vpop.f32.mrf.mxu0 }
 0x609   :  { %v14957_v57 = vld [vmem:[%s22492_s1 + $0xe78] ss:$40 sps:$4 sm:$0xff]  }
 0x60a   :  { %v9527_v45 = vpop.f32.mrf.mxu1  ;;  %9718 = vmatmul.mubr.bf16.gmra.mxu1 %v14951_v47  ;;  %v10200_v52 = vpop.f32.mrf.mxu0  ;;  %10391 = vmatmul.mubr.bf16.gmra.mxu0 %v14956_v28  ;;  %v14962_v47 = vld [vmem:[%s22492_s1 + $0x840] ss:$40 sps:$4 sm:$0xff]   ;;  %v23210_v28 = vld [vmem:[#allocation45_spill] sm:$0xff] }
 0x60b   :  { %v19759_v25 = vadd.f32 %v9527_v45, %v23208_v48  ;;  %v19762_v29 = vadd.f32 %v10200_v52, %v19225_v38  ;;  %9725 = vmatprep.mubr.bf16.mxu1 %v14959_v16  ;;  %13472 = vmatprep.mubr.msk.bf16.mxu0 %vm6521_vm1, %v14960_v8  ;;  %v14965_v16 = vld [vmem:[%s22492_s1 + $0xecc] ss:$40 sps:$4 sm:$0xff]  }
 0x60c   :  { %v9529_v2 = vpop.f32.mrf.mxu1  ;;  %v10202_v23 = vpop.f32.mrf.mxu0  ;;  %v14966_v8 = vld [vmem:[%s22492_s1 + $0x894] ss:$40 sps:$4 sm:$0xff]  }
 0x60d   :  { %23209 = vst [vmem:[#allocation201_spill] sm:$0xff] %v19762_v29  ;;  %v23211_v23 = vld [vmem:[#allocation181_spill] sm:$0xff] }
 0x60e   :  { %v9530_v6 = vpop.f32.mrf.mxu1  ;;  %v10203_v34 = vpop.f32.mrf.mxu0 }
 0x60f   :  { %v19772_v10 = vadd.f32 %v9530_v6, %v23210_v28  ;;  %v19775_v38 = vadd.f32 %v10203_v34, %v19239_v30 }
 0x610   :  { %v9532_v45 = vpop.f32.mrf.mxu1  ;;  %v10205_v52 = vpop.f32.mrf.mxu0 }
 0x611   :  { %v14963_v45 = vld [vmem:[%s22492_s1 + $0xec8] ss:$40 sps:$4 sm:$0xff]  }
 0x612   :  { %v9535_v48 = vpop.f32.mrf.mxu1  ;;  %9726 = vmatmul.mubr.bf16.gmra.mxu1 %v14957_v57  ;;  %v10208_v2 = vpop.f32.mrf.mxu0  ;;  %10399 = vmatmul.mubr.bf16.gmra.mxu0 %v14962_v47  ;;  %v14968_v57 = vld [vmem:[%s22492_s1 + $0x890] ss:$40 sps:$4 sm:$0xff]   ;;  %v23213_v47 = vld [vmem:[#allocation47_spill] sm:$0xff] }
 0x613   :  { %v19784_v6 = vadd.f32 %v9535_v48, %v23211_v23  ;;  %v19787_v30 = vadd.f32 %v10208_v2, %v19252_v9  ;;  %9733 = vmatprep.mubr.bf16.mxu1 %v14965_v16  ;;  %13473 = vmatprep.mubr.msk.bf16.mxu0 %vm6521_vm1, %v14966_v8  ;;  %v14971_v16 = vld [vmem:[%s22492_s1 + $0xf1c] ss:$40 sps:$4 sm:$0xff]  }
 0x614   :  { %v9537_v34 = vpop.f32.mrf.mxu1  ;;  %v10210_v28 = vpop.f32.mrf.mxu0  ;;  %v14972_v8 = vld [vmem:[%s22492_s1 + $0x8e4] ss:$40 sps:$4 sm:$0xff]  }
 0x615   :  { %23212 = vst [vmem:[#allocation92_spill] sm:$0xff] %v19787_v30  ;;  %v23214_v28 = vld [vmem:[#allocation183_spill] sm:$0xff] }
 0x616   :  { %v9538_v1 = vpop.f32.mrf.mxu1  ;;  %v10211_v37 = vpop.f32.mrf.mxu0 }
 0x617   :  { %v19797_v52 = vadd.f32 %v9538_v1, %v23213_v47  ;;  %v19800_v9 = vadd.f32 %v10211_v37, %v19266_v27 }
 0x618   :  { %v9540_v48 = vpop.f32.mrf.mxu1  ;;  %v10213_v2 = vpop.f32.mrf.mxu0 }
 0x619   :  { %v14969_v48 = vld [vmem:[%s22492_s1 + $0xf18] ss:$40 sps:$4 sm:$0xff]  }
 0x61a   :  { %v9543_v23 = vpop.f32.mrf.mxu1  ;;  %9734 = vmatmul.mubr.bf16.gmra.mxu1 %v14963_v45  ;;  %v10216_v34 = vpop.f32.mrf.mxu0  ;;  %10407 = vmatmul.mubr.bf16.gmra.mxu0 %v14968_v57  ;;  %v14974_v45 = vld [vmem:[%s22492_s1 + $0x8e0] ss:$40 sps:$4 sm:$0xff]   ;;  %v23216_v57 = vld [vmem:[#allocation49_spill] sm:$0xff] }
 0x61b   :  { %v19809_v1 = vadd.f32 %v9543_v23, %v23214_v28  ;;  %v19812_v37 = vadd.f32 %v10216_v34, %v19279_v21  ;;  %9741 = vmatprep.mubr.bf16.mxu1 %v14971_v16  ;;  %13474 = vmatprep.mubr.msk.bf16.mxu0 %vm6521_vm1, %v14972_v8  ;;  %v14977_v16 = vld [vmem:[%s22492_s1 + $0xf6c] ss:$40 sps:$4 sm:$0xff]  }
 0x61c   :  { %v9545_v27 = vpop.f32.mrf.mxu1  ;;  %v10218_v47 = vpop.f32.mrf.mxu0  ;;  %v14978_v8 = vld [vmem:[%s22492_s1 + $0x934] ss:$40 sps:$4 sm:$0xff]  }
 0x61d   :  { %23215 = vst [vmem:[#allocation202_spill] sm:$0xff] %v19812_v37  ;;  %v23218_v47 = vld [vmem:[#allocation185_spill] sm:$0xff] }
 0x61e   :  { %v9546_v44 = vpop.f32.mrf.mxu1  ;;  %v10219_v15 = vpop.f32.mrf.mxu0 }
 0x61f   :  { %v19822_v2 = vadd.f32 %v9546_v44, %v23216_v57  ;;  %v19825_v21 = vadd.f32 %v10219_v15, %v19293_v26 }
 0x620   :  { %v9548_v23 = vpop.f32.mrf.mxu1  ;;  %v10221_v34 = vpop.f32.mrf.mxu0 }
 0x621   :  { %23217 = vst [vmem:[#allocation94_spill] sm:$0xff] %v19825_v21  ;;  %v14975_v23 = vld [vmem:[%s22492_s1 + $0xf68] ss:$40 sps:$4 sm:$0xff]  }
 0x622   :  { %v9551_v28 = vpop.f32.mrf.mxu1  ;;  %9742 = vmatmul.mubr.bf16.gmra.mxu1 %v14969_v48  ;;  %v10224_v27 = vpop.f32.mrf.mxu0  ;;  %10415 = vmatmul.mubr.bf16.gmra.mxu0 %v14974_v45  ;;  %v14980_v48 = vld [vmem:[%s22492_s1 + $0x930] ss:$40 sps:$4 sm:$0xff]   ;;  %v23220_v45 = vld [vmem:[#allocation51_spill] sm:$0xff] }
 0x623   :  { %v19834_v44 = vadd.f32 %v9551_v28, %v23218_v47  ;;  %v19837_v15 = vadd.f32 %v10224_v27, %v19306_v12  ;;  %9749 = vmatprep.mubr.bf16.mxu1 %v14977_v16  ;;  %13475 = vmatprep.mubr.msk.bf16.mxu0 %vm6521_vm1, %v14978_v8  ;;  %v14983_v16 = vld [vmem:[%s22492_s1 + $0xfbc] ss:$40 sps:$4 sm:$0xff]  }
 0x624   :  { %v9553_v26 = vpop.f32.mrf.mxu1  ;;  %v10226_v57 = vpop.f32.mrf.mxu0  ;;  %v14984_v8 = vld [vmem:[%s22492_s1 + $0x984] ss:$40 sps:$4 sm:$0xff]  }
 0x625   :  { %23219 = vst [vmem:[#allocation203_spill] sm:$0xff] %v19837_v15  ;;  %v23222_v57 = vld [vmem:[#allocation187_spill] sm:$0xff] }
 0x626   :  { %v9554_v22 = vpop.f32.mrf.mxu1  ;;  %v10227_v49 = vpop.f32.mrf.mxu0 }
 0x627   :  { %v19847_v34 = vadd.f32 %v9554_v22, %v23220_v45  ;;  %v19850_v12 = vadd.f32 %v10227_v49, %v19320_v60 }
 0x628   :  { %v9556_v28 = vpop.f32.mrf.mxu1  ;;  %v10229_v27 = vpop.f32.mrf.mxu0 }
 0x629   :  { %23221 = vst [vmem:[#allocation96_spill] sm:$0xff] %v19850_v12  ;;  %v14981_v28 = vld [vmem:[%s22492_s1 + $0xfb8] ss:$40 sps:$4 sm:$0xff]  }
 0x62a   :  { %v9559_v47 = vpop.f32.mrf.mxu1  ;;  %9750 = vmatmul.mubr.bf16.gmra.mxu1 %v14975_v23  ;;  %v10232_v26 = vpop.f32.mrf.mxu0  ;;  %10423 = vmatmul.mubr.bf16.gmra.mxu0 %v14980_v48  ;;  %v14986_v23 = vld [vmem:[%s22492_s1 + $0x980] ss:$40 sps:$4 sm:$0xff]   ;;  %v23224_v48 = vld [vmem:[#allocation53_spill] sm:$0xff] }
 0x62b   :  { %v19859_v22 = vadd.f32 %v9559_v47, %v23222_v57  ;;  %v19862_v49 = vadd.f32 %v10232_v26, %v19333_v5  ;;  %9757 = vmatprep.mubr.bf16.mxu1 %v14983_v16  ;;  %13476 = vmatprep.mubr.msk.bf16.mxu0 %vm6521_vm1, %v14984_v8  ;;  %v14989_v16 = vld [vmem:[%s22492_s1 + $0x100c] ss:$40 sps:$4 sm:$0xff]  }
 0x62c   :  { %v9561_v60 = vpop.f32.mrf.mxu1  ;;  %v10234_v45 = vpop.f32.mrf.mxu0  ;;  %v14990_v8 = vld [vmem:[%s22492_s1 + $0x9d4] ss:$40 sps:$4 sm:$0xff]  }
 0x62d   :  { %23223 = vst [vmem:[#allocation204_spill] sm:$0xff] %v19862_v49  ;;  %v23226_v45 = vld [vmem:[#allocation189_spill] sm:$0xff] }
 0x62e   :  { %v9562_v58 = vpop.f32.mrf.mxu1  ;;  %v10235_v12 = vpop.f32.mrf.mxu0 }
 0x62f   :  { %v19872_v27 = vadd.f32 %v9562_v58, %v23224_v48  ;;  %v19875_v5 = vadd.f32 %v10235_v12, %v19347_v42 }
 0x630   :  { %v9564_v47 = vpop.f32.mrf.mxu1  ;;  %v10237_v26 = vpop.f32.mrf.mxu0 }
 0x631   :  { %23225 = vst [vmem:[#allocation98_spill] sm:$0xff] %v19875_v5  ;;  %v14987_v47 = vld [vmem:[%s22492_s1 + $0x1008] ss:$40 sps:$4 sm:$0xff]  }
 0x632   :  { %v9567_v57 = vpop.f32.mrf.mxu1  ;;  %9758 = vmatmul.mubr.bf16.gmra.mxu1 %v14981_v28  ;;  %v10240_v60 = vpop.f32.mrf.mxu0  ;;  %10431 = vmatmul.mubr.bf16.gmra.mxu0 %v14986_v23  ;;  %v14992_v28 = vld [vmem:[%s22492_s1 + $0x9d0] ss:$40 sps:$4 sm:$0xff]   ;;  %v23228_v23 = vld [vmem:[#allocation55_spill] sm:$0xff] }
 0x633   :  { %v19884_v58 = vadd.f32 %v9567_v57, %v23226_v45  ;;  %v19887_v42 = vadd.f32 %v10240_v60, %v19360_v40  ;;  %9765 = vmatprep.mubr.bf16.mxu1 %v14989_v16  ;;  %13477 = vmatprep.mubr.msk.bf16.mxu0 %vm6521_vm1, %v14990_v8  ;;  %v14995_v16 = vld [vmem:[%s22492_s1 + $0x105c] ss:$40 sps:$4 sm:$0xff]  }
 0x634   :  { %v9569_v12 = vpop.f32.mrf.mxu1  ;;  %v10242_v48 = vpop.f32.mrf.mxu0  ;;  %v14996_v8 = vld [vmem:[%s22492_s1 + $0xa24] ss:$40 sps:$4 sm:$0xff]  }
 0x635   :  { %23227 = vst [vmem:[#allocation205_spill] sm:$0xff] %v19887_v42  ;;  %v23230_v48 = vld [vmem:[#allocation191_spill] sm:$0xff] }
 0x636   :  { %v9570_v5 = vpop.f32.mrf.mxu1  ;;  %v10243_v49 = vpop.f32.mrf.mxu0 }
 0x637   :  { %v19897_v26 = vadd.f32 %v9570_v5, %v23228_v23  ;;  %v19900_v40 = vadd.f32 %v10243_v49, %v19374_v36 }
 0x638   :  { %v9572_v57 = vpop.f32.mrf.mxu1  ;;  %v10245_v60 = vpop.f32.mrf.mxu0 }
 0x639   :  { %23229 = vst [vmem:[#allocation100_spill] sm:$0xff] %v19900_v40  ;;  %v14993_v57 = vld [vmem:[%s22492_s1 + $0x1058] ss:$40 sps:$4 sm:$0xff]  }
 0x63a   :  { %v9575_v45 = vpop.f32.mrf.mxu1  ;;  %9766 = vmatmul.mubr.bf16.gmra.mxu1 %v14987_v47  ;;  %v10248_v12 = vpop.f32.mrf.mxu0  ;;  %10439 = vmatmul.mubr.bf16.gmra.mxu0 %v14992_v28  ;;  %v14998_v47 = vld [vmem:[%s22492_s1 + $0xa20] ss:$40 sps:$4 sm:$0xff]   ;;  %v23232_v28 = vld [vmem:[#allocation57_spill] sm:$0xff] }
 0x63b   :  { %v19909_v5 = vadd.f32 %v9575_v45, %v23230_v48  ;;  %v19912_v36 = vadd.f32 %v10248_v12, %v19387_v31  ;;  %9773 = vmatprep.mubr.bf16.mxu1 %v14995_v16  ;;  %13478 = vmatprep.mubr.msk.bf16.mxu0 %vm6521_vm1, %v14996_v8  ;;  %v15001_v16 = vld [vmem:[%s22492_s1 + $0x10ac] ss:$40 sps:$4 sm:$0xff]  }
 0x63c   :  { %v9577_v49 = vpop.f32.mrf.mxu1  ;;  %v10250_v23 = vpop.f32.mrf.mxu0  ;;  %v15002_v8 = vld [vmem:[%s22492_s1 + $0xa74] ss:$40 sps:$4 sm:$0xff]  }
 0x63d   :  { %23231 = vst [vmem:[#allocation206_spill] sm:$0xff] %v19912_v36  ;;  %v23234_v23 = vld [vmem:[#allocation59_spill] sm:$0xff] }
 0x63e   :  { %v9578_v40 = vpop.f32.mrf.mxu1  ;;  %v10251_v42 = vpop.f32.mrf.mxu0 }
 0x63f   :  { %v19922_v60 = vadd.f32 %v9578_v40, %v23232_v28  ;;  %v19925_v31 = vadd.f32 %v10251_v42, %v19401_v4 }
 0x640   :  { %v9580_v45 = vpop.f32.mrf.mxu1  ;;  %v10253_v12 = vpop.f32.mrf.mxu0 }
 0x641   :  { %23233 = vst [vmem:[#allocation102_spill] sm:$0xff] %v19925_v31  ;;  %v14999_v45 = vld [vmem:[%s22492_s1 + $0x10a8] ss:$40 sps:$4 sm:$0xff]  }
 0x642   :  { %v9583_v48 = vpop.f32.mrf.mxu1  ;;  %9774 = vmatmul.mubr.bf16.gmra.mxu1 %v14993_v57  ;;  %v10256_v49 = vpop.f32.mrf.mxu0  ;;  %10447 = vmatmul.mubr.bf16.gmra.mxu0 %v14998_v47  ;;  %v15004_v57 = vld [vmem:[%s22492_s1 + $0xa70] ss:$40 sps:$4 sm:$0xff]  }
 0x643   :  { %v19934_v40 = vadd.f32 %v9583_v48, %v23234_v23  ;;  %v19937_v4 = vadd.f32 %v10256_v49, %v19414_v35  ;;  %9781 = vmatprep.mubr.bf16.mxu1 %v15001_v16  ;;  %13479 = vmatprep.mubr.msk.bf16.mxu0 %vm6521_vm1, %v15002_v8  ;;  %v23236_v47 = vld [vmem:[#allocation61_spill] sm:$0xff]  ;;  %v15008_v8 = vld [vmem:[%s22492_s1 + $0xac4] ss:$40 sps:$4 sm:$0xff]  }
 0x644   :  { %v9585_v42 = vpop.f32.mrf.mxu1  ;;  %v10258_v28 = vpop.f32.mrf.mxu0  ;;  %v15007_v16 = vld [vmem:[%s22492_s1 + $0x10fc] ss:$40 sps:$4 sm:$0xff]  }
 0x645   :  { %23235 = vst [vmem:[#allocation207_spill] sm:$0xff] %v19937_v4  ;;  %v23238_v28 = vld [vmem:[#allocation63_spill] sm:$0xff] }
 0x646   :  { %v9586_v31 = vpop.f32.mrf.mxu1  ;;  %v10259_v36 = vpop.f32.mrf.mxu0 }
 0x647   :  { %v19947_v12 = vadd.f32 %v9586_v31, %v23236_v47  ;;  %v19950_v35 = vadd.f32 %v10259_v36, %v19428_v7 }
 0x648   :  { %v9588_v48 = vpop.f32.mrf.mxu1  ;;  %v10261_v49 = vpop.f32.mrf.mxu0 }
 0x649   :  { %23237 = vst [vmem:[#allocation104_spill] sm:$0xff] %v19950_v35  ;;  %v15005_v48 = vld [vmem:[%s22492_s1 + $0x10f8] ss:$40 sps:$4 sm:$0xff]  }
 0x64a   :  { %v9591_v23 = vpop.f32.mrf.mxu1  ;;  %9782 = vmatmul.mubr.bf16.gmra.mxu1 %v14999_v45  ;;  %v10264_v42 = vpop.f32.mrf.mxu0  ;;  %10455 = vmatmul.mubr.bf16.gmra.mxu0 %v15004_v57  ;;  %v15010_v45 = vld [vmem:[%s22492_s1 + $0xac0] ss:$40 sps:$4 sm:$0xff]   ;;  %v23240_v57 = vld [vmem:[#allocation65_spill] sm:$0xff] }
 0x64b   :  { %v19959_v31 = vadd.f32 %v9591_v23, %v23238_v28  ;;  %v19962_v7 = vadd.f32 %v10264_v42, %v19441_v59  ;;  %9789 = vmatprep.mubr.bf16.mxu1 %v15007_v16  ;;  %13480 = vmatprep.mubr.msk.bf16.mxu0 %vm6521_vm1, %v15008_v8  ;;  %v15013_v16 = vld [vmem:[%s22492_s1 + $0x114c] ss:$40 sps:$4 sm:$0xff]  }
 0x64c   :  { %v9593_v36 = vpop.f32.mrf.mxu1  ;;  %v10266_v47 = vpop.f32.mrf.mxu0  ;;  %v15014_v8 = vld [vmem:[%s22492_s1 + $0xb14] ss:$40 sps:$4 sm:$0xff]  }
 0x64d   :  { %23239 = vst [vmem:[#allocation208_spill] sm:$0xff] %v19962_v7  ;;  %v23242_v47 = vld [vmem:[#allocation67_spill] sm:$0xff] }
 0x64e   :  { %v9594_v35 = vpop.f32.mrf.mxu1  ;;  %v10267_v4 = vpop.f32.mrf.mxu0 }
 0x64f   :  { %v19972_v49 = vadd.f32 %v9594_v35, %v23240_v57  ;;  %v19975_v59 = vadd.f32 %v10267_v4, %v19455_v24 }
 0x650   :  { %v9596_v23 = vpop.f32.mrf.mxu1  ;;  %v10269_v42 = vpop.f32.mrf.mxu0 }
 0x651   :  { %23241 = vst [vmem:[#allocation106_spill] sm:$0xff] %v19975_v59  ;;  %v15011_v23 = vld [vmem:[%s22492_s1 + $0x1148] ss:$40 sps:$4 sm:$0xff]  }
 0x652   :  { %v9599_v28 = vpop.f32.mrf.mxu1  ;;  %9790 = vmatmul.mubr.bf16.gmra.mxu1 %v15005_v48  ;;  %v10272_v36 = vpop.f32.mrf.mxu0  ;;  %10463 = vmatmul.mubr.bf16.gmra.mxu0 %v15010_v45  ;;  %v15016_v48 = vld [vmem:[%s22492_s1 + $0xb10] ss:$40 sps:$4 sm:$0xff]  }
 0x653   :  { %v19984_v35 = vadd.f32 %v9599_v28, %v23242_v47  ;;  %v19987_v24 = vadd.f32 %v10272_v36, %v19468_v54  ;;  %9797 = vmatprep.mubr.bf16.mxu1 %v15013_v16  ;;  %13481 = vmatprep.mubr.msk.bf16.mxu0 %vm6521_vm1, %v15014_v8  ;;  %v23244_v45 = vld [vmem:[#allocation69_spill] sm:$0xff]  ;;  %v15020_v8 = vld [vmem:[%s22492_s1 + $0xb64] ss:$40 sps:$4 sm:$0xff]  }
 0x654   :  { %v9601_v4 = vpop.f32.mrf.mxu1  ;;  %v10274_v57 = vpop.f32.mrf.mxu0  ;;  %v15019_v16 = vld [vmem:[%s22492_s1 + $0x119c] ss:$40 sps:$4 sm:$0xff]  }
 0x655   :  { %23243 = vst [vmem:[#allocation209_spill] sm:$0xff] %v19987_v24  ;;  %v23246_v57 = vld [vmem:[#allocation71_spill] sm:$0xff] }
 0x656   :  { %v9602_v59 = vpop.f32.mrf.mxu1  ;;  %v10275_v7 = vpop.f32.mrf.mxu0 }
 0x657   :  { %v19997_v42 = vadd.f32 %v9602_v59, %v23244_v45  ;;  %v20000_v54 = vadd.f32 %v10275_v7, %v19482_v18 }
 0x658   :  { %v9604_v28 = vpop.f32.mrf.mxu1  ;;  %v10277_v36 = vpop.f32.mrf.mxu0 }
 0x659   :  { %23245 = vst [vmem:[#allocation108_spill] sm:$0xff] %v20000_v54  ;;  %v15017_v28 = vld [vmem:[%s22492_s1 + $0x1198] ss:$40 sps:$4 sm:$0xff]  }
 0x65a   :  { %v9607_v47 = vpop.f32.mrf.mxu1  ;;  %9798 = vmatmul.mubr.bf16.gmra.mxu1 %v15011_v23  ;;  %v10280_v4 = vpop.f32.mrf.mxu0  ;;  %10471 = vmatmul.mubr.bf16.gmra.mxu0 %v15016_v48  ;;  %v15022_v23 = vld [vmem:[%s22492_s1 + $0xb60] ss:$40 sps:$4 sm:$0xff]   ;;  %v23248_v48 = vld [vmem:[#allocation73_spill] sm:$0xff] }
 0x65b   :  { %v20009_v59 = vadd.f32 %v9607_v47, %v23246_v57  ;;  %v20012_v18 = vadd.f32 %v10280_v4, %v19495_v46  ;;  %9805 = vmatprep.mubr.bf16.mxu1 %v15019_v16  ;;  %13482 = vmatprep.mubr.msk.bf16.mxu0 %vm6521_vm1, %v15020_v8  ;;  %v15025_v16 = vld [vmem:[%s22492_s1 + $0x11ec] ss:$40 sps:$4 sm:$0xff]  }
 0x65c   :  { %v9609_v7 = vpop.f32.mrf.mxu1  ;;  %v10282_v45 = vpop.f32.mrf.mxu0  ;;  %v15026_v8 = vld [vmem:[%s22492_s1 + $0xbb4] ss:$40 sps:$4 sm:$0xff]  }
 0x65d   :  { %23247 = vst [vmem:[#allocation27_spill] sm:$0xff] %v20012_v18  ;;  %v23250_v45 = vld [vmem:[#allocation75_spill] sm:$0xff] }
 0x65e   :  { %v9610_v54 = vpop.f32.mrf.mxu1  ;;  %v10283_v24 = vpop.f32.mrf.mxu0 }
 0x65f   :  { %v20022_v36 = vadd.f32 %v9610_v54, %v23248_v48  ;;  %v20025_v46 = vadd.f32 %v10283_v24, %v19509_v20 }
 0x660   :  { %v9612_v47 = vpop.f32.mrf.mxu1  ;;  %v10285_v4 = vpop.f32.mrf.mxu0 }
 0x661   :  { %23249 = vst [vmem:[#allocation110_spill] sm:$0xff] %v20025_v46  ;;  %v15023_v47 = vld [vmem:[%s22492_s1 + $0x11e8] ss:$40 sps:$4 sm:$0xff]  }
 0x662   :  { %v9615_v57 = vpop.f32.mrf.mxu1  ;;  %9806 = vmatmul.mubr.bf16.gmra.mxu1 %v15017_v28  ;;  %v10288_v7 = vpop.f32.mrf.mxu0  ;;  %10479 = vmatmul.mubr.bf16.gmra.mxu0 %v15022_v23  ;;  %v15028_v28 = vld [vmem:[%s22492_s1 + $0xbb0] ss:$40 sps:$4 sm:$0xff]  }
 0x663   :  { %v20034_v54 = vadd.f32 %v9615_v57, %v23250_v45  ;;  %v20037_v20 = vadd.f32 %v10288_v7, %v19522_v32  ;;  %9813 = vmatprep.mubr.bf16.mxu1 %v15025_v16  ;;  %13483 = vmatprep.mubr.msk.bf16.mxu0 %vm6521_vm1, %v15026_v8  ;;  %v23252_v23 = vld [vmem:[#allocation77_spill] sm:$0xff]  ;;  %v15032_v8 = vld [vmem:[%s22492_s1 + $0xc04] ss:$40 sps:$4 sm:$0xff]  }
 0x664   :  { %v9617_v24 = vpop.f32.mrf.mxu1  ;;  %v10290_v48 = vpop.f32.mrf.mxu0  ;;  %v15031_v16 = vld [vmem:[%s22492_s1 + $0x123c] ss:$40 sps:$4 sm:$0xff]  }
 0x665   :  { %23251 = vst [vmem:[#allocation163_spill] sm:$0xff] %v20037_v20  ;;  %v23254_v48 = vld [vmem:[#allocation79_spill] sm:$0xff] }
 0x666   :  { %v9618_v46 = vpop.f32.mrf.mxu1  ;;  %v10291_v18 = vpop.f32.mrf.mxu0 }
 0x667   :  { %v20047_v4 = vadd.f32 %v9618_v46, %v23252_v23  ;;  %v20050_v32 = vadd.f32 %v10291_v18, %v19536_v3 }
 0x668   :  { %v9620_v57 = vpop.f32.mrf.mxu1  ;;  %v10293_v7 = vpop.f32.mrf.mxu0 }
 0x669   :  { %23253 = vst [vmem:[#allocation112_spill] sm:$0xff] %v20050_v32  ;;  %v15029_v57 = vld [vmem:[%s22492_s1 + $0x1238] ss:$40 sps:$4 sm:$0xff]  }
 0x66a   :  { %v9623_v45 = vpop.f32.mrf.mxu1  ;;  %9814 = vmatmul.mubr.bf16.gmra.mxu1 %v15023_v47  ;;  %v10296_v24 = vpop.f32.mrf.mxu0  ;;  %10487 = vmatmul.mubr.bf16.gmra.mxu0 %v15028_v28  ;;  %v15034_v47 = vld [vmem:[%s22492_s1 + $0xc00] ss:$40 sps:$4 sm:$0xff]   ;;  %v23256_v28 = vld [vmem:[#allocation81_spill] sm:$0xff] }
 0x66b   :  { %v20059_v46 = vadd.f32 %v9623_v45, %v23254_v48  ;;  %v20062_v3 = vadd.f32 %v10296_v24, %v19549_v56  ;;  %9821 = vmatprep.mubr.bf16.mxu1 %v15031_v16  ;;  %13484 = vmatprep.mubr.msk.bf16.mxu0 %vm6521_vm1, %v15032_v8  ;;  %v15037_v16 = vld [vmem:[%s22492_s1 + $0x128c] ss:$40 sps:$4 sm:$0xff]  }
 0x66c   :  { %v9625_v18 = vpop.f32.mrf.mxu1  ;;  %v10298_v23 = vpop.f32.mrf.mxu0  ;;  %v15038_v8 = vld [vmem:[%s22492_s1 + $0xc54] ss:$40 sps:$4 sm:$0xff]  }
 0x66d   :  { %23255 = vst [vmem:[#allocation29_spill] sm:$0xff] %v20062_v3  ;;  %v23258_v23 = vld [vmem:[#allocation83_spill] sm:$0xff] }
 0x66e   :  { %v9626_v32 = vpop.f32.mrf.mxu1  ;;  %v10299_v20 = vpop.f32.mrf.mxu0 }
 0x66f   :  { %v20072_v7 = vadd.f32 %v9626_v32, %v23256_v28  ;;  %v20075_v56 = vadd.f32 %v10299_v20, %v19563_v14 }
 0x670   :  { %v9628_v45 = vpop.f32.mrf.mxu1  ;;  %v10301_v24 = vpop.f32.mrf.mxu0 }
 0x671   :  { %23257 = vst [vmem:[#allocation114_spill] sm:$0xff] %v20075_v56  ;;  %v15035_v45 = vld [vmem:[%s22492_s1 + $0x1288] ss:$40 sps:$4 sm:$0xff]  }
 0x672   :  { %v9631_v48 = vpop.f32.mrf.mxu1  ;;  %9822 = vmatmul.mubr.bf16.gmra.mxu1 %v15029_v57  ;;  %v10304_v18 = vpop.f32.mrf.mxu0  ;;  %10495 = vmatmul.mubr.bf16.gmra.mxu0 %v15034_v47  ;;  %v15040_v57 = vld [vmem:[%s22492_s1 + $0xc50] ss:$40 sps:$4 sm:$0xff]  }
 0x673   :  { %v20084_v32 = vadd.f32 %v9631_v48, %v23258_v23  ;;  %v20087_v14 = vadd.f32 %v10304_v18, %v19576_v33  ;;  %9829 = vmatprep.mubr.bf16.mxu1 %v15037_v16  ;;  %13485 = vmatprep.mubr.msk.bf16.mxu0 %vm6521_vm1, %v15038_v8  ;;  %v23260_v47 = vld [vmem:[#allocation85_spill] sm:$0xff]  ;;  %v15044_v8 = vld [vmem:[%s22492_s1 + $0xca4] ss:$40 sps:$4 sm:$0xff]  }
 0x674   :  { %v9633_v20 = vpop.f32.mrf.mxu1  ;;  %v10306_v28 = vpop.f32.mrf.mxu0  ;;  %v15043_v16 = vld [vmem:[%s22492_s1 + $0x12dc] ss:$40 sps:$4 sm:$0xff]  }
 0x675   :  { %23259 = vst [vmem:[#allocation165_spill] sm:$0xff] %v20087_v14  ;;  %v23262_v28 = vld [vmem:[#allocation87_spill] sm:$0xff] }
 0x676   :  { %v9634_v56 = vpop.f32.mrf.mxu1  ;;  %v10307_v3 = vpop.f32.mrf.mxu0 }
 0x677   :  { %v20097_v24 = vadd.f32 %v9634_v56, %v23260_v47  ;;  %v20100_v33 = vadd.f32 %v10307_v3, %v19590_v63 }
 0x678   :  { %v9636_v48 = vpop.f32.mrf.mxu1  ;;  %v10309_v18 = vpop.f32.mrf.mxu0 }
 0x679   :  { %23261 = vst [vmem:[#allocation116_spill] sm:$0xff] %v20100_v33  ;;  %v15041_v48 = vld [vmem:[%s22492_s1 + $0x12d8] ss:$40 sps:$4 sm:$0xff]  }
 0x67a   :  { %v9639_v23 = vpop.f32.mrf.mxu1  ;;  %9830 = vmatmul.mubr.bf16.gmra.mxu1 %v15035_v45  ;;  %v10312_v20 = vpop.f32.mrf.mxu0  ;;  %10503 = vmatmul.mubr.bf16.gmra.mxu0 %v15040_v57  ;;  %v15046_v45 = vld [vmem:[%s22492_s1 + $0xca0] ss:$40 sps:$4 sm:$0xff]   ;;  %v23264_v57 = vld [vmem:[#allocation89_spill] sm:$0xff] }
 0x67b   :  { %v20109_v56 = vadd.f32 %v9639_v23, %v23262_v28  ;;  %v20112_v63 = vadd.f32 %v10312_v20, %v19603_v62  ;;  %9837 = vmatprep.mubr.bf16.mxu1 %v15043_v16  ;;  %13486 = vmatprep.mubr.msk.bf16.mxu0 %vm6521_vm1, %v15044_v8  ;;  %v15049_v16 = vld [vmem:[%s22492_s1 + $0x132c] ss:$40 sps:$4 sm:$0xff]  }
 0x67c   :  { %v9641_v3 = vpop.f32.mrf.mxu1  ;;  %v10314_v47 = vpop.f32.mrf.mxu0  ;;  %v15050_v8 = vld [vmem:[%s22492_s1 + $0xcf4] ss:$40 sps:$4 sm:$0xff]  }
 0x67d   :  { %23263 = vst [vmem:[#allocation31_spill] sm:$0xff] %v20112_v63  ;;  %v23266_v47 = vld [vmem:[#allocation91_spill] sm:$0xff] }
 0x67e   :  { %v9642_v33 = vpop.f32.mrf.mxu1  ;;  %v10315_v14 = vpop.f32.mrf.mxu0 }
 0x67f   :  { %v20122_v18 = vadd.f32 %v9642_v33, %v23264_v57  ;;  %v20125_v62 = vadd.f32 %v10315_v14, %v19617_v50 }
 0x680   :  { %v9644_v23 = vpop.f32.mrf.mxu1  ;;  %v10317_v20 = vpop.f32.mrf.mxu0 }
 0x681   :  { %23265 = vst [vmem:[#allocation118_spill] sm:$0xff] %v20125_v62  ;;  %v15047_v23 = vld [vmem:[%s22492_s1 + $0x1328] ss:$40 sps:$4 sm:$0xff]  }
 0x682   :  { %v9647_v28 = vpop.f32.mrf.mxu1  ;;  %9838 = vmatmul.mubr.bf16.gmra.mxu1 %v15041_v48  ;;  %v10320_v3 = vpop.f32.mrf.mxu0  ;;  %10511 = vmatmul.mubr.bf16.gmra.mxu0 %v15046_v45  ;;  %v15052_v48 = vld [vmem:[%s22492_s1 + $0xcf0] ss:$40 sps:$4 sm:$0xff]  }
 0x683   :  { %v20134_v33 = vadd.f32 %v9647_v28, %v23266_v47  ;;  %v20137_v50 = vadd.f32 %v10320_v3, %v19630_v39  ;;  %9845 = vmatprep.mubr.bf16.mxu1 %v15049_v16  ;;  %13487 = vmatprep.mubr.msk.bf16.mxu0 %vm6521_vm1, %v15050_v8  ;;  %v23268_v45 = vld [vmem:[#allocation93_spill] sm:$0xff]  ;;  %v15056_v8 = vld [vmem:[%s22492_s1 + $0xd44] ss:$40 sps:$4 sm:$0xff]  }
 0x684   :  { %v9649_v14 = vpop.f32.mrf.mxu1  ;;  %v10322_v57 = vpop.f32.mrf.mxu0  ;;  %v15055_v16 = vld [vmem:[%s22492_s1 + $0x137c] ss:$40 sps:$4 sm:$0xff]  }
 0x685   :  { %23267 = vst [vmem:[#allocation167_spill] sm:$0xff] %v20137_v50  ;;  %v23270_v57 = vld [vmem:[#allocation95_spill] sm:$0xff] }
 0x686   :  { %v9650_v62 = vpop.f32.mrf.mxu1  ;;  %v10323_v63 = vpop.f32.mrf.mxu0 }
 0x687   :  { %v20147_v20 = vadd.f32 %v9650_v62, %v23268_v45  ;;  %v20150_v39 = vadd.f32 %v10323_v63, %v19644_v43 }
 0x688   :  { %v9652_v28 = vpop.f32.mrf.mxu1  ;;  %v10325_v3 = vpop.f32.mrf.mxu0 }
 0x689   :  { %23269 = vst [vmem:[#allocation120_spill] sm:$0xff] %v20150_v39  ;;  %v15053_v28 = vld [vmem:[%s22492_s1 + $0x1378] ss:$40 sps:$4 sm:$0xff]  }
 0x68a   :  { %v9655_v47 = vpop.f32.mrf.mxu1  ;;  %9846 = vmatmul.mubr.bf16.gmra.mxu1 %v15047_v23  ;;  %v10328_v14 = vpop.f32.mrf.mxu0  ;;  %10519 = vmatmul.mubr.bf16.gmra.mxu0 %v15052_v48  ;;  %v15058_v23 = vld [vmem:[%s22492_s1 + $0xd40] ss:$40 sps:$4 sm:$0xff]   ;;  %v23272_v48 = vld [vmem:[#allocation97_spill] sm:$0xff] }
 0x68b   :  { %v20159_v62 = vadd.f32 %v9655_v47, %v23270_v57  ;;  %v20162_v43 = vadd.f32 %v10328_v14, %v19657_v11  ;;  %9853 = vmatprep.mubr.bf16.mxu1 %v15055_v16  ;;  %13488 = vmatprep.mubr.msk.bf16.mxu0 %vm6521_vm1, %v15056_v8  ;;  %v15061_v16 = vld [vmem:[%s22492_s1 + $0x13cc] ss:$40 sps:$4 sm:$0xff]  }
 0x68c   :  { %v9657_v63 = vpop.f32.mrf.mxu1  ;;  %v10330_v45 = vpop.f32.mrf.mxu0  ;;  %v15062_v8 = vld [vmem:[%s22492_s1 + $0xd94] ss:$40 sps:$4 sm:$0xff]  }
 0x68d   :  { %23271 = vst [vmem:[#allocation33_spill] sm:$0xff] %v20162_v43  ;;  %v23274_v45 = vld [vmem:[#allocation99_spill] sm:$0xff] }
 0x68e   :  { %v9658_v39 = vpop.f32.mrf.mxu1  ;;  %v10331_v50 = vpop.f32.mrf.mxu0 }
 0x68f   :  { %v20172_v3 = vadd.f32 %v9658_v39, %v23272_v48  ;;  %v20175_v11 = vadd.f32 %v10331_v50, %v19671_v51 }
 0x690   :  { %v9660_v47 = vpop.f32.mrf.mxu1  ;;  %v10333_v14 = vpop.f32.mrf.mxu0 }
 0x691   :  { %23273 = vst [vmem:[#allocation122_spill] sm:$0xff] %v20175_v11  ;;  %v15059_v47 = vld [vmem:[%s22492_s1 + $0x13c8] ss:$40 sps:$4 sm:$0xff]  }
 0x692   :  { %v9663_v57 = vpop.f32.mrf.mxu1  ;;  %9854 = vmatmul.mubr.bf16.gmra.mxu1 %v15053_v28  ;;  %v10336_v63 = vpop.f32.mrf.mxu0  ;;  %10527 = vmatmul.mubr.bf16.gmra.mxu0 %v15058_v23  ;;  %v15064_v28 = vld [vmem:[%s22492_s1 + $0xd90] ss:$40 sps:$4 sm:$0xff]  }
 0x693   :  { %v20184_v39 = vadd.f32 %v9663_v57, %v23274_v45  ;;  %v20187_v51 = vadd.f32 %v10336_v63, %v19684_v55  ;;  %9861 = vmatprep.mubr.bf16.mxu1 %v15061_v16  ;;  %13489 = vmatprep.mubr.msk.bf16.mxu0 %vm6521_vm1, %v15062_v8  ;;  %v23276_v23 = vld [vmem:[#allocation101_spill] sm:$0xff]  ;;  %v15068_v8 = vld [vmem:[%s22492_s1 + $0xde4] ss:$40 sps:$4 sm:$0xff]  }
 0x694   :  { %v9665_v50 = vpop.f32.mrf.mxu1  ;;  %v10338_v48 = vpop.f32.mrf.mxu0  ;;  %v15067_v16 = vld [vmem:[%s22492_s1 + $0x141c] ss:$40 sps:$4 sm:$0xff]  }
 0x695   :  { %23275 = vst [vmem:[#allocation169_spill] sm:$0xff] %v20187_v51  ;;  %v23278_v48 = vld [vmem:[#allocation103_spill] sm:$0xff] }
 0x696   :  { %v9666_v11 = vpop.f32.mrf.mxu1  ;;  %v10339_v43 = vpop.f32.mrf.mxu0 }
 0x697   :  { %v20197_v14 = vadd.f32 %v9666_v11, %v23276_v23  ;;  %v20200_v55 = vadd.f32 %v10339_v43, %v19698_v13 }
 0x698   :  { %v9668_v57 = vpop.f32.mrf.mxu1  ;;  %v10341_v63 = vpop.f32.mrf.mxu0 }
 0x699   :  { %23277 = vst [vmem:[#allocation124_spill] sm:$0xff] %v20200_v55  ;;  %v15065_v57 = vld [vmem:[%s22492_s1 + $0x1418] ss:$40 sps:$4 sm:$0xff]  }
 0x69a   :  { %v9671_v45 = vpop.f32.mrf.mxu1  ;;  %9862 = vmatmul.mubr.bf16.gmra.mxu1 %v15059_v47  ;;  %v10344_v50 = vpop.f32.mrf.mxu0  ;;  %10535 = vmatmul.mubr.bf16.gmra.mxu0 %v15064_v28  ;;  %v15070_v47 = vld [vmem:[%s22492_s1 + $0xde0] ss:$40 sps:$4 sm:$0xff]   ;;  %v23280_v28 = vld [vmem:[#allocation105_spill] sm:$0xff] }
 0x69b   :  { %v20209_v11 = vadd.f32 %v9671_v45, %v23278_v48  ;;  %v20212_v13 = vadd.f32 %v10344_v50, %v19711_v61  ;;  %9869 = vmatprep.mubr.bf16.mxu1 %v15067_v16  ;;  %13490 = vmatprep.mubr.msk.bf16.mxu0 %vm6521_vm1, %v15068_v8  ;;  %v15073_v16 = vld [vmem:[%s22492_s1 + $0x146c] ss:$40 sps:$4 sm:$0xff]  }
 0x69c   :  { %v9673_v43 = vpop.f32.mrf.mxu1  ;;  %v10346_v23 = vpop.f32.mrf.mxu0  ;;  %v15074_v8 = vld [vmem:[%s22492_s1 + $0xe34] ss:$40 sps:$4 sm:$0xff]  }
 0x69d   :  { %23279 = vst [vmem:[#allocation35_spill] sm:$0xff] %v20212_v13  ;;  %v23282_v23 = vld [vmem:[#allocation107_spill] sm:$0xff] }
 0x69e   :  { %v9674_v55 = vpop.f32.mrf.mxu1  ;;  %v10347_v51 = vpop.f32.mrf.mxu0 }
 0x69f   :  { %v20222_v63 = vadd.f32 %v9674_v55, %v23280_v28  ;;  %v20225_v61 = vadd.f32 %v10347_v51, %v19725_v0 }
 0x6a0   :  { %v9676_v45 = vpop.f32.mrf.mxu1  ;;  %v10349_v50 = vpop.f32.mrf.mxu0 }
 0x6a1   :  { %23281 = vst [vmem:[#allocation126_spill] sm:$0xff] %v20225_v61  ;;  %v15071_v45 = vld [vmem:[%s22492_s1 + $0x1468] ss:$40 sps:$4 sm:$0xff]  }
 0x6a2   :  { %v9679_v48 = vpop.f32.mrf.mxu1  ;;  %9870 = vmatmul.mubr.bf16.gmra.mxu1 %v15065_v57  ;;  %v10352_v43 = vpop.f32.mrf.mxu0  ;;  %10543 = vmatmul.mubr.bf16.gmra.mxu0 %v15070_v47  ;;  %v15076_v57 = vld [vmem:[%s22492_s1 + $0xe30] ss:$40 sps:$4 sm:$0xff]  }
 0x6a3   :  { %v20234_v55 = vadd.f32 %v9679_v48, %v23282_v23  ;;  %v20237_v0 = vadd.f32 %v10352_v43, %v19734_v53  ;;  %9877 = vmatprep.mubr.bf16.mxu1 %v15073_v16  ;;  %13491 = vmatprep.mubr.msk.bf16.mxu0 %vm6521_vm1, %v15074_v8  ;;  %v23284_v47 = vld [vmem:[#allocation109_spill] sm:$0xff]  ;;  %v15080_v8 = vld [vmem:[%s22492_s1 + $0xe84] ss:$40 sps:$4 sm:$0xff]  }
 0x6a4   :  { %v9681_v51 = vpop.f32.mrf.mxu1  ;;  %v10354_v28 = vpop.f32.mrf.mxu0  ;;  %v15079_v16 = vld [vmem:[%s22492_s1 + $0x14bc] ss:$40 sps:$4 sm:$0xff]  }
 0x6a5   :  { %23283 = vst [vmem:[#allocation171_spill] sm:$0xff] %v20237_v0  ;;  %v23286_v28 = vld [vmem:[#allocation111_spill] sm:$0xff] }
 0x6a6   :  { %v9682_v61 = vpop.f32.mrf.mxu1  ;;  %v10355_v13 = vpop.f32.mrf.mxu0 }
 0x6a7   :  { %v20247_v50 = vadd.f32 %v9682_v61, %v23284_v47  ;;  %v20250_v53 = vadd.f32 %v10355_v13, %v19747_v17 }
 0x6a8   :  { %v9684_v48 = vpop.f32.mrf.mxu1  ;;  %v10357_v43 = vpop.f32.mrf.mxu0 }
 0x6a9   :  { %23285 = vst [vmem:[#allocation128_spill] sm:$0xff] %v20250_v53  ;;  %v15077_v48 = vld [vmem:[%s22492_s1 + $0x14b8] ss:$40 sps:$4 sm:$0xff]  }
 0x6aa   :  { %v9687_v23 = vpop.f32.mrf.mxu1  ;;  %9878 = vmatmul.mubr.bf16.gmra.mxu1 %v15071_v45  ;;  %v10360_v51 = vpop.f32.mrf.mxu0  ;;  %10551 = vmatmul.mubr.bf16.gmra.mxu0 %v15076_v57  ;;  %v15082_v45 = vld [vmem:[%s22492_s1 + $0xe80] ss:$40 sps:$4 sm:$0xff]   ;;  %v23288_v57 = vld [vmem:[#allocation113_spill] sm:$0xff] }
 0x6ab   :  { %v20259_v61 = vadd.f32 %v9687_v23, %v23286_v28  ;;  %v20262_v17 = vadd.f32 %v10360_v51, %v19759_v25  ;;  %9885 = vmatprep.mubr.bf16.mxu1 %v15079_v16  ;;  %13492 = vmatprep.mubr.msk.bf16.mxu0 %vm6521_vm1, %v15080_v8  ;;  %v15085_v16 = vld [vmem:[%s22492_s1 + $0x150c] ss:$40 sps:$4 sm:$0xff]  }
 0x6ac   :  { %v9689_v13 = vpop.f32.mrf.mxu1  ;;  %v10362_v47 = vpop.f32.mrf.mxu0  ;;  %v15086_v8 = vld [vmem:[%s22492_s1 + $0xed4] ss:$40 sps:$4 sm:$0xff]  }
 0x6ad   :  { %23287 = vst [vmem:[#allocation37_spill] sm:$0xff] %v20262_v17  ;;  %v23290_v47 = vld [vmem:[#allocation115_spill] sm:$0xff] }
 0x6ae   :  { %v9690_v53 = vpop.f32.mrf.mxu1  ;;  %v10363_v0 = vpop.f32.mrf.mxu0 }
 0x6af   :  { %v20272_v43 = vadd.f32 %v9690_v53, %v23288_v57  ;;  %v20275_v25 = vadd.f32 %v10363_v0, %v19772_v10 }
 0x6b0   :  { %v9692_v23 = vpop.f32.mrf.mxu1  ;;  %v10365_v51 = vpop.f32.mrf.mxu0 }
 0x6b1   :  { %23289 = vst [vmem:[#allocation130_spill] sm:$0xff] %v20275_v25  ;;  %v15083_v23 = vld [vmem:[%s22492_s1 + $0x1508] ss:$40 sps:$4 sm:$0xff]  }
 0x6b2   :  { %v9695_v28 = vpop.f32.mrf.mxu1  ;;  %9886 = vmatmul.mubr.bf16.gmra.mxu1 %v15077_v48  ;;  %v10368_v13 = vpop.f32.mrf.mxu0  ;;  %10559 = vmatmul.mubr.bf16.gmra.mxu0 %v15082_v45  ;;  %v15088_v48 = vld [vmem:[%s22492_s1 + $0xed0] ss:$40 sps:$4 sm:$0xff]  }
 0x6b3   :  { %v20284_v53 = vadd.f32 %v9695_v28, %v23290_v47  ;;  %v20287_v10 = vadd.f32 %v10368_v13, %v19784_v6  ;;  %9893 = vmatprep.mubr.bf16.mxu1 %v15085_v16  ;;  %13493 = vmatprep.mubr.msk.bf16.mxu0 %vm6521_vm1, %v15086_v8  ;;  %v23292_v45 = vld [vmem:[#allocation117_spill] sm:$0xff]  ;;  %v15092_v8 = vld [vmem:[%s22492_s1 + $0xf24] ss:$40 sps:$4 sm:$0xff]  }
 0x6b4   :  { %v9697_v0 = vpop.f32.mrf.mxu1  ;;  %v10370_v57 = vpop.f32.mrf.mxu0  ;;  %v15091_v16 = vld [vmem:[%s22492_s1 + $0x155c] ss:$40 sps:$4 sm:$0xff]  }
 0x6b5   :  { %23291 = vst [vmem:[#allocation173_spill] sm:$0xff] %v20287_v10  ;;  %v23294_v57 = vld [vmem:[#allocation119_spill] sm:$0xff] }
 0x6b6   :  { %v9698_v25 = vpop.f32.mrf.mxu1  ;;  %v10371_v17 = vpop.f32.mrf.mxu0 }
 0x6b7   :  { %v20297_v51 = vadd.f32 %v9698_v25, %v23292_v45  ;;  %v20300_v6 = vadd.f32 %v10371_v17, %v19797_v52 }
 0x6b8   :  { %v9700_v28 = vpop.f32.mrf.mxu1  ;;  %v10373_v13 = vpop.f32.mrf.mxu0 }
 0x6b9   :  { %23293 = vst [vmem:[#allocation132_spill] sm:$0xff] %v20300_v6  ;;  %v15089_v28 = vld [vmem:[%s22492_s1 + $0x1558] ss:$40 sps:$4 sm:$0xff]  }
 0x6ba   :  { %v9703_v47 = vpop.f32.mrf.mxu1  ;;  %9894 = vmatmul.mubr.bf16.gmra.mxu1 %v15083_v23  ;;  %v10376_v0 = vpop.f32.mrf.mxu0  ;;  %10567 = vmatmul.mubr.bf16.gmra.mxu0 %v15088_v48  ;;  %v15094_v23 = vld [vmem:[%s22492_s1 + $0xf20] ss:$40 sps:$4 sm:$0xff]   ;;  %v23296_v48 = vld [vmem:[#allocation121_spill] sm:$0xff] }
 0x6bb   :  { %v20309_v25 = vadd.f32 %v9703_v47, %v23294_v57  ;;  %v20312_v52 = vadd.f32 %v10376_v0, %v19809_v1  ;;  %9901 = vmatprep.mubr.bf16.mxu1 %v15091_v16  ;;  %13494 = vmatprep.mubr.msk.bf16.mxu0 %vm6521_vm1, %v15092_v8  ;;  %v15097_v16 = vld [vmem:[%s22492_s1 + $0x15ac] ss:$40 sps:$4 sm:$0xff]  }
 0x6bc   :  { %v9705_v17 = vpop.f32.mrf.mxu1  ;;  %v10378_v45 = vpop.f32.mrf.mxu0  ;;  %v15098_v8 = vld [vmem:[%s22492_s1 + $0xf74] ss:$40 sps:$4 sm:$0xff]  }
 0x6bd   :  { %23295 = vst [vmem:[#allocation39_spill] sm:$0xff] %v20312_v52  ;;  %v23298_v45 = vld [vmem:[#allocation123_spill] sm:$0xff] }
 0x6be   :  { %v9706_v6 = vpop.f32.mrf.mxu1  ;;  %v10379_v10 = vpop.f32.mrf.mxu0 }
 0x6bf   :  { %v20322_v13 = vadd.f32 %v9706_v6, %v23296_v48  ;;  %v20325_v1 = vadd.f32 %v10379_v10, %v19822_v2 }
 0x6c0   :  { %v9708_v47 = vpop.f32.mrf.mxu1  ;;  %v10381_v0 = vpop.f32.mrf.mxu0 }
 0x6c1   :  { %23297 = vst [vmem:[#allocation134_spill] sm:$0xff] %v20325_v1  ;;  %v15095_v47 = vld [vmem:[%s22492_s1 + $0x15a8] ss:$40 sps:$4 sm:$0xff]  }
 0x6c2   :  { %v9711_v57 = vpop.f32.mrf.mxu1  ;;  %9902 = vmatmul.mubr.bf16.gmra.mxu1 %v15089_v28  ;;  %v10384_v17 = vpop.f32.mrf.mxu0  ;;  %10575 = vmatmul.mubr.bf16.gmra.mxu0 %v15094_v23  ;;  %v15100_v28 = vld [vmem:[%s22492_s1 + $0xf70] ss:$40 sps:$4 sm:$0xff]  }
 0x6c3   :  { %v20334_v6 = vadd.f32 %v9711_v57, %v23298_v45  ;;  %v20337_v2 = vadd.f32 %v10384_v17, %v19834_v44  ;;  %9909 = vmatprep.mubr.bf16.mxu1 %v15097_v16  ;;  %13495 = vmatprep.mubr.msk.bf16.mxu0 %vm6521_vm1, %v15098_v8  ;;  %v23300_v23 = vld [vmem:[#allocation125_spill] sm:$0xff]  ;;  %v15104_v8 = vld [vmem:[%s22492_s1 + $0xfc4] ss:$40 sps:$4 sm:$0xff]  }
 0x6c4   :  { %v9713_v10 = vpop.f32.mrf.mxu1  ;;  %v10386_v48 = vpop.f32.mrf.mxu0  ;;  %v15103_v16 = vld [vmem:[%s22492_s1 + $0x15fc] ss:$40 sps:$4 sm:$0xff]  }
 0x6c5   :  { %23299 = vst [vmem:[#allocation175_spill] sm:$0xff] %v20337_v2  ;;  %v23302_v48 = vld [vmem:[#allocation127_spill] sm:$0xff] }
 0x6c6   :  { %v9714_v1 = vpop.f32.mrf.mxu1  ;;  %v10387_v52 = vpop.f32.mrf.mxu0 }
 0x6c7   :  { %v20347_v0 = vadd.f32 %v9714_v1, %v23300_v23  ;;  %v20350_v44 = vadd.f32 %v10387_v52, %v19847_v34 }
 0x6c8   :  { %v9716_v57 = vpop.f32.mrf.mxu1  ;;  %v10389_v17 = vpop.f32.mrf.mxu0 }
 0x6c9   :  { %23301 = vst [vmem:[#allocation136_spill] sm:$0xff] %v20350_v44 }
 0x6ca   :  { %v9719_v45 = vpop.f32.mrf.mxu1  ;;  %9910 = vmatmul.mubr.bf16.gmra.mxu1 %v15095_v47  ;;  %v10392_v10 = vpop.f32.mrf.mxu0  ;;  %10583 = vmatmul.mubr.bf16.gmra.mxu0 %v15100_v28  ;;  %v15101_v47 = vld [vmem:[%s22492_s1 + $0x15f8] ss:$40 sps:$4 sm:$0xff]  }
 0x6cb   :  { %v20359_v1 = vadd.f32 %v9719_v45, %v23302_v48  ;;  %v20362_v34 = vadd.f32 %v10392_v10, %v19859_v22  ;;  %9917 = vmatprep.mubr.bf16.mxu1 %v15103_v16  ;;  %13496 = vmatprep.mubr.msk.bf16.mxu0 %vm6521_vm1, %v15104_v8  ;;  %v15106_v28 = vld [vmem:[%s22492_s1 + $0xfc0] ss:$40 sps:$4 sm:$0xff]   ;;  %v23304_v22 = vld [vmem:[#allocation129_spill] sm:$0xff]  ;;  %v15109_v8 = vld [vmem:[%s22492_s1 + $0x164c] ss:$40 sps:$4 sm:$0xff]  }
 0x6cc   :  { %v9721_v52 = vpop.f32.mrf.mxu1  ;;  %v10394_v23 = vpop.f32.mrf.mxu0  ;;  %v15110_v10 = vld [vmem:[%s22492_s1 + $0x1014] ss:$40 sps:$4 sm:$0xff]  }
 0x6cd   :  { %23303 = vst [vmem:[#allocation41_spill] sm:$0xff] %v20362_v34 }
 0x6ce   :  { %v9722_v57 = vpop.f32.mrf.mxu1  ;;  %v10395_v17 = vpop.f32.mrf.mxu0 }
 0x6cf   :  { %v20374_v45 = vadd.f32 %v9722_v57, %v23304_v22  ;;  %v20377_v16 = vadd.f32 %v10395_v17, %v19872_v27  ;;  %v23305_v22 = vld [vmem:[#allocation131_spill] sm:$0xff] }
 0x6d0   :  { %v9724_v48 = vpop.f32.mrf.mxu1  ;;  %v10397_v52 = vpop.f32.mrf.mxu0 }
 0x6d2   :  { %v9727_v44 = vpop.f32.mrf.mxu1  ;;  %9918 = vmatmul.mubr.bf16.gmra.mxu1 %v15101_v47  ;;  %v10400_v57 = vpop.f32.mrf.mxu0  ;;  %10591 = vmatmul.mubr.bf16.gmra.mxu0 %v15106_v28  ;;  %v15107_v47 = vld [vmem:[%s22492_s1 + $0x1648] ss:$40 sps:$4 sm:$0xff]  }
 0x6d3   :  { %v20388_v27 = vadd.f32 %v9727_v44, %v23305_v22  ;;  %v20391_v17 = vadd.f32 %v10400_v57, %v19884_v58  ;;  %9925 = vmatprep.mubr.bf16.mxu1 %v15109_v8  ;;  %13497 = vmatprep.mubr.msk.bf16.mxu0 %vm6521_vm1, %v15110_v10  ;;  %v15112_v44 = vld [vmem:[%s22492_s1 + $0x1010] ss:$40 sps:$4 sm:$0xff]  }
 0x6d4   :  { %v9729_v34 = vpop.f32.mrf.mxu1  ;;  %v10402_v19 = vpop.f32.mrf.mxu0  ;;  %v23307_v58 = vld [vmem:[#allocation133_spill] sm:$0xff] }
 0x6d5   :  { %23306 = vst [vmem:[#allocation177_spill] sm:$0xff] %v20391_v17  ;;  %v15115_v19 = vld [vmem:[%s22492_s1 + $0x169c] ss:$40 sps:$4 sm:$0xff]  }
 0x6d6   :  { %v9730_v52 = vpop.f32.mrf.mxu1  ;;  %v10403_v23 = vpop.f32.mrf.mxu0  ;;  %v15116_v34 = vld [vmem:[%s22492_s1 + $0x1064] ss:$40 sps:$4 sm:$0xff]  }
 0x6d7   :  { %v20403_v28 = vadd.f32 %v9730_v52, %v23307_v58  ;;  %v20406_v8 = vadd.f32 %v10403_v23, %v19897_v26  ;;  %v23308_v58 = vld [vmem:[#allocation135_spill] sm:$0xff] }
 0x6d8   :  { %v9732_v10 = vpop.f32.mrf.mxu1  ;;  %v10405_v57 = vpop.f32.mrf.mxu0 }
 0x6da   :  { %v9735_v48 = vpop.f32.mrf.mxu1  ;;  %9926 = vmatmul.mubr.bf16.gmra.mxu1 %v15107_v47  ;;  %v10408_v52 = vpop.f32.mrf.mxu0  ;;  %10599 = vmatmul.mubr.bf16.gmra.mxu0 %v15112_v44  ;;  %v15113_v47 = vld [vmem:[%s22492_s1 + $0x1698] ss:$40 sps:$4 sm:$0xff]  }
 0x6db   :  { %v20417_v26 = vadd.f32 %v9735_v48, %v23308_v58  ;;  %v20420_v23 = vadd.f32 %v10408_v52, %v19909_v5  ;;  %9933 = vmatprep.mubr.bf16.mxu1 %v15115_v19  ;;  %13498 = vmatprep.mubr.msk.bf16.mxu0 %vm6521_vm1, %v15116_v34  ;;  %v15118_v48 = vld [vmem:[%s22492_s1 + $0x1060] ss:$40 sps:$4 sm:$0xff]   ;;  %v23310_v5 = vld [vmem:[#allocation137_spill] sm:$0xff] }
 0x6dc   :  { %v9737_v17 = vpop.f32.mrf.mxu1  ;;  %v10410_v29 = vpop.f32.mrf.mxu0 }
 0x6dd   :  { %23309 = vst [vmem:[#allocation43_spill] sm:$0xff] %v20420_v23  ;;  %v15121_v29 = vld [vmem:[%s22492_s1 + $0x16ec] ss:$40 sps:$4 sm:$0xff]  }
 0x6de   :  { %v9738_v57 = vpop.f32.mrf.mxu1  ;;  %v10411_v22 = vpop.f32.mrf.mxu0  ;;  %v15122_v17 = vld [vmem:[%s22492_s1 + $0x10b4] ss:$40 sps:$4 sm:$0xff]  }
 0x6df   :  { %v20432_v44 = vadd.f32 %v9738_v57, %v23310_v5  ;;  %v20435_v19 = vadd.f32 %v10411_v22, %v19922_v60  ;;  %v23311_v5 = vld [vmem:[#allocation138_spill] sm:$0xff] }
 0x6e0   :  { %v9740_v34 = vpop.f32.mrf.mxu1  ;;  %v10413_v52 = vpop.f32.mrf.mxu0 }
 0x6e2   :  { %v9743_v10 = vpop.f32.mrf.mxu1  ;;  %9934 = vmatmul.mubr.bf16.gmra.mxu1 %v15113_v47  ;;  %v10416_v57 = vpop.f32.mrf.mxu0  ;;  %10607 = vmatmul.mubr.bf16.gmra.mxu0 %v15118_v48  ;;  %v15119_v47 = vld [vmem:[%s22492_s1 + $0x16e8] ss:$40 sps:$4 sm:$0xff]  }
 0x6e3   :  { %v20446_v60 = vadd.f32 %v9743_v10, %v23311_v5  ;;  %v20449_v22 = vadd.f32 %v10416_v57, %v19934_v40  ;;  %9941 = vmatprep.mubr.bf16.mxu1 %v15121_v29  ;;  %13499 = vmatprep.mubr.msk.bf16.mxu0 %vm6521_vm1, %v15122_v17  ;;  %v15124_v10 = vld [vmem:[%s22492_s1 + $0x10b0] ss:$40 sps:$4 sm:$0xff]   ;;  %v23313_v40 = vld [vmem:[#allocation139_spill] sm:$0xff] }
 0x6e4   :  { %v9745_v23 = vpop.f32.mrf.mxu1  ;;  %v10418_v30 = vpop.f32.mrf.mxu0 }
 0x6e5   :  { %23312 = vst [vmem:[#allocation179_spill] sm:$0xff] %v20449_v22  ;;  %v15127_v30 = vld [vmem:[%s22492_s1 + $0x173c] ss:$40 sps:$4 sm:$0xff]  }
 0x6e6   :  { %v9746_v52 = vpop.f32.mrf.mxu1  ;;  %v10419_v58 = vpop.f32.mrf.mxu0  ;;  %v15128_v23 = vld [vmem:[%s22492_s1 + $0x1104] ss:$40 sps:$4 sm:$0xff]  }
 0x6e7   :  { %v20461_v48 = vadd.f32 %v9746_v52, %v23313_v40  ;;  %v20464_v29 = vadd.f32 %v10419_v58, %v19947_v12  ;;  %v23315_v40 = vld [vmem:[#allocation140_spill] sm:$0xff] }
 0x6e8   :  { %v9748_v17 = vpop.f32.mrf.mxu1  ;;  %v10421_v57 = vpop.f32.mrf.mxu0 }
 0x6e9   :  { %23314 = vst [vmem:[#allocation45_spill] sm:$0xff] %v20464_v29 }
 0x6ea   :  { %v9751_v34 = vpop.f32.mrf.mxu1  ;;  %9942 = vmatmul.mubr.bf16.gmra.mxu1 %v15119_v47  ;;  %v10424_v52 = vpop.f32.mrf.mxu0  ;;  %10615 = vmatmul.mubr.bf16.gmra.mxu0 %v15124_v10  ;;  %v15125_v47 = vld [vmem:[%s22492_s1 + $0x1738] ss:$40 sps:$4 sm:$0xff]  }
 0x6eb   :  { %v20475_v12 = vadd.f32 %v9751_v34, %v23315_v40  ;;  %v20478_v58 = vadd.f32 %v10424_v52, %v19959_v31  ;;  %9949 = vmatprep.mubr.bf16.mxu1 %v15127_v30  ;;  %13500 = vmatprep.mubr.msk.bf16.mxu0 %vm6521_vm1, %v15128_v23  ;;  %v15130_v34 = vld [vmem:[%s22492_s1 + $0x1100] ss:$40 sps:$4 sm:$0xff]   ;;  %v23317_v31 = vld [vmem:[#allocation141_spill] sm:$0xff] }
 0x6ec   :  { %v9753_v22 = vpop.f32.mrf.mxu1  ;;  %v10426_v37 = vpop.f32.mrf.mxu0 }
 0x6ed   :  { %23316 = vst [vmem:[#allocation181_spill] sm:$0xff] %v20478_v58  ;;  %v15133_v37 = vld [vmem:[%s22492_s1 + $0x178c] ss:$40 sps:$4 sm:$0xff]  }
 0x6ee   :  { %v9754_v57 = vpop.f32.mrf.mxu1  ;;  %v10427_v5 = vpop.f32.mrf.mxu0  ;;  %v15134_v22 = vld [vmem:[%s22492_s1 + $0x1154] ss:$40 sps:$4 sm:$0xff]  }
 0x6ef   :  { %v20490_v10 = vadd.f32 %v9754_v57, %v23317_v31  ;;  %v20493_v30 = vadd.f32 %v10427_v5, %v19972_v49  ;;  %v23320_v31 = vld [vmem:[#allocation142_spill] sm:$0xff] }
 0x6f0   :  { %v9756_v23 = vpop.f32.mrf.mxu1  ;;  %v10429_v52 = vpop.f32.mrf.mxu0 }
 0x6f1   :  { %23318 = vst [vmem:[#allocation47_spill] sm:$0xff] %v20493_v30 }
 0x6f2   :  { %v9759_v58 = vpop.f32.mrf.mxu1  ;;  %9950 = vmatmul.mubr.bf16.gmra.mxu1 %v15125_v47  ;;  %v10432_v57 = vpop.f32.mrf.mxu0  ;;  %10623 = vmatmul.mubr.bf16.gmra.mxu0 %v15130_v34  ;;  %v15131_v47 = vld [vmem:[%s22492_s1 + $0x1788] ss:$40 sps:$4 sm:$0xff]  }
 0x6f3   :  { %v20504_v49 = vadd.f32 %v9759_v58, %v23320_v31  ;;  %v20507_v5 = vadd.f32 %v10432_v57, %v19984_v35  ;;  %9957 = vmatprep.mubr.bf16.mxu1 %v15133_v37  ;;  %13501 = vmatprep.mubr.msk.bf16.mxu0 %vm6521_vm1, %v15134_v22  ;;  %v15136_v58 = vld [vmem:[%s22492_s1 + $0x1150] ss:$40 sps:$4 sm:$0xff]   ;;  %v23323_v35 = vld [vmem:[#allocation143_spill] sm:$0xff] }
 0x6f4   :  { %v9761_v15 = vpop.f32.mrf.mxu1  ;;  %v10434_v29 = vpop.f32.mrf.mxu0 }
 0x6f5   :  { %23321 = vst [vmem:[#allocation183_spill] sm:$0xff] %v20507_v5  ;;  %v15139_v15 = vld [vmem:[%s22492_s1 + $0x17dc] ss:$40 sps:$4 sm:$0xff]  }
 0x6f6   :  { %v9762_v21 = vpop.f32.mrf.mxu1  ;;  %v10435_v17 = vpop.f32.mrf.mxu0  ;;  %v15140_v29 = vld [vmem:[%s22492_s1 + $0x11a4] ss:$40 sps:$4 sm:$0xff]  }
 0x6f7   :  { %v20519_v34 = vadd.f32 %v9762_v21, %v23323_v35  ;;  %v20522_v37 = vadd.f32 %v10435_v17, %v19997_v42  ;;  %v23326_v35 = vld [vmem:[#allocation144_spill] sm:$0xff] }
 0x6f8   :  { %v9764_v22 = vpop.f32.mrf.mxu1  ;;  %v10437_v57 = vpop.f32.mrf.mxu0 }
 0x6f9   :  { %23324 = vst [vmem:[#allocation49_spill] sm:$0xff] %v20522_v37 }
 0x6fa   :  { %v9767_v5 = vpop.f32.mrf.mxu1  ;;  %9958 = vmatmul.mubr.bf16.gmra.mxu1 %v15131_v47  ;;  %v10440_v21 = vpop.f32.mrf.mxu0  ;;  %10631 = vmatmul.mubr.bf16.gmra.mxu0 %v15136_v58  ;;  %v15137_v47 = vld [vmem:[%s22492_s1 + $0x17d8] ss:$40 sps:$4 sm:$0xff]  }
 0x6fb   :  { %v20533_v42 = vadd.f32 %v9767_v5, %v23326_v35  ;;  %v20536_v17 = vadd.f32 %v10440_v21, %v20009_v59  ;;  %9965 = vmatprep.mubr.bf16.mxu1 %v15139_v15  ;;  %13502 = vmatprep.mubr.msk.bf16.mxu0 %vm6521_vm1, %v15140_v29  ;;  %v15142_v5 = vld [vmem:[%s22492_s1 + $0x11a0] ss:$40 sps:$4 sm:$0xff]   ;;  %v23329_v59 = vld [vmem:[#allocation145_spill] sm:$0xff] }
 0x6fc   :  { %v9769_v23 = vpop.f32.mrf.mxu1  ;;  %v10442_v30 = vpop.f32.mrf.mxu0 }
 0x6fd   :  { %23327 = vst [vmem:[#allocation185_spill] sm:$0xff] %v20536_v17  ;;  %v15145_v30 = vld [vmem:[%s22492_s1 + $0x182c] ss:$40 sps:$4 sm:$0xff]  }
 0x6fe   :  { %v9770_v40 = vpop.f32.mrf.mxu1  ;;  %v10443_v52 = vpop.f32.mrf.mxu0  ;;  %v15146_v23 = vld [vmem:[%s22492_s1 + $0x11f4] ss:$40 sps:$4 sm:$0xff]  }
 0x6ff   :  { %v20548_v58 = vadd.f32 %v9770_v40, %v23329_v59  ;;  %v20551_v15 = vadd.f32 %v10443_v52, %v20022_v36  ;;  %v23332_v59 = vld [vmem:[#allocation146_spill] sm:$0xff] }
 0x700   :  { %v9772_v29 = vpop.f32.mrf.mxu1  ;;  %v10445_v21 = vpop.f32.mrf.mxu0 }
 0x701   :  { %23330 = vst [vmem:[#allocation51_spill] sm:$0xff] %v20551_v15 }
 0x702   :  { %v9775_v17 = vpop.f32.mrf.mxu1  ;;  %9966 = vmatmul.mubr.bf16.gmra.mxu1 %v15137_v47  ;;  %v10448_v40 = vpop.f32.mrf.mxu0  ;;  %10639 = vmatmul.mubr.bf16.gmra.mxu0 %v15142_v5  ;;  %v15143_v47 = vld [vmem:[%s22492_s1 + $0x1828] ss:$40 sps:$4 sm:$0xff]  }
 0x703   :  { %v20562_v36 = vadd.f32 %v9775_v17, %v23332_v59  ;;  %v20565_v52 = vadd.f32 %v10448_v40, %v20034_v54  ;;  %9973 = vmatprep.mubr.bf16.mxu1 %v15145_v30  ;;  %13503 = vmatprep.mubr.msk.bf16.mxu0 %vm6521_vm1, %v15146_v23  ;;  %v15148_v17 = vld [vmem:[%s22492_s1 + $0x11f0] ss:$40 sps:$4 sm:$0xff]   ;;  %v23335_v54 = vld [vmem:[#allocation147_spill] sm:$0xff] }
 0x704   :  { %v9777_v22 = vpop.f32.mrf.mxu1  ;;  %v10450_v37 = vpop.f32.mrf.mxu0 }
 0x705   :  { %23333 = vst [vmem:[#allocation187_spill] sm:$0xff] %v20565_v52  ;;  %v15151_v37 = vld [vmem:[%s22492_s1 + $0x187c] ss:$40 sps:$4 sm:$0xff]  }
 0x706   :  { %v9778_v31 = vpop.f32.mrf.mxu1  ;;  %v10451_v57 = vpop.f32.mrf.mxu0  ;;  %v15152_v22 = vld [vmem:[%s22492_s1 + $0x1244] ss:$40 sps:$4 sm:$0xff]  }
 0x707   :  { %v20577_v5 = vadd.f32 %v9778_v31, %v23335_v54  ;;  %v20580_v30 = vadd.f32 %v10451_v57, %v20047_v4  ;;  %v23338_v54 = vld [vmem:[#allocation148_spill] sm:$0xff] }
 0x708   :  { %v9780_v23 = vpop.f32.mrf.mxu1  ;;  %v10453_v40 = vpop.f32.mrf.mxu0 }
 0x709   :  { %23336 = vst [vmem:[#allocation53_spill] sm:$0xff] %v20580_v30 }
 0x70a   :  { %v9783_v52 = vpop.f32.mrf.mxu1  ;;  %9974 = vmatmul.mubr.bf16.gmra.mxu1 %v15143_v47  ;;  %v10456_v31 = vpop.f32.mrf.mxu0  ;;  %10647 = vmatmul.mubr.bf16.gmra.mxu0 %v15148_v17  ;;  %v15149_v47 = vld [vmem:[%s22492_s1 + $0x1878] ss:$40 sps:$4 sm:$0xff]  }
 0x70b   :  { %v20591_v4 = vadd.f32 %v9783_v52, %v23338_v54  ;;  %v20594_v57 = vadd.f32 %v10456_v31, %v20059_v46  ;;  %9981 = vmatprep.mubr.bf16.mxu1 %v15151_v37  ;;  %13504 = vmatprep.mubr.msk.bf16.mxu0 %vm6521_vm1, %v15152_v22  ;;  %v15154_v52 = vld [vmem:[%s22492_s1 + $0x1240] ss:$40 sps:$4 sm:$0xff]   ;;  %v23341_v46 = vld [vmem:[#allocation149_spill] sm:$0xff] }
 0x70c   :  { %v9785_v29 = vpop.f32.mrf.mxu1  ;;  %v10458_v15 = vpop.f32.mrf.mxu0 }
 0x70d   :  { %23339 = vst [vmem:[#allocation189_spill] sm:$0xff] %v20594_v57  ;;  %v15157_v15 = vld [vmem:[%s22492_s1 + $0x18cc] ss:$40 sps:$4 sm:$0xff]  }
 0x70e   :  { %v9786_v35 = vpop.f32.mrf.mxu1  ;;  %v10459_v21 = vpop.f32.mrf.mxu0  ;;  %v15158_v29 = vld [vmem:[%s22492_s1 + $0x1294] ss:$40 sps:$4 sm:$0xff]  }
 0x70f   :  { %v20606_v17 = vadd.f32 %v9786_v35, %v23341_v46  ;;  %v20609_v37 = vadd.f32 %v10459_v21, %v20072_v7  ;;  %v23344_v46 = vld [vmem:[#allocation150_spill] sm:$0xff] }
 0x710   :  { %v9788_v22 = vpop.f32.mrf.mxu1  ;;  %v10461_v31 = vpop.f32.mrf.mxu0 }
 0x711   :  { %23342 = vst [vmem:[#allocation55_spill] sm:$0xff] %v20609_v37 }
 0x712   :  { %v9791_v57 = vpop.f32.mrf.mxu1  ;;  %9982 = vmatmul.mubr.bf16.gmra.mxu1 %v15149_v47  ;;  %v10464_v35 = vpop.f32.mrf.mxu0  ;;  %10655 = vmatmul.mubr.bf16.gmra.mxu0 %v15154_v52  ;;  %v15155_v47 = vld [vmem:[%s22492_s1 + $0x18c8] ss:$40 sps:$4 sm:$0xff]  }
 0x713   :  { %v20620_v7 = vadd.f32 %v9791_v57, %v23344_v46  ;;  %v20623_v21 = vadd.f32 %v10464_v35, %v20084_v32  ;;  %9989 = vmatprep.mubr.bf16.mxu1 %v15157_v15  ;;  %13505 = vmatprep.mubr.msk.bf16.mxu0 %vm6521_vm1, %v15158_v29  ;;  %v15160_v57 = vld [vmem:[%s22492_s1 + $0x1290] ss:$40 sps:$4 sm:$0xff]   ;;  %v23347_v32 = vld [vmem:[#allocation151_spill] sm:$0xff] }
 0x714   :  { %v9793_v23 = vpop.f32.mrf.mxu1  ;;  %v10466_v30 = vpop.f32.mrf.mxu0 }
 0x715   :  { %23345 = vst [vmem:[#allocation191_spill] sm:$0xff] %v20623_v21  ;;  %v15163_v30 = vld [vmem:[%s22492_s1 + $0x191c] ss:$40 sps:$4 sm:$0xff]  }
 0x716   :  { %v9794_v59 = vpop.f32.mrf.mxu1  ;;  %v10467_v40 = vpop.f32.mrf.mxu0  ;;  %v15164_v23 = vld [vmem:[%s22492_s1 + $0x12e4] ss:$40 sps:$4 sm:$0xff]  }
 0x717   :  { %v20635_v52 = vadd.f32 %v9794_v59, %v23347_v32  ;;  %v20638_v15 = vadd.f32 %v10467_v40, %v20097_v24  ;;  %v23350_v32 = vld [vmem:[#allocation152_spill] sm:$0xff] }
 0x718   :  { %v9796_v29 = vpop.f32.mrf.mxu1  ;;  %v10469_v35 = vpop.f32.mrf.mxu0 }
 0x719   :  { %23348 = vst [vmem:[#allocation57_spill] sm:$0xff] %v20638_v15 }
 0x71a   :  { %v9799_v21 = vpop.f32.mrf.mxu1  ;;  %9990 = vmatmul.mubr.bf16.gmra.mxu1 %v15155_v47  ;;  %v10472_v59 = vpop.f32.mrf.mxu0  ;;  %10663 = vmatmul.mubr.bf16.gmra.mxu0 %v15160_v57  ;;  %v15161_v47 = vld [vmem:[%s22492_s1 + $0x1918] ss:$40 sps:$4 sm:$0xff]  }
 0x71b   :  { %v20649_v24 = vadd.f32 %v9799_v21, %v23350_v32  ;;  %v20652_v40 = vadd.f32 %v10472_v59, %v20109_v56  ;;  %9997 = vmatprep.mubr.bf16.mxu1 %v15163_v30  ;;  %13506 = vmatprep.mubr.msk.bf16.mxu0 %vm6521_vm1, %v15164_v23  ;;  %v15166_v21 = vld [vmem:[%s22492_s1 + $0x12e0] ss:$40 sps:$4 sm:$0xff]   ;;  %v23353_v56 = vld [vmem:[#allocation153_spill] sm:$0xff]  ;;  %v23355_v32 = vld [vmem:[#allocation108_spill] sm:$0xff] }
 0x71c   :  { %v9801_v22 = vpop.f32.mrf.mxu1  ;;  %v10474_v37 = vpop.f32.mrf.mxu0 }
 0x71d   :  { %23351 = vst [vmem:[#allocation59_spill] sm:$0xff] %v20652_v40  ;;  %v15169_v37 = vld [vmem:[%s22492_s1 + $0x196c] ss:$40 sps:$4 sm:$0xff]  }
 0x71e   :  { %v9802_v54 = vpop.f32.mrf.mxu1  ;;  %v10475_v31 = vpop.f32.mrf.mxu0  ;;  %v15170_v22 = vld [vmem:[%s22492_s1 + $0x1334] ss:$40 sps:$4 sm:$0xff]  }
 0x71f   :  { %v20664_v57 = vadd.f32 %v9802_v54, %v23353_v56  ;;  %v20667_v30 = vadd.f32 %v10475_v31, %v20122_v18  ;;  %v23356_v56 = vld [vmem:[#allocation154_spill] sm:$0xff] }
 0x720   :  { %v9804_v23 = vpop.f32.mrf.mxu1  ;;  %v10477_v59 = vpop.f32.mrf.mxu0 }
 0x721   :  { %23354 = vst [vmem:[#allocation61_spill] sm:$0xff] %v20667_v30  ;;  %v23368_v59 = vld [vmem:[#allocation158_spill] sm:$0xff] }
 0x722   :  { %v9807_v40 = vpop.f32.mrf.mxu1  ;;  %9998 = vmatmul.mubr.bf16.gmra.mxu1 %v15161_v47  ;;  %v10480_v54 = vpop.f32.mrf.mxu0  ;;  %10671 = vmatmul.mubr.bf16.gmra.mxu0 %v15166_v21  ;;  %v15167_v47 = vld [vmem:[%s22492_s1 + $0x1968] ss:$40 sps:$4 sm:$0xff]  }
 0x723   :  { %v20678_v18 = vadd.f32 %v9807_v40, %v23356_v56  ;;  %v20681_v31 = vadd.f32 %v10480_v54, %v20134_v33  ;;  %10005 = vmatprep.mubr.bf16.mxu1 %v15169_v37  ;;  %13507 = vmatprep.mubr.msk.bf16.mxu0 %vm6521_vm1, %v15170_v22  ;;  %v15172_v40 = vld [vmem:[%s22492_s1 + $0x1330] ss:$40 sps:$4 sm:$0xff]   ;;  %v23359_v21 = vld [vmem:[#allocation155_spill] sm:$0xff]  ;;  %v15175_v37 = vld [vmem:[%s22492_s1 + $0x19bc] ss:$40 sps:$4 sm:$0xff]  }
 0x724   :  { %v9809_v29 = vpop.f32.mrf.mxu1  ;;  %v10482_v15 = vpop.f32.mrf.mxu0  ;;  %v11171_v33 = vld [vmem:[%s22493_s2 + $0xf0] sm:$0xff]  ;;  %v15176_v22 = vld [vmem:[%s22492_s1 + $0x1384] ss:$40 sps:$4 sm:$0xff]  }
 0x725   :  { %23357 = vst [vmem:[#allocation63_spill] sm:$0xff] %v20681_v31  ;;  %11343 = vperm.xlu0 %13765, %v11171_v33   ;;  %v15173_v31 = vld [vmem:[%s22492_s1 + $0x19b8] ss:$40 sps:$4 sm:$0xff]  }
 0x726   :  { %v9810_v46 = vpop.f32.mrf.mxu1  ;;  %v10483_v35 = vpop.f32.mrf.mxu0 }
 0x727   :  { %v20696_v29 = vadd.f32 %v9810_v46, %v23359_v21  ;;  %v20699_v15 = vadd.f32 %v10483_v35, %v20147_v20  ;;  %v11172_v20 = vld [vmem:[%s22493_s2 + $0xf8] sm:$0xff]  ;;  %v11155_v35 = vld [vmem:[%s22493_s2 + $0x70] sm:$0xff] }
 0x728   :  { %v9812_v54 = vpop.f32.mrf.mxu1  ;;  %v10485_v56 = vpop.f32.mrf.mxu0  ;;  %v23362_v21 = vld [vmem:[#allocation156_spill] sm:$0xff]  ;;  %11263 = vperm.xlu1 %13766, %v11155_v35  }
 0x729   :  { %23360 = vst [vmem:[#allocation65_spill] sm:$0xff] %v20699_v15  ;;  %11348 = vperm.xlu0 %13765, %v11172_v20  }
 0x72a   :  { %v9815_v23 = vpop.f32.mrf.mxu1  ;;  %10006 = vmatmul.mubr.bf16.gmra.mxu1 %v15167_v47  ;;  %v10488_v46 = vpop.f32.mrf.mxu0  ;;  %10679 = vmatmul.mubr.bf16.gmra.mxu0 %v15172_v40  ;;  %v15179_v40 = vld [vmem:[%s22492_s1 + $0x1a08] ss:$40 sps:$4 sm:$0xff]  }
 0x72b   :  { %v20716_v30 = vadd.f32 %v9815_v23, %v23362_v21  ;;  %v20719_v33 = vadd.f32 %v10488_v46, %v20159_v62  ;;  %10013 = vmatprep.mubr.bf16.mxu1 %v15175_v37  ;;  %13508 = vmatprep.mubr.msk.bf16.mxu0 %vm6521_vm1, %v15176_v22  ;;  %v15178_v62 = vld [vmem:[%s22492_s1 + $0x1380] ss:$40 sps:$4 sm:$0xff]   ;;  %v11156_v22 = vld [vmem:[%s22493_s2 + $0x78] sm:$0xff]  ;;  %v15181_v21 = vld [vmem:[%s22492_s1 + $0x1a0c] ss:$40 sps:$4 sm:$0xff]  }
 0x72c   :  { %v9817_v47 = vpop.f32.mrf.mxu1  ;;  %v10490_v54 = vpop.f32.mrf.mxu0  ;;  %v11169_v37 = vld [vmem:[%s22493_s2 + $0xe0] sm:$0xff]  ;;  %v23365_v46 = vld [vmem:[#allocation157_spill] sm:$0xff]  ;;  %11268 = vperm.xlu1 %13766, %v11156_v22  }
 0x72d   :  { %23363 = vst [vmem:[#allocation67_spill] sm:$0xff] %v20719_v33  ;;  %v15182_v47 = vld [vmem:[%s22492_s1 + $0x13d4] ss:$40 sps:$4 sm:$0xff]   ;;  %11333 = vperm.xlu0 %13765, %v11169_v37  }
 0x72e   :  { %v9818_v15 = vpop.f32.mrf.mxu1  ;;  %v10491_v23 = vpop.f32.mrf.mxu0  ;;  %v23374_v33 = vld [vmem:[#allocation160_spill] sm:$0xff] }
 0x72f   :  { %v20737_v20 = vadd.f32 %v9818_v15, %v23365_v46  ;;  %v20740_v35 = vadd.f32 %v10491_v23, %v20172_v3  ;;  %v11170_v3 = vld [vmem:[%s22493_s2 + $0xe8] sm:$0xff]  ;;  %v11153_v23 = vld [vmem:[%s22493_s2 + $0x60] sm:$0xff] }
 0x730   :  { %v9820_v54 = vpop.f32.mrf.mxu1  ;;  %v10493_v56 = vpop.f32.mrf.mxu0  ;;  %11338 = vperm.xlu1 %13766, %v11170_v3  }
 0x731   :  { %23366 = vst [vmem:[#allocation69_spill] sm:$0xff] %v20740_v35  ;;  %11253 = vperm.xlu0 %13765, %v11153_v23   ;;  %v15187_v23 = vld [vmem:[%s22492_s1 + $0x1a5c] ss:$40 sps:$4 sm:$0xff]  }
 0x732   :  { %v9823_v15 = vpop.f32.mrf.mxu1  ;;  %10014 = vmatmul.mubr.bf16.gmra.mxu1 %v15173_v31  ;;  %v10496_v46 = vpop.f32.mrf.mxu0  ;;  %10687 = vmatmul.mubr.bf16.gmra.mxu0 %v15178_v62  ;;  %v15185_v62 = vld [vmem:[%s22492_s1 + $0x1a58] ss:$40 sps:$4 sm:$0xff]  }
 0x733   :  { %v20757_v54 = vadd.f32 %v9823_v15, %v23368_v59  ;;  %v20760_v56 = vadd.f32 %v10496_v46, %v20184_v39  ;;  %10021 = vmatprep.mubr.bf16.mxu1 %v15181_v21  ;;  %13509 = vmatprep.mubr.msk.bf16.mxu0 %vm6521_vm1, %v15182_v47  ;;  %v15184_v39 = vld [vmem:[%s22492_s1 + $0x13d0] ss:$40 sps:$4 sm:$0xff]   ;;  %v11154_v21 = vld [vmem:[%s22493_s2 + $0x68] sm:$0xff] }
 0x734   :  { %v9825_v31 = vpop.f32.mrf.mxu1  ;;  %v10498_v37 = vpop.f32.mrf.mxu0  ;;  %v11167_v47 = vld [vmem:[%s22493_s2 + $0xd0] sm:$0xff]  ;;  %v23371_v15 = vld [vmem:[#allocation159_spill] sm:$0xff]  ;;  %11258 = vperm.xlu1 %13766, %v11154_v21  }
 0x735   :  { %23369 = vst [vmem:[#allocation71_spill] sm:$0xff] %v20760_v56  ;;  %v15188_v31 = vld [vmem:[%s22492_s1 + $0x1424] ss:$40 sps:$4 sm:$0xff]   ;;  %11323 = vperm.xlu0 %13765, %v11167_v47  }
 0x736   :  { %v9826_v35 = vpop.f32.mrf.mxu1  ;;  %v10499_v59 = vpop.f32.mrf.mxu0  ;;  %v23380_v56 = vld [vmem:[#allocation162_spill] sm:$0xff] }
 0x737   :  { %v20778_v46 = vadd.f32 %v9826_v35, %v23371_v15  ;;  %v20781_v3 = vadd.f32 %v10499_v59, %v20197_v14  ;;  %v11168_v14 = vld [vmem:[%s22493_s2 + $0xd8] sm:$0xff]  ;;  %v11151_v59 = vld [vmem:[%s22493_s2 + $0x50] sm:$0xff] }
 0x738   :  { %v9828_v37 = vpop.f32.mrf.mxu1  ;;  %v10501_v22 = vpop.f32.mrf.mxu0  ;;  %11328 = vperm.xlu1 %13766, %v11168_v14  }
 0x739   :  { %23372 = vst [vmem:[#allocation73_spill] sm:$0xff] %v20781_v3  ;;  %11243 = vperm.xlu0 %13765, %v11151_v59   ;;  %v15193_v59 = vld [vmem:[%s22492_s1 + $0x1aac] ss:$40 sps:$4 sm:$0xff]  }
 0x73a   :  { %v9831_v35 = vpop.f32.mrf.mxu1  ;;  %10022 = vmatmul.mubr.bf16.gmra.mxu1 %v15179_v40  ;;  %v10504_v15 = vpop.f32.mrf.mxu0  ;;  %10695 = vmatmul.mubr.bf16.gmra.mxu0 %v15184_v39  ;;  %v15191_v39 = vld [vmem:[%s22492_s1 + $0x1aa8] ss:$40 sps:$4 sm:$0xff]  }
 0x73b   :  { %v20798_v37 = vadd.f32 %v9831_v35, %v23374_v33  ;;  %v20801_v22 = vadd.f32 %v10504_v15, %v20209_v11  ;;  %10029 = vmatprep.mubr.bf16.mxu1 %v15187_v23  ;;  %13510 = vmatprep.mubr.msk.bf16.mxu0 %vm6521_vm1, %v15188_v31  ;;  %v15190_v11 = vld [vmem:[%s22492_s1 + $0x1420] ss:$40 sps:$4 sm:$0xff]   ;;  %v11152_v23 = vld [vmem:[%s22493_s2 + $0x58] sm:$0xff] }
 0x73c   :  { %v9833_v40 = vpop.f32.mrf.mxu1  ;;  %v10506_v21 = vpop.f32.mrf.mxu0  ;;  %v11165_v31 = vld [vmem:[%s22493_s2 + $0xc0] sm:$0xff]  ;;  %v23377_v35 = vld [vmem:[#allocation161_spill] sm:$0xff]  ;;  %11248 = vperm.xlu1 %13766, %v11152_v23  }
 0x73d   :  { %23375 = vst [vmem:[#allocation75_spill] sm:$0xff] %v20801_v22  ;;  %v15194_v40 = vld [vmem:[%s22492_s1 + $0x1474] ss:$40 sps:$4 sm:$0xff]   ;;  %11313 = vperm.xlu0 %13765, %v11165_v31   ;;  %v23386_v22 = vld [vmem:[#allocation166_spill] sm:$0xff] }
 0x73e   :  { %v9834_v3 = vpop.f32.mrf.mxu1  ;;  %v10507_v33 = vpop.f32.mrf.mxu0 }
 0x73f   :  { %v20819_v15 = vadd.f32 %v9834_v3, %v23377_v35  ;;  %v20822_v14 = vadd.f32 %v10507_v33, %v20222_v63  ;;  %v11166_v63 = vld [vmem:[%s22493_s2 + $0xc8] sm:$0xff]  ;;  %v11149_v33 = vld [vmem:[%s22493_s2 + $0x40] sm:$0xff] }
 0x740   :  { %v9836_v21 = vpop.f32.mrf.mxu1  ;;  %v10509_v47 = vpop.f32.mrf.mxu0  ;;  %11318 = vperm.xlu1 %13766, %v11166_v63  }
 0x741   :  { %23378 = vst [vmem:[#allocation77_spill] sm:$0xff] %v20822_v14  ;;  %11233 = vperm.xlu0 %13765, %v11149_v33   ;;  %v15199_v33 = vld [vmem:[%s22492_s1 + $0x1afc] ss:$40 sps:$4 sm:$0xff]  }
 0x742   :  { %v9839_v3 = vpop.f32.mrf.mxu1  ;;  %10030 = vmatmul.mubr.bf16.gmra.mxu1 %v15185_v62  ;;  %v10512_v35 = vpop.f32.mrf.mxu0  ;;  %10703 = vmatmul.mubr.bf16.gmra.mxu0 %v15190_v11  ;;  %v15197_v11 = vld [vmem:[%s22492_s1 + $0x1af8] ss:$40 sps:$4 sm:$0xff]  }
 0x743   :  { %v20839_v21 = vadd.f32 %v9839_v3, %v23380_v56  ;;  %v20842_v47 = vadd.f32 %v10512_v35, %v20234_v55  ;;  %10037 = vmatprep.mubr.bf16.mxu1 %v15193_v59  ;;  %13511 = vmatprep.mubr.msk.bf16.mxu0 %vm6521_vm1, %v15194_v40  ;;  %v15196_v55 = vld [vmem:[%s22492_s1 + $0x1470] ss:$40 sps:$4 sm:$0xff]   ;;  %v11150_v59 = vld [vmem:[%s22493_s2 + $0x48] sm:$0xff] }
 0x744   :  { %v9841_v62 = vpop.f32.mrf.mxu1  ;;  %v10514_v23 = vpop.f32.mrf.mxu0  ;;  %v11163_v40 = vld [vmem:[%s22493_s2 + $0xb0] sm:$0xff]  ;;  %11238 = vperm.xlu1 %13766, %v11150_v59  }
 0x745   :  { %23381 = vst [vmem:[#allocation79_spill] sm:$0xff] %v20842_v47  ;;  %v23383_v3 = vld [vmem:[#allocation164_spill] sm:$0xff]  ;;  %v15200_v62 = vld [vmem:[%s22492_s1 + $0x14c4] ss:$40 sps:$4 sm:$0xff]   ;;  %11303 = vperm.xlu0 %13765, %v11163_v40  }
 0x746   :  { %v9842_v14 = vpop.f32.mrf.mxu1  ;;  %v10515_v56 = vpop.f32.mrf.mxu0  ;;  %v23392_v47 = vld [vmem:[#allocation170_spill] sm:$0xff] }
 0x747   :  { %v20860_v35 = vadd.f32 %v9842_v14, %v23383_v3  ;;  %v20863_v63 = vadd.f32 %v10515_v56, %v20247_v50  ;;  %v11164_v50 = vld [vmem:[%s22493_s2 + $0xb8] sm:$0xff]  ;;  %v11147_v56 = vld [vmem:[%s22493_s2 + $0x30] sm:$0xff] }
 0x748   :  { %v9844_v23 = vpop.f32.mrf.mxu1  ;;  %v10517_v31 = vpop.f32.mrf.mxu0  ;;  %11308 = vperm.xlu1 %13766, %v11164_v50  }
 0x749   :  { %23384 = vst [vmem:[#allocation81_spill] sm:$0xff] %v20863_v63  ;;  %11223 = vperm.xlu0 %13765, %v11147_v56   ;;  %v15205_v56 = vld [vmem:[%s22492_s1 + $0x1b4c] ss:$40 sps:$4 sm:$0xff]  }
 0x74a   :  { %v9847_v14 = vpop.f32.mrf.mxu1  ;;  %10038 = vmatmul.mubr.bf16.gmra.mxu1 %v15191_v39  ;;  %v10520_v3 = vpop.f32.mrf.mxu0  ;;  %10711 = vmatmul.mubr.bf16.gmra.mxu0 %v15196_v55  ;;  %v15203_v55 = vld [vmem:[%s22492_s1 + $0x1b48] ss:$40 sps:$4 sm:$0xff]  }
 0x74b   :  { %v20880_v23 = vadd.f32 %v9847_v14, %v23386_v22  ;;  %v20883_v31 = vadd.f32 %v10520_v3, %v20259_v61  ;;  %10045 = vmatprep.mubr.bf16.mxu1 %v15199_v33  ;;  %13512 = vmatprep.mubr.msk.bf16.mxu0 %vm6521_vm1, %v15200_v62  ;;  %v15202_v61 = vld [vmem:[%s22492_s1 + $0x14c0] ss:$40 sps:$4 sm:$0xff]   ;;  %v11148_v33 = vld [vmem:[%s22493_s2 + $0x38] sm:$0xff]  ;;  %v23389_v14 = vld [vmem:[#allocation168_spill] sm:$0xff] }
 0x74c   :  { %v9849_v39 = vpop.f32.mrf.mxu1  ;;  %v10522_v59 = vpop.f32.mrf.mxu0  ;;  %v11161_v62 = vld [vmem:[%s22493_s2 + $0xa0] sm:$0xff]  ;;  %11228 = vperm.xlu1 %13766, %v11148_v33  }
 0x74d   :  { %23387 = vst [vmem:[#allocation83_spill] sm:$0xff] %v20883_v31  ;;  %v15206_v39 = vld [vmem:[%s22492_s1 + $0x1514] ss:$40 sps:$4 sm:$0xff]   ;;  %11293 = vperm.xlu0 %13765, %v11161_v62   ;;  %v23398_v31 = vld [vmem:[#allocation174_spill] sm:$0xff] }
 0x74e   :  { %v9850_v63 = vpop.f32.mrf.mxu1  ;;  %v10523_v22 = vpop.f32.mrf.mxu0 }
 0x74f   :  { %v20901_v3 = vadd.f32 %v9850_v63, %v23389_v14  ;;  %v20904_v50 = vadd.f32 %v10523_v22, %v20272_v43  ;;  %v11162_v43 = vld [vmem:[%s22493_s2 + $0xa8] sm:$0xff]  ;;  %v11145_v22 = vld [vmem:[%s22493_s2 + $0x20] sm:$0xff] }
 0x750   :  { %v9852_v59 = vpop.f32.mrf.mxu1  ;;  %v10525_v40 = vpop.f32.mrf.mxu0  ;;  %11298 = vperm.xlu1 %13766, %v11162_v43  }
 0x751   :  { %23390 = vst [vmem:[#allocation85_spill] sm:$0xff] %v20904_v50  ;;  %11213 = vperm.xlu0 %13765, %v11145_v22   ;;  %v15211_v22 = vld [vmem:[%s22492_s1 + $0x1b9c] ss:$40 sps:$4 sm:$0xff]  }
 0x752   :  { %v9855_v63 = vpop.f32.mrf.mxu1  ;;  %10046 = vmatmul.mubr.bf16.gmra.mxu1 %v15197_v11  ;;  %v10528_v14 = vpop.f32.mrf.mxu0  ;;  %10719 = vmatmul.mubr.bf16.gmra.mxu0 %v15202_v61  ;;  %v15209_v61 = vld [vmem:[%s22492_s1 + $0x1b98] ss:$40 sps:$4 sm:$0xff]  }
 0x753   :  { %v20921_v59 = vadd.f32 %v9855_v63, %v23392_v47  ;;  %v20924_v40 = vadd.f32 %v10528_v14, %v20284_v53  ;;  %10053 = vmatprep.mubr.bf16.mxu1 %v15205_v56  ;;  %13513 = vmatprep.mubr.msk.bf16.mxu0 %vm6521_vm1, %v15206_v39  ;;  %v15208_v53 = vld [vmem:[%s22492_s1 + $0x1510] ss:$40 sps:$4 sm:$0xff]   ;;  %v11146_v56 = vld [vmem:[%s22493_s2 + $0x28] sm:$0xff] }
 0x754   :  { %v9857_v11 = vpop.f32.mrf.mxu1  ;;  %v10530_v33 = vpop.f32.mrf.mxu0  ;;  %v11159_v39 = vld [vmem:[%s22493_s2 + $0x90] sm:$0xff]  ;;  %11218 = vperm.xlu1 %13766, %v11146_v56  }
 0x755   :  { %23393 = vst [vmem:[#allocation87_spill] sm:$0xff] %v20924_v40  ;;  %v23395_v63 = vld [vmem:[#allocation172_spill] sm:$0xff]  ;;  %v15212_v11 = vld [vmem:[%s22492_s1 + $0x1564] ss:$40 sps:$4 sm:$0xff]   ;;  %11283 = vperm.xlu0 %13765, %v11159_v39  }
 0x756   :  { %v9858_v50 = vpop.f32.mrf.mxu1  ;;  %v10531_v47 = vpop.f32.mrf.mxu0  ;;  %v23404_v40 = vld [vmem:[#allocation178_spill] sm:$0xff] }
 0x757   :  { %v20942_v14 = vadd.f32 %v9858_v50, %v23395_v63  ;;  %v20945_v43 = vadd.f32 %v10531_v47, %v20297_v51  ;;  %v11160_v51 = vld [vmem:[%s22493_s2 + $0x98] sm:$0xff]  ;;  %v11143_v47 = vld [vmem:[%s22493_s2 + $0x10] sm:$0xff] }
 0x758   :  { %v9860_v33 = vpop.f32.mrf.mxu1  ;;  %v10533_v62 = vpop.f32.mrf.mxu0  ;;  %11288 = vperm.xlu1 %13766, %v11160_v51  }
 0x759   :  { %23396 = vst [vmem:[#allocation89_spill] sm:$0xff] %v20945_v43  ;;  %11203 = vperm.xlu0 %13765, %v11143_v47   ;;  %v15217_v47 = vld [vmem:[%s22492_s1 + $0x1bec] ss:$40 sps:$4 sm:$0xff]  }
 0x75a   :  { %v9863_v50 = vpop.f32.mrf.mxu1  ;;  %10054 = vmatmul.mubr.bf16.gmra.mxu1 %v15203_v55  ;;  %v10536_v63 = vpop.f32.mrf.mxu0  ;;  %10727 = vmatmul.mubr.bf16.gmra.mxu0 %v15208_v53 }
 0x75b   :  { %v20962_v33 = vadd.f32 %v9863_v50, %v23398_v31  ;;  %v20965_v62 = vadd.f32 %v10536_v63, %v20309_v25  ;;  %10061 = vmatprep.mubr.bf16.mxu1 %v15211_v22  ;;  %13514 = vmatprep.mubr.msk.bf16.mxu0 %vm6521_vm1, %v15212_v11  ;;  %v15214_v25 = vld [vmem:[%s22492_s1 + $0x1560] ss:$40 sps:$4 sm:$0xff]   ;;  %v11144_v22 = vld [vmem:[%s22493_s2 + $0x18] sm:$0xff]  ;;  %v23401_v50 = vld [vmem:[#allocation176_spill] sm:$0xff] }
 0x75c   :  { %v9865_v55 = vpop.f32.mrf.mxu1  ;;  %v10538_v56 = vpop.f32.mrf.mxu0  ;;  %v11157_v11 = vld [vmem:[%s22493_s2 + $0x80] sm:$0xff]  ;;  %11208 = vperm.xlu1 %13766, %v11144_v22  }
 0x75d   :  { %23399 = vst [vmem:[#allocation91_spill] sm:$0xff] %v20965_v62  ;;  %v15218_v55 = vld [vmem:[%s22492_s1 + $0x15b4] ss:$40 sps:$4 sm:$0xff]   ;;  %11273 = vperm.xlu0 %13765, %v11157_v11   ;;  %v23416_v11 = vld [vmem:[#allocation186_spill] sm:$0xff] }
 0x75e   :  { %v9866_v43 = vpop.f32.mrf.mxu1  ;;  %v10539_v31 = vpop.f32.mrf.mxu0 }
 0x75f   :  { %v20983_v63 = vadd.f32 %v9866_v43, %v23401_v50  ;;  %v20986_v51 = vadd.f32 %v10539_v31, %v20322_v13  ;;  %v11158_v13 = vld [vmem:[%s22493_s2 + $0x88] sm:$0xff]  ;;  %v11141_v31 = vld [vmem:[%s22493_s2] sm:$0xff] }
 0x760   :  { %v9868_v56 = vpop.f32.mrf.mxu1  ;;  %v10541_v39 = vpop.f32.mrf.mxu0  ;;  %11278 = vperm.xlu1 %13766, %v11158_v13   ;;  %v15223_v13 = vld [vmem:[%s22492_s1 + $0x1c3c] ss:$40 sps:$4 sm:$0xff]  }
 0x761   :  { %23402 = vst [vmem:[#allocation93_spill] sm:$0xff] %v20986_v51  ;;  %11193 = vperm.xlu0 %13765, %v11141_v31   ;;  %v15224_v31 = vld [vmem:[%s22492_s1 + $0x1604] ss:$40 sps:$4 sm:$0xff]  }
 0x762   :  { %v9871_v43 = vpop.f32.mrf.mxu1  ;;  %10062 = vmatmul.mubr.bf16.gmra.mxu1 %v15209_v61  ;;  %v10544_v50 = vpop.f32.mrf.mxu0  ;;  %10735 = vmatmul.mubr.bf16.gmra.mxu0 %v15214_v25 }
 0x763   :  { %v21003_v56 = vadd.f32 %v9871_v43, %v23404_v40  ;;  %v21006_v39 = vadd.f32 %v10544_v50, %v20334_v6  ;;  %10069 = vmatprep.mubr.bf16.mxu1 %v15217_v47  ;;  %13515 = vmatprep.mubr.msk.bf16.mxu0 %vm6521_vm1, %v15218_v55  ;;  %v15215_v40 = vld [vmem:[%s22492_s1 + $0x1be8] ss:$40 sps:$4 sm:$0xff]  }
 0x764   :  { %v9873_v61 = vpop.f32.mrf.mxu1  ;;  %v10546_v22 = vpop.f32.mrf.mxu0  ;;  %v15220_v6 = vld [vmem:[%s22492_s1 + $0x15b0] ss:$40 sps:$4 sm:$0xff]   ;;  %v11142_v47 = vld [vmem:[%s22493_s2 + $0x8] sm:$0xff] }
 0x765   :  { %23405 = vst [vmem:[#allocation95_spill] sm:$0xff] %v21006_v39  ;;  %v23407_v55 = vld [vmem:[#allocation180_spill] sm:$0xff]  ;;  %11198 = vperm.xlu1 %13766, %v11142_v47   ;;  %v15221_v39 = vld [vmem:[%s22492_s1 + $0x1c38] ss:$40 sps:$4 sm:$0xff]  }
 0x766   :  { %v9874_v53 = vpop.f32.mrf.mxu1  ;;  %v10547_v51 = vpop.f32.mrf.mxu0 }
 0x767   :  { %v21021_v43 = vadd.f32 %v9874_v53, %v23407_v55  ;;  %v21024_v50 = vadd.f32 %v10547_v51, %v20347_v0  ;;  %v11187_v0 = vld [vmem:[%s22493_s2 + $0x170] sm:$0xff]  ;;  %v11188_v51 = vld [vmem:[%s22493_s2 + $0x178] sm:$0xff]  ;;  %v23410_v55 = vld [vmem:[#allocation182_spill] sm:$0xff] }
 0x768   :  { %v9876_v61 = vpop.f32.mrf.mxu1  ;;  %v10549_v22 = vpop.f32.mrf.mxu0  ;;  %11423 = vperm.xlu0 %13765, %v11187_v0  }
 0x769   :  { %23408 = vst [vmem:[#allocation97_spill] sm:$0xff] %v21024_v50  ;;  %11428 = vperm.xlu1 %13766, %v11188_v51  }
 0x76a   :  { %v9879_v25 = vpop.f32.mrf.mxu1  ;;  %10070 = vmatmul.mubr.bf16.gmra.mxu1 %v15215_v40  ;;  %v10552_v53 = vpop.f32.mrf.mxu0  ;;  %10743 = vmatmul.mubr.bf16.gmra.mxu0 %v15220_v6  ;;  %v15227_v6 = vld [vmem:[%s22492_s1 + $0x1c88] ss:$40 sps:$4 sm:$0xff]  }
 0x76b   :  { %v21041_v62 = vadd.f32 %v9879_v25, %v23410_v55  ;;  %v21044_v47 = vadd.f32 %v10552_v53, %v20359_v1  ;;  %10077 = vmatprep.mubr.bf16.mxu1 %v15223_v13  ;;  %13516 = vmatprep.mubr.msk.bf16.mxu0 %vm6521_vm1, %v15224_v31  ;;  %v15226_v1 = vld [vmem:[%s22492_s1 + $0x1600] ss:$40 sps:$4 sm:$0xff]   ;;  %v23413_v53 = vld [vmem:[#allocation184_spill] sm:$0xff] }
 0x76c   :  { %v9881_v40 = vpop.f32.mrf.mxu1  ;;  %v10554_v61 = vpop.f32.mrf.mxu0  ;;  %v11185_v13 = vld [vmem:[%s22493_s2 + $0x160] sm:$0xff]  ;;  %v11186_v31 = vld [vmem:[%s22493_s2 + $0x168] sm:$0xff] }
 0x76d   :  { %23411 = vst [vmem:[#allocation99_spill] sm:$0xff] %v21044_v47  ;;  %v15229_v55 = vld [vmem:[%s22492_s1 + $0x1c8c] ss:$40 sps:$4 sm:$0xff]   ;;  %11413 = vperm.xlu0 %13765, %v11185_v13   ;;  %11418 = vperm.xlu1 %13766, %v11186_v31   ;;  %v23422_v47 = vld [vmem:[#allocation190_spill] sm:$0xff] }
 0x76e   :  { %v9882_v50 = vpop.f32.mrf.mxu1  ;;  %v10555_v25 = vpop.f32.mrf.mxu0  ;;  %v15230_v40 = vld [vmem:[%s22492_s1 + $0x1654] ss:$40 sps:$4 sm:$0xff]  }
 0x76f   :  { %v21062_v0 = vadd.f32 %v9882_v50, %v23413_v53  ;;  %v21065_v51 = vadd.f32 %v10555_v25, %v20374_v45  ;;  %v11183_v45 = vld [vmem:[%s22493_s2 + $0x150] sm:$0xff]  ;;  %v11184_v25 = vld [vmem:[%s22493_s2 + $0x158] sm:$0xff] }
 0x770   :  { %v9884_v61 = vpop.f32.mrf.mxu1  ;;  %v10557_v22 = vpop.f32.mrf.mxu0 }
 0x771   :  { %23414 = vst [vmem:[#allocation101_spill] sm:$0xff] %v21065_v51  ;;  %11403 = vperm.xlu0 %13765, %v11183_v45   ;;  %11408 = vperm.xlu1 %13766, %v11184_v25   ;;  %v15235_v25 = vld [vmem:[%s22492_s1 + $0x1cdc] ss:$40 sps:$4 sm:$0xff]  }
 0x772   :  { %v9887_v50 = vpop.f32.mrf.mxu1  ;;  %10078 = vmatmul.mubr.bf16.gmra.mxu1 %v15221_v39  ;;  %v10560_v53 = vpop.f32.mrf.mxu0  ;;  %10751 = vmatmul.mubr.bf16.gmra.mxu0 %v15226_v1  ;;  %v15233_v1 = vld [vmem:[%s22492_s1 + $0x1cd8] ss:$40 sps:$4 sm:$0xff]  }
 0x773   :  { %v21082_v61 = vadd.f32 %v9887_v50, %v23416_v11  ;;  %v21085_v22 = vadd.f32 %v10560_v53, %v20388_v27  ;;  %10085 = vmatprep.mubr.bf16.mxu1 %v15229_v55  ;;  %13517 = vmatprep.mubr.msk.bf16.mxu0 %vm6521_vm1, %v15230_v40  ;;  %v15232_v27 = vld [vmem:[%s22492_s1 + $0x1650] ss:$40 sps:$4 sm:$0xff]   ;;  %v11181_v55 = vld [vmem:[%s22493_s2 + $0x140] sm:$0xff]  ;;  %v11182_v40 = vld [vmem:[%s22493_s2 + $0x148] sm:$0xff] }
 0x774   :  { %v9889_v39 = vpop.f32.mrf.mxu1  ;;  %v10562_v13 = vpop.f32.mrf.mxu0  ;;  %v23419_v50 = vld [vmem:[#allocation188_spill] sm:$0xff] }
 0x775   :  { %23417 = vst [vmem:[#allocation103_spill] sm:$0xff] %v21085_v22  ;;  %v15236_v39 = vld [vmem:[%s22492_s1 + $0x16a4] ss:$40 sps:$4 sm:$0xff]   ;;  %11393 = vperm.xlu0 %13765, %v11181_v55   ;;  %11398 = vperm.xlu1 %13766, %v11182_v40  }
 0x776   :  { %v9890_v51 = vpop.f32.mrf.mxu1  ;;  %v10563_v11 = vpop.f32.mrf.mxu0  ;;  %v23428_v22 = vld [vmem:[#allocation3_spill] sm:$0xff] }
 0x777   :  { %v21103_v53 = vadd.f32 %v9890_v51, %v23419_v50  ;;  %v21106_v45 = vadd.f32 %v10563_v11, %v20403_v28  ;;  %v11179_v28 = vld [vmem:[%s22493_s2 + $0x130] sm:$0xff]  ;;  %v11180_v11 = vld [vmem:[%s22493_s2 + $0x138] sm:$0xff] }
 0x778   :  { %v9892_v13 = vpop.f32.mrf.mxu1  ;;  %v10565_v31 = vpop.f32.mrf.mxu0 }
 0x779   :  { %23420 = vst [vmem:[#allocation105_spill] sm:$0xff] %v21106_v45  ;;  %11383 = vperm.xlu0 %13765, %v11179_v28   ;;  %11388 = vperm.xlu1 %13766, %v11180_v11   ;;  %v15241_v11 = vld [vmem:[%s22492_s1 + $0x1d2c] ss:$40 sps:$4 sm:$0xff]  }
 0x77a   :  { %v9895_v51 = vpop.f32.mrf.mxu1  ;;  %10086 = vmatmul.mubr.bf16.gmra.mxu1 %v15227_v6  ;;  %v10568_v50 = vpop.f32.mrf.mxu0  ;;  %10759 = vmatmul.mubr.bf16.gmra.mxu0 %v15232_v27  ;;  %v15239_v27 = vld [vmem:[%s22492_s1 + $0x1d28] ss:$40 sps:$4 sm:$0xff]  }
 0x77b   :  { %v21123_v13 = vadd.f32 %v9895_v51, %v23422_v47  ;;  %v21126_v31 = vadd.f32 %v10568_v50, %v20417_v26  ;;  %10093 = vmatprep.mubr.bf16.mxu1 %v15235_v25  ;;  %13518 = vmatprep.mubr.msk.bf16.mxu0 %vm6521_vm1, %v15236_v39  ;;  %v15238_v26 = vld [vmem:[%s22492_s1 + $0x16a0] ss:$40 sps:$4 sm:$0xff]  }
 0x77c   :  { %v9897_v6 = vpop.f32.mrf.mxu1  ;;  %v10570_v55 = vpop.f32.mrf.mxu0  ;;  %v11177_v25 = vld [vmem:[%s22493_s2 + $0x120] sm:$0xff]  ;;  %v11178_v39 = vld [vmem:[%s22493_s2 + $0x128] sm:$0xff] }
 0x77d   :  { %23423 = vst [vmem:[#allocation107_spill] sm:$0xff] %v21126_v31  ;;  %v23425_v51 = vld [vmem:[#allocation2_spill] sm:$0xff]  ;;  %v15242_v6 = vld [vmem:[%s22492_s1 + $0x16f4] ss:$40 sps:$4 sm:$0xff]   ;;  %11373 = vperm.xlu0 %13765, %v11177_v25   ;;  %11378 = vperm.xlu1 %13766, %v11178_v39  }
 0x77e   :  { %v9898_v45 = vpop.f32.mrf.mxu1  ;;  %v10571_v47 = vpop.f32.mrf.mxu0  ;;  %v23434_v31 = vld [vmem:[#allocation5_spill] sm:$0xff] }
 0x77f   :  { %v21144_v50 = vadd.f32 %v9898_v45, %v23425_v51  ;;  %v21147_v28 = vadd.f32 %v10571_v47, %v20432_v44  ;;  %v11175_v44 = vld [vmem:[%s22493_s2 + $0x110] sm:$0xff]  ;;  %v11176_v47 = vld [vmem:[%s22493_s2 + $0x118] sm:$0xff] }
 0x780   :  { %v9900_v55 = vpop.f32.mrf.mxu1  ;;  %v10573_v40 = vpop.f32.mrf.mxu0 }
 0x781   :  { %23426 = vst [vmem:[#allocation109_spill] sm:$0xff] %v21147_v28  ;;  %11363 = vperm.xlu0 %13765, %v11175_v44   ;;  %11368 = vperm.xlu1 %13766, %v11176_v47   ;;  %v15247_v47 = vld [vmem:[%s22492_s1 + $0x1d7c] ss:$40 sps:$4 sm:$0xff]  }
 0x782   :  { %v9903_v45 = vpop.f32.mrf.mxu1  ;;  %10094 = vmatmul.mubr.bf16.gmra.mxu1 %v15233_v1  ;;  %v10576_v51 = vpop.f32.mrf.mxu0  ;;  %10767 = vmatmul.mubr.bf16.gmra.mxu0 %v15238_v26 }
 0x783   :  { %v21164_v55 = vadd.f32 %v9903_v45, %v23428_v22  ;;  %v21167_v40 = vadd.f32 %v10576_v51, %v20446_v60  ;;  %10101 = vmatprep.mubr.bf16.mxu1 %v15241_v11  ;;  %13519 = vmatprep.mubr.msk.bf16.mxu0 %vm6521_vm1, %v15242_v6  ;;  %v15244_v60 = vld [vmem:[%s22492_s1 + $0x16f0] ss:$40 sps:$4 sm:$0xff]   ;;  %v11173_v11 = vld [vmem:[%s22493_s2 + $0x100] sm:$0xff]  ;;  %v11174_v6 = vld [vmem:[%s22493_s2 + $0x108] sm:$0xff] }
 0x784   :  { %v9905_v1 = vpop.f32.mrf.mxu1  ;;  %v10578_v25 = vpop.f32.mrf.mxu0  ;;  %v23431_v45 = vld [vmem:[#allocation4_spill] sm:$0xff] }
 0x785   :  { %23429 = vst [vmem:[#allocation111_spill] sm:$0xff] %v21167_v40  ;;  %v15248_v1 = vld [vmem:[%s22492_s1 + $0x1744] ss:$40 sps:$4 sm:$0xff]   ;;  %11353 = vperm.xlu0 %13765, %v11173_v11   ;;  %11358 = vperm.xlu1 %13766, %v11174_v6   ;;  %v15245_v6 = vld [vmem:[%s22492_s1 + $0x1d78] ss:$40 sps:$4 sm:$0xff]  }
 0x786   :  { %v9906_v28 = vpop.f32.mrf.mxu1  ;;  %v10579_v22 = vpop.f32.mrf.mxu0  ;;  %v23433_v40 = vld [vmem:[#allocation134_spill] sm:$0xff] }
 0x787   :  { %v21185_v51 = vadd.f32 %v9906_v28, %v23431_v45  ;;  %v21188_v44 = vadd.f32 %v10579_v22, %v20461_v48  ;;  %v11189_v48 = vld [vmem:[%s22493_s2 + $0x180] sm:$0xff]  ;;  %v11190_v22 = vld [vmem:[%s22493_s2 + $0x188] sm:$0xff] }
 0x788   :  { %v9908_v25 = vpop.f32.mrf.mxu1  ;;  %v10581_v39 = vpop.f32.mrf.mxu0 }
 0x789   :  { %23432 = vst [vmem:[#allocation113_spill] sm:$0xff] %v21188_v44  ;;  %11433 = vperm.xlu0 %13765, %v11189_v48   ;;  %11438 = vperm.xlu1 %13766, %v11190_v22   ;;  %v15253_v22 = vld [vmem:[%s22492_s1 + $0x1dcc] ss:$40 sps:$4 sm:$0xff]  }
 0x78a   :  { %v9911_v28 = vpop.f32.mrf.mxu1  ;;  %10102 = vmatmul.mubr.bf16.gmra.mxu1 %v15239_v27  ;;  %v10584_v45 = vpop.f32.mrf.mxu0  ;;  %10775 = vmatmul.mubr.bf16.gmra.mxu0 %v15244_v60  ;;  %v23439_v44 = vld [vmem:[#allocation7_spill] sm:$0xff] }
 0x78b   :  { %v21205_v25 = vadd.f32 %v9911_v28, %v23434_v31  ;;  %v21208_v39 = vadd.f32 %v10584_v45, %v20475_v12  ;;  %10109 = vmatprep.mubr.bf16.mxu1 %v15247_v47  ;;  %13520 = vmatprep.mubr.msk.bf16.mxu0 %vm6521_vm1, %v15248_v1  ;;  %v15250_v12 = vld [vmem:[%s22492_s1 + $0x1740] ss:$40 sps:$4 sm:$0xff]   ;;  %v11610_v47 = vld [vmem:[%s22494_s4 + $0x70] sm:$0xff] }
 0x78c   :  { %v9913_v27 = vpop.f32.mrf.mxu1  ;;  %v10586_v11 = vpop.f32.mrf.mxu0  ;;  %v11608_v1 = vld [vmem:[%s22494_s4 + $0x60] sm:$0xff] }
 0x78d   :  { %23435 = vst [vmem:[#allocation115_spill] sm:$0xff] %v21208_v39  ;;  %v23436_v28 = vld [vmem:[#allocation6_spill] sm:$0xff]  ;;  %v15254_v27 = vld [vmem:[%s22492_s1 + $0x1794] ss:$40 sps:$4 sm:$0xff]   ;;  %11683 = vperm.xlu0 %13765, %v11610_v47   ;;  %11673 = vperm.xlu1 %13766, %v11608_v1   ;;  %v15251_v39 = vld [vmem:[%s22492_s1 + $0x1dc8] ss:$40 sps:$4 sm:$0xff]  }
 0x78e   :  { %v9914_v26 = vpop.f32.mrf.mxu1  ;;  %v10587_v31 = vpop.f32.mrf.mxu0  ;;  %v23441_v1 = vld [vmem:[#allocation41_spill] sm:$0xff] }
 0x78f   :  { %v21226_v45 = vadd.f32 %v9914_v26, %v23436_v28  ;;  %v21229_v48 = vadd.f32 %v10587_v31, %v20490_v10  ;;  %v11609_v10 = vld [vmem:[%s22494_s4 + $0x68] sm:$0xff]  ;;  %v11606_v31 = vld [vmem:[%s22494_s4 + $0x50] sm:$0xff] }
 0x790   :  { %v9916_v11 = vpop.f32.mrf.mxu1  ;;  %v10589_v60 = vpop.f32.mrf.mxu0 }
 0x791   :  { %23437 = vst [vmem:[#allocation117_spill] sm:$0xff] %v21229_v48  ;;  %11678 = vperm.xlu0 %13765, %v11609_v10   ;;  %11663 = vperm.xlu1 %13766, %v11606_v31   ;;  %v15259_v31 = vld [vmem:[%s22492_s1 + $0x1e1c] ss:$40 sps:$4 sm:$0xff]  }
 0x792   :  { %v9919_v26 = vpop.f32.mrf.mxu1  ;;  %10110 = vmatmul.mubr.bf16.gmra.mxu1 %v15245_v6  ;;  %v10592_v28 = vpop.f32.mrf.mxu0  ;;  %10783 = vmatmul.mubr.bf16.gmra.mxu0 %v15250_v12  ;;  %v23440_v12 = vld [vmem:[#allocation90_spill] sm:$0xff] }
 0x793   :  { %v21246_v11 = vadd.f32 %v9919_v26, %v23439_v44  ;;  %v10593_v60 = vadd.f32 %v10592_v28, %v20504_v49  ;;  %10117 = vmatprep.mubr.bf16.mxu1 %v15253_v22  ;;  %13521 = vmatprep.mubr.msk.bf16.mxu0 %vm6521_vm1, %v15254_v27  ;;  %v23442_v2 = vmax.f32 %v23440_v12, %v23441_v1  ;;  %v15256_v49 = vld [vmem:[%s22492_s1 + $0x1790] ss:$40 sps:$4 sm:$0xff]   ;;  %v11604_v27 = vld [vmem:[%s22494_s4 + $0x40] sm:$0xff] }
 0x794   :  { %v9921_v47 = vpop.f32.mrf.mxu1  ;;  %v10594_v6 = vpop.f32.mrf.mxu0  ;;  %v11607_v22 = vld [vmem:[%s22494_s4 + $0x58] sm:$0xff]  ;;  %v23444_v12 = vmax.f32 %v19750_v41, %v20377_v16 }
 0x795   :  { %v21253_v48 = vmax.f32 %v23442_v2, %v10593_v60  ;;  %v23443_v2 = vld [vmem:[#allocation8_spill] sm:$0xff]  ;;  %v15260_v60 = vld [vmem:[%s22492_s1 + $0x17e4] ss:$40 sps:$4 sm:$0xff]   ;;  %11668 = vperm.xlu0 %13765, %v11607_v22   ;;  %11653 = vperm.xlu1 %13766, %v11604_v27  }
 0x796   :  { %v9922_v44 = vpop.f32.mrf.mxu1  ;;  %v10595_v26 = vpop.f32.mrf.mxu0 }
 0x797   :  { %v21268_v28 = vadd.f32 %v9922_v44, %v23443_v2  ;;  %v10596_v10 = vadd.f32 %v10595_v26, %v20519_v34  ;;  %v11605_v26 = vld [vmem:[%s22494_s4 + $0x48] sm:$0xff]  ;;  %v11602_v2 = vld [vmem:[%s22494_s4 + $0x30] sm:$0xff] }
 0x798   :  { %v9924_v47 = vpop.f32.mrf.mxu1  ;;  %v10597_v6 = vpop.f32.mrf.mxu0 }
 0x799   :  { %v21280_v1 = vmax.f32 %v23444_v12, %v10596_v10  ;;  %v23445_v47 = vld [vmem:[#allocation9_spill] sm:$0xff]  ;;  %11658 = vperm.xlu0 %13765, %v11605_v26   ;;  %11643 = vperm.xlu1 %13766, %v11602_v2  }
 0x79a   :  { %v9927_v44 = vpop.f32.mrf.mxu1  ;;  %10118 = vmatmul.mubr.bf16.gmra.mxu1 %v15251_v39  ;;  %v10600_v34 = vpop.f32.mrf.mxu0  ;;  %10791 = vmatmul.mubr.bf16.gmra.mxu0 %v15256_v49  ;;  %v23446_v39 = vld [vmem:[#allocation201_spill] sm:$0xff] }
 0x79b   :  { %v21289_v22 = vadd.f32 %v9927_v44, %v23445_v47  ;;  %v10601_v27 = vadd.f32 %v10600_v34, %v20533_v42  ;;  %10125 = vmatprep.mubr.bf16.mxu1 %v15259_v31  ;;  %13522 = vmatprep.mubr.msk.bf16.mxu0 %vm6521_vm1, %v15260_v60  ;;  %v23447_v49 = vld [vmem:[#allocation177_spill] sm:$0xff]  ;;  %v15262_v42 = vld [vmem:[%s22492_s1 + $0x17e0] ss:$40 sps:$4 sm:$0xff]  }
 0x79c   :  { %v9929_v41 = vpop.f32.mrf.mxu1  ;;  %v10602_v16 = vpop.f32.mrf.mxu0  ;;  %v23448_v10 = vmax.f32 %v23446_v39, %v23447_v49  ;;  %v15257_v12 = vld [vmem:[%s22492_s1 + $0x1e18] ss:$40 sps:$4 sm:$0xff]   ;;  %v23450_v49 = vmax.f32 %v19775_v38, %v20406_v8 }
 0x79d   :  { %v11603_v31 = vld [vmem:[%s22494_s4 + $0x38] sm:$0xff]  ;;  %v11600_v60 = vld [vmem:[%s22494_s4 + $0x20] sm:$0xff] }
 0x79e   :  { %v21296_v6 = vmax.f32 %v23448_v10, %v10601_v27  ;;  %v9930_v44 = vpop.f32.mrf.mxu1  ;;  %v10603_v47 = vpop.f32.mrf.mxu0  ;;  %v23449_v34 = vld [vmem:[#allocation10_spill] sm:$0xff]  ;;  %v15265_v27 = vld [vmem:[%s22492_s1 + $0x1e6c] ss:$40 sps:$4 sm:$0xff]   ;;  %11648 = vperm.xlu0 %13765, %v11603_v31   ;;  %11633 = vperm.xlu1 %13766, %v11600_v60  }
 0x79f   :  { %v21311_v26 = vadd.f32 %v9930_v44, %v23449_v34  ;;  %v10604_v2 = vadd.f32 %v10603_v47, %v20548_v58  ;;  %v15266_v41 = vld [vmem:[%s22492_s1 + $0x1834] ss:$40 sps:$4 sm:$0xff]   ;;  %v11601_v47 = vld [vmem:[%s22494_s4 + $0x28] sm:$0xff] }
 0x7a0   :  { %v9932_v16 = vpop.f32.mrf.mxu1  ;;  %v10605_v39 = vpop.f32.mrf.mxu0  ;;  %v11598_v34 = vld [vmem:[%s22494_s4 + $0x10] sm:$0xff] }
 0x7a1   :  { %v21323_v10 = vmax.f32 %v23450_v49, %v10604_v2  ;;  %v23451_v16 = vld [vmem:[#allocation11_spill] sm:$0xff] }
 0x7a2   :  { %v9935_v44 = vpop.f32.mrf.mxu1  ;;  %10126 = vmatmul.mubr.bf16.gmra.mxu1 %v15257_v12  ;;  %v10608_v58 = vpop.f32.mrf.mxu0  ;;  %10799 = vmatmul.mubr.bf16.gmra.mxu0 %v15262_v42  ;;  %v23452_v12 = vld [vmem:[#allocation92_spill] sm:$0xff]  ;;  %v23453_v42 = vld [vmem:[#allocation43_spill] sm:$0xff] }
 0x7a3   :  { %v21332_v31 = vadd.f32 %v9935_v44, %v23451_v16  ;;  %v10609_v60 = vadd.f32 %v10608_v58, %v20562_v36  ;;  %10133 = vmatprep.mubr.bf16.mxu1 %v15265_v27  ;;  %13523 = vmatprep.mubr.msk.bf16.mxu0 %vm6521_vm1, %v15266_v41  ;;  %v23454_v2 = vmax.f32 %v23452_v12, %v23453_v42  ;;  %v15263_v49 = vld [vmem:[%s22492_s1 + $0x1e68] ss:$40 sps:$4 sm:$0xff]   ;;  %v11599_v27 = vld [vmem:[%s22494_s4 + $0x18] sm:$0xff]  ;;  %v11596_v41 = vld [vmem:[%s22494_s4] sm:$0xff] }
 0x7a4   :  { %v9937_v38 = vpop.f32.mrf.mxu1  ;;  %v10610_v8 = vpop.f32.mrf.mxu0  ;;  %11638 = vperm.xlu0 %13765, %v11601_v47   ;;  %11623 = vperm.xlu1 %13766, %v11598_v34   ;;  %v15268_v36 = vld [vmem:[%s22492_s1 + $0x1830] ss:$40 sps:$4 sm:$0xff]   ;;  %v23457_v42 = vmax.f32 %v19800_v9, %v20435_v19 }
 0x7a5   :  { %v21339_v39 = vmax.f32 %v23454_v2, %v10609_v60  ;;  %v23456_v58 = vld [vmem:[#allocation12_spill] sm:$0xff]  ;;  %v15271_v60 = vld [vmem:[%s22492_s1 + $0x1ebc] ss:$40 sps:$4 sm:$0xff]  }
 0x7a6   :  { %v9938_v44 = vpop.f32.mrf.mxu1  ;;  %v10611_v16 = vpop.f32.mrf.mxu0  ;;  %v15272_v38 = vld [vmem:[%s22492_s1 + $0x1884] ss:$40 sps:$4 sm:$0xff]  }
 0x7a7   :  { %23455 = vst [vmem:[#allocation119_spill] sm:$0xff] %v21339_v39  ;;  %v21354_v47 = vadd.f32 %v9938_v44, %v23456_v58  ;;  %v10612_v34 = vadd.f32 %v10611_v16, %v20577_v5  ;;  %v11597_v16 = vld [vmem:[%s22494_s4 + $0x8] sm:$0xff]  ;;  %v12093_v58 = vld [vmem:[%s22495_s6 + $0x50] sm:$0xf] }
 0x7a8   :  { %v9940_v8 = vpop.f32.mrf.mxu1  ;;  %v10613_v12 = vpop.f32.mrf.mxu0  ;;  %11628 = vperm.xlu0 %13765, %v11599_v27   ;;  %11613 = vperm.xlu1 %13766, %v11596_v41  }
 0x7a9   :  { %v21366_v2 = vmax.f32 %v23457_v42, %v10612_v34  ;;  %v23459_v8 = vld [vmem:[#allocation13_spill] sm:$0xff] }
 0x7aa   :  { %v9943_v44 = vpop.f32.mrf.mxu1  ;;  %10134 = vmatmul.mubr.bf16.gmra.mxu1 %v15263_v49  ;;  %v10616_v5 = vpop.f32.mrf.mxu0  ;;  %10807 = vmatmul.mubr.bf16.gmra.mxu0 %v15268_v36  ;;  %v23460_v49 = vld [vmem:[#allocation202_spill] sm:$0xff]  ;;  %v23461_v36 = vld [vmem:[#allocation179_spill] sm:$0xff] }
 0x7ab   :  { %23458 = vst [vmem:[#allocation121_spill] sm:$0xff] %v21366_v2  ;;  %v21375_v27 = vadd.f32 %v9943_v44, %v23459_v8  ;;  %v10617_v41 = vadd.f32 %v10616_v5, %v20591_v4  ;;  %10141 = vmatprep.mubr.bf16.mxu1 %v15271_v60  ;;  %13524 = vmatprep.mubr.msk.bf16.mxu0 %vm6521_vm1, %v15272_v38  ;;  %v15269_v42 = vld [vmem:[%s22492_s1 + $0x1eb8] ss:$40 sps:$4 sm:$0xff]   ;;  %v12092_v38 = vld [vmem:[%s22495_s6 + $0x48] sm:$0xff] }
 0x7ac   :  { %v9945_v9 = vpop.f32.mrf.mxu1  ;;  %v10618_v19 = vpop.f32.mrf.mxu0  ;;  %11618 = vperm.xlu0 %13765, %v11597_v16   ;;  %12146 = vperm.xlu1 %13766, %v12093_v58   ;;  %v23462_v34 = vmax.f32 %v23460_v49, %v23461_v36  ;;  %v15274_v4 = vld [vmem:[%s22492_s1 + $0x1880] ss:$40 sps:$4 sm:$0xff]  }
 0x7ad   :  { %v12091_v60 = vld [vmem:[%s22495_s6 + $0x40] sm:$0xff]  ;;  %v15278_v9 = vld [vmem:[%s22492_s1 + $0x18d4] ss:$40 sps:$4 sm:$0xff]  }
 0x7ae   :  { %v21382_v12 = vmax.f32 %v23462_v34, %v10617_v41  ;;  %v9946_v44 = vpop.f32.mrf.mxu1  ;;  %v10619_v8 = vpop.f32.mrf.mxu0  ;;  %v23464_v5 = vld [vmem:[#allocation14_spill] sm:$0xff]  ;;  %v15277_v41 = vld [vmem:[%s22492_s1 + $0x1f0c] ss:$40 sps:$4 sm:$0xff]   ;;  %v23466_v34 = vld [vmem:[#allocation45_spill] sm:$0xff] }
 0x7af   :  { %v21397_v16 = vadd.f32 %v9946_v44, %v23464_v5  ;;  %v10620_v58 = vadd.f32 %v10619_v8, %v20606_v17  ;;  %v23465_v36 = vld [vmem:[#allocation94_spill] sm:$0xff]  ;;  %v12089_v8 = vld [vmem:[%s22495_s6 + $0x30] sm:$0xff]  ;;  %v12090_v5 = vld [vmem:[%s22495_s6 + $0x38] sm:$0xff] }
 0x7b0   :  { %23463 = vst [vmem:[#allocation123_spill] sm:$0xff] %v21382_v12  ;;  %v9948_v19 = vpop.f32.mrf.mxu1  ;;  %v10621_v49 = vpop.f32.mrf.mxu0  ;;  %12136 = vperm.xlu0 %13765, %v12091_v60   ;;  %12141 = vperm.xlu1 %13766, %v12092_v38   ;;  %v23467_v12 = vmax.f32 %v23465_v36, %v23466_v34  ;;  %v15275_v34 = vld [vmem:[%s22492_s1 + $0x1f08] ss:$40 sps:$4 sm:$0xff]  }
 0x7b1   :  { %v23469_v19 = vld [vmem:[#allocation15_spill] sm:$0xff] }
 0x7b2   :  { %v21409_v2 = vmax.f32 %v23467_v12, %v10620_v58  ;;  %v9951_v44 = vpop.f32.mrf.mxu1  ;;  %10142 = vmatmul.mubr.bf16.gmra.mxu1 %v15269_v42  ;;  %v10624_v17 = vpop.f32.mrf.mxu0  ;;  %10815 = vmatmul.mubr.bf16.gmra.mxu0 %v15274_v4  ;;  %v23470_v4 = vld [vmem:[#allocation203_spill] sm:$0xff]  ;;  %v23471_v58 = vld [vmem:[#allocation181_spill] sm:$0xff] }
 0x7b3   :  { %v21418_v60 = vadd.f32 %v9951_v44, %v23469_v19  ;;  %v10625_v38 = vadd.f32 %v10624_v17, %v20620_v7  ;;  %10149 = vmatprep.mubr.bf16.mxu1 %v15277_v41  ;;  %13525 = vmatprep.mubr.msk.bf16.mxu0 %vm6521_vm1, %v15278_v9  ;;  %v23472_v49 = vmax.f32 %v23470_v4, %v23471_v58  ;;  %v15280_v7 = vld [vmem:[%s22492_s1 + $0x18d0] ss:$40 sps:$4 sm:$0xff]   ;;  %v12087_v41 = vld [vmem:[%s22495_s6 + $0x20] sm:$0xff]  ;;  %v12088_v9 = vld [vmem:[%s22495_s6 + $0x28] sm:$0xff] }
 0x7b4   :  { %23468 = vst [vmem:[#allocation125_spill] sm:$0xff] %v21409_v2  ;;  %v9953_v12 = vpop.f32.mrf.mxu1  ;;  %v10626_v42 = vpop.f32.mrf.mxu0  ;;  %12126 = vperm.xlu0 %13765, %v12089_v8   ;;  %12131 = vperm.xlu1 %13766, %v12090_v5   ;;  %v23474_v17 = vld [vmem:[#allocation16_spill] sm:$0xff]  ;;  %v23476_v58 = vld [vmem:[#allocation47_spill] sm:$0xff] }
 0x7b5   :  { %v21425_v36 = vmax.f32 %v23472_v49, %v10625_v38  ;;  %v15281_v38 = vld [vmem:[%s22492_s1 + $0x1924] ss:$40 sps:$4 sm:$0xff]   ;;  %v23475_v4 = vld [vmem:[#allocation96_spill] sm:$0xff] }
 0x7b6   :  { %v9954_v44 = vpop.f32.mrf.mxu1  ;;  %v10627_v19 = vpop.f32.mrf.mxu0  ;;  %v23477_v49 = vmax.f32 %v23475_v4, %v23476_v58 }
 0x7b7   :  { %23473 = vst [vmem:[#allocation127_spill] sm:$0xff] %v21425_v36  ;;  %v21440_v8 = vadd.f32 %v9954_v44, %v23474_v17  ;;  %v10628_v5 = vadd.f32 %v10627_v19, %v20635_v52  ;;  %v12085_v52 = vld [vmem:[%s22495_s6 + $0x10] sm:$0xff]  ;;  %v12086_v44 = vld [vmem:[%s22495_s6 + $0x18] sm:$0xff] }
 0x7b8   :  { %v9956_v12 = vpop.f32.mrf.mxu1  ;;  %v10629_v42 = vpop.f32.mrf.mxu0  ;;  %12116 = vperm.xlu0 %13765, %v12087_v41   ;;  %12121 = vperm.xlu1 %13766, %v12088_v9   ;;  %v23479_v19 = vld [vmem:[#allocation17_spill] sm:$0xff] }
 0x7b9   :  { %v21449_v36 = vmax.f32 %v23477_v49, %v10628_v5 }
 0x7ba   :  { %v9959_v2 = vpop.f32.mrf.mxu1  ;;  %10150 = vmatmul.mubr.bf16.gmra.mxu1 %v15275_v34  ;;  %v10632_v39 = vpop.f32.mrf.mxu0  ;;  %10823 = vmatmul.mubr.bf16.gmra.mxu0 %v15280_v7  ;;  %v23480_v34 = vld [vmem:[#allocation204_spill] sm:$0xff]  ;;  %v23481_v7 = vld [vmem:[#allocation183_spill] sm:$0xff] }
 0x7bb   :  { %23478 = vst [vmem:[#allocation129_spill] sm:$0xff] %v21449_v36  ;;  %v21458_v41 = vadd.f32 %v9959_v2, %v23479_v19  ;;  %v10633_v9 = vadd.f32 %v10632_v39, %v20649_v24  ;;  %13526 = vmatprep.mubr.msk.bf16.mxu0 %vm6521_vm1, %v15281_v38  ;;  %v23482_v12 = vmax.f32 %v23480_v34, %v23481_v7  ;;  %v15283_v2 = vld [vmem:[%s22492_s1 + $0x1920] ss:$40 sps:$4 sm:$0xff]  }
 0x7bc   :  { %v9961_v17 = vpop.f32.mrf.mxu1  ;;  %v10634_v5 = vpop.f32.mrf.mxu0  ;;  %12106 = vperm.xlu0 %13765, %v12085_v52   ;;  %12111 = vperm.xlu1 %13766, %v12086_v44   ;;  %v12083_v24 = vld [vmem:[%s22495_s6] sm:$0xff]  ;;  %v12084_v39 = vld [vmem:[%s22495_s6 + $0x8] sm:$0xff]  ;;  %v15284_v44 = vld [vmem:[%s22492_s1 + $0x1974] ss:$40 sps:$4 sm:$0xff]  }
 0x7bd   :  { %v21465_v42 = vmax.f32 %v23482_v12, %v10633_v9  ;;  %v23484_v38 = vld [vmem:[#allocation18_spill] sm:$0xff]  ;;  %v23486_v5 = vld [vmem:[#allocation49_spill] sm:$0xff] }
 0x7be   :  { %v9962_v4 = vpop.f32.mrf.mxu1  ;;  %v10635_v58 = vpop.f32.mrf.mxu0  ;;  %v23485_v17 = vld [vmem:[#allocation98_spill] sm:$0xff] }
 0x7bf   :  { %23483 = vst [vmem:[#allocation131_spill] sm:$0xff] %v21465_v42  ;;  %v21477_v49 = vadd.f32 %v9962_v4, %v23484_v38  ;;  %v10636_v52 = vadd.f32 %v10635_v58, %v20664_v57  ;;  %v23487_v34 = vmax.f32 %v23485_v17, %v23486_v5  ;;  %v12298_v57 = vld [vmem:[%s22496_s8] sm:$0xff]  ;;  %v12299_v4 = vld [vmem:[%s22496_s8 + $0x8] sm:$0x3] }
 0x7c0   :  { %v9964_v19 = vpop.f32.mrf.mxu1  ;;  %v10637_v9 = vpop.f32.mrf.mxu0  ;;  %12096 = vperm.xlu0 %13765, %v12083_v24   ;;  %12101 = vperm.xlu1 %13766, %v12084_v39   ;;  %v23489_v58 = vld [vmem:[#allocation19_spill] sm:$0xff] }
 0x7c1   :  { %v21486_v7 = vmax.f32 %v23487_v34, %v10636_v52  ;;  %v23491_v19 = vld [vmem:[#allocation185_spill] sm:$0xff] }
 0x7c2   :  { %v9967_v12 = vpop.f32.mrf.mxu1  ;;  %v10640_v42 = vpop.f32.mrf.mxu0  ;;  %10831 = vmatmul.mubr.bf16.gmra.mxu0 %v15283_v2  ;;  %v23490_v2 = vld [vmem:[#allocation205_spill] sm:$0xff] }
 0x7c3   :  { %23488 = vst [vmem:[#allocation133_spill] sm:$0xff] %v21486_v7  ;;  %v21495_v38 = vadd.f32 %v9967_v12, %v23489_v58  ;;  %v10641_v24 = vadd.f32 %v10640_v42, %v20678_v18  ;;  %13527 = vmatprep.mubr.msk.bf16.mxu0 %vm6521_vm1, %v15284_v44  ;;  %v23492_v9 = vmax.f32 %v23490_v2, %v23491_v19  ;;  %v15286_v12 = vld [vmem:[%s22492_s1 + $0x1970] ss:$40 sps:$4 sm:$0xff]   ;;  %v15287_v42 = vld [vmem:[%s22492_s1 + $0x19c4] ss:$40 sps:$4 sm:$0xff]  }
 0x7c4   :  { %v9969_v39 = vpop.f32.mrf.mxu1  ;;  %v10642_v52 = vpop.f32.mrf.mxu0  ;;  %12302 = vperm.xlu0 %13765, %v12298_v57   ;;  %12307 = vperm.xlu1 %13766, %v12299_v4   ;;  %v23494_v58 = vld [vmem:[#allocation20_spill] sm:$0xff] }
 0x7c5   :  { %v21502_v17 = vmax.f32 %v23492_v9, %v10641_v24  ;;  %v23495_v4 = vld [vmem:[#allocation100_spill] sm:$0xff]  ;;  %v23496_v24 = vld [vmem:[#allocation51_spill] sm:$0xff]  ;;  %v23499_v9 = vld [vmem:[#allocation21_spill] sm:$0xff] }
 0x7c6   :  { %v9970_v5 = vpop.f32.mrf.mxu1  ;;  %v10643_v34 = vpop.f32.mrf.mxu0  ;;  %v23497_v39 = vmax.f32 %v23495_v4, %v23496_v24  ;;  %v23504_v24 = vld [vmem:[#allocation22_spill] sm:$0xff] }
 0x7c7   :  { %23493 = vst [vmem:[#allocation135_spill] sm:$0xff] %v21502_v17  ;;  %v21508_v7 = vadd.f32 %v9970_v5, %v23494_v58  ;;  %v10644_v18 = vadd.f32 %v10643_v34, %v20696_v29  ;;  %v23500_v58 = vld [vmem:[#allocation206_spill] sm:$0xff] }
 0x7c8   :  { %v9972_v44 = vpop.f32.mrf.mxu1  ;;  %v10645_v57 = vpop.f32.mrf.mxu0 }
 0x7c9   :  { %v21517_v52 = vmax.f32 %v23497_v39, %v10644_v18  ;;  %v23501_v44 = vld [vmem:[#allocation187_spill] sm:$0xff] }
 0x7ca   :  { %v9975_v2 = vpop.f32.mrf.mxu1  ;;  %v10648_v19 = vpop.f32.mrf.mxu0  ;;  %10839 = vmatmul.mubr.bf16.gmra.mxu0 %v15286_v12  ;;  %v23502_v57 = vmax.f32 %v23500_v58, %v23501_v44  ;;  %v15289_v12 = vld [vmem:[%s22492_s1 + $0x19c0] ss:$40 sps:$4 sm:$0xff]  }
 0x7cb   :  { %23498 = vst [vmem:[#allocation137_spill] sm:$0xff] %v21517_v52  ;;  %v21520_v17 = vadd.f32 %v9975_v2, %v23499_v9  ;;  %v10649_v5 = vadd.f32 %v10648_v19, %v20716_v30  ;;  %13528 = vmatprep.mubr.msk.bf16.mxu0 %vm6521_vm1, %v15287_v42  ;;  %v15290_v42 = vld [vmem:[%s22492_s1 + $0x1a14] ss:$40 sps:$4 sm:$0xff]   ;;  %v23505_v9 = vld [vmem:[#allocation102_spill] sm:$0xff] }
 0x7cc   :  { %v9977_v29 = vpop.f32.mrf.mxu1  ;;  %v10650_v34 = vpop.f32.mrf.mxu0 }
 0x7cd   :  { %v21527_v36 = vmax.f32 %v23502_v57, %v10649_v5  ;;  %v23506_v5 = vld [vmem:[#allocation53_spill] sm:$0xff]  ;;  %v23509_v57 = vld [vmem:[#allocation23_spill] sm:$0xff] }
 0x7ce   :  { %v9978_v4 = vpop.f32.mrf.mxu1  ;;  %v10651_v18 = vpop.f32.mrf.mxu0  ;;  %v23507_v29 = vmax.f32 %v23505_v9, %v23506_v5  ;;  %v23514_v5 = vld [vmem:[#allocation24_spill] sm:$0xff] }
 0x7cf   :  { %23503 = vst [vmem:[#allocation138_spill] sm:$0xff] %v21527_v36  ;;  %v21533_v39 = vadd.f32 %v9978_v4, %v23504_v24  ;;  %v10652_v30 = vadd.f32 %v10651_v18, %v20737_v20  ;;  %v23510_v24 = vld [vmem:[#allocation207_spill] sm:$0xff] }
 0x7d0   :  { %v9980_v2 = vpop.f32.mrf.mxu1  ;;  %v10653_v19 = vpop.f32.mrf.mxu0 }
 0x7d1   :  { %v21542_v34 = vmax.f32 %v23507_v29, %v10652_v30  ;;  %v23511_v2 = vld [vmem:[#allocation189_spill] sm:$0xff] }
 0x7d2   :  { %v9983_v58 = vpop.f32.mrf.mxu1  ;;  %v10656_v44 = vpop.f32.mrf.mxu0  ;;  %10847 = vmatmul.mubr.bf16.gmra.mxu0 %v15289_v12  ;;  %v23512_v19 = vmax.f32 %v23510_v24, %v23511_v2  ;;  %v15292_v12 = vld [vmem:[%s22492_s1 + $0x1a10] ss:$40 sps:$4 sm:$0xff]  }
 0x7d3   :  { %23508 = vst [vmem:[#allocation139_spill] sm:$0xff] %v21542_v34  ;;  %v21545_v36 = vadd.f32 %v9983_v58, %v23509_v57  ;;  %v10657_v4 = vadd.f32 %v10656_v44, %v20757_v54  ;;  %13529 = vmatprep.mubr.msk.bf16.mxu0 %vm6521_vm1, %v15290_v42  ;;  %v15293_v42 = vld [vmem:[%s22492_s1 + $0x1a64] ss:$40 sps:$4 sm:$0xff]   ;;  %v23515_v57 = vld [vmem:[#allocation104_spill] sm:$0xff] }
 0x7d4   :  { %v9985_v20 = vpop.f32.mrf.mxu1  ;;  %v10658_v18 = vpop.f32.mrf.mxu0 }
 0x7d5   :  { %v21552_v52 = vmax.f32 %v23512_v19, %v10657_v4  ;;  %v23516_v4 = vld [vmem:[#allocation55_spill] sm:$0xff]  ;;  %v23519_v19 = vld [vmem:[#allocation25_spill] sm:$0xff] }
 0x7d6   :  { %v9986_v9 = vpop.f32.mrf.mxu1  ;;  %v10659_v30 = vpop.f32.mrf.mxu0  ;;  %v23517_v20 = vmax.f32 %v23515_v57, %v23516_v4  ;;  %v23524_v4 = vld [vmem:[#allocation26_spill] sm:$0xff] }
 0x7d7   :  { %23513 = vst [vmem:[#allocation140_spill] sm:$0xff] %v21552_v52  ;;  %v21558_v29 = vadd.f32 %v9986_v9, %v23514_v5  ;;  %v10660_v54 = vadd.f32 %v10659_v30, %v20778_v46  ;;  %v23520_v5 = vld [vmem:[#allocation208_spill] sm:$0xff] }
 0x7d8   :  { %v9988_v58 = vpop.f32.mrf.mxu1  ;;  %v10661_v44 = vpop.f32.mrf.mxu0 }
 0x7d9   :  { %v21567_v18 = vmax.f32 %v23517_v20, %v10660_v54  ;;  %v23521_v58 = vld [vmem:[#allocation191_spill] sm:$0xff] }
 0x7da   :  { %v9991_v24 = vpop.f32.mrf.mxu1  ;;  %v10664_v2 = vpop.f32.mrf.mxu0  ;;  %10855 = vmatmul.mubr.bf16.gmra.mxu0 %v15292_v12  ;;  %v23522_v44 = vmax.f32 %v23520_v5, %v23521_v58  ;;  %v15295_v12 = vld [vmem:[%s22492_s1 + $0x1a60] ss:$40 sps:$4 sm:$0xff]  }
 0x7db   :  { %23518 = vst [vmem:[#allocation141_spill] sm:$0xff] %v21567_v18  ;;  %v21570_v52 = vadd.f32 %v9991_v24, %v23519_v19  ;;  %v10665_v9 = vadd.f32 %v10664_v2, %v20798_v37  ;;  %13530 = vmatprep.mubr.msk.bf16.mxu0 %vm6521_vm1, %v15293_v42  ;;  %v15296_v42 = vld [vmem:[%s22492_s1 + $0x1ab4] ss:$40 sps:$4 sm:$0xff]   ;;  %v23525_v19 = vld [vmem:[#allocation106_spill] sm:$0xff] }
 0x7dc   :  { %v9993_v46 = vpop.f32.mrf.mxu1  ;;  %v10666_v30 = vpop.f32.mrf.mxu0 }
 0x7dd   :  { %v21577_v34 = vmax.f32 %v23522_v44, %v10665_v9  ;;  %v23526_v9 = vld [vmem:[#allocation57_spill] sm:$0xff]  ;;  %v23528_v44 = vld [vmem:[#allocation28_spill] sm:$0xff] }
 0x7de   :  { %v9994_v57 = vpop.f32.mrf.mxu1  ;;  %v10667_v54 = vpop.f32.mrf.mxu0  ;;  %v23527_v46 = vmax.f32 %v23525_v19, %v23526_v9  ;;  %v23533_v9 = vld [vmem:[#allocation30_spill] sm:$0xff] }
 0x7df   :  { %23523 = vst [vmem:[#allocation142_spill] sm:$0xff] %v21577_v34  ;;  %v21583_v20 = vadd.f32 %v9994_v57, %v23524_v4  ;;  %v10668_v37 = vadd.f32 %v10667_v54, %v20819_v15  ;;  %v23529_v4 = vld [vmem:[#allocation209_spill] sm:$0xff] }
 0x7e0   :  { %v9996_v24 = vpop.f32.mrf.mxu1  ;;  %v10669_v2 = vpop.f32.mrf.mxu0 }
 0x7e1   :  { %v21592_v30 = vmax.f32 %v23527_v46, %v10668_v37  ;;  %v23530_v24 = vld [vmem:[#allocation59_spill] sm:$0xff] }
 0x7e2   :  { %v9999_v5 = vpop.f32.mrf.mxu1  ;;  %v10672_v58 = vpop.f32.mrf.mxu0  ;;  %10863 = vmatmul.mubr.bf16.gmra.mxu0 %v15295_v12  ;;  %v23531_v2 = vmax.f32 %v23529_v4, %v23530_v24  ;;  %v15298_v12 = vld [vmem:[%s22492_s1 + $0x1ab0] ss:$40 sps:$4 sm:$0xff]  }
 0x7e3   :  { %v21595_v34 = vadd.f32 %v9999_v5, %v23528_v44  ;;  %v10673_v57 = vadd.f32 %v10672_v58, %v20839_v21  ;;  %13531 = vmatprep.mubr.msk.bf16.mxu0 %vm6521_vm1, %v15296_v42  ;;  %v15299_v42 = vld [vmem:[%s22492_s1 + $0x1b04] ss:$40 sps:$4 sm:$0xff]   ;;  %v23534_v44 = vld [vmem:[#allocation61_spill] sm:$0xff]  ;;  %v23537_v24 = vld [vmem:[#allocation32_spill] sm:$0xff] }
 0x7e4   :  { %v10001_v15 = vpop.f32.mrf.mxu1  ;;  %v10674_v54 = vpop.f32.mrf.mxu0 }
 0x7e5   :  { %v21602_v18 = vmax.f32 %v23531_v2, %v10673_v57  ;;  %v23535_v57 = vmax.f32 %v23355_v32, %v23534_v44  ;;  %v23542_v44 = vld [vmem:[#allocation34_spill] sm:$0xff] }
 0x7e6   :  { %v10002_v19 = vpop.f32.mrf.mxu1  ;;  %v10675_v37 = vpop.f32.mrf.mxu0 }
 0x7e7   :  { %23532 = vst [vmem:[#allocation143_spill] sm:$0xff] %v21602_v18  ;;  %v21608_v46 = vadd.f32 %v10002_v19, %v23533_v9  ;;  %v10676_v21 = vadd.f32 %v10675_v37, %v20860_v35  ;;  %v23538_v9 = vld [vmem:[#allocation27_spill] sm:$0xff] }
 0x7e8   :  { %v10004_v5 = vpop.f32.mrf.mxu1  ;;  %v10677_v58 = vpop.f32.mrf.mxu0 }
 0x7e9   :  { %v21617_v15 = vmax.f32 %v23535_v57, %v10676_v21  ;;  %v23539_v5 = vld [vmem:[#allocation63_spill] sm:$0xff] }
 0x7ea   :  { %v10007_v54 = vpop.f32.mrf.mxu1  ;;  %v10680_v4 = vpop.f32.mrf.mxu0  ;;  %10871 = vmatmul.mubr.bf16.gmra.mxu0 %v15298_v12  ;;  %v23540_v58 = vmax.f32 %v23538_v9, %v23539_v5  ;;  %v15301_v12 = vld [vmem:[%s22492_s1 + $0x1b00] ss:$40 sps:$4 sm:$0xff]  }
 0x7eb   :  { %23536 = vst [vmem:[#allocation144_spill] sm:$0xff] %v21617_v15  ;;  %v21620_v2 = vadd.f32 %v10007_v54, %v23537_v24  ;;  %v10681_v19 = vadd.f32 %v10680_v4, %v20880_v23  ;;  %13532 = vmatprep.mubr.msk.bf16.mxu0 %vm6521_vm1, %v15299_v42  ;;  %v15302_v42 = vld [vmem:[%s22492_s1 + $0x1b54] ss:$40 sps:$4 sm:$0xff]   ;;  %v23543_v24 = vld [vmem:[#allocation110_spill] sm:$0xff] }
 0x7ec   :  { %v10009_v35 = vpop.f32.mrf.mxu1  ;;  %v10682_v37 = vpop.f32.mrf.mxu0 }
 0x7ed   :  { %v21627_v18 = vmax.f32 %v23540_v58, %v10681_v19  ;;  %v23544_v19 = vld [vmem:[#allocation65_spill] sm:$0xff]  ;;  %v23547_v58 = vld [vmem:[#allocation36_spill] sm:$0xff] }
 0x7ee   :  { %v10010_v32 = vpop.f32.mrf.mxu1  ;;  %v10683_v21 = vpop.f32.mrf.mxu0  ;;  %v23545_v35 = vmax.f32 %v23543_v24, %v23544_v19  ;;  %v23552_v19 = vld [vmem:[#allocation38_spill] sm:$0xff] }
 0x7ef   :  { %23541 = vst [vmem:[#allocation145_spill] sm:$0xff] %v21627_v18  ;;  %v21633_v57 = vadd.f32 %v10010_v32, %v23542_v44  ;;  %v10684_v23 = vadd.f32 %v10683_v21, %v20901_v3  ;;  %v23548_v44 = vld [vmem:[#allocation163_spill] sm:$0xff] }
 0x7f0   :  { %v10012_v54 = vpop.f32.mrf.mxu1  ;;  %v10685_v4 = vpop.f32.mrf.mxu0 }
 0x7f1   :  { %v21642_v37 = vmax.f32 %v23545_v35, %v10684_v23  ;;  %v23549_v54 = vld [vmem:[#allocation67_spill] sm:$0xff] }
 0x7f2   :  { %v10015_v9 = vpop.f32.mrf.mxu1  ;;  %v10688_v5 = vpop.f32.mrf.mxu0  ;;  %10879 = vmatmul.mubr.bf16.gmra.mxu0 %v15301_v12  ;;  %v23550_v4 = vmax.f32 %v23548_v44, %v23549_v54  ;;  %v15304_v12 = vld [vmem:[%s22492_s1 + $0x1b50] ss:$40 sps:$4 sm:$0xff]  }
 0x7f3   :  { %23546 = vst [vmem:[#allocation146_spill] sm:$0xff] %v21642_v37  ;;  %v21645_v18 = vadd.f32 %v10015_v9, %v23547_v58  ;;  %v10689_v32 = vadd.f32 %v10688_v5, %v20921_v59  ;;  %13533 = vmatprep.mubr.msk.bf16.mxu0 %vm6521_vm1, %v15302_v42  ;;  %v15305_v42 = vld [vmem:[%s22492_s1 + $0x1ba4] ss:$40 sps:$4 sm:$0xff]   ;;  %v23553_v58 = vld [vmem:[#allocation112_spill] sm:$0xff] }
 0x7f4   :  { %v10017_v3 = vpop.f32.mrf.mxu1  ;;  %v10690_v21 = vpop.f32.mrf.mxu0 }
 0x7f5   :  { %v21652_v15 = vmax.f32 %v23550_v4, %v10689_v32  ;;  %v23554_v32 = vld [vmem:[#allocation69_spill] sm:$0xff]  ;;  %v23557_v4 = vld [vmem:[#allocation40_spill] sm:$0xff] }
 0x7f6   :  { %v10018_v24 = vpop.f32.mrf.mxu1  ;;  %v10691_v23 = vpop.f32.mrf.mxu0  ;;  %v23555_v3 = vmax.f32 %v23553_v58, %v23554_v32  ;;  %v23562_v32 = vld [vmem:[#allocation42_spill] sm:$0xff] }
 0x7f7   :  { %23551 = vst [vmem:[#allocation147_spill] sm:$0xff] %v21652_v15  ;;  %v21658_v35 = vadd.f32 %v10018_v24, %v23552_v19  ;;  %v10692_v59 = vadd.f32 %v10691_v23, %v20942_v14  ;;  %v23558_v19 = vld [vmem:[#allocation29_spill] sm:$0xff] }
 0x7f8   :  { %v10020_v9 = vpop.f32.mrf.mxu1  ;;  %v10693_v5 = vpop.f32.mrf.mxu0 }
 0x7f9   :  { %v21667_v21 = vmax.f32 %v23555_v3, %v10692_v59  ;;  %v23559_v9 = vld [vmem:[#allocation71_spill] sm:$0xff] }
 0x7fa   :  { %v10023_v44 = vpop.f32.mrf.mxu1  ;;  %v10696_v54 = vpop.f32.mrf.mxu0  ;;  %10887 = vmatmul.mubr.bf16.gmra.mxu0 %v15304_v12  ;;  %v23560_v5 = vmax.f32 %v23558_v19, %v23559_v9  ;;  %v15307_v12 = vld [vmem:[%s22492_s1 + $0x1ba0] ss:$40 sps:$4 sm:$0xff]  }
 0x7fb   :  { %23556 = vst [vmem:[#allocation148_spill] sm:$0xff] %v21667_v21  ;;  %v21670_v15 = vadd.f32 %v10023_v44, %v23557_v4  ;;  %v10697_v24 = vadd.f32 %v10696_v54, %v20962_v33  ;;  %13534 = vmatprep.mubr.msk.bf16.mxu0 %vm6521_vm1, %v15305_v42  ;;  %v15308_v42 = vld [vmem:[%s22492_s1 + $0x1bf4] ss:$40 sps:$4 sm:$0xff]   ;;  %v23563_v4 = vld [vmem:[#allocation114_spill] sm:$0xff] }
 0x7fc   :  { %v10025_v14 = vpop.f32.mrf.mxu1  ;;  %v10698_v23 = vpop.f32.mrf.mxu0 }
 0x7fd   :  { %v21677_v37 = vmax.f32 %v23560_v5, %v10697_v24  ;;  %v23564_v24 = vld [vmem:[#allocation73_spill] sm:$0xff]  ;;  %v23567_v5 = vld [vmem:[#allocation44_spill] sm:$0xff] }
 0x7fe   :  { %v10026_v58 = vpop.f32.mrf.mxu1  ;;  %v10699_v59 = vpop.f32.mrf.mxu0  ;;  %v23565_v14 = vmax.f32 %v23563_v4, %v23564_v24 }
 0x7ff   :  { %23561 = vst [vmem:[#allocation149_spill] sm:$0xff] %v21677_v37  ;;  %v21683_v3 = vadd.f32 %v10026_v58, %v23562_v32  ;;  %v10700_v33 = vadd.f32 %v10699_v59, %v20983_v63  ;;  %v21699_v63 = vpop.permute.xlu0 %11343 }
 0x800   :  { %v10028_v44 = vpop.f32.mrf.mxu1  ;;  %v10701_v54 = vpop.f32.mrf.mxu0  ;;  %23568 = vst [vmem:[#allocation151_spill] sm:$0xff] %v21699_v63 }
 0x801   :  { %v21692_v23 = vmax.f32 %v23565_v14, %v10700_v33  ;;  %v23569_v44 = vld [vmem:[#allocation165_spill] sm:$0xff]  ;;  %v23570_v54 = vld [vmem:[#allocation75_spill] sm:$0xff]  ;;  %v21706_v33 = vpop.permute.xlu1 %11263 }
 0x802   :  { %v10031_v19 = vpop.f32.mrf.mxu1  ;;  %v10704_v9 = vpop.f32.mrf.mxu0  ;;  %10895 = vmatmul.mubr.bf16.gmra.mxu0 %v15307_v12  ;;  %v23571_v21 = vmax.f32 %v23569_v44, %v23570_v54  ;;  %v15310_v14 = vld [vmem:[%s22492_s1 + $0x1bf0] ss:$40 sps:$4 sm:$0xff]  }
 0x803   :  { %23566 = vst [vmem:[#allocation150_spill] sm:$0xff] %v21692_v23  ;;  %v21695_v37 = vadd.f32 %v10031_v19, %v23567_v5  ;;  %v10705_v58 = vadd.f32 %v10704_v9, %v21003_v56  ;;  %13535 = vmatprep.mubr.msk.bf16.mxu0 %vm6521_vm1, %v15308_v42  ;;  %v23573_v56 = vld [vmem:[#allocation46_spill] sm:$0xff]  ;;  %v21723_v54 = vpop.permute.xlu0 %11348  ;;  %v23581_v23 = vld [vmem:[#allocation31_spill] sm:$0xff] }
 0x804   :  { %v10033_v59 = vpop.f32.mrf.mxu1  ;;  %v10706_v32 = vpop.f32.mrf.mxu0  ;;  %v15311_v9 = vld [vmem:[%s22492_s1 + $0x1c44] ss:$40 sps:$4 sm:$0xff]   ;;  %23578 = vst [vmem:[#allocation108_spill] sm:$0xff] %v21723_v54 }
 0x805   :  { %v21704_v4 = vmax.f32 %v23571_v21, %v10705_v58  ;;  %v23574_v58 = vld [vmem:[#allocation116_spill] sm:$0xff]  ;;  %v23575_v59 = vld [vmem:[#allocation77_spill] sm:$0xff] }
 0x806   :  { %v10034_v24 = vpop.f32.mrf.mxu1  ;;  %v10707_v12 = vpop.f32.mrf.mxu0  ;;  %v23576_v32 = vmax.f32 %v23574_v58, %v23575_v59  ;;  %v23582_v58 = vld [vmem:[#allocation79_spill] sm:$0xff] }
 0x807   :  { %23572 = vst [vmem:[#allocation152_spill] sm:$0xff] %v21704_v4  ;;  %v21712_v19 = vadd.f32 %v10034_v24, %v23573_v56  ;;  %v10708_v42 = vadd.f32 %v10707_v12, %v21021_v43  ;;  %v23579_v24 = vld [vmem:[#allocation48_spill] sm:$0xff]  ;;  %v21730_v12 = vpop.permute.xlu1 %11268 }
 0x808   :  { %v10036_v5 = vpop.f32.mrf.mxu1  ;;  %v10709_v21 = vpop.f32.mrf.mxu0 }
 0x809   :  { %v21721_v44 = vmax.f32 %v23576_v32, %v10708_v42  ;;  %v23583_v42 = vmax.f32 %v23581_v23, %v23582_v58 }
 0x80a   :  { %v10039_v63 = vpop.f32.mrf.mxu1  ;;  %v10712_v4 = vpop.f32.mrf.mxu0  ;;  %10903 = vmatmul.mubr.bf16.gmra.mxu0 %v15310_v14  ;;  %v23585_v14 = vld [vmem:[#allocation50_spill] sm:$0xff] }
 0x80b   :  { %23577 = vst [vmem:[#allocation153_spill] sm:$0xff] %v21721_v44  ;;  %v21726_v56 = vadd.f32 %v10039_v63, %v23579_v24  ;;  %v10713_v43 = vadd.f32 %v10712_v4, %v21041_v62  ;;  %13536 = vmatprep.mubr.msk.bf16.mxu0 %vm6521_vm1, %v15311_v9  ;;  %v15313_v63 = vld [vmem:[%s22492_s1 + $0x1c40] ss:$40 sps:$4 sm:$0xff]   ;;  %v15314_v4 = vld [vmem:[%s22492_s1 + $0x1c94] ss:$40 sps:$4 sm:$0xff]   ;;  %v21747_v9 = vpop.permute.xlu0 %11333 }
 0x80c   :  { %v10041_v5 = vpop.f32.mrf.mxu1  ;;  %v10714_v21 = vpop.f32.mrf.mxu0  ;;  %23587 = vst [vmem:[#allocation157_spill] sm:$0xff] %v21747_v9 }
 0x80d   :  { %23580 = vst [vmem:[#allocation154_spill] sm:$0xff] %v21726_v56  ;;  %v21735_v59 = vmax.f32 %v23583_v42, %v10713_v43  ;;  %v23588_v5 = vld [vmem:[#allocation118_spill] sm:$0xff]  ;;  %v23589_v21 = vld [vmem:[#allocation81_spill] sm:$0xff] }
 0x80e   :  { %v10042_v32 = vpop.f32.mrf.mxu1  ;;  %v10715_v54 = vpop.f32.mrf.mxu0  ;;  %v23590_v58 = vmax.f32 %v23588_v5, %v23589_v21 }
 0x80f   :  { %23584 = vst [vmem:[#allocation155_spill] sm:$0xff] %v21735_v59  ;;  %v21741_v24 = vadd.f32 %v10042_v32, %v23585_v14  ;;  %v10716_v62 = vadd.f32 %v10715_v54, %v21062_v0  ;;  %v21754_v59 = vpop.permute.xlu1 %11338  ;;  %v23593_v14 = vld [vmem:[#allocation52_spill] sm:$0xff] }
 0x810   :  { %v10044_v23 = vpop.f32.mrf.mxu1  ;;  %v10717_v43 = vpop.f32.mrf.mxu0  ;;  %23592 = vst [vmem:[#allocation159_spill] sm:$0xff] %v21754_v59 }
 0x811   :  { %23586 = vst [vmem:[#allocation156_spill] sm:$0xff] %v21741_v24  ;;  %v21752_v42 = vmax.f32 %v23590_v58, %v10716_v62  ;;  %v23595_v43 = vld [vmem:[#allocation167_spill] sm:$0xff]  ;;  %v21766_v62 = vpop.permute.xlu0 %11253 }
 0x812   :  { %v10047_v44 = vpop.f32.mrf.mxu1  ;;  %v10720_v32 = vpop.f32.mrf.mxu0  ;;  %10911 = vmatmul.mubr.bf16.gmra.mxu0 %v15313_v63  ;;  %v23596_v24 = vld [vmem:[#allocation83_spill] sm:$0xff]  ;;  %v23599_v63 = vld [vmem:[#allocation54_spill] sm:$0xff] }
 0x813   :  { %23591 = vst [vmem:[#allocation158_spill] sm:$0xff] %v21752_v42  ;;  %v21757_v0 = vadd.f32 %v10047_v44, %v23593_v14  ;;  %v10721_v54 = vadd.f32 %v10720_v32, %v21082_v61  ;;  %13537 = vmatprep.mubr.msk.bf16.mxu0 %vm6521_vm1, %v15314_v4  ;;  %v23597_v56 = vmax.f32 %v23595_v43, %v23596_v24  ;;  %v15316_v44 = vld [vmem:[%s22492_s1 + $0x1c90] ss:$40 sps:$4 sm:$0xff]   ;;  %v15317_v4 = vld [vmem:[%s22492_s1 + $0x1ce4] ss:$40 sps:$4 sm:$0xff]   ;;  %v21778_v24 = vpop.permute.xlu1 %11258 }
 0x814   :  { %v10049_v9 = vpop.f32.mrf.mxu1  ;;  %v10722_v23 = vpop.f32.mrf.mxu0  ;;  %v23601_v32 = vld [vmem:[#allocation120_spill] sm:$0xff] }
 0x815   :  { %23594 = vst [vmem:[#allocation160_spill] sm:$0xff] %v21757_v0  ;;  %v21764_v5 = vmax.f32 %v23597_v56, %v10721_v54  ;;  %v23602_v54 = vld [vmem:[#allocation85_spill] sm:$0xff] }
 0x816   :  { %v10050_v21 = vpop.f32.mrf.mxu1  ;;  %v10723_v58 = vpop.f32.mrf.mxu0  ;;  %v23603_v23 = vmax.f32 %v23601_v32, %v23602_v54 }
 0x817   :  { %23598 = vst [vmem:[#allocation161_spill] sm:$0xff] %v21764_v5  ;;  %v21772_v14 = vadd.f32 %v10050_v21, %v23599_v63  ;;  %v10724_v61 = vadd.f32 %v10723_v58, %v21103_v53  ;;  %v23605_v21 = vld [vmem:[#allocation56_spill] sm:$0xff]  ;;  %v21790_v58 = vpop.permute.xlu0 %11323 }
 0x818   :  { %v10052_v56 = vpop.f32.mrf.mxu1  ;;  %v10725_v9 = vpop.f32.mrf.mxu0  ;;  %23607 = vst [vmem:[#allocation168_spill] sm:$0xff] %v21790_v58 }
 0x819   :  { %23600 = vst [vmem:[#allocation162_spill] sm:$0xff] %v21772_v14  ;;  %v21783_v43 = vmax.f32 %v23603_v23, %v10724_v61  ;;  %v23608_v9 = vld [vmem:[#allocation33_spill] sm:$0xff]  ;;  %v23609_v14 = vld [vmem:[#allocation87_spill] sm:$0xff]  ;;  %v21797_v61 = vpop.permute.xlu1 %11328  ;;  %v23615_v23 = vld [vmem:[#allocation122_spill] sm:$0xff] }
 0x81a   :  { %v10055_v5 = vpop.f32.mrf.mxu1  ;;  %v10728_v42 = vpop.f32.mrf.mxu0  ;;  %10919 = vmatmul.mubr.bf16.gmra.mxu0 %v15316_v44  ;;  %v23610_v0 = vmax.f32 %v23608_v9, %v23609_v14  ;;  %23612 = vst [vmem:[#allocation172_spill] sm:$0xff] %v21797_v61  ;;  %v23621_v61 = vld [vmem:[#allocation169_spill] sm:$0xff] }
 0x81b   :  { %23604 = vst [vmem:[#allocation164_spill] sm:$0xff] %v21783_v43  ;;  %v21786_v63 = vadd.f32 %v10055_v5, %v23605_v21  ;;  %v10729_v53 = vadd.f32 %v10728_v42, %v21123_v13  ;;  %13538 = vmatprep.mubr.msk.bf16.mxu0 %vm6521_vm1, %v15317_v4  ;;  %v15319_v5 = vld [vmem:[%s22492_s1 + $0x1ce0] ss:$40 sps:$4 sm:$0xff]   ;;  %v23616_v21 = vld [vmem:[#allocation89_spill] sm:$0xff]  ;;  %v21814_v9 = vpop.permute.xlu0 %11243 }
 0x81c   :  { %v10057_v59 = vpop.f32.mrf.mxu1  ;;  %v10730_v56 = vpop.f32.mrf.mxu0  ;;  %v23613_v13 = vld [vmem:[#allocation58_spill] sm:$0xff] }
 0x81d   :  { %23606 = vst [vmem:[#allocation166_spill] sm:$0xff] %v21786_v63  ;;  %v21795_v32 = vmax.f32 %v23610_v0, %v10729_v53  ;;  %v15320_v59 = vld [vmem:[%s22492_s1 + $0x1d34] ss:$40 sps:$4 sm:$0xff]   ;;  %v23617_v53 = vmax.f32 %v23615_v23, %v23616_v21  ;;  %v23622_v23 = vld [vmem:[#allocation91_spill] sm:$0xff] }
 0x81e   :  { %v10058_v54 = vpop.f32.mrf.mxu1  ;;  %v10731_v44 = vpop.f32.mrf.mxu0 }
 0x81f   :  { %23611 = vst [vmem:[#allocation170_spill] sm:$0xff] %v21795_v32  ;;  %v21803_v42 = vadd.f32 %v10058_v54, %v23613_v13  ;;  %v10732_v4 = vadd.f32 %v10731_v44, %v21144_v50  ;;  %v23619_v54 = vld [vmem:[#allocation60_spill] sm:$0xff]  ;;  %v21821_v44 = vpop.permute.xlu1 %11248 }
 0x820   :  { %v10060_v14 = vpop.f32.mrf.mxu1  ;;  %v10733_v0 = vpop.f32.mrf.mxu0 }
 0x821   :  { %23614 = vst [vmem:[#allocation174_spill] sm:$0xff] %v21803_v42  ;;  %v21812_v56 = vmax.f32 %v23617_v53, %v10732_v4  ;;  %v23623_v4 = vmax.f32 %v23621_v61, %v23622_v23 }
 0x822   :  { %v10063_v32 = vpop.f32.mrf.mxu1  ;;  %v10736_v43 = vpop.f32.mrf.mxu0  ;;  %10927 = vmatmul.mubr.bf16.gmra.mxu0 %v15319_v5  ;;  %v23625_v5 = vld [vmem:[#allocation62_spill] sm:$0xff] }
 0x823   :  { %23618 = vst [vmem:[#allocation176_spill] sm:$0xff] %v21812_v56  ;;  %v21817_v13 = vadd.f32 %v10063_v32, %v23619_v54  ;;  %v10737_v50 = vadd.f32 %v10736_v43, %v21164_v55  ;;  %13539 = vmatprep.mubr.msk.bf16.mxu0 %vm6521_vm1, %v15320_v59  ;;  %v15322_v32 = vld [vmem:[%s22492_s1 + $0x1d30] ss:$40 sps:$4 sm:$0xff]   ;;  %v15323_v43 = vld [vmem:[%s22492_s1 + $0x1d84] ss:$40 sps:$4 sm:$0xff]   ;;  %v21838_v59 = vpop.permute.xlu0 %11313 }
 0x824   :  { %v10065_v14 = vpop.f32.mrf.mxu1  ;;  %v10738_v0 = vpop.f32.mrf.mxu0  ;;  %23627 = vst [vmem:[#allocation184_spill] sm:$0xff] %v21838_v59 }
 0x825   :  { %23620 = vst [vmem:[#allocation178_spill] sm:$0xff] %v21817_v13  ;;  %v21826_v21 = vmax.f32 %v23623_v4, %v10737_v50  ;;  %v23628_v14 = vld [vmem:[#allocation124_spill] sm:$0xff]  ;;  %v23629_v0 = vld [vmem:[#allocation93_spill] sm:$0xff]  ;;  %v23636_v13 = vld [vmem:[#allocation95_spill] sm:$0xff] }
 0x826   :  { %v10066_v53 = vpop.f32.mrf.mxu1  ;;  %v10739_v56 = vpop.f32.mrf.mxu0  ;;  %v23630_v23 = vmax.f32 %v23628_v14, %v23629_v0 }
 0x827   :  { %23624 = vst [vmem:[#allocation180_spill] sm:$0xff] %v21826_v21  ;;  %v21832_v54 = vadd.f32 %v10066_v53, %v23625_v5  ;;  %v10740_v55 = vadd.f32 %v10739_v56, %v21185_v51  ;;  %v21845_v21 = vpop.permute.xlu1 %11318  ;;  %v23633_v5 = vld [vmem:[#allocation64_spill] sm:$0xff] }
 0x828   :  { %v10068_v61 = vpop.f32.mrf.mxu1  ;;  %v10741_v50 = vpop.f32.mrf.mxu0  ;;  %23632 = vst [vmem:[#allocation188_spill] sm:$0xff] %v21845_v21 }
 0x829   :  { %23626 = vst [vmem:[#allocation182_spill] sm:$0xff] %v21832_v54  ;;  %v21843_v4 = vmax.f32 %v23630_v23, %v10740_v55  ;;  %v23635_v50 = vld [vmem:[#allocation35_spill] sm:$0xff]  ;;  %v21857_v55 = vpop.permute.xlu0 %11233 }
 0x82a   :  { %v10071_v58 = vpop.f32.mrf.mxu1  ;;  %v10744_v53 = vpop.f32.mrf.mxu0  ;;  %10935 = vmatmul.mubr.bf16.gmra.mxu0 %v15322_v32  ;;  %v23637_v59 = vmax.f32 %v23635_v50, %v23636_v13  ;;  %v23639_v32 = vld [vmem:[#allocation66_spill] sm:$0xff] }
 0x82b   :  { %23631 = vst [vmem:[#allocation186_spill] sm:$0xff] %v21843_v4  ;;  %v21848_v51 = vadd.f32 %v10071_v58, %v23633_v5  ;;  %v10745_v56 = vadd.f32 %v10744_v53, %v21205_v25  ;;  %13540 = vmatprep.mubr.msk.bf16.mxu0 %vm6521_vm1, %v15323_v43  ;;  %v15325_v58 = vld [vmem:[%s22492_s1 + $0x1d80] ss:$40 sps:$4 sm:$0xff]   ;;  %v21869_v13 = vpop.permute.xlu1 %11238 }
 0x82c   :  { %v10073_v54 = vpop.f32.mrf.mxu1  ;;  %v10746_v61 = vpop.f32.mrf.mxu0  ;;  %v23641_v53 = vld [vmem:[#allocation126_spill] sm:$0xff] }
 0x82d   :  { %23634 = vst [vmem:[#allocation190_spill] sm:$0xff] %v21848_v51  ;;  %v21855_v14 = vmax.f32 %v23637_v59, %v10745_v56  ;;  %v15326_v54 = vld [vmem:[%s22492_s1 + $0x1dd4] ss:$40 sps:$4 sm:$0xff]   ;;  %v23648_v51 = vld [vmem:[#allocation99_spill] sm:$0xff] }
 0x82e   :  { %v10074_v0 = vpop.f32.mrf.mxu1  ;;  %v10747_v23 = vpop.f32.mrf.mxu0  ;;  %v23642_v56 = vld [vmem:[#allocation97_spill] sm:$0xff] }
 0x82f   :  { %23638 = vst [vmem:[#allocation2_spill] sm:$0xff] %v21855_v14  ;;  %v21863_v5 = vadd.f32 %v10074_v0, %v23639_v32  ;;  %v10748_v25 = vadd.f32 %v10747_v23, %v21226_v45  ;;  %v23643_v61 = vmax.f32 %v23641_v53, %v23642_v56  ;;  %v23645_v0 = vld [vmem:[#allocation68_spill] sm:$0xff]  ;;  %v21881_v23 = vpop.permute.xlu0 %11303 }
 0x830   :  { %v10076_v43 = vpop.f32.mrf.mxu1  ;;  %v10749_v59 = vpop.f32.mrf.mxu0 }
 0x831   :  { %23640 = vst [vmem:[#allocation3_spill] sm:$0xff] %v21863_v5  ;;  %v21874_v50 = vmax.f32 %v23643_v61, %v10748_v25  ;;  %v23647_v59 = vld [vmem:[#allocation171_spill] sm:$0xff]  ;;  %v21888_v25 = vpop.permute.xlu1 %11308  ;;  %v23654_v61 = vld [vmem:[#allocation128_spill] sm:$0xff] }
 0x832   :  { %v10079_v14 = vpop.f32.mrf.mxu1  ;;  %v10752_v4 = vpop.f32.mrf.mxu0  ;;  %10943 = vmatmul.mubr.bf16.gmra.mxu0 %v15325_v58  ;;  %v23649_v21 = vmax.f32 %v23647_v59, %v23648_v51  ;;  %23651 = vst [vmem:[#allocation6_spill] sm:$0xff] %v21888_v25 }
 0x833   :  { %23644 = vst [vmem:[#allocation4_spill] sm:$0xff] %v21874_v50  ;;  %v21877_v32 = vadd.f32 %v10079_v14, %v23645_v0  ;;  %v10753_v45 = vadd.f32 %v10752_v4, %v21246_v11  ;;  %13541 = vmatprep.mubr.msk.bf16.mxu0 %vm6521_vm1, %v15326_v54  ;;  %v15328_v14 = vld [vmem:[%s22492_s1 + $0x1dd0] ss:$40 sps:$4 sm:$0xff]   ;;  %v23652_v11 = vld [vmem:[#allocation70_spill] sm:$0xff]  ;;  %v21905_v59 = vpop.permute.xlu0 %11223 }
 0x834   :  { %v10081_v5 = vpop.f32.mrf.mxu1  ;;  %v10754_v43 = vpop.f32.mrf.mxu0  ;;  %v23655_v0 = vld [vmem:[#allocation101_spill] sm:$0xff] }
 0x835   :  { %23646 = vst [vmem:[#allocation134_spill] sm:$0xff] %v21877_v32  ;;  %v21886_v53 = vmax.f32 %v23649_v21, %v10753_v45  ;;  %v15329_v5 = vld [vmem:[%s22492_s1 + $0x1e24] ss:$40 sps:$4 sm:$0xff]   ;;  %v23656_v45 = vmax.f32 %v23654_v61, %v23655_v0 }
 0x836   :  { %v10082_v56 = vpop.f32.mrf.mxu1  ;;  %v10755_v58 = vpop.f32.mrf.mxu0  ;;  %v23661_v61 = vld [vmem:[#allocation103_spill] sm:$0xff] }
 0x837   :  { %23650 = vst [vmem:[#allocation5_spill] sm:$0xff] %v21886_v53  ;;  %v21894_v4 = vadd.f32 %v10082_v56, %v23652_v11  ;;  %v10756_v54 = vadd.f32 %v10755_v58, %v21268_v28  ;;  %v23658_v56 = vld [vmem:[#allocation72_spill] sm:$0xff]  ;;  %v21912_v58 = vpop.permute.xlu1 %11228  ;;  %v23673_v32 = vld [vmem:[#allocation107_spill] sm:$0xff] }
 0x838   :  { %v10084_v51 = vpop.f32.mrf.mxu1  ;;  %v10757_v21 = vpop.f32.mrf.mxu0 }
 0x839   :  { %23653 = vst [vmem:[#allocation7_spill] sm:$0xff] %v21894_v4  ;;  %v21903_v43 = vmax.f32 %v23656_v45, %v10756_v54  ;;  %v23660_v4 = vld [vmem:[#allocation37_spill] sm:$0xff] }
 0x83a   :  { %v10087_v53 = vpop.f32.mrf.mxu1  ;;  %v10760_v50 = vpop.f32.mrf.mxu0  ;;  %10951 = vmatmul.mubr.bf16.gmra.mxu0 %v15328_v14  ;;  %v23662_v54 = vmax.f32 %v23660_v4, %v23661_v61  ;;  %v23664_v14 = vld [vmem:[#allocation192_spill] sm:$0xff] }
 0x83b   :  { %23657 = vst [vmem:[#allocation90_spill] sm:$0xff] %v21903_v43  ;;  %v21908_v11 = vadd.f32 %v10087_v53, %v23658_v56  ;;  %v10761_v28 = vadd.f32 %v10760_v50, %v21289_v22  ;;  %13542 = vmatprep.mubr.msk.bf16.mxu0 %vm6521_vm1, %v15329_v5  ;;  %v15331_v53 = vld [vmem:[%s22492_s1 + $0x1e20] ss:$40 sps:$4 sm:$0xff]   ;;  %v15332_v50 = vld [vmem:[%s22492_s1 + $0x1e74] ss:$40 sps:$4 sm:$0xff]   ;;  %v21929_v5 = vpop.permute.xlu0 %11293 }
 0x83c   :  { %v10089_v51 = vpop.f32.mrf.mxu1  ;;  %v10762_v21 = vpop.f32.mrf.mxu0 }
 0x83d   :  { %23659 = vst [vmem:[#allocation41_spill] sm:$0xff] %v21908_v11  ;;  %v21917_v0 = vmax.f32 %v23662_v54, %v10761_v28  ;;  %v23666_v51 = vld [vmem:[#allocation130_spill] sm:$0xff]  ;;  %v23667_v21 = vld [vmem:[#allocation105_spill] sm:$0xff] }
 0x83e   :  { %v10090_v45 = vpop.f32.mrf.mxu1  ;;  %v10763_v43 = vpop.f32.mrf.mxu0  ;;  %v23668_v61 = vmax.f32 %v23666_v51, %v23667_v21 }
 0x83f   :  { %23663 = vst [vmem:[#allocation8_spill] sm:$0xff] %v21917_v0  ;;  %v21923_v56 = vadd.f32 %v10090_v45, %v23664_v14  ;;  %v10764_v22 = vadd.f32 %v10763_v43, %v21311_v26  ;;  %v21936_v0 = vpop.permute.xlu1 %11298  ;;  %v23670_v14 = vld [vmem:[#allocation74_spill] sm:$0xff] }
 0x840   :  { %v10092_v4 = vpop.f32.mrf.mxu1  ;;  %v10765_v28 = vpop.f32.mrf.mxu0 }
 0x841   :  { %23665 = vst [vmem:[#allocation9_spill] sm:$0xff] %v21923_v56  ;;  %v21934_v54 = vmax.f32 %v23668_v61, %v10764_v22  ;;  %v23672_v28 = vld [vmem:[#allocation173_spill] sm:$0xff]  ;;  %v21948_v22 = vpop.permute.xlu0 %11213 }
 0x842   :  { %v10095_v11 = vpop.f32.mrf.mxu1  ;;  %v10768_v45 = vpop.f32.mrf.mxu0  ;;  %10959 = vmatmul.mubr.bf16.gmra.mxu0 %v15331_v53  ;;  %v23674_v42 = vmax.f32 %v23672_v28, %v23673_v32  ;;  %v23676_v53 = vld [vmem:[#allocation193_spill] sm:$0xff] }
 0x843   :  { %23669 = vst [vmem:[#allocation201_spill] sm:$0xff] %v21934_v54  ;;  %v21939_v26 = vadd.f32 %v10095_v11, %v23670_v14  ;;  %v10769_v43 = vadd.f32 %v10768_v45, %v21332_v31  ;;  %13543 = vmatprep.mubr.msk.bf16.mxu0 %vm6521_vm1, %v15332_v50  ;;  %v15334_v11 = vld [vmem:[%s22492_s1 + $0x1e70] ss:$40 sps:$4 sm:$0xff]   ;;  %v21960_v32 = vpop.permute.xlu1 %11218 }
 0x844   :  { %v10097_v56 = vpop.f32.mrf.mxu1  ;;  %v10770_v4 = vpop.f32.mrf.mxu0  ;;  %v23678_v45 = vld [vmem:[#allocation132_spill] sm:$0xff] }
 0x845   :  { %23671 = vst [vmem:[#allocation177_spill] sm:$0xff] %v21939_v26  ;;  %v21946_v51 = vmax.f32 %v23674_v42, %v10769_v43  ;;  %v15335_v56 = vld [vmem:[%s22492_s1 + $0x1ec4] ss:$40 sps:$4 sm:$0xff]   ;;  %v23679_v43 = vld [vmem:[#allocation109_spill] sm:$0xff] }
 0x846   :  { %v10098_v21 = vpop.f32.mrf.mxu1  ;;  %v10771_v61 = vpop.f32.mrf.mxu0  ;;  %v23680_v4 = vmax.f32 %v23678_v45, %v23679_v43  ;;  %v23685_v26 = vld [vmem:[#allocation111_spill] sm:$0xff] }
 0x847   :  { %23675 = vst [vmem:[#allocation10_spill] sm:$0xff] %v21946_v51  ;;  %v21954_v14 = vadd.f32 %v10098_v21, %v23676_v53  ;;  %v10772_v31 = vadd.f32 %v10771_v61, %v21354_v47  ;;  %v23682_v21 = vld [vmem:[#allocation76_spill] sm:$0xff]  ;;  %v21972_v61 = vpop.permute.xlu0 %11283 }
 0x848   :  { %v10100_v42 = vpop.f32.mrf.mxu1  ;;  %v10773_v50 = vpop.f32.mrf.mxu0 }
 0x849   :  { %23677 = vst [vmem:[#allocation11_spill] sm:$0xff] %v21954_v14  ;;  %v21965_v28 = vmax.f32 %v23680_v4, %v10772_v31  ;;  %v23684_v50 = vld [vmem:[#allocation39_spill] sm:$0xff]  ;;  %v21979_v31 = vpop.permute.xlu1 %11288  ;;  %v23690_v4 = vld [vmem:[#allocation113_spill] sm:$0xff] }
 0x84a   :  { %v10103_v51 = vpop.f32.mrf.mxu1  ;;  %v10776_v54 = vpop.f32.mrf.mxu0  ;;  %10967 = vmatmul.mubr.bf16.gmra.mxu0 %v15334_v11  ;;  %v23686_v63 = vmax.f32 %v23684_v50, %v23685_v26 }
 0x84b   :  { %23681 = vst [vmem:[#allocation92_spill] sm:$0xff] %v21965_v28  ;;  %v21968_v53 = vadd.f32 %v10103_v51, %v23682_v21  ;;  %v10777_v47 = vadd.f32 %v10776_v54, %v21375_v27  ;;  %13544 = vmatprep.mubr.msk.bf16.mxu0 %vm6521_vm1, %v15335_v56  ;;  %v15337_v51 = vld [vmem:[%s22492_s1 + $0x1ec0] ss:$40 sps:$4 sm:$0xff]   ;;  %v23691_v21 = vmax.f32 %v23433_v40, %v23690_v4 }
 0x84c   :  { %v10105_v14 = vpop.f32.mrf.mxu1  ;;  %v10778_v42 = vpop.f32.mrf.mxu0  ;;  %v23688_v27 = vld [vmem:[#allocation194_spill] sm:$0xff] }
 0x84d   :  { %23683 = vst [vmem:[#allocation43_spill] sm:$0xff] %v21968_v53  ;;  %v21977_v45 = vmax.f32 %v23686_v63, %v10777_v47  ;;  %v15338_v14 = vld [vmem:[%s22492_s1 + $0x1f14] ss:$40 sps:$4 sm:$0xff]   ;;  %v11204_v42 = vpop.permute.xlu0 %11203  ;;  %v23693_v28 = vld [vmem:[#allocation78_spill] sm:$0xff] }
 0x84e   :  { %v10106_v43 = vpop.f32.mrf.mxu1  ;;  %v10779_v11 = vpop.f32.mrf.mxu0 }
 0x84f   :  { %23687 = vst [vmem:[#allocation12_spill] sm:$0xff] %v21977_v45  ;;  %v21985_v54 = vadd.f32 %v10106_v43, %v23688_v27  ;;  %v10780_v56 = vadd.f32 %v10779_v11, %v21397_v16  ;;  %v11209_v11 = vpop.permute.xlu1 %11208 }
 0x850   :  { %v10108_v26 = vpop.f32.mrf.mxu1  ;;  %v10781_v63 = vpop.f32.mrf.mxu0 }
 0x851   :  { %23689 = vst [vmem:[#allocation13_spill] sm:$0xff] %v21985_v54  ;;  %v21994_v47 = vmax.f32 %v23691_v21, %v10780_v56  ;;  %v23695_v63 = vld [vmem:[#allocation175_spill] sm:$0xff] }
 0x852   :  { %v10111_v50 = vpop.f32.mrf.mxu1  ;;  %v10784_v45 = vpop.f32.mrf.mxu0  ;;  %10975 = vmatmul.mubr.bf16.gmra.mxu0 %v15337_v51  ;;  %v23696_v54 = vld [vmem:[#allocation115_spill] sm:$0xff]  ;;  %v15340_v51 = vld [vmem:[%s22492_s1 + $0x1f10] ss:$40 sps:$4 sm:$0xff]  }
 0x853   :  { %23692 = vst [vmem:[#allocation202_spill] sm:$0xff] %v21994_v47  ;;  %v21997_v43 = vadd.f32 %v10111_v50, %v23693_v28  ;;  %v10785_v16 = vadd.f32 %v10784_v45, %v21418_v60  ;;  %13545 = vmatprep.mubr.msk.bf16.mxu0 %vm6521_vm1, %v15338_v14  ;;  %v23697_v53 = vmax.f32 %v23695_v63, %v23696_v54  ;;  %v23699_v28 = vld [vmem:[#allocation195_spill] sm:$0xff]  ;;  %v22013_v45 = vpop.permute.xlu0 %11273  ;;  %v23705_v47 = vld [vmem:[#allocation80_spill] sm:$0xff] }
 0x854   :  { %v10113_v27 = vpop.f32.mrf.mxu1  ;;  %v10786_v26 = vpop.f32.mrf.mxu0 }
 0x855   :  { %23694 = vst [vmem:[#allocation179_spill] sm:$0xff] %v21997_v43  ;;  %v22004_v40 = vmax.f32 %v23697_v53, %v10785_v16  ;;  %v23701_v27 = vld [vmem:[#allocation136_spill] sm:$0xff]  ;;  %v23702_v26 = vld [vmem:[#allocation117_spill] sm:$0xff]  ;;  %v22020_v16 = vpop.permute.xlu1 %11278 }
 0x856   :  { %v10114_v56 = vpop.f32.mrf.mxu1  ;;  %v10787_v4 = vpop.f32.mrf.mxu0  ;;  %v23703_v54 = vmax.f32 %v23701_v27, %v23702_v26  ;;  %v23707_v27 = vld [vmem:[#allocation196_spill] sm:$0xff] }
 0x857   :  { %23698 = vst [vmem:[#allocation14_spill] sm:$0xff] %v22004_v40  ;;  %v22010_v21 = vadd.f32 %v10114_v56, %v23699_v28  ;;  %v10788_v60 = vadd.f32 %v10787_v4, %v21440_v8  ;;  %v11194_v28 = vpop.permute.xlu0 %11193 }
 0x858   :  { %v10116_v14 = vpop.f32.mrf.mxu1  ;;  %v10789_v50 = vpop.f32.mrf.mxu0 }
 0x859   :  { %23700 = vst [vmem:[#allocation94_spill] sm:$0xff] %v22010_v21  ;;  %v22018_v53 = vmax.f32 %v23703_v54, %v10788_v60  ;;  %v11199_v54 = vpop.permute.xlu1 %11198 }
 0x85a   :  { %v10119_v63 = vpop.f32.mrf.mxu1  ;;  %v10792_v40 = vpop.f32.mrf.mxu0  ;;  %10983 = vmatmul.mubr.bf16.gmra.mxu0 %v15340_v51 }
 0x85b   :  { %23704 = vst [vmem:[#allocation45_spill] sm:$0xff] %v22018_v53  ;;  %v22023_v43 = vadd.f32 %v10119_v63, %v23705_v47  ;;  %v10793_v56 = vadd.f32 %v10792_v40, %v21458_v41 }
 0x85c   :  { %v10121_v8 = vpop.f32.mrf.mxu1  ;;  %v10794_v4 = vpop.f32.mrf.mxu0 }
 0x85d   :  { %23706 = vst [vmem:[#allocation15_spill] sm:$0xff] %v22023_v43  ;;  %v11091_v14 = vmax.f32 %v21253_v48, %v10793_v56  ;;  %v23708_v8 = vld [vmem:[#allocation82_spill] sm:$0xff] }
 0x85e   :  { %v10122_v50 = vpop.f32.mrf.mxu1  ;;  %v10795_v21 = vpop.f32.mrf.mxu0 }
 0x85f   :  { %v22028_v60 = vadd.f32 %v10122_v50, %v23707_v27  ;;  %v10796_v26 = vadd.f32 %v10795_v21, %v21477_v49  ;;  %v11441_v25 = vadd.f32 %v11194_v28, %v11091_v14  ;;  %v23709_v28 = vld [vmem:[#allocation197_spill] sm:$0xff] }
 0x860   :  { %v10124_v53 = vpop.f32.mrf.mxu1  ;;  %v10797_v51 = vpop.f32.mrf.mxu0 }
 0x861   :  { %v11092_v47 = vmax.f32 %v21280_v1, %v10796_v26  ;;  %v11491_v50 = vmax.f32 %v11441_v25, 0.0 }
 0x862   :  { %v10127_v63 = vpop.f32.mrf.mxu1  ;;  %v10800_v41 = vpop.f32.mrf.mxu0 }
 0x863   :  { %v11442_v40 = vadd.f32 %v11199_v54, %v11092_v47  ;;  %v22033_v4 = vadd.f32 %v10127_v63, %v23708_v8  ;;  %v10801_v48 = vadd.f32 %v10800_v41, %v21495_v38  ;;  %v23710_v41 = vld [vmem:[#allocation84_spill] sm:$0xff] }
 0x864   :  { %v10129_v56 = vpop.f32.mrf.mxu1  ;;  %v10802_v43 = vpop.f32.mrf.mxu0 }
 0x865   :  { %v11492_v27 = vmax.f32 %v11442_v40, 0.0  ;;  %v11093_v49 = vmax.f32 %v21296_v6, %v10801_v48 }
 0x866   :  { %v10130_v21 = vpop.f32.mrf.mxu1  ;;  %v10803_v53 = vpop.f32.mrf.mxu0 }
 0x867   :  { %v22037_v51 = vpack.c.bf16 %v11492_v27, %v11491_v50  ;;  %v22040_v1 = vadd.f32 %v10130_v21, %v23709_v28  ;;  %v10804_v14 = vadd.f32 %v10803_v53, %v21508_v7  ;;  %v11443_v47 = vadd.f32 %v11204_v42, %v11093_v49  ;;  %v23711_v27 = vld [vmem:[#allocation119_spill] sm:$0xff]  ;;  %v23712_v42 = vld [vmem:[#allocation198_spill] sm:$0xff] }
 0x868   :  { %v10132_v26 = vpop.f32.mrf.mxu1  ;;  %v10805_v54 = vpop.f32.mrf.mxu0 }
 0x869   :  { %v11094_v38 = vmax.f32 %v21323_v10, %v10804_v14  ;;  %v11493_v56 = vmax.f32 %v11443_v47, 0.0 }
 0x86a   :  { %v10135_v63 = vpop.f32.mrf.mxu1  ;;  %v10808_v43 = vpop.f32.mrf.mxu0 }
 0x86b   :  { %v11444_v25 = vadd.f32 %v11209_v11, %v11094_v38  ;;  %v22045_v40 = vadd.f32 %v10135_v63, %v23710_v41  ;;  %v10809_v6 = vadd.f32 %v10808_v43, %v21520_v17  ;;  %v23713_v17 = vld [vmem:[#allocation121_spill] sm:$0xff]  ;;  %v23714_v43 = vld [vmem:[#allocation86_spill] sm:$0xff] }
 0x86c   :  { %v10137_v8 = vpop.f32.mrf.mxu1  ;;  %v10810_v48 = vpop.f32.mrf.mxu0 }
 0x86d   :  { %v11494_v50 = vmax.f32 %v11444_v25, 0.0  ;;  %v11095_v21 = vmax.f32 %v23711_v27, %v10809_v6 }
 0x86e   :  { %v10138_v7 = vpop.f32.mrf.mxu1  ;;  %v10811_v53 = vpop.f32.mrf.mxu0 }
 0x86f   :  { %v22049_v28 = vpack.c.bf16 %v11494_v50, %v11493_v56  ;;  %v22052_v10 = vadd.f32 %v10138_v7, %v23712_v42  ;;  %v10812_v11 = vadd.f32 %v10811_v53, %v21533_v39  ;;  %v11445_v26 = vadd.f32 %v21948_v22, %v11095_v21  ;;  %v23715_v39 = vld [vmem:[#allocation123_spill] sm:$0xff] }
 0x870   :  { %v10140_v49 = vpop.f32.mrf.mxu1  ;;  %v10813_v14 = vpop.f32.mrf.mxu0  ;;  %v23716_v21 = vld [vmem:[#allocation199_spill] sm:$0xff] }
 0x871   :  { %v11096_v54 = vmax.f32 %v23713_v17, %v10812_v11  ;;  %v11495_v48 = vmax.f32 %v11445_v26, 0.0 }
 0x872   :  { %v10143_v38 = vpop.f32.mrf.mxu1  ;;  %v10816_v47 = vpop.f32.mrf.mxu0 }
 0x873   :  { %v11446_v63 = vadd.f32 %v21960_v32, %v11096_v54  ;;  %v22059_v25 = vadd.f32 %v10143_v38, %v23714_v43  ;;  %v10817_v41 = vadd.f32 %v10816_v47, %v21545_v36  ;;  %v23717_v36 = vld [vmem:[#allocation125_spill] sm:$0xff]  ;;  %v23718_v38 = vld [vmem:[#allocation88_spill] sm:$0xff] }
 0x874   :  { %v10145_v6 = vpop.f32.mrf.mxu1  ;;  %v10818_v8 = vpop.f32.mrf.mxu0 }
 0x875   :  { %v11496_v56 = vmax.f32 %v11446_v63, 0.0  ;;  %v11097_v50 = vmax.f32 %v23715_v39, %v10817_v41 }
 0x876   :  { %v10146_v27 = vpop.f32.mrf.mxu1  ;;  %v10819_v7 = vpop.f32.mrf.mxu0 }
 0x877   :  { %v22063_v22 = vpack.c.bf16 %v11496_v56, %v11495_v48  ;;  %v22066_v53 = vadd.f32 %v10146_v27, %v23716_v21  ;;  %v10820_v32 = vadd.f32 %v10819_v7, %v21558_v29  ;;  %v11447_v49 = vadd.f32 %v21905_v59, %v11097_v50  ;;  %v23719_v29 = vld [vmem:[#allocation127_spill] sm:$0xff]  ;;  %v15343_v59 = vld [vmem:[%s22497_s3 + $0x4] ss:$16 sps:$4 sm:$0xff]  }
 0x878   :  { %v10148_v42 = vpop.f32.mrf.mxu1  ;;  %v10821_v11 = vpop.f32.mrf.mxu0  ;;  %11889 = vmatprep.mubr.bf16.mxu1 %v15343_v59 }
 0x879   :  { %v11098_v14 = vmax.f32 %v23717_v36, %v10820_v32  ;;  %v11497_v6 = vmax.f32 %v11447_v49, 0.0  ;;  %v23721_v42 = vld [vmem:[#allocation129_spill] sm:$0xff] }
 0x87a   :  { %v10151_v17 = vpop.f32.mrf.mxu1  ;;  %v10824_v26 = vpop.f32.mrf.mxu0 }
 0x87b   :  { %v11448_v54 = vadd.f32 %v21912_v58, %v11098_v14  ;;  %v22073_v47 = vadd.f32 %v10151_v17, %v23718_v38  ;;  %v10825_v63 = vadd.f32 %v10824_v26, %v21570_v52  ;;  %v23720_v58 = vld [vmem:[#allocation200_spill] sm:$0xff]  ;;  %v23722_v38 = vld [vmem:[#allocation131_spill] sm:$0xff] }
 0x87c   :  { %v10153_v43 = vpop.f32.mrf.mxu1  ;;  %v10826_v41 = vpop.f32.mrf.mxu0 }
 0x87d   :  { %v11498_v8 = vmax.f32 %v11448_v54, 0.0  ;;  %v11099_v48 = vmax.f32 %v23719_v29, %v10825_v63 }
 0x87e   :  { %v10154_v56 = vpop.f32.mrf.mxu1  ;;  %v10827_v39 = vpop.f32.mrf.mxu0 }
 0x87f   :  { %v22080_v50 = vpack.c.bf16 %v11498_v8, %v11497_v6  ;;  %v22083_v27 = vadd.f32 %v10154_v56, %v23720_v58  ;;  %v10828_v7 = vadd.f32 %v10827_v39, %v21583_v20  ;;  %v11449_v32 = vadd.f32 %v21857_v55, %v11099_v48  ;;  %v23723_v8 = vld [vmem:[#allocation133_spill] sm:$0xff]  ;;  %v23724_v58 = vld [vmem:[#allocation135_spill] sm:$0xff] }
 0x880   :  { %v10829_v52 = vpop.f32.mrf.mxu0  ;;  %v10156_v21 = vpop.f32.mrf.mxu1 }
 0x881   :  { %v11100_v11 = vmax.f32 %v23721_v42, %v10828_v7  ;;  %v11499_v26 = vmax.f32 %v11449_v32, 0.0  ;;  %v23725_v42 = vld [vmem:[#allocation137_spill] sm:$0xff] }
 0x882   :  { %v10832_v49 = vpop.f32.mrf.mxu0 }
 0x883   :  { %v11450_v36 = vadd.f32 %v21869_v13, %v11100_v11  ;;  %v10833_v14 = vadd.f32 %v10832_v49, %v21595_v34 }
 0x884   :  { %v10834_v17 = vpop.f32.mrf.mxu0 }
 0x885   :  { %v11500_v54 = vmax.f32 %v11450_v36, 0.0  ;;  %v11101_v63 = vmax.f32 %v23722_v38, %v10833_v14 }
 0x886   :  { %v10835_v43 = vpop.f32.mrf.mxu0 }
 0x887   :  { %v22091_v41 = vpack.c.bf16 %v11500_v54, %v11499_v26  ;;  %v10836_v20 = vadd.f32 %v10835_v43, %v21608_v46  ;;  %v11451_v55 = vadd.f32 %v21814_v9, %v11101_v63  ;;  %v23726_v26 = vld [vmem:[#allocation138_spill] sm:$0xff] }
 0x888   :  { %v10837_v6 = vpop.f32.mrf.mxu0 }
 0x889   :  { %v11102_v29 = vmax.f32 %v23723_v8, %v10836_v20  ;;  %v11501_v39 = vmax.f32 %v11451_v55, 0.0  ;;  %v23727_v20 = vld [vmem:[#allocation139_spill] sm:$0xff] }
 0x88a   :  { %v10840_v48 = vpop.f32.mrf.mxu0 }
 0x88b   :  { %v11452_v13 = vadd.f32 %v21821_v44, %v11102_v29  ;;  %v10841_v34 = vadd.f32 %v10840_v48, %v21620_v2 }
 0x88c   :  { %v10842_v56 = vpop.f32.mrf.mxu0 }
 0x88d   :  { %v11502_v59 = vmax.f32 %v11452_v13, 0.0  ;;  %v11103_v7 = vmax.f32 %v23724_v58, %v10841_v34  ;;  %v23728_v13 = vld [vmem:[#allocation140_spill] sm:$0xff]  ;;  %v23729_v58 = vld [vmem:[#allocation141_spill] sm:$0xff] }
 0x88e   :  { %v10843_v52 = vpop.f32.mrf.mxu0 }
 0x88f   :  { %v22099_v21 = vpack.c.bf16 %v11502_v59, %v11501_v39  ;;  %v10844_v46 = vadd.f32 %v10843_v52, %v21633_v57  ;;  %v11453_v9 = vadd.f32 %v21766_v62, %v11103_v7 }
 0x890   :  { %v10845_v32 = vpop.f32.mrf.mxu0 }
 0x891   :  { %v11104_v11 = vmax.f32 %v23725_v42, %v10844_v46  ;;  %v11503_v14 = vmax.f32 %v11453_v9, 0.0  ;;  %v23730_v42 = vld [vmem:[#allocation142_spill] sm:$0xff] }
 0x892   :  { %v10848_v49 = vpop.f32.mrf.mxu0 }
 0x893   :  { %v11454_v44 = vadd.f32 %v21778_v24, %v11104_v11  ;;  %v10849_v2 = vadd.f32 %v10848_v49, %v21645_v18 }
 0x894   :  { %v10850_v36 = vpop.f32.mrf.mxu0 }
 0x895   :  { %v11504_v17 = vmax.f32 %v11454_v44, 0.0  ;;  %v11105_v54 = vmax.f32 %v23726_v26, %v10849_v2 }
 0x896   :  { %v10851_v38 = vpop.f32.mrf.mxu0 }
 0x897   :  { %v22107_v63 = vpack.c.bf16 %v11504_v17, %v11503_v14  ;;  %v10852_v57 = vadd.f32 %v10851_v38, %v21658_v35  ;;  %v11455_v62 = vadd.f32 %v21706_v33, %v11105_v54  ;;  %v23731_v17 = vld [vmem:[#allocation154_spill] sm:$0xff] }
 0x898   :  { %v10853_v43 = vpop.f32.mrf.mxu0 }
 0x899   :  { %v11106_v6 = vmax.f32 %v23727_v20, %v10852_v57  ;;  %v11505_v29 = vmax.f32 %v11455_v62, 0.0  ;;  %v23732_v57 = vld [vmem:[#allocation143_spill] sm:$0xff]  ;;  %v23733_v20 = vld [vmem:[#allocation156_spill] sm:$0xff] }
 0x89a   :  { %v10856_v55 = vpop.f32.mrf.mxu0 }
 0x89b   :  { %v11456_v24 = vadd.f32 %v21730_v12, %v11106_v6  ;;  %v10857_v18 = vadd.f32 %v10856_v55, %v21670_v15 }
 0x89c   :  { %v10858_v8 = vpop.f32.mrf.mxu0 }
 0x89d   :  { %v11506_v48 = vmax.f32 %v11456_v24, 0.0  ;;  %v11107_v34 = vmax.f32 %v23728_v13, %v10857_v18  ;;  %v23734_v24 = vld [vmem:[#allocation144_spill] sm:$0xff] }
 0x89e   :  { %v10859_v56 = vpop.f32.mrf.mxu0  ;;  %v23735_v8 = vld [vmem:[#allocation160_spill] sm:$0xff] }
 0x89f   :  { %v22115_v39 = vpack.c.bf16 %v11506_v48, %v11505_v29  ;;  %v10860_v35 = vadd.f32 %v10859_v56, %v21683_v3  ;;  %v11457_v33 = vadd.f32 %v22013_v45, %v11107_v34  ;;  %v23736_v56 = vld [vmem:[#allocation145_spill] sm:$0xff] }
 0x8a0   :  { %v10861_v59 = vpop.f32.mrf.mxu0 }
 0x8a1   :  { %v11108_v7 = vmax.f32 %v23729_v58, %v10860_v35  ;;  %v11507_v32 = vmax.f32 %v11457_v33, 0.0  ;;  %v22139_v59 = vpop.permute.xlu0 %11423  ;;  %v23737_v58 = vld [vmem:[#allocation162_spill] sm:$0xff] }
 0x8a2   :  { %v10864_v52 = vpop.f32.mrf.mxu0 }
 0x8a3   :  { %v11458_v12 = vadd.f32 %v22020_v16, %v11108_v7  ;;  %v10865_v15 = vadd.f32 %v10864_v52, %v21695_v37 }
 0x8a4   :  { %v10866_v46 = vpop.f32.mrf.mxu0 }
 0x8a5   :  { %v11508_v9 = vmax.f32 %v11458_v12, 0.0  ;;  %v11109_v11 = vmax.f32 %v23730_v42, %v10865_v15 }
 0x8a6   :  { %v10867_v49 = vpop.f32.mrf.mxu0 }
 0x8a7   :  { %v10868_v44 = vadd.f32 %v10867_v49, %v21712_v19  ;;  %v22124_v2 = vpack.c.bf16 %v11508_v9, %v11507_v32  ;;  %v11459_v45 = vadd.f32 %v21972_v61, %v11109_v11  ;;  %v23739_v9 = vld [vmem:[#allocation6_spill] sm:$0xff] }
 0x8a8   :  { %v10869_v3 = vpop.f32.mrf.mxu0  ;;  %v23740_v11 = vld [vmem:[#allocation166_spill] sm:$0xff] }
 0x8a9   :  { %v11110_v36 = vmax.f32 %v21592_v30, %v10868_v44  ;;  %v11509_v54 = vmax.f32 %v11459_v45, 0.0  ;;  %v22150_v44 = vpop.permute.xlu0 %11413 }
 0x8aa   :  { %v10872_v14 = vpop.f32.mrf.mxu0 }
 0x8ab   :  { %v11460_v16 = vadd.f32 %v21979_v31, %v11110_v36  ;;  %v10873_v37 = vadd.f32 %v10872_v14, %v23731_v17  ;;  %v23741_v14 = vld [vmem:[#allocation147_spill] sm:$0xff] }
 0x8ac   :  { %v10874_v26 = vpop.f32.mrf.mxu0 }
 0x8ad   :  { %v11510_v38 = vmax.f32 %v11460_v16, 0.0  ;;  %v11111_v43 = vmax.f32 %v23732_v57, %v10873_v37  ;;  %v23742_v26 = vld [vmem:[#allocation174_spill] sm:$0xff]  ;;  %v23743_v57 = vld [vmem:[#allocation184_spill] sm:$0xff] }
 0x8ae   :  { %v10875_v62 = vpop.f32.mrf.mxu0 }
 0x8af   :  { %v10876_v19 = vadd.f32 %v10875_v62, %v23733_v20  ;;  %v22132_v6 = vpack.c.bf16 %v11510_v38, %v11509_v54  ;;  %v11461_v61 = vadd.f32 %v21929_v5, %v11111_v43  ;;  %v22144_v5 = vpop.permute.xlu1 %11428  ;;  %v23744_v62 = vld [vmem:[#allocation148_spill] sm:$0xff] }
 0x8b0   :  { %v10877_v55 = vpop.f32.mrf.mxu0 }
 0x8b1   :  { %v11112_v30 = vmax.f32 %v23734_v24, %v10876_v19  ;;  %v11511_v13 = vmax.f32 %v11461_v61, 0.0  ;;  %v22160_v19 = vpop.permute.xlu0 %11403  ;;  %v23745_v61 = vld [vmem:[#allocation188_spill] sm:$0xff] }
 0x8b2   :  { %v10880_v18 = vpop.f32.mrf.mxu0 }
 0x8b3   :  { %v11462_v31 = vadd.f32 %v21936_v0, %v11112_v30  ;;  %v10881_v29 = vadd.f32 %v10880_v18, %v23735_v8  ;;  %v23738_v0 = vld [vmem:[#allocation146_spill] sm:$0xff]  ;;  %v22153_v17 = vpop.permute.xlu1 %11418 }
 0x8b4   :  { %v10882_v48 = vpop.f32.mrf.mxu0  ;;  %v23746_v30 = vld [vmem:[#allocation178_spill] sm:$0xff] }
 0x8b5   :  { %v11512_v34 = vmax.f32 %v11462_v31, 0.0  ;;  %v11113_v35 = vmax.f32 %v23736_v56, %v10881_v29 }
 0x8b6   :  { %v10883_v33 = vpop.f32.mrf.mxu0 }
 0x8b7   :  { %v10884_v7 = vadd.f32 %v10883_v33, %v23737_v58  ;;  %v22142_v52 = vpack.c.bf16 %v11512_v34, %v11511_v13  ;;  %v11463_v15 = vadd.f32 %v21881_v23, %v11113_v35  ;;  %v22164_v31 = vpop.permute.xlu1 %11408  ;;  %v23747_v13 = vld [vmem:[#allocation149_spill] sm:$0xff]  ;;  %v23748_v35 = vld [vmem:[#allocation182_spill] sm:$0xff] }
 0x8b8   :  { %v10885_v12 = vpop.f32.mrf.mxu0 }
 0x8b9   :  { %v11114_v46 = vmax.f32 %v23738_v0, %v10884_v7  ;;  %v11513_v45 = vmax.f32 %v11463_v15, 0.0  ;;  %v22170_v7 = vpop.permute.xlu0 %11393  ;;  %v23749_v15 = vld [vmem:[#allocation168_spill] sm:$0xff] }
 0x8ba   :  { %v10888_v32 = vpop.f32.mrf.mxu0 }
 0x8bb   :  { %v11464_v42 = vadd.f32 %v23739_v9, %v11114_v46  ;;  %v10889_v49 = vadd.f32 %v10888_v32, %v23740_v11  ;;  %v23750_v46 = vld [vmem:[#allocation150_spill] sm:$0xff]  ;;  %v22174_v9 = vpop.permute.xlu1 %11398  ;;  %v23751_v11 = vld [vmem:[#allocation172_spill] sm:$0xff] }
 0x8bc   :  { %v10890_v3 = vpop.f32.mrf.mxu0 }
 0x8bd   :  { %v11514_v36 = vmax.f32 %v11464_v42, 0.0  ;;  %v11115_v16 = vmax.f32 %v23741_v14, %v10889_v49  ;;  %v23752_v3 = vld [vmem:[#allocation190_spill] sm:$0xff] }
 0x8be   :  { %v10891_v37 = vpop.f32.mrf.mxu0 }
 0x8bf   :  { %v10892_v54 = vadd.f32 %v10891_v37, %v23742_v26  ;;  %v22156_v23 = vpack.c.bf16 %v11514_v36, %v11513_v45  ;;  %v11465_v43 = vadd.f32 %v23743_v57, %v11115_v16  ;;  %v23753_v37 = vld [vmem:[#allocation152_spill] sm:$0xff]  ;;  %v23754_v57 = vld [vmem:[#allocation3_spill] sm:$0xff] }
 0x8c0   :  { %v10893_v38 = vpop.f32.mrf.mxu0 }
 0x8c1   :  { %v11116_v20 = vmax.f32 %v23744_v62, %v10892_v54  ;;  %v11515_v29 = vmax.f32 %v11465_v43, 0.0  ;;  %v22179_v54 = vpop.permute.xlu0 %11383 }
 0x8c2   :  { %v10896_v55 = vpop.f32.mrf.mxu0 }
 0x8c3   :  { %v11466_v24 = vadd.f32 %v23745_v61, %v11116_v20  ;;  %v10897_v18 = vadd.f32 %v10896_v55, %v23746_v30  ;;  %v22182_v20 = vpop.permute.xlu1 %11388  ;;  %v23755_v61 = vld [vmem:[#allocation157_spill] sm:$0xff] }
 0x8c4   :  { %v10898_v8 = vpop.f32.mrf.mxu0  ;;  %v23756_v30 = vld [vmem:[#allocation153_spill] sm:$0xff] }
 0x8c5   :  { %v11516_v48 = vmax.f32 %v11466_v24, 0.0  ;;  %v11117_v34 = vmax.f32 %v23747_v13, %v10897_v18  ;;  %v23758_v13 = vld [vmem:[#allocation134_spill] sm:$0xff] }
 0x8c6   :  { %v10899_v56 = vpop.f32.mrf.mxu0 }
 0x8c7   :  { %v10900_v33 = vadd.f32 %v10899_v56, %v23748_v35  ;;  %v22168_v58 = vpack.c.bf16 %v11516_v48, %v11515_v29  ;;  %v11467_v0 = vadd.f32 %v23749_v15, %v11117_v34  ;;  %v23757_v29 = vld [vmem:[#allocation159_spill] sm:$0xff]  ;;  %v11374_v56 = vpop.permute.xlu0 %11373 }
 0x8c8   :  { %v10901_v12 = vpop.f32.mrf.mxu0  ;;  %v23759_v15 = vld [vmem:[#allocation155_spill] sm:$0xff] }
 0x8c9   :  { %v11118_v32 = vmax.f32 %v23750_v46, %v10900_v33  ;;  %v11517_v14 = vmax.f32 %v11467_v0, 0.0  ;;  %v11379_v46 = vpop.permute.xlu1 %11378 }
 0x8ca   :  { %v10904_v42 = vpop.f32.mrf.mxu0 }
 0x8cb   :  { %v11468_v49 = vadd.f32 %v23751_v11, %v11118_v32  ;;  %v10905_v45 = vadd.f32 %v10904_v42, %v23752_v3  ;;  %v23760_v42 = vld [vmem:[#allocation7_spill] sm:$0xff] }
 0x8cc   :  { %v10906_v36 = vpop.f32.mrf.mxu0 }
 0x8cd   :  { %v11518_v16 = vmax.f32 %v11468_v49, 0.0  ;;  %v11119_v26 = vmax.f32 %v23753_v37, %v10905_v45  ;;  %v23761_v45 = vld [vmem:[#allocation151_spill] sm:$0xff]  ;;  %v11364_v37 = vpop.permute.xlu0 %11363 }
 0x8ce   :  { %v10907_v38 = vpop.f32.mrf.mxu0 }
 0x8cf   :  { %v10908_v43 = vadd.f32 %v10907_v38, %v23754_v57  ;;  %v11584_v62 = vpack.c.bf16 %v11518_v16, %v11517_v14  ;;  %v11469_v24 = vadd.f32 %v23755_v61, %v11119_v26  ;;  %v23762_v14 = vld [vmem:[#allocation158_spill] sm:$0xff]  ;;  %v23763_v38 = vld [vmem:[#allocation108_spill] sm:$0xff]  ;;  %v11369_v61 = vpop.permute.xlu1 %11368 }
 0x8d0   :  { %v10909_v55 = vpop.f32.mrf.mxu0 }
 0x8d1   :  { %v11120_v18 = vmax.f32 %v23756_v30, %v10908_v43  ;;  %v11519_v33 = vmax.f32 %v11469_v24, 0.0  ;;  %v23764_v43 = vld [vmem:[#allocation41_spill] sm:$0xff] }
 0x8d2   :  { %v10912_v8 = vpop.f32.mrf.mxu0 }
 0x8d3   :  { %v11470_v48 = vadd.f32 %v23757_v29, %v11120_v18  ;;  %v10913_v34 = vadd.f32 %v10912_v8, %v23758_v13  ;;  %v23765_v8 = vld [vmem:[#allocation161_spill] sm:$0xff] }
 0x8d4   :  { %v10914_v35 = vpop.f32.mrf.mxu0  ;;  %v23766_v13 = vld [vmem:[#allocation9_spill] sm:$0xff] }
 0x8d5   :  { %v11520_v12 = vmax.f32 %v11470_v48, 0.0  ;;  %v11121_v0 = vmax.f32 %v23759_v15, %v10913_v34 }
 0x8d6   :  { %v10915_v32 = vpop.f32.mrf.mxu0 }
 0x8d7   :  { %v10916_v11 = vadd.f32 %v10915_v32, %v23760_v42  ;;  %v11585_v49 = vpack.c.bf16 %v11520_v12, %v11519_v33  ;;  %v11471_v36 = vadd.f32 %v23761_v45, %v11121_v0  ;;  %v11354_v33 = vpop.permute.xlu0 %11353  ;;  %v23767_v0 = vld [vmem:[#allocation164_spill] sm:$0xff]  ;;  %v11359_v42 = vpop.permute.xlu1 %11358  ;;  %v23768_v45 = vld [vmem:[#allocation177_spill] sm:$0xff] }
 0x8d8   :  { %v10917_v3 = vpop.f32.mrf.mxu0 }
 0x8d9   :  { %v11122_v16 = vmax.f32 %v23762_v14, %v10916_v11  ;;  %v11521_v30 = vmax.f32 %v11471_v36, 0.0 }
 0x8da   :  { %v10920_v26 = vpop.f32.mrf.mxu0 }
 0x8db   :  { %v11472_v57 = vadd.f32 %v23763_v38, %v11122_v16  ;;  %v10921_v55 = vadd.f32 %v10920_v26, %v23764_v43  ;;  %v23769_v38 = vld [vmem:[#allocation170_spill] sm:$0xff] }
 0x8dc   :  { %v10922_v24 = vpop.f32.mrf.mxu0 }
 0x8dd   :  { %v11522_v18 = vmax.f32 %v11472_v57, 0.0  ;;  %v11123_v29 = vmax.f32 %v23765_v8, %v10921_v55  ;;  %v23770_v24 = vld [vmem:[#allocation11_spill] sm:$0xff] }
 0x8de   :  { %v10923_v48 = vpop.f32.mrf.mxu0 }
 0x8df   :  { %v10924_v34 = vadd.f32 %v10923_v48, %v23766_v13  ;;  %v11586_v35 = vpack.c.bf16 %v11522_v18, %v11521_v30  ;;  %v11473_v15 = vadd.f32 %v11354_v33, %v11123_v29  ;;  %v23772_v13 = vld [vmem:[#allocation43_spill] sm:$0xff] }
 0x8e0   :  { %v10925_v12 = vpop.f32.mrf.mxu0 }
 0x8e1   :  { %v11124_v32 = vmax.f32 %v23767_v0, %v10924_v34  ;;  %13600 = vmatprep.subr.bf16.mxu1 %v11586_v35  ;;  %v11523_v16 = vmax.f32 %v11473_v15, 0.0  ;;  %v23773_v12 = vld [vmem:[#allocation180_spill] sm:$0xff] }
 0x8e2   :  { %v10928_v11 = vpop.f32.mrf.mxu0  ;;  %13601 = vmatpush3.bf16.msra.mxu1 %v22115_v39  ;;  %v23771_v39 = vld [vmem:[#allocation176_spill] sm:$0xff] }
 0x8e3   :  { %v11474_v3 = vadd.f32 %v11359_v42, %v11124_v32  ;;  %v10929_v36 = vadd.f32 %v10928_v11, %v23768_v45  ;;  %13602 = vmatprep.subr.bf16.mxu1 %v11585_v49  ;;  %v23775_v42 = vld [vmem:[#allocation186_spill] sm:$0xff]  ;;  %v23776_v45 = vld [vmem:[#allocation179_spill] sm:$0xff] }
 0x8e4   :  { %v10930_v14 = vpop.f32.mrf.mxu0 }
 0x8e5   :  { %v11524_v26 = vmax.f32 %v11474_v3, 0.0  ;;  %v11125_v57 = vmax.f32 %v23769_v38, %v10929_v36 }
 0x8e6   :  { %v10931_v43 = vpop.f32.mrf.mxu0  ;;  %13603 = vmatpush3.bf16.msra.mxu1 %v22107_v63 }
 0x8e7   :  { %v22201_v55 = vpack.c.bf16 %v11524_v26, %v11523_v16  ;;  %v10932_v30 = vadd.f32 %v10931_v43, %v23770_v24  ;;  %13604 = vmatprep.subr.bf16.mxu1 %v11584_v62  ;;  %v11475_v8 = vadd.f32 %v11364_v37, %v11125_v57  ;;  %v23774_v37 = vld [vmem:[#allocation13_spill] sm:$0xff]  ;;  %v23777_v26 = vld [vmem:[#allocation2_spill] sm:$0xff]  ;;  %v23779_v24 = vld [vmem:[#allocation4_spill] sm:$0xff] }
 0x8e8   :  { %v10933_v18 = vpop.f32.mrf.mxu0 }
 0x8e9   :  { %v11126_v29 = vmax.f32 %v23771_v39, %v10932_v30  ;;  %v11525_v33 = vmax.f32 %v11475_v8, 0.0  ;;  %v23780_v8 = vld [vmem:[#allocation15_spill] sm:$0xff] }
 0x8ea   :  { %v10936_v48 = vpop.f32.mrf.mxu0  ;;  %13605 = vmatpush3.bf16.msra.mxu1 %v22099_v21 }
 0x8eb   :  { %v11476_v49 = vadd.f32 %v11369_v61, %v11126_v29  ;;  %v10937_v34 = vadd.f32 %v10936_v48, %v23772_v13  ;;  %13606 = vmatprep.subr.bf16.mxu1 %v22168_v58 }
 0x8ec   :  { %v10938_v35 = vpop.f32.mrf.mxu0 }
 0x8ed   :  { %v11526_v63 = vmax.f32 %v11476_v49, 0.0  ;;  %v11127_v15 = vmax.f32 %v23773_v12, %v10937_v34  ;;  %v23781_v49 = vld [vmem:[#allocation5_spill] sm:$0xff]  ;;  %v23782_v34 = vmov 0  }
 0x8ee   :  { %v10939_v0 = vpop.f32.mrf.mxu0  ;;  %13607 = vmatpush3.bf16.msra.mxu1 %v22091_v41 }
 0x8ef   :  { %v22210_v62 = vpack.c.bf16 %v11526_v63, %v11525_v33  ;;  %v10940_v32 = vadd.f32 %v10939_v0, %v23774_v37  ;;  %13608 = vmatprep.subr.bf16.mxu1 %v22156_v23  ;;  %v11477_v61 = vadd.f32 %v11374_v56, %v11127_v15  ;;  %v23778_v56 = vld [vmem:[#allocation94_spill] sm:$0xff] }
 0x8f0   :  { %v10941_v21 = vpop.f32.mrf.mxu0  ;;  %v23783_v63 = vld [vmem:[#allocation90_spill] sm:$0xff] }
 0x8f1   :  { %v11128_v11 = vmax.f32 %v23775_v42, %v10940_v32  ;;  %v11527_v41 = vmax.f32 %v11477_v61, 0.0  ;;  %v23784_v61 = vld [vmem:[#allocation8_spill] sm:$0xff] }
 0x8f2   :  { %v10944_v3 = vpop.f32.mrf.mxu0  ;;  %13609 = vmatpush3.bf16.msra.mxu1 %v22080_v50 }
 0x8f3   :  { %v11478_v58 = vadd.f32 %v11379_v46, %v11128_v11  ;;  %v10945_v36 = vadd.f32 %v10944_v3, %v23776_v45  ;;  %13610 = vmatprep.subr.bf16.mxu1 %v22142_v52  ;;  %v23785_v45 = vld [vmem:[#allocation201_spill] sm:$0xff] }
 0x8f4   :  { %v10946_v14 = vpop.f32.mrf.mxu0 }
 0x8f5   :  { %v11528_v16 = vmax.f32 %v11478_v58, 0.0  ;;  %v11129_v38 = vmax.f32 %v23777_v26, %v10945_v36 }
 0x8f6   :  { %v10947_v57 = vpop.f32.mrf.mxu0  ;;  %13611 = vmatpush3.bf16.msra.mxu1 %v22063_v22 }
 0x8f7   :  { %v22220_v23 = vpack.c.bf16 %v11528_v16, %v11527_v41  ;;  %v10948_v43 = vadd.f32 %v10947_v57, %v23778_v56  ;;  %13612 = vmatprep.subr.bf16.mxu1 %v22132_v6  ;;  %v11479_v46 = vadd.f32 %v22179_v54, %v11129_v38  ;;  %v15341_v6 = vld [vmem:[%s22497_s3] ss:$16 sps:$4 sm:$0xff]  }
 0x8f8   :  { %v10949_v50 = vpop.f32.mrf.mxu0  ;;  %v23786_v56 = vld [vmem:[#allocation10_spill] sm:$0xff] }
 0x8f9   :  { %v11130_v30 = vmax.f32 %v23779_v24, %v10948_v43  ;;  %v11529_v29 = vmax.f32 %v11479_v46, 0.0 }
 0x8fa   :  { %v10952_v52 = vpop.f32.mrf.mxu0  ;;  %13613 = vmatpush3.bf16.msra.mxu1 %v22049_v28  ;;  %v15346_v28 = vld [vmem:[%s22497_s3 + $0x24] ss:$16 sps:$4 sm:$0xff]  }
 0x8fb   :  { %v11480_v18 = vadd.f32 %v22182_v20, %v11130_v30  ;;  %v10953_v39 = vadd.f32 %v10952_v52, %v23780_v8  ;;  %13614 = vmatprep.subr.bf16.mxu1 %v22124_v2  ;;  %v23787_v30 = vld [vmem:[#allocation92_spill] sm:$0xff] }
 0x8fc   :  { %v10954_v22 = vpop.f32.mrf.mxu0 }
 0x8fd   :  { %v11530_v48 = vmax.f32 %v11480_v18, 0.0  ;;  %v11131_v13 = vmax.f32 %v23781_v49, %v10953_v39  ;;  %v23788_v49 = vld [vmem:[#allocation12_spill] sm:$0xff] }
 0x8fe   :  { %v10955_v54 = vpop.f32.mrf.mxu0  ;;  %13615 = vmatpush3.bf16.msra.mxu1 %v22037_v51 }
 0x8ff   :  { %v22238_v20 = vpack.c.bf16 %v11530_v48, %v11529_v29  ;;  %v10956_v2 = vadd.f32 %v10955_v54, %v22028_v60  ;;  %11953 = vmatprep.subr.bf16.mxu1 %v23782_v34  ;;  %v11481_v33 = vadd.f32 %v22170_v7, %v11131_v13  ;;  %v15344_v60 = vld [vmem:[%s22497_s3 + $0x20] ss:$16 sps:$4 sm:$0xff]   ;;  %v15349_v7 = vld [vmem:[%s22497_s3 + $0x44] ss:$16 sps:$4 sm:$0xff]  }
 0x900   :  { %v10957_v35 = vpop.f32.mrf.mxu0 }
 0x901   :  { %v11132_v12 = vmax.f32 %v23783_v63, %v10956_v2  ;;  %11890 = vmatmul.mubr.bf16.vlgmr.msra.gmra.mxu1 %v15341_v6  ;;  %v11531_v32 = vmax.f32 %v11481_v33, 0.0  ;;  %v23789_v2 = vld [vmem:[#allocation202_spill] sm:$0xff] }
 0x902   :  { %v10960_v15 = vpop.f32.mrf.mxu0  ;;  %11897 = vmatprep.mubr.bf16.mxu1 %v15346_v28 }
 0x903   :  { %v11482_v51 = vadd.f32 %v22174_v9, %v11132_v12  ;;  %v10961_v0 = vadd.f32 %v10960_v15, %v22033_v4 }
 0x904   :  { %v10962_v37 = vpop.f32.mrf.mxu0 }
 0x905   :  { %v11532_v21 = vmax.f32 %v11482_v51, 0.0  ;;  %v11133_v42 = vmax.f32 %v23784_v61, %v10961_v0  ;;  %v23790_v37 = vld [vmem:[#allocation14_spill] sm:$0xff] }
 0x906   :  { %v10963_v11 = vpop.f32.mrf.mxu0 }
 0x907   :  { %v22253_v3 = vpack.c.bf16 %v11532_v21, %v11531_v32  ;;  %v10964_v9 = vadd.f32 %v10963_v11, %v22040_v1  ;;  %v11483_v4 = vadd.f32 %v22160_v19, %v11133_v42  ;;  %v15347_v1 = vld [vmem:[%s22497_s3 + $0x40] ss:$16 sps:$4 sm:$0xff]   ;;  %v15352_v19 = vld [vmem:[%s22497_s3 + $0x64] ss:$16 sps:$4 sm:$0xff]   ;;  %v23791_v11 = vld [vmem:[#allocation45_spill] sm:$0xff] }
 0x908   :  { %v10965_v58 = vpop.f32.mrf.mxu0 }
 0x909   :  { %v11134_v36 = vmax.f32 %v23785_v45, %v10964_v9  ;;  %11898 = vmatmul.mubr.bf16.gmra.mxu1 %v15344_v60  ;;  %v11533_v38 = vmax.f32 %v11483_v4, 0.0  ;;  %v11439_v9 = vpop.permute.xlu1 %11438 }
 0x90a   :  { %v10968_v14 = vpop.f32.mrf.mxu0  ;;  %11905 = vmatprep.mubr.bf16.mxu1 %v15349_v7 }
 0x90b   :  { %v11484_v41 = vadd.f32 %v22164_v31, %v11134_v36  ;;  %v10969_v16 = vadd.f32 %v10968_v14, %v22045_v40  ;;  %v15356_v36 = vld [vmem:[%s22497_s3 + $0xa0] ss:$16 sps:$4 sm:$0xff]  }
 0x90c   :  { %v10970_v26 = vpop.f32.mrf.mxu0 }
 0x90d   :  { %v11534_v57 = vmax.f32 %v11484_v41, 0.0  ;;  %v11135_v43 = vmax.f32 %v23786_v56, %v10969_v16  ;;  %v11569_v41 = vld [vmem:[%s22497_s3 + $0xe0] sm:$0xff]  ;;  %v15375_v56 = vld [vmem:[%s22497_s3 + $0x68] ss:$16 sps:$4 sm:$0xff]  }
 0x90e   :  { %v10971_v50 = vpop.f32.mrf.mxu0  ;;  %v15359_v16 = vld [vmem:[%s22497_s3 + $0xc0] ss:$16 sps:$4 sm:$0xff]   ;;  %v13575_v26 = vcombine.high %v11569_v41, %v11569_v41 }
 0x90f   :  { %v11592_v46 = vpack.c.bf16 %v11534_v57, %v11533_v38  ;;  %v10972_v24 = vadd.f32 %v10971_v50, %v22052_v10  ;;  %v11485_v40 = vadd.f32 %v22150_v44, %v11135_v43  ;;  %v15350_v10 = vld [vmem:[%s22497_s3 + $0x60] ss:$16 sps:$4 sm:$0xff]   ;;  %v15355_v44 = vld [vmem:[%s22497_s3 + $0x84] ss:$16 sps:$4 sm:$0xff]   ;;  %v13574_v38 = vcombine.low %v11569_v41, %v11569_v41  ;;  %v15366_v57 = vld [vmem:[%s22497_s3 + $0xc] ss:$16 sps:$4 sm:$0xff]  }
 0x910   :  { %v10973_v31 = vpop.f32.mrf.mxu0  ;;  %v15376_v43 = vld [vmem:[%s22497_s3 + $0x8c] ss:$16 sps:$4 sm:$0xff]  }
 0x911   :  { %v11136_v52 = vmax.f32 %v23787_v30, %v10972_v24  ;;  %11906 = vmatmul.mubr.bf16.gmra.mxu1 %v15347_v1  ;;  %v11535_v29 = vmax.f32 %v11485_v40, 0.0  ;;  %v15378_v1 = vld [vmem:[%s22497_s3 + $0x88] ss:$16 sps:$4 sm:$0xff]   ;;  %v15379_v50 = vld [vmem:[%s22497_s3 + $0xac] ss:$16 sps:$4 sm:$0xff]  }
 0x912   :  { %v10976_v18 = vpop.f32.mrf.mxu0  ;;  %11913 = vmatprep.mubr.bf16.mxu1 %v15352_v19  ;;  %v15381_v19 = vld [vmem:[%s22497_s3 + $0xa8] ss:$16 sps:$4 sm:$0xff]  }
 0x913   :  { %v11486_v8 = vadd.f32 %v22153_v17, %v11136_v52  ;;  %v10977_v39 = vadd.f32 %v10976_v18, %v22059_v25  ;;  %v11570_v24 = vld [vmem:[%s22497_s3 + $0xe8] sm:$0xff] }
 0x914   :  { %v10978_v22 = vpop.f32.mrf.mxu0  ;;  %v15384_v31 = vld [vmem:[%s22497_s3 + $0xc8] ss:$16 sps:$4 sm:$0xff]   ;;  %v13577_v40 = vcombine.high %v11570_v24, %v11570_v24  ;;  %v13576_v30 = vcombine.low %v11570_v24, %v11570_v24 }
 0x915   :  { %v11536_v48 = vmax.f32 %v11486_v8, 0.0  ;;  %v11137_v13 = vmax.f32 %v23788_v49, %v10977_v39 }
 0x916   :  { %v10979_v6 = vpop.f32.mrf.mxu0 }
 0x917   :  { %v11593_v54 = vpack.c.bf16 %v11536_v48, %v11535_v29  ;;  %v10980_v28 = vadd.f32 %v10979_v6, %v22066_v53  ;;  %v11487_v25 = vadd.f32 %v22139_v59, %v11137_v13  ;;  %v15353_v53 = vld [vmem:[%s22497_s3 + $0x80] ss:$16 sps:$4 sm:$0xff]   ;;  %v15358_v59 = vld [vmem:[%s22497_s3 + $0xa4] ss:$16 sps:$4 sm:$0xff]  }
 0x918   :  { %v10981_v17 = vpop.f32.mrf.mxu0 }
 0x919   :  { %v11138_v35 = vmax.f32 %v23789_v2, %v10980_v28  ;;  %11914 = vmatmul.mubr.bf16.gmra.mxu1 %v15350_v10  ;;  %v11537_v51 = vmax.f32 %v11487_v25, 0.0 }
 0x91a   :  { %v10984_v33 = vpop.f32.mrf.mxu0  ;;  %11921 = vmatprep.mubr.bf16.mxu1 %v15355_v44 }
 0x91b   :  { %v11488_v63 = vadd.f32 %v22144_v5, %v11138_v35  ;;  %v10985_v12 = vadd.f32 %v10984_v33, %v22073_v47  ;;  %v11434_v5 = vpop.permute.xlu0 %11433 }
 0x91c   :  { %v10986_v15 = vpop.f32.mrf.mxu0 }
 0x91d   :  { %v11538_v0 = vmax.f32 %v11488_v63, 0.0  ;;  %v11139_v32 = vmax.f32 %v23790_v37, %v10985_v12 }
 0x91e   :  { %v10987_v21 = vpop.f32.mrf.mxu0 }
 0x91f   :  { %v11594_v61 = vpack.c.bf16 %v11538_v0, %v11537_v51  ;;  %v10988_v42 = vadd.f32 %v10987_v21, %v22083_v27  ;;  %v11489_v47 = vadd.f32 %v11434_v5, %v11139_v32  ;;  %v15361_v27 = vld [vmem:[%s22497_s3 + $0xc4] ss:$16 sps:$4 sm:$0xff]   ;;  %v22383_v15 = vpop.permute.xlu0 %11683  ;;  %v22385_v0 = vpop.permute.xlu1 %11673 }
 0x920   :  { %v10989_v60 = vpop.f32.mrf.mxu0  ;;  %v15387_v21 = vld [vmem:[%s22498_s5] sm:$0xff]  }
 0x921   :  { %v11140_v7 = vmax.f32 %v23791_v11, %v10988_v42  ;;  %11922 = vmatmul.mubr.bf16.gmra.mxu1 %v15353_v53  ;;  %v11539_v4 = vmax.f32 %v11489_v47, 0.0 }
 0x922   :  { %11954 = vmatpush1.bf16.msra.mxu1 %v11594_v61  ;;  %11929 = vmatprep.mubr.bf16.mxu1 %v15358_v59 }
 0x923   :  { %v11490_v58 = vadd.f32 %v11439_v9, %v11140_v7  ;;  %11955 = vmatprep.subr.bf16.mxu1 %v23782_v34  ;;  %v22392_v59 = vpop.permute.xlu0 %11678  ;;  %v22397_v5 = vpop.permute.xlu1 %11663 }
 0x925   :  { %v11540_v45 = vmax.f32 %v11490_v58, 0.0 }
 0x926   :  { %11956 = vmatpush1.bf16.msra.mxu1 %v11593_v54 }
 0x927   :  { %v11595_v14 = vpack.c.bf16 %v11540_v45, %v11539_v4  ;;  %11957 = vmatprep.subr.bf16.mxu1 %v23782_v34  ;;  %v22401_v7 = vpop.permute.xlu0 %11668  ;;  %v22403_v58 = vpop.permute.xlu1 %11653 }
 0x929   :  { %11930 = vmatmul.mubr.bf16.gmra.mxu1 %v15356_v36 }
 0x92a   :  { %11958 = vmatpush1.bf16.msra.mxu1 %v11592_v46  ;;  %11937 = vmatprep.mubr.bf16.mxu1 %v15361_v27  ;;  %v15382_v46 = vld [vmem:[%s22497_s3 + $0xcc] ss:$16 sps:$4 sm:$0xff]  }
 0x92b   :  { %11959 = vmatprep.subr.bf16.mxu1 %v23782_v34  ;;  %v22407_v27 = vpop.permute.xlu0 %11658 }
 0x92e   :  { %11960 = vmatpush1.bf16.msra.mxu1 %v22253_v3  ;;  %v15373_v3 = vld [vmem:[%s22497_s3 + $0x6c] ss:$16 sps:$4 sm:$0xff]  }
 0x92f   :  { %11961 = vmatprep.subr.bf16.mxu1 %v23782_v34 }
 0x931   :  { %11938 = vmatmul.mubr.bf16.gmra.mxu1 %v15359_v16  ;;  %v11644_v16 = vpop.permute.xlu1 %11643 }
 0x932   :  { %11962 = vmatpush1.bf16.msra.mxu1 %v22238_v20  ;;  %11945 = vmatprep.mubr.bf16.mxu1 %v13575_v26  ;;  %v15367_v20 = vld [vmem:[%s22497_s3 + $0x2c] ss:$16 sps:$4 sm:$0xff]  }
 0x933   :  { %11963 = vmatprep.subr.bf16.mxu1 %v23782_v34 }
 0x936   :  { %11964 = vmatpush1.bf16.msra.mxu1 %v22220_v23  ;;  %v15364_v23 = vld [vmem:[%s22497_s3 + $0x8] ss:$16 sps:$4 sm:$0xff]  }
 0x937   :  { %11965 = vmatprep.subr.bf16.mxu1 %v23782_v34 }
 0x939   :  { %11946 = vmatmul.mubr.bf16.gmra.mxu1 %v13574_v38 }
 0x93a   :  { %11966 = vmatpush1.bf16.msra.mxu1 %v22210_v62  ;;  %13578 = vmatprep.mubr.msk.bf16.mxu1 %vm11832_vm2, %v15366_v57  ;;  %v15369_v62 = vld [vmem:[%s22497_s3 + $0x28] ss:$16 sps:$4 sm:$0xff]  }
 0x93b   :  { %11967 = vmatprep.subr.bf16.mxu1 %v23782_v34 }
 0x93e   :  { %11968 = vmatpush1.bf16.msra.mxu1 %v22201_v55  ;;  %v15370_v55 = vld [vmem:[%s22497_s3 + $0x4c] ss:$16 sps:$4 sm:$0xff]  }
 0x93f   :  { %11983 = vmatprep.subr.bf16.mxu1 %v23782_v34  ;;  %v15372_v34 = vld [vmem:[%s22497_s3 + $0x48] ss:$16 sps:$4 sm:$0xff]  }
 0x942   :  { %11984 = vmatpush2.bf16.msra.mxu1 %v11595_v14 }
 0x945   :  { %11986 = vmatmul.mubr.bf16.vlgmr.msra.gmra.mxu1 %v15364_v23  ;;  %v11649_v23 = vpop.permute.xlu0 %11648 }
 0x946   :  { %13579 = vmatprep.mubr.msk.bf16.mxu1 %vm11832_vm2, %v15367_v20 }
 0x94d   :  { %11994 = vmatmul.mubr.bf16.gmra.mxu1 %v15369_v62  ;;  %v11634_v62 = vpop.permute.xlu1 %11633 }
 0x94e   :  { %13580 = vmatprep.mubr.msk.bf16.mxu1 %vm11832_vm2, %v15370_v55 }
 0x955   :  { %12002 = vmatmul.mubr.bf16.gmra.mxu1 %v15372_v34 }
 0x956   :  { %13581 = vmatprep.mubr.msk.bf16.mxu1 %vm11832_vm2, %v15373_v3 }
 0x95d   :  { %12010 = vmatmul.mubr.bf16.gmra.mxu1 %v15375_v56  ;;  %v11639_v56 = vpop.permute.xlu0 %11638 }
 0x95e   :  { %13582 = vmatprep.mubr.msk.bf16.mxu1 %vm11832_vm2, %v15376_v43 }
 0x965   :  { %12018 = vmatmul.mubr.bf16.gmra.mxu1 %v15378_v1  ;;  %v11624_v1 = vpop.permute.xlu1 %11623 }
 0x966   :  { %13583 = vmatprep.mubr.msk.bf16.mxu1 %vm11832_vm2, %v15379_v50 }
 0x969   :  { %v11614_v24 = vpop.permute.xlu1 %11613 }
 0x96d   :  { %12026 = vmatmul.mubr.bf16.gmra.mxu1 %v15381_v19 }
 0x96e   :  { %13584 = vmatprep.mubr.msk.bf16.mxu1 %vm11832_vm2, %v15382_v46  ;;  %v11629_v46 = vpop.permute.xlu0 %11628 }
 0x975   :  { %12034 = vmatmul.mubr.bf16.gmra.mxu1 %v15384_v31 }
 0x976   :  { %13585 = vmatprep.mubr.msk.bf16.mxu1 %vm11832_vm2, %v13577_v40 }
 0x97d   :  { %12042 = vmatmul.mubr.bf16.gmra.mxu1 %v13576_v30 }
 0x97e   :  { %13701 = vmatprep.mubr.msk.bf16.mxu1 %vm12177_vm3, %v15387_v21 }
 0x9c1   :  { %v13616_v52 = vpop.f32.mrf.mxu1 }
 0x9c3   :  { %v13617_v18 = vpop.f32.mrf.mxu1 }
 0x9c4   :  { %v13618_v8 = vadd.f32 %v13617_v18, %v13616_v52  ;;  %v11619_v52 = vpop.permute.xlu0 %11618 }
 0x9c5   :  { %v13619_v39 = vpop.f32.mrf.mxu1 }
 0x9c6   :  { %v11892_v31 = vadd.f32 %v13618_v8, %v11614_v24 }
 0x9c7   :  { %v13620_v22 = vpop.f32.mrf.mxu1 }
 0x9c8   :  { %v22371_v29 = vadd.f32 %v13620_v22, %v13619_v39 }
 0x9c9   :  { %v13622_v48 = vpop.f32.mrf.mxu1 }
 0x9ca   :  { %v11895_v39 = vadd.f32 %v22371_v29, %v11619_v52 }
 0x9cb   :  { %v13623_v49 = vpop.f32.mrf.mxu1 }
 0x9cc   :  { %v22373_v13 = vadd.f32 %v13623_v49, %v13622_v48 }
 0x9cd   :  { %v13625_v10 = vpop.f32.mrf.mxu1 }
 0x9cf   :  { %v13626_v6 = vpop.f32.mrf.mxu1 }
 0x9d0   :  { %v22375_v44 = vadd.f32 %v13626_v6, %v13625_v10 }
 0x9d1   :  { %v13628_v54 = vpop.f32.mrf.mxu1 }
 0x9d2   :  { %v11903_v8 = vadd.f32 %v22375_v44, %v11629_v46 }
 0x9d3   :  { %v13629_v28 = vpop.f32.mrf.mxu1 }
 0x9d4   :  { %v22377_v17 = vadd.f32 %v13629_v28, %v13628_v54  ;;  %v11900_v54 = vadd.f32 %v22373_v13, %v11624_v1 }
 0x9d5   :  { %v13631_v25 = vpop.f32.mrf.mxu1 }
 0x9d7   :  { %v13632_v2 = vpop.f32.mrf.mxu1 }
 0x9d8   :  { %v22379_v35 = vadd.f32 %v13632_v2, %v13631_v25 }
 0x9d9   :  { %v13634_v33 = vpop.f32.mrf.mxu1 }
 0x9da   :  { %v11911_v13 = vadd.f32 %v22379_v35, %v11639_v56 }
 0x9db   :  { %v13635_v63 = vpop.f32.mrf.mxu1 }
 0x9dc   :  { %v22381_v12 = vadd.f32 %v13635_v63, %v13634_v33 }
 0x9dd   :  { %v13637_v51 = vpop.f32.mrf.mxu1 }
 0x9df   :  { %v13638_v37 = vpop.f32.mrf.mxu1 }
 0x9e0   :  { %v22387_v32 = vadd.f32 %v13638_v37, %v13637_v51 }
 0x9e1   :  { %v13640_v53 = vpop.f32.mrf.mxu1 }
 0x9e3   :  { %v13641_v61 = vpop.f32.mrf.mxu1 }
 0x9e4   :  { %v22395_v42 = vadd.f32 %v13641_v61, %v13640_v53 }
 0x9e5   :  { %v13643_v60 = vpop.f32.mrf.mxu1 }
 0x9e7   :  { %v13644_v47 = vpop.f32.mrf.mxu1 }
 0x9e8   :  { %v22399_v11 = vadd.f32 %v13644_v47, %v13643_v60  ;;  %v11908_v60 = vadd.f32 %v22377_v17, %v11634_v62 }
 0x9e9   :  { %v13646_v9 = vpop.f32.mrf.mxu1 }
 0x9eb   :  { %v13647_v4 = vpop.f32.mrf.mxu1 }
 0x9ec   :  { %v22405_v45 = vadd.f32 %v13647_v4, %v13646_v9 }
 0x9ed   :  { %v13649_v36 = vpop.f32.mrf.mxu1 }
 0x9ef   :  { %v13650_v14 = vpop.f32.mrf.mxu1 }
 0x9f0   :  { %v22409_v41 = vadd.f32 %v13650_v14, %v13649_v36 }
 0x9f1   :  { %v13652_v26 = vpop.f32.mrf.mxu1 }
 0x9f3   :  { %v13653_v38 = vpop.f32.mrf.mxu1 }
 0x9f4   :  { %v22411_v57 = vadd.f32 %v13653_v38, %v13652_v26 }
 0x9f5   :  { %v13655_v20 = vpop.f32.mrf.mxu1 }
 0x9f7   :  { %v13656_v55 = vpop.f32.mrf.mxu1 }
 0x9f8   :  { %v22413_v34 = vadd.f32 %v13656_v55, %v13655_v20  ;;  %v11916_v55 = vadd.f32 %v22381_v12, %v11644_v16 }
 0x9f9   :  { %v22415_v3 = vpop.f32.mrf.mxu1 }
 0x9fb   :  { %v22417_v43 = vpop.f32.mrf.mxu1 }
 0x9fd   :  { %v13661_v50 = vpop.f32.mrf.mxu1 }
 0x9ff   :  { %v13662_v19 = vpop.f32.mrf.mxu1 }
 0xa00   :  { %v11919_v19 = vadd.f32 %v22387_v32, %v11649_v23 }
 0xa05   :  { %v11987_v40 = vpop.f32.mrf.mxu1 }
 0xa06   :  { %v11988_v30 = vadd.f32 %v11987_v40, %v11892_v31  ;;  %v11924_v40 = vadd.f32 %v22395_v42, %v22403_v58  ;;  %v11935_v42 = vadd.f32 %v22409_v41, %v22401_v7 }
 0xa07   :  { %v11989_v18 = vpop.f32.mrf.mxu1 }
 0xa08   :  { %v12049_v10 = vmax.f32 %v11988_v30, 0.0  ;;  %v11927_v18 = vadd.f32 %v22399_v11, %v22407_v27 }
 0xa09   :  { %v11990_v22 = vpop.f32.mrf.mxu1 }
 0xa0a   :  { %v11991_v48 = vadd.f32 %v11990_v22, %v11895_v39 }
 0xa0b   :  { %v11992_v49 = vpop.f32.mrf.mxu1 }
 0xa0c   :  { %v12050_v6 = vmax.f32 %v11991_v48, 0.0  ;;  %v11932_v49 = vadd.f32 %v22405_v45, %v22397_v5  ;;  %v11943_v45 = vadd.f32 %v22413_v34, %v22392_v59  ;;  %v15389_v59 = vld [vmem:[%s22498_s5 + $0x10] sm:$0xff]   ;;  %v15390_v34 = vld [vmem:[%s22498_s5 + $0x18] sm:$0xff]  }
 0xa0d   :  { %v11995_v28 = vpop.f32.mrf.mxu1 }
 0xa0e   :  { %v22421_v25 = vpack.c.bf16 %v12050_v6, %v12049_v10  ;;  %v11996_v2 = vadd.f32 %v11995_v28, %v11900_v54 }
 0xa0f   :  { %v11997_v33 = vpop.f32.mrf.mxu1 }
 0xa10   :  { %v12051_v53 = vmax.f32 %v11996_v2, 0.0 }
 0xa11   :  { %v11998_v63 = vpop.f32.mrf.mxu1 }
 0xa12   :  { %v11999_v51 = vadd.f32 %v11998_v63, %v11903_v8  ;;  %v11940_v8 = vadd.f32 %v22411_v57, %v22385_v0 }
 0xa13   :  { %v12000_v37 = vpop.f32.mrf.mxu1 }
 0xa14   :  { %v12052_v21 = vmax.f32 %v11999_v51, 0.0  ;;  %v13660_v51 = vadd.f32 %v22417_v43, %v22415_v3  ;;  %v15391_v43 = vld [vmem:[%s22498_s5 + $0x20] sm:$0xff]  }
 0xa15   :  { %v12003_v29 = vpop.f32.mrf.mxu1 }
 0xa16   :  { %v22424_v61 = vpack.c.bf16 %v12052_v21, %v12051_v53  ;;  %v12004_v9 = vadd.f32 %v12003_v29, %v11908_v60  ;;  %v11948_v29 = vadd.f32 %v13660_v51, %v22383_v15  ;;  %v15388_v15 = vld [vmem:[%s22498_s5 + $0x8] sm:$0xff]  }
 0xa17   :  { %v12005_v47 = vpop.f32.mrf.mxu1 }
 0xa18   :  { %v12053_v26 = vmax.f32 %v12004_v9, 0.0 }
 0xa19   :  { %v12006_v4 = vpop.f32.mrf.mxu1 }
 0xa1a   :  { %v12007_v36 = vadd.f32 %v12006_v4, %v11911_v13 }
 0xa1b   :  { %v12008_v14 = vpop.f32.mrf.mxu1 }
 0xa1c   :  { %v12054_v38 = vmax.f32 %v12007_v36, 0.0 }
 0xa1d   :  { %v12011_v44 = vpop.f32.mrf.mxu1 }
 0xa1e   :  { %v22428_v20 = vpack.c.bf16 %v12054_v38, %v12053_v26  ;;  %v12012_v50 = vadd.f32 %v12011_v44, %v11916_v55  ;;  %v12147_v38 = vpop.permute.xlu1 %12146 }
 0xa1f   :  { %v12013_v1 = vpop.f32.mrf.mxu1 }
 0xa20   :  { %v12055_v24 = vmax.f32 %v12012_v50, 0.0 }
 0xa21   :  { %v12014_v46 = vpop.f32.mrf.mxu1 }
 0xa22   :  { %v12015_v17 = vadd.f32 %v12014_v46, %v11919_v19  ;;  %v12142_v1 = vpop.permute.xlu1 %12141  ;;  %v12137_v19 = vpop.permute.xlu0 %12136 }
 0xa23   :  { %v12016_v62 = vpop.f32.mrf.mxu1 }
 0xa24   :  { %v12056_v31 = vmax.f32 %v12015_v17, 0.0 }
 0xa25   :  { %v12019_v35 = vpop.f32.mrf.mxu1 }
 0xa26   :  { %v12078_v56 = vpack.c.bf16 %v12056_v31, %v12055_v24  ;;  %v12020_v52 = vadd.f32 %v12019_v35, %v11924_v40  ;;  %v12132_v62 = vpop.permute.xlu1 %12131  ;;  %v12127_v35 = vpop.permute.xlu0 %12126 }
 0xa27   :  { %v12021_v30 = vpop.f32.mrf.mxu1 }
 0xa28   :  { %v12057_v22 = vmax.f32 %v12020_v52, 0.0 }
 0xa29   :  { %v12022_v12 = vpop.f32.mrf.mxu1 }
 0xa2a   :  { %v12023_v16 = vadd.f32 %v12022_v12, %v11927_v18  ;;  %v12122_v12 = vpop.permute.xlu1 %12121 }
 0xa2b   :  { %v12024_v39 = vpop.f32.mrf.mxu1 }
 0xa2c   :  { %v12058_v32 = vmax.f32 %v12023_v16, 0.0 }
 0xa2d   :  { %v12027_v23 = vpop.f32.mrf.mxu1 }
 0xa2e   :  { %v12079_v48 = vpack.c.bf16 %v12058_v32, %v12057_v22  ;;  %v12028_v6 = vadd.f32 %v12027_v23, %v11932_v49  ;;  %v12117_v23 = vpop.permute.xlu0 %12116 }
 0xa2f   :  { %v12029_v10 = vpop.f32.mrf.mxu1 }
 0xa30   :  { %v12059_v2 = vmax.f32 %v12028_v6, 0.0 }
 0xa31   :  { %v12030_v58 = vpop.f32.mrf.mxu1 }
 0xa32   :  { %v12031_v54 = vadd.f32 %v12030_v58, %v11935_v42 }
 0xa33   :  { %v12032_v28 = vpop.f32.mrf.mxu1 }
 0xa34   :  { %v12060_v11 = vmax.f32 %v12031_v54, 0.0  ;;  %v12112_v54 = vpop.permute.xlu1 %12111 }
 0xa35   :  { %v12035_v27 = vpop.f32.mrf.mxu1 }
 0xa36   :  { %v12080_v33 = vpack.c.bf16 %v12060_v11, %v12059_v2  ;;  %v12036_v5 = vadd.f32 %v12035_v27, %v11940_v8  ;;  %v12107_v11 = vpop.permute.xlu0 %12106 }
 0xa37   :  { %v12037_v63 = vpop.f32.mrf.mxu1 }
 0xa38   :  { %v12061_v53 = vmax.f32 %v12036_v5, 0.0  ;;  %v12102_v5 = vpop.permute.xlu1 %12101 }
 0xa39   :  { %v12038_v37 = vpop.f32.mrf.mxu1 }
 0xa3a   :  { %v12039_v7 = vadd.f32 %v12038_v37, %v11943_v45 }
 0xa3b   :  { %v12040_v41 = vpop.f32.mrf.mxu1 }
 0xa3c   :  { %v12062_v21 = vmax.f32 %v12039_v7, 0.0  ;;  %v12097_v41 = vpop.permute.xlu0 %12096 }
 0xa3d   :  { %v12043_v60 = vpop.f32.mrf.mxu1 }
 0xa3e   :  { %v12081_v47 = vpack.c.bf16 %v12062_v21, %v12061_v53  ;;  %v12044_v9 = vadd.f32 %v12043_v60, %v11948_v29 }
 0xa3f   :  { %v12045_v13 = vpop.f32.mrf.mxu1 }
 0xa40   :  { %v12063_v0 = vmax.f32 %v12044_v9, 0.0  ;;  %v15393_v13 = vld [vmem:[%s22499_s7] sm:$0x1f]  }
 0xa41   :  { %v12046_v57 = vpop.f32.mrf.mxu1 }
 0xa42   :  { %v12082_v4 = vpack.c.bf16 %v12063_v0, %v12063_v0  ;;  %v12303_v0 = vpop.permute.xlu0 %12302 }
 0xa43   :  { %v12047_v36 = vpop.f32.mrf.mxu1 }
 0xa44   :  { %13761 = vmatprep.subr.msk.bf16.mxu1 %vm6822_vm0, %v12082_v4  ;;  %v12197_v3 = vsel %vm6822_vm0, %v12082_v4, 0 }
 0xa45   :  { %13686 = vmatpush3.bf16.msra.mxu1 %v12197_v3  ;;  %v12308_v3 = vpop.permute.xlu1 %12307 }
 0xa46   :  { %13687 = vmatprep.subr.bf16.mxu1 %v12081_v47 }
 0xa49   :  { %13688 = vmatpush3.bf16.msra.mxu1 %v12081_v47 }
 0xa4a   :  { %13689 = vmatprep.subr.bf16.mxu1 %v12080_v33 }
 0xa4d   :  { %13690 = vmatpush3.bf16.msra.mxu1 %v12080_v33 }
 0xa4e   :  { %13691 = vmatprep.subr.bf16.mxu1 %v12079_v48 }
 0xa51   :  { %13692 = vmatpush3.bf16.msra.mxu1 %v12079_v48 }
 0xa52   :  { %13693 = vmatprep.subr.bf16.mxu1 %v12078_v56 }
 0xa55   :  { %13694 = vmatpush3.bf16.msra.mxu1 %v12078_v56 }
 0xa56   :  { %13695 = vmatprep.subr.bf16.mxu1 %v22428_v20 }
 0xa59   :  { %13696 = vmatpush3.bf16.msra.mxu1 %v22428_v20 }
 0xa5a   :  { %13697 = vmatprep.subr.bf16.mxu1 %v22424_v61 }
 0xa5d   :  { %13698 = vmatpush3.bf16.msra.mxu1 %v22424_v61  ;;  %v15395_v61 = vmov 0.0  }
 0xa5e   :  { %13699 = vmatprep.subr.bf16.mxu1 %v22421_v25 }
 0xa61   :  { %13700 = vmatpush3.bf16.msra.mxu1 %v22421_v25  ;;  %v15392_v25 = vld [vmem:[%s22498_s5 + $0x28] ss:$0 sps:$4 sm:$0x33]  }
 0xa62   :  { %13713 = vmatprep.subr.bf16.mxu1 %v15395_v61 }
 0xa64   :  { %13702 = vmatmul.mubr.msk.bf16.vlgmr.msra.gmra.mxu1 %vm12177_vm3, %v15388_v15 }
 0xa65   :  { %13705 = vmatprep.mubr.msk.bf16.mxu1 %vm12177_vm3, %v15389_v59 }
 0xa6c   :  { %13706 = vmatmul.mubr.msk.bf16.gmra.mxu1 %vm12177_vm3, %v15390_v34 }
 0xa6d   :  { %13709 = vmatprep.mubr.msk.bf16.mxu1 %vm12177_vm3, %v15391_v43 }
 0xa74   :  { %13710 = vmatmul.mubr.msk.bf16.gmra.mxu1 %vm12177_vm3, %v15392_v25 }
 0xa75   :  { %13725 = vmatprep.mubr.msk.bf16.mxu1 %vm15396_vm4, %v15395_v61 }
 0xb24   :  { %v13703_v14 = vpop.f32.mrf.mxu1 }
 0xb25   :  { %v12242_v63 = vadd.f32 %v13703_v14, %v12107_v11 }
 0xb26   :  { %v12233_v26 = vpop.f32.mrf.mxu1 }
 0xb27   :  { %v12281_v53 = vmax.f32 %v12242_v63, 0.0  ;;  %v12234_v21 = vadd.f32 %v12233_v26, %v12097_v41 }
 0xb28   :  { %v13704_v44 = vpop.f32.mrf.mxu1 }
 0xb29   :  { %v12245_v27 = vadd.f32 %v13704_v44, %v12112_v54  ;;  %v12279_v47 = vmax.f32 %v12234_v21, 0.0 }
 0xb2a   :  { %v12236_v20 = vpop.f32.mrf.mxu1 }
 0xb2b   :  { %v12282_v45 = vmax.f32 %v12245_v27, 0.0  ;;  %v12237_v37 = vadd.f32 %v12236_v20, %v12102_v5 }
 0xb2c   :  { %v13707_v55 = vpop.f32.mrf.mxu1 }
 0xb2d   :  { %v12258_v48 = vadd.f32 %v13707_v55, %v12127_v35  ;;  %v12293_v29 = vpack.c.bf16 %v12282_v45, %v12281_v53  ;;  %v12280_v60 = vmax.f32 %v12237_v37, 0.0 }
 0xb2e   :  { %v12249_v50 = vpop.f32.mrf.mxu1 }
 0xb2f   :  { %v12285_v28 = vmax.f32 %v12258_v48, 0.0  ;;  %v12250_v2 = vadd.f32 %v12249_v50, %v12117_v23  ;;  %v12292_v9 = vpack.c.bf16 %v12280_v60, %v12279_v47 }
 0xb30   :  { %v13708_v46 = vpop.f32.mrf.mxu1 }
 0xb31   :  { %v12261_v39 = vadd.f32 %v13708_v46, %v12132_v62  ;;  %v12283_v51 = vmax.f32 %v12250_v2, 0.0 }
 0xb32   :  { %v12252_v17 = vpop.f32.mrf.mxu1 }
 0xb33   :  { %v12286_v6 = vmax.f32 %v12261_v39, 0.0  ;;  %v12253_v42 = vadd.f32 %v12252_v17, %v12122_v12 }
 0xb34   :  { %v13711_v24 = vpop.f32.mrf.mxu1 }
 0xb35   :  { %v12274_v31 = vadd.f32 %v13711_v24, %v12147_v38  ;;  %v12295_v33 = vpack.c.bf16 %v12286_v6, %v12285_v28  ;;  %v12284_v8 = vmax.f32 %v12253_v42, 0.0 }
 0xb36   :  { %v12265_v56 = vpop.f32.mrf.mxu1 }
 0xb37   :  { %v12289_v40 = vmax.f32 %v12274_v31, 0.0  ;;  %v12266_v18 = vadd.f32 %v12265_v56, %v12137_v19  ;;  %v12294_v7 = vpack.c.bf16 %v12284_v8, %v12283_v51 }
 0xb38   :  { %v13712_v30 = vpop.f32.mrf.mxu1 }
 0xb39   :  { %v12297_v52 = vpack.c.bf16 %v12289_v40, %v12289_v40  ;;  %v12287_v49 = vmax.f32 %v12266_v18, 0.0 }
 0xb3a   :  { %v12268_v16 = vpop.f32.mrf.mxu1 }
 0xb3b   :  { %v12269_v22 = vadd.f32 %v12268_v16, %v12142_v1  ;;  %v12321_v32 = vsel %vm12319_vm5, %v12297_v52, 0 }
 0xb3c   :  { %13714 = vmatpush3.bf16.msra.mxu1 %v12321_v32 }
 0xb3d   :  { %v12288_v10 = vmax.f32 %v12269_v22, 0.0  ;;  %13715 = vmatprep.subr.bf16.mxu1 %v15395_v61 }
 0xb3f   :  { %v12296_v58 = vpack.c.bf16 %v12288_v10, %v12287_v49 }
 0xb41   :  { %13716 = vmatpush3.bf16.msra.mxu1 %v12296_v58 }
 0xb42   :  { %13717 = vmatprep.subr.bf16.mxu1 %v15395_v61 }
 0xb45   :  { %13718 = vmatpush3.bf16.msra.mxu1 %v12295_v33 }
 0xb46   :  { %13719 = vmatprep.subr.bf16.mxu1 %v15395_v61 }
 0xb49   :  { %13720 = vmatpush3.bf16.msra.mxu1 %v12294_v7 }
 0xb4a   :  { %13721 = vmatprep.subr.bf16.mxu1 %v15395_v61 }
 0xb4d   :  { %13722 = vmatpush3.bf16.msra.mxu1 %v12293_v29 }
 0xb4e   :  { %13723 = vmatprep.subr.bf16.mxu1 %v15395_v61 }
 0xb51   :  { %13724 = vmatpush3.bf16.msra.mxu1 %v12292_v9 }
 0xb54   :  { %13726 = vmatmul.mubr.msk.bf16.vlgmr.msra.gmra.mxu1 %vm12315_vm6, %v15393_v13 }
 0xc14   :  { %v12357_v57 = vpop.f32.mrf.mxu1 }
 0xc15   :  { %v12358_v4 = vadd.f32 %v12357_v57, %v12303_v0 }
 0xc16   :  { %v13727_v36 = vpop.f32.mrf.mxu1 }
 0xc17   :  { %12365 = vst.msk [vmem:[%s22500_s9] sm:$0xff] %vm12364_vm7, %v12358_v4 }
 0xc18   :  { %v12360_v15 = vpop.f32.mrf.mxu1 }
 0xc19   :  { %v12361_v59 = vadd.f32 %v12360_v15, %v12308_v3 }
 0xc1a   :  { %v13728_v34 = vpop.f32.mrf.mxu1 }
 0xc1b   :  { %12367 = vst.msk [vmem:[%s22500_s9 + $0x8] sm:$0x3] %vm12366_vm8, %v12361_v59 }

</bundles_post_ra>
